<compile_context>
chip_gen: v6e
topology: v6e:2x2x1
jax: 0.10.0
libtpu: 0.0.40
codegen_flags: <defaults>
</compile_context>

<pallas_src>
import functools
import math

import jax
import jax.numpy as jnp
from jax.experimental import pallas as pl
from jax.experimental.pallas import tpu as pltpu

NEG_INF = -1e9      # matches the PyTorch -1e9 masking convention
NEG_INIT = -1e30    # finite "-inf" for the online-softmax running max (avoids inf-inf)
LN_EPS = 1e-12      # matches the custom LayerNorm used by this Transformer impl


def _pick_tile(dim, candidates=(512, 256, 128)):
    """Largest tile from `candidates` that divides `dim`; else the full dim.

    Large non-128-divisible dims (e.g. the vocabulary) must be padded by the
    caller -- see the vocab padding in init_params.
    """
    for c in candidates:
        if dim % c == 0:
            return c
    return dim


def _round_up(n, m):
    return ((n + m - 1) // m) * m


# ----------------------------------------------------------------------------
# Kernel 1: generic tiled matmul  y = act(x @ w + b)   (bf16 in, f32 accumulate)
# ----------------------------------------------------------------------------
def _matmul_kernel(x_ref, w_ref, b_ref, o_ref, acc_ref, *, activation):
    @pl.when(pl.program_id(2) == 0)
    def _():
        acc_ref[...] = jnp.zeros_like(acc_ref)

    acc_ref[...] += jnp.dot(x_ref[...], w_ref[...],
                            preferred_element_type=jnp.float32)

    @pl.when(pl.program_id(2) == pl.num_programs(2) - 1)
    def _():
        y = acc_ref[...] + b_ref[...]
        if activation == "relu":
            y = jnp.maximum(y, 0.0)
        o_ref[...] = y.astype(o_ref.dtype)


# f32-output variant: accumulate straight into the resident output block
# (no scratch, no epilogue copy) -- used for the final vocab projection.
def _matmul_f32_kernel(x_ref, w_ref, b_ref, o_ref):
    @pl.when(pl.program_id(2) == 0)
    def _():
        o_ref[...] = jnp.zeros_like(o_ref)

    o_ref[...] += jnp.dot(x_ref[...], w_ref[...],
                          preferred_element_type=jnp.float32)

    @pl.when(pl.program_id(2) == pl.num_programs(2) - 1)
    def _():
        o_ref[...] += b_ref[...]


def linear(x2d, w, b, *, activation="none", out_dtype=jnp.bfloat16):
    """Tiled x2d[M,K] @ w[K,N] + b[N]."""
    M, K = x2d.shape
    _, N = w.shape
    tm = _pick_tile(M)
    tn = _pick_tile(N)
    tk = _pick_tile(K)
    grid = (M // tm, N // tn, K // tk)
    in_specs = [
        pl.BlockSpec((tm, tk), lambda i, j, k: (i, k)),
        pl.BlockSpec((tk, tn), lambda i, j, k: (k, j)),
        pl.BlockSpec((1, tn), lambda i, j, k: (0, j)),
    ]
    out_spec = pl.BlockSpec((tm, tn), lambda i, j, k: (i, j))
    cparams = pltpu.CompilerParams(
        dimension_semantics=("parallel", "parallel", "arbitrary"))
    b2 = b.reshape(1, N).astype(jnp.float32)

    if out_dtype == jnp.float32 and activation == "none":
        return pl.pallas_call(
            _matmul_f32_kernel,
            out_shape=jax.ShapeDtypeStruct((M, N), jnp.float32),
            grid=grid, in_specs=in_specs, out_specs=out_spec,
            compiler_params=cparams,
        )(x2d, w, b2)

    return pl.pallas_call(
        functools.partial(_matmul_kernel, activation=activation),
        out_shape=jax.ShapeDtypeStruct((M, N), out_dtype),
        grid=grid, in_specs=in_specs, out_specs=out_spec,
        scratch_shapes=[pltpu.VMEM((tm, tn), jnp.float32)],
        compiler_params=cparams,
    )(x2d, w, b2)


# ----------------------------------------------------------------------------
# Kernel 2: fused  LayerNorm((x @ w + b) + residual)   -- K tiled, N = D whole
# ----------------------------------------------------------------------------
def _matmul_add_ln_kernel(x_ref, w_ref, b_ref, res_ref, g_ref, beta_ref,
                          o_ref, acc_ref, *, eps):
    @pl.when(pl.program_id(1) == 0)
    def _():
        acc_ref[...] = jnp.zeros_like(acc_ref)

    acc_ref[...] += jnp.dot(x_ref[...], w_ref[...],
                            preferred_element_type=jnp.float32)

    @pl.when(pl.program_id(1) == pl.num_programs(1) - 1)
    def _():
        y = acc_ref[...] + b_ref[...] + res_ref[...].astype(jnp.float32)
        mu = jnp.mean(y, axis=-1, keepdims=True)
        var = jnp.mean((y - mu) ** 2, axis=-1, keepdims=True)
        o_ref[...] = ((y - mu) * jax.lax.rsqrt(var + eps) * g_ref[...]
                      + beta_ref[...]).astype(o_ref.dtype)


def matmul_add_ln(x2d, w, b, res2d, gamma, beta, out_dtype=jnp.bfloat16):
    M, K = x2d.shape
    _, D = w.shape
    tm = _pick_tile(M)
    tk = _pick_tile(K)
    return pl.pallas_call(
        functools.partial(_matmul_add_ln_kernel, eps=LN_EPS),
        out_shape=jax.ShapeDtypeStruct((M, D), out_dtype),
        grid=(M // tm, K // tk),
        in_specs=[
            pl.BlockSpec((tm, tk), lambda i, k: (i, k)),
            pl.BlockSpec((tk, D), lambda i, k: (k, 0)),
            pl.BlockSpec((1, D), lambda i, k: (0, 0)),
            pl.BlockSpec((tm, D), lambda i, k: (i, 0)),
            pl.BlockSpec((1, D), lambda i, k: (0, 0)),
            pl.BlockSpec((1, D), lambda i, k: (0, 0)),
        ],
        out_specs=pl.BlockSpec((tm, D), lambda i, k: (i, 0)),
        scratch_shapes=[pltpu.VMEM((tm, D), jnp.float32)],
        compiler_params=pltpu.CompilerParams(
            dimension_semantics=("parallel", "arbitrary")),
    )(x2d, w, b.reshape(1, D).astype(jnp.float32), res2d,
      gamma.reshape(1, D).astype(jnp.float32),
      beta.reshape(1, D).astype(jnp.float32))


# ----------------------------------------------------------------------------
# Kernel 3: fused FFN + residual + LayerNorm.  Hidden dim F is a grid axis, so
# w1/w2 stream through VMEM and the hidden value is bounded to (tm, tf).
# ----------------------------------------------------------------------------
def _ffn_kernel(x_ref, w1_ref, b1_ref, w2_ref, b2_ref, res_ref,
                g_ref, beta_ref, o_ref, acc_ref, *, eps):
    @pl.when(pl.program_id(1) == 0)
    def _():
        acc_ref[...] = jnp.zeros_like(acc_ref)

    h = jnp.dot(x_ref[...], w1_ref[...],
                preferred_element_type=jnp.float32) + b1_ref[...]
    h = jnp.maximum(h, 0.0).astype(x_ref.dtype)           # bf16 back into the MXU
    acc_ref[...] += jnp.dot(h, w2_ref[...],
                            preferred_element_type=jnp.float32)

    @pl.when(pl.program_id(1) == pl.num_programs(1) - 1)
    def _():
        y = acc_ref[...] + b2_ref[...] + res_ref[...].astype(jnp.float32)
        mu = jnp.mean(y, axis=-1, keepdims=True)
        var = jnp.mean((y - mu) ** 2, axis=-1, keepdims=True)
        o_ref[...] = ((y - mu) * jax.lax.rsqrt(var + eps) * g_ref[...]
                      + beta_ref[...]).astype(o_ref.dtype)


def ffn_add_ln(x, p, res, gamma, beta):
    B, S, D = x.shape
    M = B * S
    F = p["w1"].shape[1]
    tm = _pick_tile(M, (256, 128))
    tf = _pick_tile(F, (512, 256, 128))
    out = pl.pallas_call(
        functools.partial(_ffn_kernel, eps=LN_EPS),
        out_shape=jax.ShapeDtypeStruct((M, D), jnp.bfloat16),
        grid=(M // tm, F // tf),
        in_specs=[
            pl.BlockSpec((tm, D), lambda i, j: (i, 0)),
            pl.BlockSpec((D, tf), lambda i, j: (0, j)),
            pl.BlockSpec((1, tf), lambda i, j: (0, j)),
            pl.BlockSpec((tf, D), lambda i, j: (j, 0)),
            pl.BlockSpec((1, D), lambda i, j: (0, 0)),
            pl.BlockSpec((tm, D), lambda i, j: (i, 0)),
            pl.BlockSpec((1, D), lambda i, j: (0, 0)),
            pl.BlockSpec((1, D), lambda i, j: (0, 0)),
        ],
        out_specs=pl.BlockSpec((tm, D), lambda i, j: (i, 0)),
        scratch_shapes=[pltpu.VMEM((tm, D), jnp.float32)],
        compiler_params=pltpu.CompilerParams(
            dimension_semantics=("parallel", "arbitrary")),
    )(x.reshape(M, D), p["w1"], p["b1"].reshape(1, F).astype(jnp.float32),
      p["w2"], p["b2"].reshape(1, D).astype(jnp.float32),
      res.reshape(M, D),
      gamma.reshape(1, D).astype(jnp.float32),
      beta.reshape(1, D).astype(jnp.float32))
    return out.reshape(B, S, D)


# ----------------------------------------------------------------------------
# Kernel 4: flash-style multi-head attention.
#   q/k/v consumed as lane-dense column slices of the fused projection output
#   ([B,S,n*D]); heads split inside the kernel; online softmax over the KV axis;
#   additive mask built in-kernel from compact pad biases; output [B,Sq,D].
# ----------------------------------------------------------------------------
def _attn_kernel(qpb_ref, kpb_ref, q_ref, k_ref, v_ref, o_ref,
                 m_sc, l_sc, acc_sc, *, n_heads, causal):
    kv = pl.program_id(2)

    @pl.when(kv == 0)
    def _():
        m_sc[...] = jnp.full_like(m_sc, NEG_INIT)
        l_sc[...] = jnp.zeros_like(l_sc)
        acc_sc[...] = jnp.zeros_like(acc_sc)

    tq, D = q_ref.shape[1], q_ref.shape[2]
    tk = k_ref.shape[1]
    Dh = D // n_heads

    # additive mask shared by all heads: (tq, tk) f32
    bias = qpb_ref[0] + kpb_ref[0]                      # (tq,1) + (1,tk)
    if causal:
        row = jax.lax.broadcasted_iota(jnp.int32, (tq, tk), 0) + pl.program_id(1) * tq
        col = jax.lax.broadcasted_iota(jnp.int32, (tq, tk), 1) + kv * tk
        bias = bias + jnp.where(row >= col, 0.0, NEG_INF)

    q = q_ref[0]                                        # (tq, D) bf16 (pre-scaled Q)
    k = k_ref[0]                                        # (tk, D)
    v = v_ref[0]                                        # (tk, D)

    for h in range(n_heads):                            # static unroll
        sl = slice(h * Dh, (h + 1) * Dh)
        qh, kh, vh = q[:, sl], k[:, sl], v[:, sl]
        s = jax.lax.dot_general(qh, kh, (((1,), (1,)), ((), ())),
                                preferred_element_type=jnp.float32)   # (tq, tk)
        s = s + bias
        m_prev = m_sc[h]
        m_new = jnp.maximum(m_prev, jnp.max(s, axis=-1, keepdims=True))
        alpha = jnp.exp(m_prev - m_new)
        p = jnp.exp(s - m_new)
        l_sc[h] = alpha * l_sc[h] + jnp.sum(p, axis=-1, keepdims=True)
        acc_sc[h] = alpha * acc_sc[h] + jnp.dot(
            p.astype(vh.dtype), vh, preferred_element_type=jnp.float32)
        m_sc[h] = m_new

    @pl.when(kv == pl.num_programs(2) - 1)
    def _():
        out = jnp.concatenate(
            [acc_sc[h] * pl.reciprocal(l_sc[h], approx=True)
             for h in range(n_heads)], axis=-1)          # (tq, D) f32
        o_ref[0] = out.astype(o_ref.dtype)


def sdp_attention(q_arr, k_arr, v_arr, q_col, k_col, v_col, qpb, kpb,
                  *, d_model, n_heads, causal):
    """q_arr[B,Sq,*], k_arr/v_arr[B,Sk,*]; *_col selects the D-wide column block.

    qpb: [B,Sq,1] additive query-pad bias; kpb: [B,1,Sk] additive key-pad bias.
    """
    B, Sq = q_arr.shape[0], q_arr.shape[1]
    Sk = k_arr.shape[1]
    D, H = d_model, n_heads
    Dh = D // H
    tq = _pick_tile(Sq, (256, 128))
    tk = _pick_tile(Sk, (512, 256, 128))
    return pl.pallas_call(
        functools.partial(_attn_kernel, n_heads=H, causal=causal),
        out_shape=jax.ShapeDtypeStruct((B, Sq, D), jnp.bfloat16),
        grid=(B, Sq // tq, Sk // tk),
        in_specs=[
            pl.BlockSpec((1, tq, 1), lambda b, i, j: (b, i, 0)),
            pl.BlockSpec((1, 1, tk), lambda b, i, j: (b, 0, j)),
            pl.BlockSpec((1, tq, D), lambda b, i, j, c=q_col: (b, i, c)),
            pl.BlockSpec((1, tk, D), lambda b, i, j, c=k_col: (b, j, c)),
            pl.BlockSpec((1, tk, D), lambda b, i, j, c=v_col: (b, j, c)),
        ],
        out_specs=pl.BlockSpec((1, tq, D), lambda b, i, j: (b, i, 0)),
        scratch_shapes=[
            pltpu.VMEM((H, tq, 1), jnp.float32),    # running max
            pltpu.VMEM((H, tq, 1), jnp.float32),    # running denom
            pltpu.VMEM((H, tq, Dh), jnp.float32),   # running output
        ],
        compiler_params=pltpu.CompilerParams(
            dimension_semantics=("parallel", "parallel", "arbitrary")),
    )(qpb, kpb, q_arr, k_arr, v_arr)


# ----------------------------------------------------------------------------
# Model pieces (JAX glue around the kernels)
# ----------------------------------------------------------------------------
def mha_self(x, qpb, kpb, p, n_heads, causal):
    """Fused QKV projection -> attention; output projection is fused by caller."""
    B, S, D = x.shape
    qkv = linear(x.reshape(B * S, D), p["w_qkv"], p["b_qkv"])      # [B*S, 3D] bf16
    qkv = qkv.reshape(B, S, 3 * D)                                 # free reshape
    return sdp_attention(qkv, qkv, qkv, 0, 1, 2, qpb, kpb,
                         d_model=D, n_heads=n_heads, causal=causal)


def mha_cross(x, enc, qpb, kpb, p, n_heads):
    B, Sq, D = x.shape
    Sk = enc.shape[1]
    q = linear(x.reshape(B * Sq, D), p["w_q"], p["b_q"]).reshape(B, Sq, D)
    kv = linear(enc.reshape(B * Sk, D), p["w_kv"], p["b_kv"]).reshape(B, Sk, 2 * D)
    return sdp_attention(q, kv, kv, 0, 0, 1, qpb, kpb,
                         d_model=D, n_heads=n_heads, causal=False)


def sinusoid_pos_encoding(max_len, d_model):
    pos = jnp.arange(max_len, dtype=jnp.float32)[:, None]
    i = jnp.arange(0, d_model, 2, dtype=jnp.float32)[None, :]
    angle = pos / jnp.power(10000.0, i / d_model)
    pe = jnp.zeros((max_len, d_model), jnp.float32)
    pe = pe.at[:, 0::2].set(jnp.sin(angle))
    pe = pe.at[:, 1::2].set(jnp.cos(angle))
    return pe


def embed(tokens, emb_table, pe):
    S = tokens.shape[1]
    x = jnp.take(emb_table, tokens, axis=0) + pe[None, :S, :]
    return x.astype(jnp.bfloat16)          # dropout = identity (eval)


def encoder_layer(x, qpb, kpb, p, n_heads):
    B, S, D = x.shape
    attn = mha_self(x, qpb, kpb, p["attn"], n_heads, causal=False)
    x = matmul_add_ln(attn.reshape(B * S, D), p["attn"]["w_o"], p["attn"]["b_o"],
                      x.reshape(B * S, D), p["ln1_g"], p["ln1_b"]).reshape(B, S, D)
    x = ffn_add_ln(x, p["ffn"], x, p["ln2_g"], p["ln2_b"])
    return x


def decoder_layer(x, enc, qpb_t, kpb_t, qpb_s, kpb_s, p, n_heads):
    B, S, D = x.shape
    sa = mha_self(x, qpb_t, kpb_t, p["self_attn"], n_heads, causal=True)
    x = matmul_add_ln(sa.reshape(B * S, D), p["self_attn"]["w_o"],
                      p["self_attn"]["b_o"], x.reshape(B * S, D),
                      p["ln1_g"], p["ln1_b"]).reshape(B, S, D)
    ca = mha_cross(x, enc, qpb_s, kpb_s, p["cross_attn"], n_heads)
    x = matmul_add_ln(ca.reshape(B * S, D), p["cross_attn"]["w_o"],
                      p["cross_attn"]["b_o"], x.reshape(B * S, D),
                      p["ln2_g"], p["ln2_b"]).reshape(B, S, D)
    x = ffn_add_ln(x, p["ffn"], x, p["ln3_g"], p["ln3_b"])
    return x


def transformer_forward(params, src, tgt, cfg):
    H, D = cfg["n_heads"], cfg["d_model"]
    B, Ss = src.shape
    St = tgt.shape[1]

    # compact additive pad biases (B*S floats instead of B*S*S bias tensors);
    # torch semantics: src_mask masks keys only; tgt_mask masks query rows + causal.
    kpb_src = jnp.where(src != cfg["src_pad_idx"], 0.0, NEG_INF
                        ).astype(jnp.float32)[:, None, :]          # [B,1,Ss]
    qpb_tgt = jnp.where(tgt != cfg["trg_pad_idx"], 0.0, NEG_INF
                        ).astype(jnp.float32)[:, :, None]          # [B,St,1]
    zero_q_src = jnp.zeros((B, Ss, 1), jnp.float32)
    zero_q_tgt = jnp.zeros((B, St, 1), jnp.float32)
    zero_k_tgt = jnp.zeros((B, 1, St), jnp.float32)

    pe = params["pos_enc"]

    # ---- Encoder ----
    x = embed(src, params["enc_emb"], pe)
    for lp in params["enc_layers"]:
        x = encoder_layer(x, zero_q_src, kpb_src, lp, H)
    enc_src = x

    # ---- Decoder ----
    y = embed(tgt, params["dec_emb"], pe)
    for lp in params["dec_layers"]:
        y = decoder_layer(y, enc_src, qpb_tgt, zero_k_tgt, zero_q_tgt, kpb_src, lp, H)

    logits = linear(y.reshape(B * St, D), params["out_w"], params["out_b"],
                    out_dtype=jnp.float32)                          # [B*St, V_pad]
    V = cfg["dec_voc_size"]
    return logits[:, :V].reshape(B, St, V)


# ----------------------------------------------------------------------------
# Deterministic parameter init (weights bf16 for the MXU; biases/LN/emb f32)
# ----------------------------------------------------------------------------
def _dense(key, fan_in, fan_out):
    w = jax.random.normal(key, (fan_in, fan_out), jnp.float32) / math.sqrt(fan_in)
    b = jnp.zeros((fan_out,), jnp.float32)
    return w, b


def _self_attn_params(key, d_model, n_heads):
    ks = jax.random.split(key, 4)
    scale = 1.0 / math.sqrt(d_model // n_heads)
    wq, bq = _dense(ks[0], d_model, d_model)
    wk, bk = _dense(ks[1], d_model, d_model)
    wv, bv = _dense(ks[2], d_model, d_model)
    wo, bo = _dense(ks[3], d_model, d_model)
    # fold 1/sqrt(Dh) into the Q projection (mathematically identical)
    return dict(w_qkv=jnp.concatenate([wq * scale, wk, wv], axis=1).astype(jnp.bfloat16),
                b_qkv=jnp.concatenate([bq * scale, bk, bv]),
                w_o=wo.astype(jnp.bfloat16), b_o=bo)


def _cross_attn_params(key, d_model, n_heads):
    ks = jax.random.split(key, 4)
    scale = 1.0 / math.sqrt(d_model // n_heads)
    wq, bq = _dense(ks[0], d_model, d_model)
    wk, bk = _dense(ks[1], d_model, d_model)
    wv, bv = _dense(ks[2], d_model, d_model)
    wo, bo = _dense(ks[3], d_model, d_model)
    return dict(w_q=(wq * scale).astype(jnp.bfloat16), b_q=bq * scale,
                w_kv=jnp.concatenate([wk, wv], axis=1).astype(jnp.bfloat16),
                b_kv=jnp.concatenate([bk, bv]),
                w_o=wo.astype(jnp.bfloat16), b_o=bo)


def _ffn_params(key, d_model, ffn_hidden):
    k1, k2 = jax.random.split(key)
    w1, b1 = _dense(k1, d_model, ffn_hidden)
    w2, b2 = _dense(k2, ffn_hidden, d_model)
    return dict(w1=w1.astype(jnp.bfloat16), b1=b1,
                w2=w2.astype(jnp.bfloat16), b2=b2)


def init_params(key, *, src_pad_idx, trg_pad_idx, enc_voc_size, dec_voc_size,
                d_model, n_heads, max_len, ffn_hidden, n_layers):
    keys = jax.random.split(key, 6)

    enc_emb = jax.random.normal(keys[0], (enc_voc_size, d_model)) * 0.02
    enc_emb = enc_emb.at[src_pad_idx].set(0.0)
    dec_emb = jax.random.normal(keys[1], (dec_voc_size, d_model)) * 0.02
    dec_emb = dec_emb.at[trg_pad_idx].set(0.0)

    def enc_layer_params(k):
        ka, kf = jax.random.split(k)
        return dict(attn=_self_attn_params(ka, d_model, n_heads),
                    ffn=_ffn_params(kf, d_model, ffn_hidden),
                    ln1_g=jnp.ones((d_model,)), ln1_b=jnp.zeros((d_model,)),
                    ln2_g=jnp.ones((d_model,)), ln2_b=jnp.zeros((d_model,)))

    def dec_layer_params(k):
        ka, kc, kf = jax.random.split(k, 3)
        return dict(self_attn=_self_attn_params(ka, d_model, n_heads),
                    cross_attn=_cross_attn_params(kc, d_model, n_heads),
                    ffn=_ffn_params(kf, d_model, ffn_hidden),
                    ln1_g=jnp.ones((d_model,)), ln1_b=jnp.zeros((d_model,)),
                    ln2_g=jnp.ones((d_model,)), ln2_b=jnp.zeros((d_model,)),
                    ln3_g=jnp.ones((d_model,)), ln3_b=jnp.zeros((d_model,)))

    enc_layers = [enc_layer_params(k) for k in jax.random.split(keys[2], n_layers)]
    dec_layers = [dec_layer_params(k) for k in jax.random.split(keys[3], n_layers)]

    # vocab projection: pad N to a multiple of 128 so the tile never falls back
    # to the full vocabulary (silent VMEM blow-up at production vocab sizes)
    V_pad = _round_up(dec_voc_size, 128)
    out_w, out_b = _dense(keys[4], d_model, dec_voc_size)
    out_w = jnp.pad(out_w, ((0, 0), (0, V_pad - dec_voc_size))).astype(jnp.bfloat16)
    out_b = jnp.pad(out_b, (0, V_pad - dec_voc_size))

    return dict(
        pos_enc=sinusoid_pos_encoding(max_len, d_model),
        enc_emb=enc_emb, dec_emb=dec_emb,
        enc_layers=enc_layers, dec_layers=dec_layers,
        out_w=out_w, out_b=out_b,
    )


# ----------------------------------------------------------------------------
if __name__ == "__main__":
    # small demo config
    B = 2
    S_SRC = 16
    S_TGT = 16
    D_MODEL = 128
    N_HEADS = 4
    FFN_HIDDEN = 256
    N_LAYERS = 2
    MAX_LEN = 32
    ENC_VOC = 19
    DEC_VOC = 19
    PAD = 0
    SOS = 1

    key = jax.random.PRNGKey(0)
    kp, ks, kt = jax.random.split(key, 3)

    params = init_params(
        kp, src_pad_idx=PAD, trg_pad_idx=PAD,
        enc_voc_size=ENC_VOC, dec_voc_size=DEC_VOC, d_model=D_MODEL,
        n_heads=N_HEADS, max_len=MAX_LEN, ffn_hidden=FFN_HIDDEN,
        n_layers=N_LAYERS)

    # static (non-traced) config -- closed over, never passed through jit args
    cfg = dict(src_pad_idx=PAD, trg_pad_idx=PAD, trg_sos_idx=SOS,
               n_heads=N_HEADS, d_model=D_MODEL, dec_voc_size=DEC_VOC,
               drop_prob=0.1)

    src = jax.random.randint(ks, (B, S_SRC), 2, ENC_VOC, dtype=jnp.int32)
    tgt = jax.random.randint(kt, (B, S_TGT), 2, DEC_VOC, dtype=jnp.int32)
    # introduce some padding to exercise the masks
    src = src.at[:, -3:].set(PAD)
    tgt = tgt.at[:, -2:].set(PAD)
    tgt = tgt.at[:, 0].set(SOS)

    fwd = jax.jit(functools.partial(transformer_forward, cfg=cfg))
    out = fwd(params, src, tgt)
    out = jax.block_until_ready(out)

    assert out.shape == (B, S_TGT, DEC_VOC), out.shape
    assert bool(jnp.all(jnp.isfinite(out)))
    print("KERNEL_OK")
</pallas_src>

<mosaic_0001>
module attributes {stable_mosaic.version = 11 : i64} {
  func.func @_attn_kernel(%arg0: i32, %arg1: i32, %arg2: i32, %arg3: memref<1x16x1xf32, #tpu.memory_space<vmem>>, %arg4: memref<1x1x16xf32, #tpu.memory_space<vmem>>, %arg5: memref<1x16x128xbf16, #tpu.memory_space<vmem>>, %arg6: memref<1x16x128xbf16, #tpu.memory_space<vmem>>, %arg7: memref<1x16x128xbf16, #tpu.memory_space<vmem>>, %arg8: memref<1x16x128xbf16, #tpu.memory_space<vmem>>, %arg9: memref<4x16x1xf32, #tpu.memory_space<vmem>>, %arg10: memref<4x16x1xf32, #tpu.memory_space<vmem>>, %arg11: memref<4x16x32xf32, #tpu.memory_space<vmem>>) attributes {dimension_semantics = [#tpu.dimension_semantics<parallel>, #tpu.dimension_semantics<parallel>, #tpu.dimension_semantics<arbitrary>], iteration_bounds = array<i64: 2, 1, 1>, scalar_prefetch = 0 : i64, scratch_operands = 3 : i64, tpu.core_type = #tpu.core_type<tc>, window_params = [{transform_indices = @transform_0, window_bounds = array<i64: 1, 16, 1>}, {transform_indices = @transform_1, window_bounds = array<i64: 1, 1, 16>}, {transform_indices = @transform_2, window_bounds = array<i64: 1, 16, 128>}, {transform_indices = @transform_3, window_bounds = array<i64: 1, 16, 128>}, {transform_indices = @transform_4, window_bounds = array<i64: 1, 16, 128>}, {transform_indices = @transform_5, window_bounds = array<i64: 1, 16, 128>}]} {
    %c0_i32 = arith.constant 0 : i32
    %0 = arith.cmpi eq, %arg2, %c0_i32 : i32
    %1 = arith.extui %0 : i1 to i32
    %c0_i32_0 = arith.constant 0 : i32
    %2 = arith.cmpi ne, %1, %c0_i32_0 : i32
    scf.if %2 {
      %cst_104 = arith.constant -1.000000e+30 : f32
      %180 = vector.broadcast %cst_104 : f32 to vector<4x16x1xf32>
      %c0_105 = arith.constant 0 : index
      %c0_106 = arith.constant 0 : index
      %c0_107 = arith.constant 0 : index
      %181 = vector.load %arg9[%c0_105, %c0_106, %c0_107] : memref<4x16x1xf32, #tpu.memory_space<vmem>>, vector<4x16x1xf32>
      tpu.vector_store %arg9[%c0_105, %c0_106, %c0_107], %180 {strides = array<i32>} : memref<4x16x1xf32, #tpu.memory_space<vmem>>, vector<4x16x1xf32>,
      %cst_108 = arith.constant 0.000000e+00 : f32
      %182 = vector.broadcast %cst_108 : f32 to vector<4x16x1xf32>
      %c0_109 = arith.constant 0 : index
      %c0_110 = arith.constant 0 : index
      %c0_111 = arith.constant 0 : index
      %183 = vector.load %arg10[%c0_109, %c0_110, %c0_111] : memref<4x16x1xf32, #tpu.memory_space<vmem>>, vector<4x16x1xf32>
      tpu.vector_store %arg10[%c0_109, %c0_110, %c0_111], %182 {strides = array<i32>} : memref<4x16x1xf32, #tpu.memory_space<vmem>>, vector<4x16x1xf32>,
      %cst_112 = arith.constant 0.000000e+00 : f32
      %184 = vector.broadcast %cst_112 : f32 to vector<4x16x32xf32>
      %c0_113 = arith.constant 0 : index
      %c0_114 = arith.constant 0 : index
      %c0_115 = arith.constant 0 : index
      %185 = vector.load %arg11[%c0_113, %c0_114, %c0_115] : memref<4x16x32xf32, #tpu.memory_space<vmem>>, vector<4x16x32xf32>
      tpu.vector_store %arg11[%c0_113, %c0_114, %c0_115], %184 {strides = array<i32>} : memref<4x16x32xf32, #tpu.memory_space<vmem>>, vector<4x16x32xf32>,
    } else {
    }
    %c0 = arith.constant 0 : index
    %c0_1 = arith.constant 0 : index
    %c0_2 = arith.constant 0 : index
    %3 = vector.load %arg3[%c0, %c0_1, %c0_2] : memref<1x16x1xf32, #tpu.memory_space<vmem>>, vector<1x16x1xf32>
    %4 = vector.shape_cast %3 : vector<1x16x1xf32> to vector<16x1xf32>
    %c0_3 = arith.constant 0 : index
    %c0_4 = arith.constant 0 : index
    %c0_5 = arith.constant 0 : index
    %5 = vector.load %arg4[%c0_3, %c0_4, %c0_5] : memref<1x1x16xf32, #tpu.memory_space<vmem>>, vector<1x1x16xf32>
    %6 = vector.shape_cast %5 : vector<1x1x16xf32> to vector<1x16xf32>
    %7 = vector.broadcast %4 : vector<16x1xf32> to vector<16x16xf32>
    %8 = vector.broadcast %6 : vector<1x16xf32> to vector<16x16xf32>
    %9 = arith.addf %7, %8 : vector<16x16xf32>
    %10 = tpu.iota {dimensions = array<i32: 0>} : vector<16x16xi32>
    %c16_i32 = arith.constant 16 : i32
    %11 = arith.muli %arg1, %c16_i32 : i32
    %12 = vector.broadcast %11 : i32 to vector<16x16xi32>
    %13 = arith.addi %10, %12 : vector<16x16xi32>
    %14 = tpu.iota {dimensions = array<i32: 1>} : vector<16x16xi32>
    %c16_i32_6 = arith.constant 16 : i32
    %15 = arith.muli %arg2, %c16_i32_6 : i32
    %16 = vector.broadcast %15 : i32 to vector<16x16xi32>
    %17 = arith.addi %14, %16 : vector<16x16xi32>
    %18 = arith.cmpi sge, %13, %17 : vector<16x16xi32>
    %cst = arith.constant 0.000000e+00 : f32
    %cst_7 = arith.constant -1.000000e+09 : f32
    %19 = vector.broadcast %cst : f32 to vector<16x16xf32>
    %20 = vector.broadcast %cst_7 : f32 to vector<16x16xf32>
    %21 = arith.select %18, %19, %20 : vector<16x16xi1>, vector<16x16xf32>
    %22 = arith.addf %9, %21 : vector<16x16xf32>
    %c0_8 = arith.constant 0 : index
    %c0_9 = arith.constant 0 : index
    %c0_10 = arith.constant 0 : index
    %23 = vector.load %arg5[%c0_8, %c0_9, %c0_10] : memref<1x16x128xbf16, #tpu.memory_space<vmem>>, vector<1x16x128xbf16>
    %24 = vector.shape_cast %23 : vector<1x16x128xbf16> to vector<16x128xbf16>
    %c0_11 = arith.constant 0 : index
    %c0_12 = arith.constant 0 : index
    %c0_13 = arith.constant 0 : index
    %25 = vector.load %arg6[%c0_11, %c0_12, %c0_13] : memref<1x16x128xbf16, #tpu.memory_space<vmem>>, vector<1x16x128xbf16>
    %26 = vector.shape_cast %25 : vector<1x16x128xbf16> to vector<16x128xbf16>
    %c0_14 = arith.constant 0 : index
    %c0_15 = arith.constant 0 : index
    %c0_16 = arith.constant 0 : index
    %27 = vector.load %arg7[%c0_14, %c0_15, %c0_16] : memref<1x16x128xbf16, #tpu.memory_space<vmem>>, vector<1x16x128xbf16>
    %28 = vector.shape_cast %27 : vector<1x16x128xbf16> to vector<16x128xbf16>
    %29 = vector.extract_strided_slice %24 {offsets = [0, 0], sizes = [16, 32], strides = [1, 1]} : vector<16x128xbf16> to vector<16x32xbf16>
    %30 = vector.extract_strided_slice %26 {offsets = [0, 0], sizes = [16, 32], strides = [1, 1]} : vector<16x128xbf16> to vector<16x32xbf16>
    %31 = vector.extract_strided_slice %28 {offsets = [0, 0], sizes = [16, 32], strides = [1, 1]} : vector<16x128xbf16> to vector<16x32xbf16>
    %cst_17 = arith.constant dense<0.000000e+00> : vector<16x16xf32>
    %32 = tpu.matmul %29, %30, %cst_17 {dimension_numbers = #tpu.dot_dimension_numbers<[1], [1], [0], [0], [0, 0, 1, 0], [], []>} : vector<16x32xbf16>, vector<16x32xbf16>, vector<16x16xf32> -> vector<16x16xf32>
    %33 = arith.addf %32, %22 : vector<16x16xf32>
    %c0_18 = arith.constant 0 : index
    %c0_19 = arith.constant 0 : index
    %c0_20 = arith.constant 0 : index
    %34 = vector.load %arg9[%c0_18, %c0_19, %c0_20] : memref<4x16x1xf32, #tpu.memory_space<vmem>>, vector<1x16x1xf32>
    %35 = vector.shape_cast %34 : vector<1x16x1xf32> to vector<16x1xf32>
    %cst_21 = arith.constant dense<0xFF800000> : vector<16xf32>
    %36 = vector.multi_reduction <maximumf>, %33, %cst_21 [1] : vector<16x16xf32> to vector<16xf32>
    %37 = vector.shape_cast %36 : vector<16xf32> to vector<16x1xf32>
    %38 = arith.maximumf %35, %37 : vector<16x1xf32>
    %39 = arith.subf %35, %38 : vector<16x1xf32>
    %40 = math.exp %39 : vector<16x1xf32>
    %41 = vector.broadcast %38 : vector<16x1xf32> to vector<16x16xf32>
    %42 = arith.subf %33, %41 : vector<16x16xf32>
    %43 = math.exp %42 : vector<16x16xf32>
    %c0_22 = arith.constant 0 : index
    %c0_23 = arith.constant 0 : index
    %c0_24 = arith.constant 0 : index
    %44 = vector.load %arg10[%c0_22, %c0_23, %c0_24] : memref<4x16x1xf32, #tpu.memory_space<vmem>>, vector<1x16x1xf32>
    %45 = vector.shape_cast %44 : vector<1x16x1xf32> to vector<16x1xf32>
    %46 = arith.mulf %40, %45 : vector<16x1xf32>
    %cst_25 = arith.constant dense<0.000000e+00> : vector<16xf32>
    %47 = vector.multi_reduction <add>, %43, %cst_25 [1] : vector<16x16xf32> to vector<16xf32>
    %48 = vector.shape_cast %47 : vector<16xf32> to vector<16x1xf32>
    %49 = arith.addf %46, %48 : vector<16x1xf32>
    %c0_26 = arith.constant 0 : index
    %c0_27 = arith.constant 0 : index
    %c0_28 = arith.constant 0 : index
    %50 = vector.load %arg10[%c0_26, %c0_27, %c0_28] : memref<4x16x1xf32, #tpu.memory_space<vmem>>, vector<1x16x1xf32>
    %51 = vector.shape_cast %50 : vector<1x16x1xf32> to vector<16x1xf32>
    %52 = vector.shape_cast %49 : vector<16x1xf32> to vector<1x16x1xf32>
    tpu.vector_store %arg10[%c0_26, %c0_27, %c0_28], %52 {strides = array<i32>} : memref<4x16x1xf32, #tpu.memory_space<vmem>>, vector<1x16x1xf32>,
    %c0_29 = arith.constant 0 : index
    %c0_30 = arith.constant 0 : index
    %c0_31 = arith.constant 0 : index
    %53 = vector.load %arg11[%c0_29, %c0_30, %c0_31] : memref<4x16x32xf32, #tpu.memory_space<vmem>>, vector<1x16x32xf32>
    %54 = vector.shape_cast %53 : vector<1x16x32xf32> to vector<16x32xf32>
    %55 = vector.broadcast %40 : vector<16x1xf32> to vector<16x32xf32>
    %56 = arith.mulf %55, %54 : vector<16x32xf32>
    %57 = arith.truncf %43 : vector<16x16xf32> to vector<16x16xbf16>
    %cst_32 = arith.constant dense<0.000000e+00> : vector<16x32xf32>
    %58 = tpu.matmul %57, %31, %cst_32 {dimension_numbers = #tpu.dot_dimension_numbers<[1], [0], [0], [1], [0, 0, 1, 1], [], []>} : vector<16x16xbf16>, vector<16x32xbf16>, vector<16x32xf32> -> vector<16x32xf32>
    %59 = arith.addf %56, %58 : vector<16x32xf32>
    %c0_33 = arith.constant 0 : index
    %c0_34 = arith.constant 0 : index
    %c0_35 = arith.constant 0 : index
    %60 = vector.load %arg11[%c0_33, %c0_34, %c0_35] : memref<4x16x32xf32, #tpu.memory_space<vmem>>, vector<1x16x32xf32>
    %61 = vector.shape_cast %60 : vector<1x16x32xf32> to vector<16x32xf32>
    %62 = vector.shape_cast %59 : vector<16x32xf32> to vector<1x16x32xf32>
    tpu.vector_store %arg11[%c0_33, %c0_34, %c0_35], %62 {strides = array<i32>} : memref<4x16x32xf32, #tpu.memory_space<vmem>>, vector<1x16x32xf32>,
    %c0_36 = arith.constant 0 : index
    %c0_37 = arith.constant 0 : index
    %c0_38 = arith.constant 0 : index
    %63 = vector.load %arg9[%c0_36, %c0_37, %c0_38] : memref<4x16x1xf32, #tpu.memory_space<vmem>>, vector<1x16x1xf32>
    %64 = vector.shape_cast %63 : vector<1x16x1xf32> to vector<16x1xf32>
    %65 = vector.shape_cast %38 : vector<16x1xf32> to vector<1x16x1xf32>
    tpu.vector_store %arg9[%c0_36, %c0_37, %c0_38], %65 {strides = array<i32>} : memref<4x16x1xf32, #tpu.memory_space<vmem>>, vector<1x16x1xf32>,
    %66 = vector.extract_strided_slice %24 {offsets = [0, 32], sizes = [16, 32], strides = [1, 1]} : vector<16x128xbf16> to vector<16x32xbf16>
    %67 = vector.extract_strided_slice %26 {offsets = [0, 32], sizes = [16, 32], strides = [1, 1]} : vector<16x128xbf16> to vector<16x32xbf16>
    %68 = vector.extract_strided_slice %28 {offsets = [0, 32], sizes = [16, 32], strides = [1, 1]} : vector<16x128xbf16> to vector<16x32xbf16>
    %cst_39 = arith.constant dense<0.000000e+00> : vector<16x16xf32>
    %69 = tpu.matmul %66, %67, %cst_39 {dimension_numbers = #tpu.dot_dimension_numbers<[1], [1], [0], [0], [0, 0, 1, 0], [], []>} : vector<16x32xbf16>, vector<16x32xbf16>, vector<16x16xf32> -> vector<16x16xf32>
    %70 = arith.addf %69, %22 : vector<16x16xf32>
    %c1 = arith.constant 1 : index
    %c0_40 = arith.constant 0 : index
    %c0_41 = arith.constant 0 : index
    %71 = vector.load %arg9[%c1, %c0_40, %c0_41] : memref<4x16x1xf32, #tpu.memory_space<vmem>>, vector<1x16x1xf32>
    %72 = vector.shape_cast %71 : vector<1x16x1xf32> to vector<16x1xf32>
    %cst_42 = arith.constant dense<0xFF800000> : vector<16xf32>
    %73 = vector.multi_reduction <maximumf>, %70, %cst_42 [1] : vector<16x16xf32> to vector<16xf32>
    %74 = vector.shape_cast %73 : vector<16xf32> to vector<16x1xf32>
    %75 = arith.maximumf %72, %74 : vector<16x1xf32>
    %76 = arith.subf %72, %75 : vector<16x1xf32>
    %77 = math.exp %76 : vector<16x1xf32>
    %78 = vector.broadcast %75 : vector<16x1xf32> to vector<16x16xf32>
    %79 = arith.subf %70, %78 : vector<16x16xf32>
    %80 = math.exp %79 : vector<16x16xf32>
    %c1_43 = arith.constant 1 : index
    %c0_44 = arith.constant 0 : index
    %c0_45 = arith.constant 0 : index
    %81 = vector.load %arg10[%c1_43, %c0_44, %c0_45] : memref<4x16x1xf32, #tpu.memory_space<vmem>>, vector<1x16x1xf32>
    %82 = vector.shape_cast %81 : vector<1x16x1xf32> to vector<16x1xf32>
    %83 = arith.mulf %77, %82 : vector<16x1xf32>
    %cst_46 = arith.constant dense<0.000000e+00> : vector<16xf32>
    %84 = vector.multi_reduction <add>, %80, %cst_46 [1] : vector<16x16xf32> to vector<16xf32>
    %85 = vector.shape_cast %84 : vector<16xf32> to vector<16x1xf32>
    %86 = arith.addf %83, %85 : vector<16x1xf32>
    %c1_47 = arith.constant 1 : index
    %c0_48 = arith.constant 0 : index
    %c0_49 = arith.constant 0 : index
    %87 = vector.load %arg10[%c1_47, %c0_48, %c0_49] : memref<4x16x1xf32, #tpu.memory_space<vmem>>, vector<1x16x1xf32>
    %88 = vector.shape_cast %87 : vector<1x16x1xf32> to vector<16x1xf32>
    %89 = vector.shape_cast %86 : vector<16x1xf32> to vector<1x16x1xf32>
    tpu.vector_store %arg10[%c1_47, %c0_48, %c0_49], %89 {strides = array<i32>} : memref<4x16x1xf32, #tpu.memory_space<vmem>>, vector<1x16x1xf32>,
    %c1_50 = arith.constant 1 : index
    %c0_51 = arith.constant 0 : index
    %c0_52 = arith.constant 0 : index
    %90 = vector.load %arg11[%c1_50, %c0_51, %c0_52] : memref<4x16x32xf32, #tpu.memory_space<vmem>>, vector<1x16x32xf32>
    %91 = vector.shape_cast %90 : vector<1x16x32xf32> to vector<16x32xf32>
    %92 = vector.broadcast %77 : vector<16x1xf32> to vector<16x32xf32>
    %93 = arith.mulf %92, %91 : vector<16x32xf32>
    %94 = arith.truncf %80 : vector<16x16xf32> to vector<16x16xbf16>
    %cst_53 = arith.constant dense<0.000000e+00> : vector<16x32xf32>
    %95 = tpu.matmul %94, %68, %cst_53 {dimension_numbers = #tpu.dot_dimension_numbers<[1], [0], [0], [1], [0, 0, 1, 1], [], []>} : vector<16x16xbf16>, vector<16x32xbf16>, vector<16x32xf32> -> vector<16x32xf32>
    %96 = arith.addf %93, %95 : vector<16x32xf32>
    %c1_54 = arith.constant 1 : index
    %c0_55 = arith.constant 0 : index
    %c0_56 = arith.constant 0 : index
    %97 = vector.load %arg11[%c1_54, %c0_55, %c0_56] : memref<4x16x32xf32, #tpu.memory_space<vmem>>, vector<1x16x32xf32>
    %98 = vector.shape_cast %97 : vector<1x16x32xf32> to vector<16x32xf32>
    %99 = vector.shape_cast %96 : vector<16x32xf32> to vector<1x16x32xf32>
    tpu.vector_store %arg11[%c1_54, %c0_55, %c0_56], %99 {strides = array<i32>} : memref<4x16x32xf32, #tpu.memory_space<vmem>>, vector<1x16x32xf32>,
    %c1_57 = arith.constant 1 : index
    %c0_58 = arith.constant 0 : index
    %c0_59 = arith.constant 0 : index
    %100 = vector.load %arg9[%c1_57, %c0_58, %c0_59] : memref<4x16x1xf32, #tpu.memory_space<vmem>>, vector<1x16x1xf32>
    %101 = vector.shape_cast %100 : vector<1x16x1xf32> to vector<16x1xf32>
    %102 = vector.shape_cast %75 : vector<16x1xf32> to vector<1x16x1xf32>
    tpu.vector_store %arg9[%c1_57, %c0_58, %c0_59], %102 {strides = array<i32>} : memref<4x16x1xf32, #tpu.memory_space<vmem>>, vector<1x16x1xf32>,
    %103 = vector.extract_strided_slice %24 {offsets = [0, 64], sizes = [16, 32], strides = [1, 1]} : vector<16x128xbf16> to vector<16x32xbf16>
    %104 = vector.extract_strided_slice %26 {offsets = [0, 64], sizes = [16, 32], strides = [1, 1]} : vector<16x128xbf16> to vector<16x32xbf16>
    %105 = vector.extract_strided_slice %28 {offsets = [0, 64], sizes = [16, 32], strides = [1, 1]} : vector<16x128xbf16> to vector<16x32xbf16>
    %cst_60 = arith.constant dense<0.000000e+00> : vector<16x16xf32>
    %106 = tpu.matmul %103, %104, %cst_60 {dimension_numbers = #tpu.dot_dimension_numbers<[1], [1], [0], [0], [0, 0, 1, 0], [], []>} : vector<16x32xbf16>, vector<16x32xbf16>, vector<16x16xf32> -> vector<16x16xf32>
    %107 = arith.addf %106, %22 : vector<16x16xf32>
    %c2 = arith.constant 2 : index
    %c0_61 = arith.constant 0 : index
    %c0_62 = arith.constant 0 : index
    %108 = vector.load %arg9[%c2, %c0_61, %c0_62] : memref<4x16x1xf32, #tpu.memory_space<vmem>>, vector<1x16x1xf32>
    %109 = vector.shape_cast %108 : vector<1x16x1xf32> to vector<16x1xf32>
    %cst_63 = arith.constant dense<0xFF800000> : vector<16xf32>
    %110 = vector.multi_reduction <maximumf>, %107, %cst_63 [1] : vector<16x16xf32> to vector<16xf32>
    %111 = vector.shape_cast %110 : vector<16xf32> to vector<16x1xf32>
    %112 = arith.maximumf %109, %111 : vector<16x1xf32>
    %113 = arith.subf %109, %112 : vector<16x1xf32>
    %114 = math.exp %113 : vector<16x1xf32>
    %115 = vector.broadcast %112 : vector<16x1xf32> to vector<16x16xf32>
    %116 = arith.subf %107, %115 : vector<16x16xf32>
    %117 = math.exp %116 : vector<16x16xf32>
    %c2_64 = arith.constant 2 : index
    %c0_65 = arith.constant 0 : index
    %c0_66 = arith.constant 0 : index
    %118 = vector.load %arg10[%c2_64, %c0_65, %c0_66] : memref<4x16x1xf32, #tpu.memory_space<vmem>>, vector<1x16x1xf32>
    %119 = vector.shape_cast %118 : vector<1x16x1xf32> to vector<16x1xf32>
    %120 = arith.mulf %114, %119 : vector<16x1xf32>
    %cst_67 = arith.constant dense<0.000000e+00> : vector<16xf32>
    %121 = vector.multi_reduction <add>, %117, %cst_67 [1] : vector<16x16xf32> to vector<16xf32>
    %122 = vector.shape_cast %121 : vector<16xf32> to vector<16x1xf32>
    %123 = arith.addf %120, %122 : vector<16x1xf32>
    %c2_68 = arith.constant 2 : index
    %c0_69 = arith.constant 0 : index
    %c0_70 = arith.constant 0 : index
    %124 = vector.load %arg10[%c2_68, %c0_69, %c0_70] : memref<4x16x1xf32, #tpu.memory_space<vmem>>, vector<1x16x1xf32>
    %125 = vector.shape_cast %124 : vector<1x16x1xf32> to vector<16x1xf32>
    %126 = vector.shape_cast %123 : vector<16x1xf32> to vector<1x16x1xf32>
    tpu.vector_store %arg10[%c2_68, %c0_69, %c0_70], %126 {strides = array<i32>} : memref<4x16x1xf32, #tpu.memory_space<vmem>>, vector<1x16x1xf32>,
    %c2_71 = arith.constant 2 : index
    %c0_72 = arith.constant 0 : index
    %c0_73 = arith.constant 0 : index
    %127 = vector.load %arg11[%c2_71, %c0_72, %c0_73] : memref<4x16x32xf32, #tpu.memory_space<vmem>>, vector<1x16x32xf32>
    %128 = vector.shape_cast %127 : vector<1x16x32xf32> to vector<16x32xf32>
    %129 = vector.broadcast %114 : vector<16x1xf32> to vector<16x32xf32>
    %130 = arith.mulf %129, %128 : vector<16x32xf32>
    %131 = arith.truncf %117 : vector<16x16xf32> to vector<16x16xbf16>
    %cst_74 = arith.constant dense<0.000000e+00> : vector<16x32xf32>
    %132 = tpu.matmul %131, %105, %cst_74 {dimension_numbers = #tpu.dot_dimension_numbers<[1], [0], [0], [1], [0, 0, 1, 1], [], []>} : vector<16x16xbf16>, vector<16x32xbf16>, vector<16x32xf32> -> vector<16x32xf32>
    %133 = arith.addf %130, %132 : vector<16x32xf32>
    %c2_75 = arith.constant 2 : index
    %c0_76 = arith.constant 0 : index
    %c0_77 = arith.constant 0 : index
    %134 = vector.load %arg11[%c2_75, %c0_76, %c0_77] : memref<4x16x32xf32, #tpu.memory_space<vmem>>, vector<1x16x32xf32>
    %135 = vector.shape_cast %134 : vector<1x16x32xf32> to vector<16x32xf32>
    %136 = vector.shape_cast %133 : vector<16x32xf32> to vector<1x16x32xf32>
    tpu.vector_store %arg11[%c2_75, %c0_76, %c0_77], %136 {strides = array<i32>} : memref<4x16x32xf32, #tpu.memory_space<vmem>>, vector<1x16x32xf32>,
    %c2_78 = arith.constant 2 : index
    %c0_79 = arith.constant 0 : index
    %c0_80 = arith.constant 0 : index
    %137 = vector.load %arg9[%c2_78, %c0_79, %c0_80] : memref<4x16x1xf32, #tpu.memory_space<vmem>>, vector<1x16x1xf32>
    %138 = vector.shape_cast %137 : vector<1x16x1xf32> to vector<16x1xf32>
    %139 = vector.shape_cast %112 : vector<16x1xf32> to vector<1x16x1xf32>
    tpu.vector_store %arg9[%c2_78, %c0_79, %c0_80], %139 {strides = array<i32>} : memref<4x16x1xf32, #tpu.memory_space<vmem>>, vector<1x16x1xf32>,
    %140 = vector.extract_strided_slice %24 {offsets = [0, 96], sizes = [16, 32], strides = [1, 1]} : vector<16x128xbf16> to vector<16x32xbf16>
    %141 = vector.extract_strided_slice %26 {offsets = [0, 96], sizes = [16, 32], strides = [1, 1]} : vector<16x128xbf16> to vector<16x32xbf16>
    %142 = vector.extract_strided_slice %28 {offsets = [0, 96], sizes = [16, 32], strides = [1, 1]} : vector<16x128xbf16> to vector<16x32xbf16>
    %cst_81 = arith.constant dense<0.000000e+00> : vector<16x16xf32>
    %143 = tpu.matmul %140, %141, %cst_81 {dimension_numbers = #tpu.dot_dimension_numbers<[1], [1], [0], [0], [0, 0, 1, 0], [], []>} : vector<16x32xbf16>, vector<16x32xbf16>, vector<16x16xf32> -> vector<16x16xf32>
    %144 = arith.addf %143, %22 : vector<16x16xf32>
    %c3 = arith.constant 3 : index
    %c0_82 = arith.constant 0 : index
    %c0_83 = arith.constant 0 : index
    %145 = vector.load %arg9[%c3, %c0_82, %c0_83] : memref<4x16x1xf32, #tpu.memory_space<vmem>>, vector<1x16x1xf32>
    %146 = vector.shape_cast %145 : vector<1x16x1xf32> to vector<16x1xf32>
    %cst_84 = arith.constant dense<0xFF800000> : vector<16xf32>
    %147 = vector.multi_reduction <maximumf>, %144, %cst_84 [1] : vector<16x16xf32> to vector<16xf32>
    %148 = vector.shape_cast %147 : vector<16xf32> to vector<16x1xf32>
    %149 = arith.maximumf %146, %148 : vector<16x1xf32>
    %150 = arith.subf %146, %149 : vector<16x1xf32>
    %151 = math.exp %150 : vector<16x1xf32>
    %152 = vector.broadcast %149 : vector<16x1xf32> to vector<16x16xf32>
    %153 = arith.subf %144, %152 : vector<16x16xf32>
    %154 = math.exp %153 : vector<16x16xf32>
    %c3_85 = arith.constant 3 : index
    %c0_86 = arith.constant 0 : index
    %c0_87 = arith.constant 0 : index
    %155 = vector.load %arg10[%c3_85, %c0_86, %c0_87] : memref<4x16x1xf32, #tpu.memory_space<vmem>>, vector<1x16x1xf32>
    %156 = vector.shape_cast %155 : vector<1x16x1xf32> to vector<16x1xf32>
    %157 = arith.mulf %151, %156 : vector<16x1xf32>
    %cst_88 = arith.constant dense<0.000000e+00> : vector<16xf32>
    %158 = vector.multi_reduction <add>, %154, %cst_88 [1] : vector<16x16xf32> to vector<16xf32>
    %159 = vector.shape_cast %158 : vector<16xf32> to vector<16x1xf32>
    %160 = arith.addf %157, %159 : vector<16x1xf32>
    %c3_89 = arith.constant 3 : index
    %c0_90 = arith.constant 0 : index
    %c0_91 = arith.constant 0 : index
    %161 = vector.load %arg10[%c3_89, %c0_90, %c0_91] : memref<4x16x1xf32, #tpu.memory_space<vmem>>, vector<1x16x1xf32>
    %162 = vector.shape_cast %161 : vector<1x16x1xf32> to vector<16x1xf32>
    %163 = vector.shape_cast %160 : vector<16x1xf32> to vector<1x16x1xf32>
    tpu.vector_store %arg10[%c3_89, %c0_90, %c0_91], %163 {strides = array<i32>} : memref<4x16x1xf32, #tpu.memory_space<vmem>>, vector<1x16x1xf32>,
    %c3_92 = arith.constant 3 : index
    %c0_93 = arith.constant 0 : index
    %c0_94 = arith.constant 0 : index
    %164 = vector.load %arg11[%c3_92, %c0_93, %c0_94] : memref<4x16x32xf32, #tpu.memory_space<vmem>>, vector<1x16x32xf32>
    %165 = vector.shape_cast %164 : vector<1x16x32xf32> to vector<16x32xf32>
    %166 = vector.broadcast %151 : vector<16x1xf32> to vector<16x32xf32>
    %167 = arith.mulf %166, %165 : vector<16x32xf32>
    %168 = arith.truncf %154 : vector<16x16xf32> to vector<16x16xbf16>
    %cst_95 = arith.constant dense<0.000000e+00> : vector<16x32xf32>
    %169 = tpu.matmul %168, %142, %cst_95 {dimension_numbers = #tpu.dot_dimension_numbers<[1], [0], [0], [1], [0, 0, 1, 1], [], []>} : vector<16x16xbf16>, vector<16x32xbf16>, vector<16x32xf32> -> vector<16x32xf32>
    %170 = arith.addf %167, %169 : vector<16x32xf32>
    %c3_96 = arith.constant 3 : index
    %c0_97 = arith.constant 0 : index
    %c0_98 = arith.constant 0 : index
    %171 = vector.load %arg11[%c3_96, %c0_97, %c0_98] : memref<4x16x32xf32, #tpu.memory_space<vmem>>, vector<1x16x32xf32>
    %172 = vector.shape_cast %171 : vector<1x16x32xf32> to vector<16x32xf32>
    %173 = vector.shape_cast %170 : vector<16x32xf32> to vector<1x16x32xf32>
    tpu.vector_store %arg11[%c3_96, %c0_97, %c0_98], %173 {strides = array<i32>} : memref<4x16x32xf32, #tpu.memory_space<vmem>>, vector<1x16x32xf32>,
    %c3_99 = arith.constant 3 : index
    %c0_100 = arith.constant 0 : index
    %c0_101 = arith.constant 0 : index
    %174 = vector.load %arg9[%c3_99, %c0_100, %c0_101] : memref<4x16x1xf32, #tpu.memory_space<vmem>>, vector<1x16x1xf32>
    %175 = vector.shape_cast %174 : vector<1x16x1xf32> to vector<16x1xf32>
    %176 = vector.shape_cast %149 : vector<16x1xf32> to vector<1x16x1xf32>
    tpu.vector_store %arg9[%c3_99, %c0_100, %c0_101], %176 {strides = array<i32>} : memref<4x16x1xf32, #tpu.memory_space<vmem>>, vector<1x16x1xf32>,
    %c0_i32_102 = arith.constant 0 : i32
    %177 = arith.cmpi eq, %arg2, %c0_i32_102 : i32
    %178 = arith.extui %177 : i1 to i32
    %c0_i32_103 = arith.constant 0 : i32
    %179 = arith.cmpi ne, %178, %c0_i32_103 : i32
    scf.if %179 {
      %c0_104 = arith.constant 0 : index
      %c0_105 = arith.constant 0 : index
      %c0_106 = arith.constant 0 : index
      %180 = vector.load %arg11[%c0_104, %c0_105, %c0_106] : memref<4x16x32xf32, #tpu.memory_space<vmem>>, vector<1x16x32xf32>
      %181 = vector.shape_cast %180 : vector<1x16x32xf32> to vector<16x32xf32>
      %c0_107 = arith.constant 0 : index
      %c0_108 = arith.constant 0 : index
      %c0_109 = arith.constant 0 : index
      %182 = vector.load %arg10[%c0_107, %c0_108, %c0_109] : memref<4x16x1xf32, #tpu.memory_space<vmem>>, vector<1x16x1xf32>
      %183 = vector.shape_cast %182 : vector<1x16x1xf32> to vector<16x1xf32>
      %184 = tpu.reciprocal %183 {approx = true} : vector<16x1xf32> -> vector<16x1xf32>
      %185 = vector.broadcast %184 : vector<16x1xf32> to vector<16x32xf32>
      %186 = arith.mulf %181, %185 : vector<16x32xf32>
      %c1_110 = arith.constant 1 : index
      %c0_111 = arith.constant 0 : index
      %c0_112 = arith.constant 0 : index
      %187 = vector.load %arg11[%c1_110, %c0_111, %c0_112] : memref<4x16x32xf32, #tpu.memory_space<vmem>>, vector<1x16x32xf32>
      %188 = vector.shape_cast %187 : vector<1x16x32xf32> to vector<16x32xf32>
      %c1_113 = arith.constant 1 : index
      %c0_114 = arith.constant 0 : index
      %c0_115 = arith.constant 0 : index
      %189 = vector.load %arg10[%c1_113, %c0_114, %c0_115] : memref<4x16x1xf32, #tpu.memory_space<vmem>>, vector<1x16x1xf32>
      %190 = vector.shape_cast %189 : vector<1x16x1xf32> to vector<16x1xf32>
      %191 = tpu.reciprocal %190 {approx = true} : vector<16x1xf32> -> vector<16x1xf32>
      %192 = vector.broadcast %191 : vector<16x1xf32> to vector<16x32xf32>
      %193 = arith.mulf %188, %192 : vector<16x32xf32>
      %c2_116 = arith.constant 2 : index
      %c0_117 = arith.constant 0 : index
      %c0_118 = arith.constant 0 : index
      %194 = vector.load %arg11[%c2_116, %c0_117, %c0_118] : memref<4x16x32xf32, #tpu.memory_space<vmem>>, vector<1x16x32xf32>
      %195 = vector.shape_cast %194 : vector<1x16x32xf32> to vector<16x32xf32>
      %c2_119 = arith.constant 2 : index
      %c0_120 = arith.constant 0 : index
      %c0_121 = arith.constant 0 : index
      %196 = vector.load %arg10[%c2_119, %c0_120, %c0_121] : memref<4x16x1xf32, #tpu.memory_space<vmem>>, vector<1x16x1xf32>
      %197 = vector.shape_cast %196 : vector<1x16x1xf32> to vector<16x1xf32>
      %198 = tpu.reciprocal %197 {approx = true} : vector<16x1xf32> -> vector<16x1xf32>
      %199 = vector.broadcast %198 : vector<16x1xf32> to vector<16x32xf32>
      %200 = arith.mulf %195, %199 : vector<16x32xf32>
      %c3_122 = arith.constant 3 : index
      %c0_123 = arith.constant 0 : index
      %c0_124 = arith.constant 0 : index
      %201 = vector.load %arg11[%c3_122, %c0_123, %c0_124] : memref<4x16x32xf32, #tpu.memory_space<vmem>>, vector<1x16x32xf32>
      %202 = vector.shape_cast %201 : vector<1x16x32xf32> to vector<16x32xf32>
      %c3_125 = arith.constant 3 : index
      %c0_126 = arith.constant 0 : index
      %c0_127 = arith.constant 0 : index
      %203 = vector.load %arg10[%c3_125, %c0_126, %c0_127] : memref<4x16x1xf32, #tpu.memory_space<vmem>>, vector<1x16x1xf32>
      %204 = vector.shape_cast %203 : vector<1x16x1xf32> to vector<16x1xf32>
      %205 = tpu.reciprocal %204 {approx = true} : vector<16x1xf32> -> vector<16x1xf32>
      %206 = vector.broadcast %205 : vector<16x1xf32> to vector<16x32xf32>
      %207 = arith.mulf %202, %206 : vector<16x32xf32>
      %208 = tpu.concatenate %186, %193, %200, %207 in 1 : vector<16x32xf32>, vector<16x32xf32>, vector<16x32xf32>, vector<16x32xf32> -> vector<16x128xf32>
      %209 = arith.truncf %208 : vector<16x128xf32> to vector<16x128xbf16>
      %c0_128 = arith.constant 0 : index
      %c0_129 = arith.constant 0 : index
      %c0_130 = arith.constant 0 : index
      %210 = vector.load %arg8[%c0_128, %c0_129, %c0_130] : memref<1x16x128xbf16, #tpu.memory_space<vmem>>, vector<1x16x128xbf16>
      %211 = vector.shape_cast %210 : vector<1x16x128xbf16> to vector<16x128xbf16>
      %212 = vector.shape_cast %209 : vector<16x128xbf16> to vector<1x16x128xbf16>
      tpu.vector_store %arg8[%c0_128, %c0_129, %c0_130], %212 {strides = array<i32>} : memref<1x16x128xbf16, #tpu.memory_space<vmem>>, vector<1x16x128xbf16>,
    } else {
    }
    return
  }
  func.func @transform_0(%arg0: i32, %arg1: i32, %arg2: i32) -> (i32, i32, i32) {
    %c0_i32 = arith.constant 0 : i32
    %c0_i32_0 = arith.constant 0 : i32
    return %arg0, %arg1, %c0_i32 : i32, i32, i32
  }
  func.func @transform_1(%arg0: i32, %arg1: i32, %arg2: i32) -> (i32, i32, i32) {
    %c0_i32 = arith.constant 0 : i32
    %c0_i32_0 = arith.constant 0 : i32
    return %arg0, %c0_i32, %arg2 : i32, i32, i32
  }
  func.func @transform_2(%arg0: i32, %arg1: i32, %arg2: i32) -> (i32, i32, i32) {
    %c0_i32 = arith.constant 0 : i32
    %c0_i32_0 = arith.constant 0 : i32
    return %arg0, %arg1, %c0_i32 : i32, i32, i32
  }
  func.func @transform_3(%arg0: i32, %arg1: i32, %arg2: i32) -> (i32, i32, i32) {
    %c1_i32 = arith.constant 1 : i32
    %c0_i32 = arith.constant 0 : i32
    return %arg0, %arg2, %c1_i32 : i32, i32, i32
  }
  func.func @transform_4(%arg0: i32, %arg1: i32, %arg2: i32) -> (i32, i32, i32) {
    %c2_i32 = arith.constant 2 : i32
    %c0_i32 = arith.constant 0 : i32
    return %arg0, %arg2, %c2_i32 : i32, i32, i32
  }
  func.func @transform_5(%arg0: i32, %arg1: i32, %arg2: i32) -> (i32, i32, i32) {
    %c0_i32 = arith.constant 0 : i32
    %c0_i32_0 = arith.constant 0 : i32
    return %arg0, %arg1, %c0_i32 : i32, i32, i32
  }
}

module attributes {stable_mosaic.version = 11 : i64} {
  func.func @_matmul_add_ln_kernel(%arg0: i32, %arg1: i32, %arg2: memref<32x128xbf16, #tpu.memory_space<vmem>>, %arg3: memref<128x128xbf16, #tpu.memory_space<vmem>>, %arg4: memref<1x128xf32, #tpu.memory_space<vmem>>, %arg5: memref<32x128xbf16, #tpu.memory_space<vmem>>, %arg6: memref<1x128xf32, #tpu.memory_space<vmem>>, %arg7: memref<1x128xf32, #tpu.memory_space<vmem>>, %arg8: memref<32x128xbf16, #tpu.memory_space<vmem>>, %arg9: memref<32x128xf32, #tpu.memory_space<vmem>>) attributes {dimension_semantics = [#tpu.dimension_semantics<parallel>, #tpu.dimension_semantics<arbitrary>], iteration_bounds = array<i64: 1, 1>, scalar_prefetch = 0 : i64, scratch_operands = 1 : i64, tpu.core_type = #tpu.core_type<tc>, window_params = [{transform_indices = @transform_0, window_bounds = array<i64: 32, 128>}, {transform_indices = @transform_1, window_bounds = array<i64: 128, 128>}, {pipeline_mode = #tpu.pipeline_mode<synchronous>, transform_indices = @transform_2, window_bounds = array<i64: 1, 128>}, {transform_indices = @transform_3, window_bounds = array<i64: 32, 128>}, {pipeline_mode = #tpu.pipeline_mode<synchronous>, transform_indices = @transform_4, window_bounds = array<i64: 1, 128>}, {pipeline_mode = #tpu.pipeline_mode<synchronous>, transform_indices = @transform_5, window_bounds = array<i64: 1, 128>}, {transform_indices = @transform_6, window_bounds = array<i64: 32, 128>}]} {
    %c0_i32 = arith.constant 0 : i32
    %0 = arith.cmpi eq, %arg1, %c0_i32 : i32
    %1 = arith.extui %0 : i1 to i32
    %c0_i32_0 = arith.constant 0 : i32
    %2 = arith.cmpi ne, %1, %c0_i32_0 : i32
    scf.if %2 {
      %cst_10 = arith.constant 0.000000e+00 : f32
      %12 = vector.broadcast %cst_10 : f32 to vector<32x128xf32>
      %c0_11 = arith.constant 0 : index
      %c0_12 = arith.constant 0 : index
      %13 = vector.load %arg9[%c0_11, %c0_12] : memref<32x128xf32, #tpu.memory_space<vmem>>, vector<32x128xf32>
      tpu.vector_store %arg9[%c0_11, %c0_12], %12 {strides = array<i32>} : memref<32x128xf32, #tpu.memory_space<vmem>>, vector<32x128xf32>,
    } else {
    }
    %c0 = arith.constant 0 : index
    %c0_1 = arith.constant 0 : index
    %3 = vector.load %arg9[%c0, %c0_1] : memref<32x128xf32, #tpu.memory_space<vmem>>, vector<32x128xf32>
    %c0_2 = arith.constant 0 : index
    %c0_3 = arith.constant 0 : index
    %4 = vector.load %arg2[%c0_2, %c0_3] : memref<32x128xbf16, #tpu.memory_space<vmem>>, vector<32x128xbf16>
    %c0_4 = arith.constant 0 : index
    %c0_5 = arith.constant 0 : index
    %5 = vector.load %arg3[%c0_4, %c0_5] : memref<128x128xbf16, #tpu.memory_space<vmem>>, vector<128x128xbf16>
    %cst = arith.constant dense<0.000000e+00> : vector<32x128xf32>
    %6 = tpu.matmul %4, %5, %cst {dimension_numbers = #tpu.dot_dimension_numbers<[1], [0], [0], [1], [0, 0, 1, 1], [], []>} : vector<32x128xbf16>, vector<128x128xbf16>, vector<32x128xf32> -> vector<32x128xf32>
    %7 = arith.addf %3, %6 : vector<32x128xf32>
    %c0_6 = arith.constant 0 : index
    %c0_7 = arith.constant 0 : index
    %8 = vector.load %arg9[%c0_6, %c0_7] : memref<32x128xf32, #tpu.memory_space<vmem>>, vector<32x128xf32>
    tpu.vector_store %arg9[%c0_6, %c0_7], %7 {strides = array<i32>} : memref<32x128xf32, #tpu.memory_space<vmem>>, vector<32x128xf32>,
    %c0_i32_8 = arith.constant 0 : i32
    %9 = arith.cmpi eq, %arg1, %c0_i32_8 : i32
    %10 = arith.extui %9 : i1 to i32
    %c0_i32_9 = arith.constant 0 : i32
    %11 = arith.cmpi ne, %10, %c0_i32_9 : i32
    scf.if %11 {
      %c0_10 = arith.constant 0 : index
      %c0_11 = arith.constant 0 : index
      %12 = vector.load %arg9[%c0_10, %c0_11] : memref<32x128xf32, #tpu.memory_space<vmem>>, vector<32x128xf32>
      %c0_12 = arith.constant 0 : index
      %c0_13 = arith.constant 0 : index
      %13 = vector.load %arg4[%c0_12, %c0_13] : memref<1x128xf32, #tpu.memory_space<vmem>>, vector<1x128xf32>
      %14 = vector.broadcast %13 : vector<1x128xf32> to vector<32x128xf32>
      %15 = arith.addf %12, %14 : vector<32x128xf32>
      %c0_14 = arith.constant 0 : index
      %c0_15 = arith.constant 0 : index
      %16 = vector.load %arg5[%c0_14, %c0_15] : memref<32x128xbf16, #tpu.memory_space<vmem>>, vector<32x128xbf16>
      %17 = arith.extf %16 : vector<32x128xbf16> to vector<32x128xf32>
      %18 = arith.addf %15, %17 : vector<32x128xf32>
      %cst_16 = arith.constant dense<0.000000e+00> : vector<32xf32>
      %19 = vector.multi_reduction <add>, %18, %cst_16 [1] : vector<32x128xf32> to vector<32xf32>
      %20 = vector.shape_cast %19 : vector<32xf32> to vector<32x1xf32>
      %cst_17 = arith.constant 1.280000e+02 : f32
      %21 = vector.broadcast %cst_17 : f32 to vector<32x1xf32>
      %22 = arith.divf %20, %21 : vector<32x1xf32>
      %23 = vector.broadcast %22 : vector<32x1xf32> to vector<32x128xf32>
      %24 = arith.subf %18, %23 : vector<32x128xf32>
      %25 = arith.mulf %24, %24 : vector<32x128xf32>
      %cst_18 = arith.constant dense<0.000000e+00> : vector<32xf32>
      %26 = vector.multi_reduction <add>, %25, %cst_18 [1] : vector<32x128xf32> to vector<32xf32>
      %27 = vector.shape_cast %26 : vector<32xf32> to vector<32x1xf32>
      %cst_19 = arith.constant 1.280000e+02 : f32
      %28 = vector.broadcast %cst_19 : f32 to vector<32x1xf32>
      %29 = arith.divf %27, %28 : vector<32x1xf32>
      %30 = vector.broadcast %22 : vector<32x1xf32> to vector<32x128xf32>
      %31 = arith.subf %18, %30 : vector<32x128xf32>
      %cst_20 = arith.constant 9.99999996E-13 : f32
      %32 = vector.broadcast %cst_20 : f32 to vector<32x1xf32>
      %33 = arith.addf %29, %32 : vector<32x1xf32>
      %34 = math.rsqrt %33 : vector<32x1xf32>
      %35 = vector.broadcast %34 : vector<32x1xf32> to vector<32x128xf32>
      %36 = arith.mulf %31, %35 : vector<32x128xf32>
      %c0_21 = arith.constant 0 : index
      %c0_22 = arith.constant 0 : index
      %37 = vector.load %arg6[%c0_21, %c0_22] : memref<1x128xf32, #tpu.memory_space<vmem>>, vector<1x128xf32>
      %38 = vector.broadcast %37 : vector<1x128xf32> to vector<32x128xf32>
      %39 = arith.mulf %36, %38 : vector<32x128xf32>
      %c0_23 = arith.constant 0 : index
      %c0_24 = arith.constant 0 : index
      %40 = vector.load %arg7[%c0_23, %c0_24] : memref<1x128xf32, #tpu.memory_space<vmem>>, vector<1x128xf32>
      %41 = vector.broadcast %40 : vector<1x128xf32> to vector<32x128xf32>
      %42 = arith.addf %39, %41 : vector<32x128xf32>
      %43 = arith.truncf %42 : vector<32x128xf32> to vector<32x128xbf16>
      %c0_25 = arith.constant 0 : index
      %c0_26 = arith.constant 0 : index
      %44 = vector.load %arg8[%c0_25, %c0_26] : memref<32x128xbf16, #tpu.memory_space<vmem>>, vector<32x128xbf16>
      tpu.vector_store %arg8[%c0_25, %c0_26], %43 {strides = array<i32>} : memref<32x128xbf16, #tpu.memory_space<vmem>>, vector<32x128xbf16>,
    } else {
    }
    return
  }
  func.func @transform_0(%arg0: i32, %arg1: i32) -> (i32, i32) {
    %c0_i32 = arith.constant 0 : i32
    return %arg0, %arg1 : i32, i32
  }
  func.func @transform_1(%arg0: i32, %arg1: i32) -> (i32, i32) {
    %c0_i32 = arith.constant 0 : i32
    %c0_i32_0 = arith.constant 0 : i32
    return %arg1, %c0_i32 : i32, i32
  }
  func.func @transform_2(%arg0: i32, %arg1: i32) -> (i32, i32) {
    %c0_i32 = arith.constant 0 : i32
    %c0_i32_0 = arith.constant 0 : i32
    %c0_i32_1 = arith.constant 0 : i32
    return %c0_i32, %c0_i32_0 : i32, i32
  }
  func.func @transform_3(%arg0: i32, %arg1: i32) -> (i32, i32) {
    %c0_i32 = arith.constant 0 : i32
    %c0_i32_0 = arith.constant 0 : i32
    return %arg0, %c0_i32 : i32, i32
  }
  func.func @transform_4(%arg0: i32, %arg1: i32) -> (i32, i32) {
    %c0_i32 = arith.constant 0 : i32
    %c0_i32_0 = arith.constant 0 : i32
    %c0_i32_1 = arith.constant 0 : i32
    return %c0_i32, %c0_i32_0 : i32, i32
  }
  func.func @transform_5(%arg0: i32, %arg1: i32) -> (i32, i32) {
    %c0_i32 = arith.constant 0 : i32
    %c0_i32_0 = arith.constant 0 : i32
    %c0_i32_1 = arith.constant 0 : i32
    return %c0_i32, %c0_i32_0 : i32, i32
  }
  func.func @transform_6(%arg0: i32, %arg1: i32) -> (i32, i32) {
    %c0_i32 = arith.constant 0 : i32
    %c0_i32_0 = arith.constant 0 : i32
    return %arg0, %c0_i32 : i32, i32
  }
}

module attributes {stable_mosaic.version = 11 : i64} {
  func.func @_matmul_kernel(%arg0: i32, %arg1: i32, %arg2: i32, %arg3: memref<32x128xbf16, #tpu.memory_space<vmem>>, %arg4: memref<128x128xbf16, #tpu.memory_space<vmem>>, %arg5: memref<1x128xf32, #tpu.memory_space<vmem>>, %arg6: memref<32x128xbf16, #tpu.memory_space<vmem>>, %arg7: memref<32x128xf32, #tpu.memory_space<vmem>>) attributes {dimension_semantics = [#tpu.dimension_semantics<parallel>, #tpu.dimension_semantics<parallel>, #tpu.dimension_semantics<arbitrary>], iteration_bounds = array<i64: 1, 3, 1>, scalar_prefetch = 0 : i64, scratch_operands = 1 : i64, tpu.core_type = #tpu.core_type<tc>, window_params = [{transform_indices = @transform_0, window_bounds = array<i64: 32, 128>}, {transform_indices = @transform_1, window_bounds = array<i64: 128, 128>}, {transform_indices = @transform_2, window_bounds = array<i64: 1, 128>}, {transform_indices = @transform_3, window_bounds = array<i64: 32, 128>}]} {
    %c0_i32 = arith.constant 0 : i32
    %0 = arith.cmpi eq, %arg2, %c0_i32 : i32
    %1 = arith.extui %0 : i1 to i32
    %c0_i32_0 = arith.constant 0 : i32
    %2 = arith.cmpi ne, %1, %c0_i32_0 : i32
    scf.if %2 {
      %cst_10 = arith.constant 0.000000e+00 : f32
      %12 = vector.broadcast %cst_10 : f32 to vector<32x128xf32>
      %c0_11 = arith.constant 0 : index
      %c0_12 = arith.constant 0 : index
      %13 = vector.load %arg7[%c0_11, %c0_12] : memref<32x128xf32, #tpu.memory_space<vmem>>, vector<32x128xf32>
      tpu.vector_store %arg7[%c0_11, %c0_12], %12 {strides = array<i32>} : memref<32x128xf32, #tpu.memory_space<vmem>>, vector<32x128xf32>,
    } else {
    }
    %c0 = arith.constant 0 : index
    %c0_1 = arith.constant 0 : index
    %3 = vector.load %arg7[%c0, %c0_1] : memref<32x128xf32, #tpu.memory_space<vmem>>, vector<32x128xf32>
    %c0_2 = arith.constant 0 : index
    %c0_3 = arith.constant 0 : index
    %4 = vector.load %arg3[%c0_2, %c0_3] : memref<32x128xbf16, #tpu.memory_space<vmem>>, vector<32x128xbf16>
    %c0_4 = arith.constant 0 : index
    %c0_5 = arith.constant 0 : index
    %5 = vector.load %arg4[%c0_4, %c0_5] : memref<128x128xbf16, #tpu.memory_space<vmem>>, vector<128x128xbf16>
    %cst = arith.constant dense<0.000000e+00> : vector<32x128xf32>
    %6 = tpu.matmul %4, %5, %cst {dimension_numbers = #tpu.dot_dimension_numbers<[1], [0], [0], [1], [0, 0, 1, 1], [], []>} : vector<32x128xbf16>, vector<128x128xbf16>, vector<32x128xf32> -> vector<32x128xf32>
    %7 = arith.addf %3, %6 : vector<32x128xf32>
    %c0_6 = arith.constant 0 : index
    %c0_7 = arith.constant 0 : index
    %8 = vector.load %arg7[%c0_6, %c0_7] : memref<32x128xf32, #tpu.memory_space<vmem>>, vector<32x128xf32>
    tpu.vector_store %arg7[%c0_6, %c0_7], %7 {strides = array<i32>} : memref<32x128xf32, #tpu.memory_space<vmem>>, vector<32x128xf32>,
    %c0_i32_8 = arith.constant 0 : i32
    %9 = arith.cmpi eq, %arg2, %c0_i32_8 : i32
    %10 = arith.extui %9 : i1 to i32
    %c0_i32_9 = arith.constant 0 : i32
    %11 = arith.cmpi ne, %10, %c0_i32_9 : i32
    scf.if %11 {
      %c0_10 = arith.constant 0 : index
      %c0_11 = arith.constant 0 : index
      %12 = vector.load %arg7[%c0_10, %c0_11] : memref<32x128xf32, #tpu.memory_space<vmem>>, vector<32x128xf32>
      %c0_12 = arith.constant 0 : index
      %c0_13 = arith.constant 0 : index
      %13 = vector.load %arg5[%c0_12, %c0_13] : memref<1x128xf32, #tpu.memory_space<vmem>>, vector<1x128xf32>
      %14 = vector.broadcast %13 : vector<1x128xf32> to vector<32x128xf32>
      %15 = arith.addf %12, %14 : vector<32x128xf32>
      %16 = arith.truncf %15 : vector<32x128xf32> to vector<32x128xbf16>
      %c0_14 = arith.constant 0 : index
      %c0_15 = arith.constant 0 : index
      %17 = vector.load %arg6[%c0_14, %c0_15] : memref<32x128xbf16, #tpu.memory_space<vmem>>, vector<32x128xbf16>
      tpu.vector_store %arg6[%c0_14, %c0_15], %16 {strides = array<i32>} : memref<32x128xbf16, #tpu.memory_space<vmem>>, vector<32x128xbf16>,
    } else {
    }
    return
  }
  func.func @transform_0(%arg0: i32, %arg1: i32, %arg2: i32) -> (i32, i32) {
    %c0_i32 = arith.constant 0 : i32
    return %arg0, %arg2 : i32, i32
  }
  func.func @transform_1(%arg0: i32, %arg1: i32, %arg2: i32) -> (i32, i32) {
    %c0_i32 = arith.constant 0 : i32
    return %arg2, %arg1 : i32, i32
  }
  func.func @transform_2(%arg0: i32, %arg1: i32, %arg2: i32) -> (i32, i32) {
    %c0_i32 = arith.constant 0 : i32
    %c0_i32_0 = arith.constant 0 : i32
    return %c0_i32, %arg1 : i32, i32
  }
  func.func @transform_3(%arg0: i32, %arg1: i32, %arg2: i32) -> (i32, i32) {
    %c0_i32 = arith.constant 0 : i32
    return %arg0, %arg1 : i32, i32
  }
}

module attributes {stable_mosaic.version = 11 : i64} {
  func.func @_matmul_kernel(%arg0: i32, %arg1: i32, %arg2: i32, %arg3: memref<32x128xbf16, #tpu.memory_space<vmem>>, %arg4: memref<128x128xbf16, #tpu.memory_space<vmem>>, %arg5: memref<1x128xf32, #tpu.memory_space<vmem>>, %arg6: memref<32x128xbf16, #tpu.memory_space<vmem>>, %arg7: memref<32x128xf32, #tpu.memory_space<vmem>>) attributes {dimension_semantics = [#tpu.dimension_semantics<parallel>, #tpu.dimension_semantics<parallel>, #tpu.dimension_semantics<arbitrary>], iteration_bounds = array<i64: 1, 1, 1>, scalar_prefetch = 0 : i64, scratch_operands = 1 : i64, tpu.core_type = #tpu.core_type<tc>, window_params = [{transform_indices = @transform_0, window_bounds = array<i64: 32, 128>}, {transform_indices = @transform_1, window_bounds = array<i64: 128, 128>}, {transform_indices = @transform_2, window_bounds = array<i64: 1, 128>}, {transform_indices = @transform_3, window_bounds = array<i64: 32, 128>}]} {
    %c0_i32 = arith.constant 0 : i32
    %0 = arith.cmpi eq, %arg2, %c0_i32 : i32
    %1 = arith.extui %0 : i1 to i32
    %c0_i32_0 = arith.constant 0 : i32
    %2 = arith.cmpi ne, %1, %c0_i32_0 : i32
    scf.if %2 {
      %cst_10 = arith.constant 0.000000e+00 : f32
      %12 = vector.broadcast %cst_10 : f32 to vector<32x128xf32>
      %c0_11 = arith.constant 0 : index
      %c0_12 = arith.constant 0 : index
      %13 = vector.load %arg7[%c0_11, %c0_12] : memref<32x128xf32, #tpu.memory_space<vmem>>, vector<32x128xf32>
      tpu.vector_store %arg7[%c0_11, %c0_12], %12 {strides = array<i32>} : memref<32x128xf32, #tpu.memory_space<vmem>>, vector<32x128xf32>,
    } else {
    }
    %c0 = arith.constant 0 : index
    %c0_1 = arith.constant 0 : index
    %3 = vector.load %arg7[%c0, %c0_1] : memref<32x128xf32, #tpu.memory_space<vmem>>, vector<32x128xf32>
    %c0_2 = arith.constant 0 : index
    %c0_3 = arith.constant 0 : index
    %4 = vector.load %arg3[%c0_2, %c0_3] : memref<32x128xbf16, #tpu.memory_space<vmem>>, vector<32x128xbf16>
    %c0_4 = arith.constant 0 : index
    %c0_5 = arith.constant 0 : index
    %5 = vector.load %arg4[%c0_4, %c0_5] : memref<128x128xbf16, #tpu.memory_space<vmem>>, vector<128x128xbf16>
    %cst = arith.constant dense<0.000000e+00> : vector<32x128xf32>
    %6 = tpu.matmul %4, %5, %cst {dimension_numbers = #tpu.dot_dimension_numbers<[1], [0], [0], [1], [0, 0, 1, 1], [], []>} : vector<32x128xbf16>, vector<128x128xbf16>, vector<32x128xf32> -> vector<32x128xf32>
    %7 = arith.addf %3, %6 : vector<32x128xf32>
    %c0_6 = arith.constant 0 : index
    %c0_7 = arith.constant 0 : index
    %8 = vector.load %arg7[%c0_6, %c0_7] : memref<32x128xf32, #tpu.memory_space<vmem>>, vector<32x128xf32>
    tpu.vector_store %arg7[%c0_6, %c0_7], %7 {strides = array<i32>} : memref<32x128xf32, #tpu.memory_space<vmem>>, vector<32x128xf32>,
    %c0_i32_8 = arith.constant 0 : i32
    %9 = arith.cmpi eq, %arg2, %c0_i32_8 : i32
    %10 = arith.extui %9 : i1 to i32
    %c0_i32_9 = arith.constant 0 : i32
    %11 = arith.cmpi ne, %10, %c0_i32_9 : i32
    scf.if %11 {
      %c0_10 = arith.constant 0 : index
      %c0_11 = arith.constant 0 : index
      %12 = vector.load %arg7[%c0_10, %c0_11] : memref<32x128xf32, #tpu.memory_space<vmem>>, vector<32x128xf32>
      %c0_12 = arith.constant 0 : index
      %c0_13 = arith.constant 0 : index
      %13 = vector.load %arg5[%c0_12, %c0_13] : memref<1x128xf32, #tpu.memory_space<vmem>>, vector<1x128xf32>
      %14 = vector.broadcast %13 : vector<1x128xf32> to vector<32x128xf32>
      %15 = arith.addf %12, %14 : vector<32x128xf32>
      %16 = arith.truncf %15 : vector<32x128xf32> to vector<32x128xbf16>
      %c0_14 = arith.constant 0 : index
      %c0_15 = arith.constant 0 : index
      %17 = vector.load %arg6[%c0_14, %c0_15] : memref<32x128xbf16, #tpu.memory_space<vmem>>, vector<32x128xbf16>
      tpu.vector_store %arg6[%c0_14, %c0_15], %16 {strides = array<i32>} : memref<32x128xbf16, #tpu.memory_space<vmem>>, vector<32x128xbf16>,
    } else {
    }
    return
  }
  func.func @transform_0(%arg0: i32, %arg1: i32, %arg2: i32) -> (i32, i32) {
    %c0_i32 = arith.constant 0 : i32
    return %arg0, %arg2 : i32, i32
  }
  func.func @transform_1(%arg0: i32, %arg1: i32, %arg2: i32) -> (i32, i32) {
    %c0_i32 = arith.constant 0 : i32
    return %arg2, %arg1 : i32, i32
  }
  func.func @transform_2(%arg0: i32, %arg1: i32, %arg2: i32) -> (i32, i32) {
    %c0_i32 = arith.constant 0 : i32
    %c0_i32_0 = arith.constant 0 : i32
    return %c0_i32, %arg1 : i32, i32
  }
  func.func @transform_3(%arg0: i32, %arg1: i32, %arg2: i32) -> (i32, i32) {
    %c0_i32 = arith.constant 0 : i32
    return %arg0, %arg1 : i32, i32
  }
}

module attributes {stable_mosaic.version = 11 : i64} {
  func.func @_ffn_kernel(%arg0: i32, %arg1: i32, %arg2: memref<32x128xbf16, #tpu.memory_space<vmem>>, %arg3: memref<128x256xbf16, #tpu.memory_space<vmem>>, %arg4: memref<1x256xf32, #tpu.memory_space<vmem>>, %arg5: memref<256x128xbf16, #tpu.memory_space<vmem>>, %arg6: memref<1x128xf32, #tpu.memory_space<vmem>>, %arg7: memref<32x128xbf16, #tpu.memory_space<vmem>>, %arg8: memref<1x128xf32, #tpu.memory_space<vmem>>, %arg9: memref<1x128xf32, #tpu.memory_space<vmem>>, %arg10: memref<32x128xbf16, #tpu.memory_space<vmem>>, %arg11: memref<32x128xf32, #tpu.memory_space<vmem>>) attributes {dimension_semantics = [#tpu.dimension_semantics<parallel>, #tpu.dimension_semantics<arbitrary>], iteration_bounds = array<i64: 1, 1>, scalar_prefetch = 0 : i64, scratch_operands = 1 : i64, tpu.core_type = #tpu.core_type<tc>, window_params = [{transform_indices = @transform_0, window_bounds = array<i64: 32, 128>}, {transform_indices = @transform_1, window_bounds = array<i64: 128, 256>}, {transform_indices = @transform_2, window_bounds = array<i64: 1, 256>}, {transform_indices = @transform_3, window_bounds = array<i64: 256, 128>}, {pipeline_mode = #tpu.pipeline_mode<synchronous>, transform_indices = @transform_4, window_bounds = array<i64: 1, 128>}, {transform_indices = @transform_5, window_bounds = array<i64: 32, 128>}, {pipeline_mode = #tpu.pipeline_mode<synchronous>, transform_indices = @transform_6, window_bounds = array<i64: 1, 128>}, {pipeline_mode = #tpu.pipeline_mode<synchronous>, transform_indices = @transform_7, window_bounds = array<i64: 1, 128>}, {transform_indices = @transform_8, window_bounds = array<i64: 32, 128>}]} {
    %c0_i32 = arith.constant 0 : i32
    %0 = arith.cmpi eq, %arg1, %c0_i32 : i32
    %1 = arith.extui %0 : i1 to i32
    %c0_i32_0 = arith.constant 0 : i32
    %2 = arith.cmpi ne, %1, %c0_i32_0 : i32
    scf.if %2 {
      %cst_16 = arith.constant 0.000000e+00 : f32
      %20 = vector.broadcast %cst_16 : f32 to vector<32x128xf32>
      %c0_17 = arith.constant 0 : index
      %c0_18 = arith.constant 0 : index
      %21 = vector.load %arg11[%c0_17, %c0_18] : memref<32x128xf32, #tpu.memory_space<vmem>>, vector<32x128xf32>
      tpu.vector_store %arg11[%c0_17, %c0_18], %20 {strides = array<i32>} : memref<32x128xf32, #tpu.memory_space<vmem>>, vector<32x128xf32>,
    } else {
    }
    %c0 = arith.constant 0 : index
    %c0_1 = arith.constant 0 : index
    %3 = vector.load %arg2[%c0, %c0_1] : memref<32x128xbf16, #tpu.memory_space<vmem>>, vector<32x128xbf16>
    %c0_2 = arith.constant 0 : index
    %c0_3 = arith.constant 0 : index
    %4 = vector.load %arg3[%c0_2, %c0_3] : memref<128x256xbf16, #tpu.memory_space<vmem>>, vector<128x256xbf16>
    %cst = arith.constant dense<0.000000e+00> : vector<32x256xf32>
    %5 = tpu.matmul %3, %4, %cst {dimension_numbers = #tpu.dot_dimension_numbers<[1], [0], [0], [1], [0, 0, 1, 1], [], []>} : vector<32x128xbf16>, vector<128x256xbf16>, vector<32x256xf32> -> vector<32x256xf32>
    %c0_4 = arith.constant 0 : index
    %c0_5 = arith.constant 0 : index
    %6 = vector.load %arg4[%c0_4, %c0_5] : memref<1x256xf32, #tpu.memory_space<vmem>>, vector<1x256xf32>
    %7 = vector.broadcast %6 : vector<1x256xf32> to vector<32x256xf32>
    %8 = arith.addf %5, %7 : vector<32x256xf32>
    %cst_6 = arith.constant 0.000000e+00 : f32
    %9 = vector.broadcast %cst_6 : f32 to vector<32x256xf32>
    %10 = arith.maximumf %8, %9 : vector<32x256xf32>
    %11 = arith.truncf %10 : vector<32x256xf32> to vector<32x256xbf16>
    %c0_7 = arith.constant 0 : index
    %c0_8 = arith.constant 0 : index
    %12 = vector.load %arg11[%c0_7, %c0_8] : memref<32x128xf32, #tpu.memory_space<vmem>>, vector<32x128xf32>
    %c0_9 = arith.constant 0 : index
    %c0_10 = arith.constant 0 : index
    %13 = vector.load %arg5[%c0_9, %c0_10] : memref<256x128xbf16, #tpu.memory_space<vmem>>, vector<256x128xbf16>
    %cst_11 = arith.constant dense<0.000000e+00> : vector<32x128xf32>
    %14 = tpu.matmul %11, %13, %cst_11 {dimension_numbers = #tpu.dot_dimension_numbers<[1], [0], [0], [1], [0, 0, 1, 1], [], []>} : vector<32x256xbf16>, vector<256x128xbf16>, vector<32x128xf32> -> vector<32x128xf32>
    %15 = arith.addf %12, %14 : vector<32x128xf32>
    %c0_12 = arith.constant 0 : index
    %c0_13 = arith.constant 0 : index
    %16 = vector.load %arg11[%c0_12, %c0_13] : memref<32x128xf32, #tpu.memory_space<vmem>>, vector<32x128xf32>
    tpu.vector_store %arg11[%c0_12, %c0_13], %15 {strides = array<i32>} : memref<32x128xf32, #tpu.memory_space<vmem>>, vector<32x128xf32>,
    %c0_i32_14 = arith.constant 0 : i32
    %17 = arith.cmpi eq, %arg1, %c0_i32_14 : i32
    %18 = arith.extui %17 : i1 to i32
    %c0_i32_15 = arith.constant 0 : i32
    %19 = arith.cmpi ne, %18, %c0_i32_15 : i32
    scf.if %19 {
      %c0_16 = arith.constant 0 : index
      %c0_17 = arith.constant 0 : index
      %20 = vector.load %arg11[%c0_16, %c0_17] : memref<32x128xf32, #tpu.memory_space<vmem>>, vector<32x128xf32>
      %c0_18 = arith.constant 0 : index
      %c0_19 = arith.constant 0 : index
      %21 = vector.load %arg6[%c0_18, %c0_19] : memref<1x128xf32, #tpu.memory_space<vmem>>, vector<1x128xf32>
      %22 = vector.broadcast %21 : vector<1x128xf32> to vector<32x128xf32>
      %23 = arith.addf %20, %22 : vector<32x128xf32>
      %c0_20 = arith.constant 0 : index
      %c0_21 = arith.constant 0 : index
      %24 = vector.load %arg7[%c0_20, %c0_21] : memref<32x128xbf16, #tpu.memory_space<vmem>>, vector<32x128xbf16>
      %25 = arith.extf %24 : vector<32x128xbf16> to vector<32x128xf32>
      %26 = arith.addf %23, %25 : vector<32x128xf32>
      %cst_22 = arith.constant dense<0.000000e+00> : vector<32xf32>
      %27 = vector.multi_reduction <add>, %26, %cst_22 [1] : vector<32x128xf32> to vector<32xf32>
      %28 = vector.shape_cast %27 : vector<32xf32> to vector<32x1xf32>
      %cst_23 = arith.constant 1.280000e+02 : f32
      %29 = vector.broadcast %cst_23 : f32 to vector<32x1xf32>
      %30 = arith.divf %28, %29 : vector<32x1xf32>
      %31 = vector.broadcast %30 : vector<32x1xf32> to vector<32x128xf32>
      %32 = arith.subf %26, %31 : vector<32x128xf32>
      %33 = arith.mulf %32, %32 : vector<32x128xf32>
      %cst_24 = arith.constant dense<0.000000e+00> : vector<32xf32>
      %34 = vector.multi_reduction <add>, %33, %cst_24 [1] : vector<32x128xf32> to vector<32xf32>
      %35 = vector.shape_cast %34 : vector<32xf32> to vector<32x1xf32>
      %cst_25 = arith.constant 1.280000e+02 : f32
      %36 = vector.broadcast %cst_25 : f32 to vector<32x1xf32>
      %37 = arith.divf %35, %36 : vector<32x1xf32>
      %38 = vector.broadcast %30 : vector<32x1xf32> to vector<32x128xf32>
      %39 = arith.subf %26, %38 : vector<32x128xf32>
      %cst_26 = arith.constant 9.99999996E-13 : f32
      %40 = vector.broadcast %cst_26 : f32 to vector<32x1xf32>
      %41 = arith.addf %37, %40 : vector<32x1xf32>
      %42 = math.rsqrt %41 : vector<32x1xf32>
      %43 = vector.broadcast %42 : vector<32x1xf32> to vector<32x128xf32>
      %44 = arith.mulf %39, %43 : vector<32x128xf32>
      %c0_27 = arith.constant 0 : index
      %c0_28 = arith.constant 0 : index
      %45 = vector.load %arg8[%c0_27, %c0_28] : memref<1x128xf32, #tpu.memory_space<vmem>>, vector<1x128xf32>
      %46 = vector.broadcast %45 : vector<1x128xf32> to vector<32x128xf32>
      %47 = arith.mulf %44, %46 : vector<32x128xf32>
      %c0_29 = arith.constant 0 : index
      %c0_30 = arith.constant 0 : index
      %48 = vector.load %arg9[%c0_29, %c0_30] : memref<1x128xf32, #tpu.memory_space<vmem>>, vector<1x128xf32>
      %49 = vector.broadcast %48 : vector<1x128xf32> to vector<32x128xf32>
      %50 = arith.addf %47, %49 : vector<32x128xf32>
      %51 = arith.truncf %50 : vector<32x128xf32> to vector<32x128xbf16>
      %c0_31 = arith.constant 0 : index
      %c0_32 = arith.constant 0 : index
      %52 = vector.load %arg10[%c0_31, %c0_32] : memref<32x128xbf16, #tpu.memory_space<vmem>>, vector<32x128xbf16>
      tpu.vector_store %arg10[%c0_31, %c0_32], %51 {strides = array<i32>} : memref<32x128xbf16, #tpu.memory_space<vmem>>, vector<32x128xbf16>,
    } else {
    }
    return
  }
  func.func @transform_0(%arg0: i32, %arg1: i32) -> (i32, i32) {
    %c0_i32 = arith.constant 0 : i32
    %c0_i32_0 = arith.constant 0 : i32
    return %arg0, %c0_i32 : i32, i32
  }
  func.func @transform_1(%arg0: i32, %arg1: i32) -> (i32, i32) {
    %c0_i32 = arith.constant 0 : i32
    %c0_i32_0 = arith.constant 0 : i32
    return %c0_i32, %arg1 : i32, i32
  }
  func.func @transform_2(%arg0: i32, %arg1: i32) -> (i32, i32) {
    %c0_i32 = arith.constant 0 : i32
    %c0_i32_0 = arith.constant 0 : i32
    return %c0_i32, %arg1 : i32, i32
  }
  func.func @transform_3(%arg0: i32, %arg1: i32) -> (i32, i32) {
    %c0_i32 = arith.constant 0 : i32
    %c0_i32_0 = arith.constant 0 : i32
    return %arg1, %c0_i32 : i32, i32
  }
  func.func @transform_4(%arg0: i32, %arg1: i32) -> (i32, i32) {
    %c0_i32 = arith.constant 0 : i32
    %c0_i32_0 = arith.constant 0 : i32
    %c0_i32_1 = arith.constant 0 : i32
    return %c0_i32, %c0_i32_0 : i32, i32
  }
  func.func @transform_5(%arg0: i32, %arg1: i32) -> (i32, i32) {
    %c0_i32 = arith.constant 0 : i32
    %c0_i32_0 = arith.constant 0 : i32
    return %arg0, %c0_i32 : i32, i32
  }
  func.func @transform_6(%arg0: i32, %arg1: i32) -> (i32, i32) {
    %c0_i32 = arith.constant 0 : i32
    %c0_i32_0 = arith.constant 0 : i32
    %c0_i32_1 = arith.constant 0 : i32
    return %c0_i32, %c0_i32_0 : i32, i32
  }
  func.func @transform_7(%arg0: i32, %arg1: i32) -> (i32, i32) {
    %c0_i32 = arith.constant 0 : i32
    %c0_i32_0 = arith.constant 0 : i32
    %c0_i32_1 = arith.constant 0 : i32
    return %c0_i32, %c0_i32_0 : i32, i32
  }
  func.func @transform_8(%arg0: i32, %arg1: i32) -> (i32, i32) {
    %c0_i32 = arith.constant 0 : i32
    %c0_i32_0 = arith.constant 0 : i32
    return %arg0, %c0_i32 : i32, i32
  }
}

module attributes {stable_mosaic.version = 11 : i64} {
  func.func @_matmul_kernel(%arg0: i32, %arg1: i32, %arg2: i32, %arg3: memref<32x128xbf16, #tpu.memory_space<vmem>>, %arg4: memref<128x256xbf16, #tpu.memory_space<vmem>>, %arg5: memref<1x256xf32, #tpu.memory_space<vmem>>, %arg6: memref<32x256xbf16, #tpu.memory_space<vmem>>, %arg7: memref<32x256xf32, #tpu.memory_space<vmem>>) attributes {dimension_semantics = [#tpu.dimension_semantics<parallel>, #tpu.dimension_semantics<parallel>, #tpu.dimension_semantics<arbitrary>], iteration_bounds = array<i64: 1, 1, 1>, scalar_prefetch = 0 : i64, scratch_operands = 1 : i64, tpu.core_type = #tpu.core_type<tc>, window_params = [{transform_indices = @transform_0, window_bounds = array<i64: 32, 128>}, {transform_indices = @transform_1, window_bounds = array<i64: 128, 256>}, {transform_indices = @transform_2, window_bounds = array<i64: 1, 256>}, {transform_indices = @transform_3, window_bounds = array<i64: 32, 256>}]} {
    %c0_i32 = arith.constant 0 : i32
    %0 = arith.cmpi eq, %arg2, %c0_i32 : i32
    %1 = arith.extui %0 : i1 to i32
    %c0_i32_0 = arith.constant 0 : i32
    %2 = arith.cmpi ne, %1, %c0_i32_0 : i32
    scf.if %2 {
      %cst_10 = arith.constant 0.000000e+00 : f32
      %12 = vector.broadcast %cst_10 : f32 to vector<32x256xf32>
      %c0_11 = arith.constant 0 : index
      %c0_12 = arith.constant 0 : index
      %13 = vector.load %arg7[%c0_11, %c0_12] : memref<32x256xf32, #tpu.memory_space<vmem>>, vector<32x256xf32>
      tpu.vector_store %arg7[%c0_11, %c0_12], %12 {strides = array<i32>} : memref<32x256xf32, #tpu.memory_space<vmem>>, vector<32x256xf32>,
    } else {
    }
    %c0 = arith.constant 0 : index
    %c0_1 = arith.constant 0 : index
    %3 = vector.load %arg7[%c0, %c0_1] : memref<32x256xf32, #tpu.memory_space<vmem>>, vector<32x256xf32>
    %c0_2 = arith.constant 0 : index
    %c0_3 = arith.constant 0 : index
    %4 = vector.load %arg3[%c0_2, %c0_3] : memref<32x128xbf16, #tpu.memory_space<vmem>>, vector<32x128xbf16>
    %c0_4 = arith.constant 0 : index
    %c0_5 = arith.constant 0 : index
    %5 = vector.load %arg4[%c0_4, %c0_5] : memref<128x256xbf16, #tpu.memory_space<vmem>>, vector<128x256xbf16>
    %cst = arith.constant dense<0.000000e+00> : vector<32x256xf32>
    %6 = tpu.matmul %4, %5, %cst {dimension_numbers = #tpu.dot_dimension_numbers<[1], [0], [0], [1], [0, 0, 1, 1], [], []>} : vector<32x128xbf16>, vector<128x256xbf16>, vector<32x256xf32> -> vector<32x256xf32>
    %7 = arith.addf %3, %6 : vector<32x256xf32>
    %c0_6 = arith.constant 0 : index
    %c0_7 = arith.constant 0 : index
    %8 = vector.load %arg7[%c0_6, %c0_7] : memref<32x256xf32, #tpu.memory_space<vmem>>, vector<32x256xf32>
    tpu.vector_store %arg7[%c0_6, %c0_7], %7 {strides = array<i32>} : memref<32x256xf32, #tpu.memory_space<vmem>>, vector<32x256xf32>,
    %c0_i32_8 = arith.constant 0 : i32
    %9 = arith.cmpi eq, %arg2, %c0_i32_8 : i32
    %10 = arith.extui %9 : i1 to i32
    %c0_i32_9 = arith.constant 0 : i32
    %11 = arith.cmpi ne, %10, %c0_i32_9 : i32
    scf.if %11 {
      %c0_10 = arith.constant 0 : index
      %c0_11 = arith.constant 0 : index
      %12 = vector.load %arg7[%c0_10, %c0_11] : memref<32x256xf32, #tpu.memory_space<vmem>>, vector<32x256xf32>
      %c0_12 = arith.constant 0 : index
      %c0_13 = arith.constant 0 : index
      %13 = vector.load %arg5[%c0_12, %c0_13] : memref<1x256xf32, #tpu.memory_space<vmem>>, vector<1x256xf32>
      %14 = vector.broadcast %13 : vector<1x256xf32> to vector<32x256xf32>
      %15 = arith.addf %12, %14 : vector<32x256xf32>
      %16 = arith.truncf %15 : vector<32x256xf32> to vector<32x256xbf16>
      %c0_14 = arith.constant 0 : index
      %c0_15 = arith.constant 0 : index
      %17 = vector.load %arg6[%c0_14, %c0_15] : memref<32x256xbf16, #tpu.memory_space<vmem>>, vector<32x256xbf16>
      tpu.vector_store %arg6[%c0_14, %c0_15], %16 {strides = array<i32>} : memref<32x256xbf16, #tpu.memory_space<vmem>>, vector<32x256xbf16>,
    } else {
    }
    return
  }
  func.func @transform_0(%arg0: i32, %arg1: i32, %arg2: i32) -> (i32, i32) {
    %c0_i32 = arith.constant 0 : i32
    return %arg0, %arg2 : i32, i32
  }
  func.func @transform_1(%arg0: i32, %arg1: i32, %arg2: i32) -> (i32, i32) {
    %c0_i32 = arith.constant 0 : i32
    return %arg2, %arg1 : i32, i32
  }
  func.func @transform_2(%arg0: i32, %arg1: i32, %arg2: i32) -> (i32, i32) {
    %c0_i32 = arith.constant 0 : i32
    %c0_i32_0 = arith.constant 0 : i32
    return %c0_i32, %arg1 : i32, i32
  }
  func.func @transform_3(%arg0: i32, %arg1: i32, %arg2: i32) -> (i32, i32) {
    %c0_i32 = arith.constant 0 : i32
    return %arg0, %arg1 : i32, i32
  }
}

module attributes {stable_mosaic.version = 11 : i64} {
  func.func @_attn_kernel(%arg0: i32, %arg1: i32, %arg2: i32, %arg3: memref<1x16x1xf32, #tpu.memory_space<vmem>>, %arg4: memref<1x1x16xf32, #tpu.memory_space<vmem>>, %arg5: memref<1x16x128xbf16, #tpu.memory_space<vmem>>, %arg6: memref<1x16x128xbf16, #tpu.memory_space<vmem>>, %arg7: memref<1x16x128xbf16, #tpu.memory_space<vmem>>, %arg8: memref<1x16x128xbf16, #tpu.memory_space<vmem>>, %arg9: memref<4x16x1xf32, #tpu.memory_space<vmem>>, %arg10: memref<4x16x1xf32, #tpu.memory_space<vmem>>, %arg11: memref<4x16x32xf32, #tpu.memory_space<vmem>>) attributes {dimension_semantics = [#tpu.dimension_semantics<parallel>, #tpu.dimension_semantics<parallel>, #tpu.dimension_semantics<arbitrary>], iteration_bounds = array<i64: 2, 1, 1>, scalar_prefetch = 0 : i64, scratch_operands = 3 : i64, tpu.core_type = #tpu.core_type<tc>, window_params = [{transform_indices = @transform_0, window_bounds = array<i64: 1, 16, 1>}, {transform_indices = @transform_1, window_bounds = array<i64: 1, 1, 16>}, {transform_indices = @transform_2, window_bounds = array<i64: 1, 16, 128>}, {transform_indices = @transform_3, window_bounds = array<i64: 1, 16, 128>}, {transform_indices = @transform_4, window_bounds = array<i64: 1, 16, 128>}, {transform_indices = @transform_5, window_bounds = array<i64: 1, 16, 128>}]} {
    %c0_i32 = arith.constant 0 : i32
    %0 = arith.cmpi eq, %arg2, %c0_i32 : i32
    %1 = arith.extui %0 : i1 to i32
    %c0_i32_0 = arith.constant 0 : i32
    %2 = arith.cmpi ne, %1, %c0_i32_0 : i32
    scf.if %2 {
      %cst_101 = arith.constant -1.000000e+30 : f32
      %167 = vector.broadcast %cst_101 : f32 to vector<4x16x1xf32>
      %c0_102 = arith.constant 0 : index
      %c0_103 = arith.constant 0 : index
      %c0_104 = arith.constant 0 : index
      %168 = vector.load %arg9[%c0_102, %c0_103, %c0_104] : memref<4x16x1xf32, #tpu.memory_space<vmem>>, vector<4x16x1xf32>
      tpu.vector_store %arg9[%c0_102, %c0_103, %c0_104], %167 {strides = array<i32>} : memref<4x16x1xf32, #tpu.memory_space<vmem>>, vector<4x16x1xf32>,
      %cst_105 = arith.constant 0.000000e+00 : f32
      %169 = vector.broadcast %cst_105 : f32 to vector<4x16x1xf32>
      %c0_106 = arith.constant 0 : index
      %c0_107 = arith.constant 0 : index
      %c0_108 = arith.constant 0 : index
      %170 = vector.load %arg10[%c0_106, %c0_107, %c0_108] : memref<4x16x1xf32, #tpu.memory_space<vmem>>, vector<4x16x1xf32>
      tpu.vector_store %arg10[%c0_106, %c0_107, %c0_108], %169 {strides = array<i32>} : memref<4x16x1xf32, #tpu.memory_space<vmem>>, vector<4x16x1xf32>,
      %cst_109 = arith.constant 0.000000e+00 : f32
      %171 = vector.broadcast %cst_109 : f32 to vector<4x16x32xf32>
      %c0_110 = arith.constant 0 : index
      %c0_111 = arith.constant 0 : index
      %c0_112 = arith.constant 0 : index
      %172 = vector.load %arg11[%c0_110, %c0_111, %c0_112] : memref<4x16x32xf32, #tpu.memory_space<vmem>>, vector<4x16x32xf32>
      tpu.vector_store %arg11[%c0_110, %c0_111, %c0_112], %171 {strides = array<i32>} : memref<4x16x32xf32, #tpu.memory_space<vmem>>, vector<4x16x32xf32>,
    } else {
    }
    %c0 = arith.constant 0 : index
    %c0_1 = arith.constant 0 : index
    %c0_2 = arith.constant 0 : index
    %3 = vector.load %arg3[%c0, %c0_1, %c0_2] : memref<1x16x1xf32, #tpu.memory_space<vmem>>, vector<1x16x1xf32>
    %4 = vector.shape_cast %3 : vector<1x16x1xf32> to vector<16x1xf32>
    %c0_3 = arith.constant 0 : index
    %c0_4 = arith.constant 0 : index
    %c0_5 = arith.constant 0 : index
    %5 = vector.load %arg4[%c0_3, %c0_4, %c0_5] : memref<1x1x16xf32, #tpu.memory_space<vmem>>, vector<1x1x16xf32>
    %6 = vector.shape_cast %5 : vector<1x1x16xf32> to vector<1x16xf32>
    %7 = vector.broadcast %4 : vector<16x1xf32> to vector<16x16xf32>
    %8 = vector.broadcast %6 : vector<1x16xf32> to vector<16x16xf32>
    %9 = arith.addf %7, %8 : vector<16x16xf32>
    %c0_6 = arith.constant 0 : index
    %c0_7 = arith.constant 0 : index
    %c0_8 = arith.constant 0 : index
    %10 = vector.load %arg5[%c0_6, %c0_7, %c0_8] : memref<1x16x128xbf16, #tpu.memory_space<vmem>>, vector<1x16x128xbf16>
    %11 = vector.shape_cast %10 : vector<1x16x128xbf16> to vector<16x128xbf16>
    %c0_9 = arith.constant 0 : index
    %c0_10 = arith.constant 0 : index
    %c0_11 = arith.constant 0 : index
    %12 = vector.load %arg6[%c0_9, %c0_10, %c0_11] : memref<1x16x128xbf16, #tpu.memory_space<vmem>>, vector<1x16x128xbf16>
    %13 = vector.shape_cast %12 : vector<1x16x128xbf16> to vector<16x128xbf16>
    %c0_12 = arith.constant 0 : index
    %c0_13 = arith.constant 0 : index
    %c0_14 = arith.constant 0 : index
    %14 = vector.load %arg7[%c0_12, %c0_13, %c0_14] : memref<1x16x128xbf16, #tpu.memory_space<vmem>>, vector<1x16x128xbf16>
    %15 = vector.shape_cast %14 : vector<1x16x128xbf16> to vector<16x128xbf16>
    %16 = vector.extract_strided_slice %11 {offsets = [0, 0], sizes = [16, 32], strides = [1, 1]} : vector<16x128xbf16> to vector<16x32xbf16>
    %17 = vector.extract_strided_slice %13 {offsets = [0, 0], sizes = [16, 32], strides = [1, 1]} : vector<16x128xbf16> to vector<16x32xbf16>
    %18 = vector.extract_strided_slice %15 {offsets = [0, 0], sizes = [16, 32], strides = [1, 1]} : vector<16x128xbf16> to vector<16x32xbf16>
    %cst = arith.constant dense<0.000000e+00> : vector<16x16xf32>
    %19 = tpu.matmul %16, %17, %cst {dimension_numbers = #tpu.dot_dimension_numbers<[1], [1], [0], [0], [0, 0, 1, 0], [], []>} : vector<16x32xbf16>, vector<16x32xbf16>, vector<16x16xf32> -> vector<16x16xf32>
    %20 = arith.addf %19, %9 : vector<16x16xf32>
    %c0_15 = arith.constant 0 : index
    %c0_16 = arith.constant 0 : index
    %c0_17 = arith.constant 0 : index
    %21 = vector.load %arg9[%c0_15, %c0_16, %c0_17] : memref<4x16x1xf32, #tpu.memory_space<vmem>>, vector<1x16x1xf32>
    %22 = vector.shape_cast %21 : vector<1x16x1xf32> to vector<16x1xf32>
    %cst_18 = arith.constant dense<0xFF800000> : vector<16xf32>
    %23 = vector.multi_reduction <maximumf>, %20, %cst_18 [1] : vector<16x16xf32> to vector<16xf32>
    %24 = vector.shape_cast %23 : vector<16xf32> to vector<16x1xf32>
    %25 = arith.maximumf %22, %24 : vector<16x1xf32>
    %26 = arith.subf %22, %25 : vector<16x1xf32>
    %27 = math.exp %26 : vector<16x1xf32>
    %28 = vector.broadcast %25 : vector<16x1xf32> to vector<16x16xf32>
    %29 = arith.subf %20, %28 : vector<16x16xf32>
    %30 = math.exp %29 : vector<16x16xf32>
    %c0_19 = arith.constant 0 : index
    %c0_20 = arith.constant 0 : index
    %c0_21 = arith.constant 0 : index
    %31 = vector.load %arg10[%c0_19, %c0_20, %c0_21] : memref<4x16x1xf32, #tpu.memory_space<vmem>>, vector<1x16x1xf32>
    %32 = vector.shape_cast %31 : vector<1x16x1xf32> to vector<16x1xf32>
    %33 = arith.mulf %27, %32 : vector<16x1xf32>
    %cst_22 = arith.constant dense<0.000000e+00> : vector<16xf32>
    %34 = vector.multi_reduction <add>, %30, %cst_22 [1] : vector<16x16xf32> to vector<16xf32>
    %35 = vector.shape_cast %34 : vector<16xf32> to vector<16x1xf32>
    %36 = arith.addf %33, %35 : vector<16x1xf32>
    %c0_23 = arith.constant 0 : index
    %c0_24 = arith.constant 0 : index
    %c0_25 = arith.constant 0 : index
    %37 = vector.load %arg10[%c0_23, %c0_24, %c0_25] : memref<4x16x1xf32, #tpu.memory_space<vmem>>, vector<1x16x1xf32>
    %38 = vector.shape_cast %37 : vector<1x16x1xf32> to vector<16x1xf32>
    %39 = vector.shape_cast %36 : vector<16x1xf32> to vector<1x16x1xf32>
    tpu.vector_store %arg10[%c0_23, %c0_24, %c0_25], %39 {strides = array<i32>} : memref<4x16x1xf32, #tpu.memory_space<vmem>>, vector<1x16x1xf32>,
    %c0_26 = arith.constant 0 : index
    %c0_27 = arith.constant 0 : index
    %c0_28 = arith.constant 0 : index
    %40 = vector.load %arg11[%c0_26, %c0_27, %c0_28] : memref<4x16x32xf32, #tpu.memory_space<vmem>>, vector<1x16x32xf32>
    %41 = vector.shape_cast %40 : vector<1x16x32xf32> to vector<16x32xf32>
    %42 = vector.broadcast %27 : vector<16x1xf32> to vector<16x32xf32>
    %43 = arith.mulf %42, %41 : vector<16x32xf32>
    %44 = arith.truncf %30 : vector<16x16xf32> to vector<16x16xbf16>
    %cst_29 = arith.constant dense<0.000000e+00> : vector<16x32xf32>
    %45 = tpu.matmul %44, %18, %cst_29 {dimension_numbers = #tpu.dot_dimension_numbers<[1], [0], [0], [1], [0, 0, 1, 1], [], []>} : vector<16x16xbf16>, vector<16x32xbf16>, vector<16x32xf32> -> vector<16x32xf32>
    %46 = arith.addf %43, %45 : vector<16x32xf32>
    %c0_30 = arith.constant 0 : index
    %c0_31 = arith.constant 0 : index
    %c0_32 = arith.constant 0 : index
    %47 = vector.load %arg11[%c0_30, %c0_31, %c0_32] : memref<4x16x32xf32, #tpu.memory_space<vmem>>, vector<1x16x32xf32>
    %48 = vector.shape_cast %47 : vector<1x16x32xf32> to vector<16x32xf32>
    %49 = vector.shape_cast %46 : vector<16x32xf32> to vector<1x16x32xf32>
    tpu.vector_store %arg11[%c0_30, %c0_31, %c0_32], %49 {strides = array<i32>} : memref<4x16x32xf32, #tpu.memory_space<vmem>>, vector<1x16x32xf32>,
    %c0_33 = arith.constant 0 : index
    %c0_34 = arith.constant 0 : index
    %c0_35 = arith.constant 0 : index
    %50 = vector.load %arg9[%c0_33, %c0_34, %c0_35] : memref<4x16x1xf32, #tpu.memory_space<vmem>>, vector<1x16x1xf32>
    %51 = vector.shape_cast %50 : vector<1x16x1xf32> to vector<16x1xf32>
    %52 = vector.shape_cast %25 : vector<16x1xf32> to vector<1x16x1xf32>
    tpu.vector_store %arg9[%c0_33, %c0_34, %c0_35], %52 {strides = array<i32>} : memref<4x16x1xf32, #tpu.memory_space<vmem>>, vector<1x16x1xf32>,
    %53 = vector.extract_strided_slice %11 {offsets = [0, 32], sizes = [16, 32], strides = [1, 1]} : vector<16x128xbf16> to vector<16x32xbf16>
    %54 = vector.extract_strided_slice %13 {offsets = [0, 32], sizes = [16, 32], strides = [1, 1]} : vector<16x128xbf16> to vector<16x32xbf16>
    %55 = vector.extract_strided_slice %15 {offsets = [0, 32], sizes = [16, 32], strides = [1, 1]} : vector<16x128xbf16> to vector<16x32xbf16>
    %cst_36 = arith.constant dense<0.000000e+00> : vector<16x16xf32>
    %56 = tpu.matmul %53, %54, %cst_36 {dimension_numbers = #tpu.dot_dimension_numbers<[1], [1], [0], [0], [0, 0, 1, 0], [], []>} : vector<16x32xbf16>, vector<16x32xbf16>, vector<16x16xf32> -> vector<16x16xf32>
    %57 = arith.addf %56, %9 : vector<16x16xf32>
    %c1 = arith.constant 1 : index
    %c0_37 = arith.constant 0 : index
    %c0_38 = arith.constant 0 : index
    %58 = vector.load %arg9[%c1, %c0_37, %c0_38] : memref<4x16x1xf32, #tpu.memory_space<vmem>>, vector<1x16x1xf32>
    %59 = vector.shape_cast %58 : vector<1x16x1xf32> to vector<16x1xf32>
    %cst_39 = arith.constant dense<0xFF800000> : vector<16xf32>
    %60 = vector.multi_reduction <maximumf>, %57, %cst_39 [1] : vector<16x16xf32> to vector<16xf32>
    %61 = vector.shape_cast %60 : vector<16xf32> to vector<16x1xf32>
    %62 = arith.maximumf %59, %61 : vector<16x1xf32>
    %63 = arith.subf %59, %62 : vector<16x1xf32>
    %64 = math.exp %63 : vector<16x1xf32>
    %65 = vector.broadcast %62 : vector<16x1xf32> to vector<16x16xf32>
    %66 = arith.subf %57, %65 : vector<16x16xf32>
    %67 = math.exp %66 : vector<16x16xf32>
    %c1_40 = arith.constant 1 : index
    %c0_41 = arith.constant 0 : index
    %c0_42 = arith.constant 0 : index
    %68 = vector.load %arg10[%c1_40, %c0_41, %c0_42] : memref<4x16x1xf32, #tpu.memory_space<vmem>>, vector<1x16x1xf32>
    %69 = vector.shape_cast %68 : vector<1x16x1xf32> to vector<16x1xf32>
    %70 = arith.mulf %64, %69 : vector<16x1xf32>
    %cst_43 = arith.constant dense<0.000000e+00> : vector<16xf32>
    %71 = vector.multi_reduction <add>, %67, %cst_43 [1] : vector<16x16xf32> to vector<16xf32>
    %72 = vector.shape_cast %71 : vector<16xf32> to vector<16x1xf32>
    %73 = arith.addf %70, %72 : vector<16x1xf32>
    %c1_44 = arith.constant 1 : index
    %c0_45 = arith.constant 0 : index
    %c0_46 = arith.constant 0 : index
    %74 = vector.load %arg10[%c1_44, %c0_45, %c0_46] : memref<4x16x1xf32, #tpu.memory_space<vmem>>, vector<1x16x1xf32>
    %75 = vector.shape_cast %74 : vector<1x16x1xf32> to vector<16x1xf32>
    %76 = vector.shape_cast %73 : vector<16x1xf32> to vector<1x16x1xf32>
    tpu.vector_store %arg10[%c1_44, %c0_45, %c0_46], %76 {strides = array<i32>} : memref<4x16x1xf32, #tpu.memory_space<vmem>>, vector<1x16x1xf32>,
    %c1_47 = arith.constant 1 : index
    %c0_48 = arith.constant 0 : index
    %c0_49 = arith.constant 0 : index
    %77 = vector.load %arg11[%c1_47, %c0_48, %c0_49] : memref<4x16x32xf32, #tpu.memory_space<vmem>>, vector<1x16x32xf32>
    %78 = vector.shape_cast %77 : vector<1x16x32xf32> to vector<16x32xf32>
    %79 = vector.broadcast %64 : vector<16x1xf32> to vector<16x32xf32>
    %80 = arith.mulf %79, %78 : vector<16x32xf32>
    %81 = arith.truncf %67 : vector<16x16xf32> to vector<16x16xbf16>
    %cst_50 = arith.constant dense<0.000000e+00> : vector<16x32xf32>
    %82 = tpu.matmul %81, %55, %cst_50 {dimension_numbers = #tpu.dot_dimension_numbers<[1], [0], [0], [1], [0, 0, 1, 1], [], []>} : vector<16x16xbf16>, vector<16x32xbf16>, vector<16x32xf32> -> vector<16x32xf32>
    %83 = arith.addf %80, %82 : vector<16x32xf32>
    %c1_51 = arith.constant 1 : index
    %c0_52 = arith.constant 0 : index
    %c0_53 = arith.constant 0 : index
    %84 = vector.load %arg11[%c1_51, %c0_52, %c0_53] : memref<4x16x32xf32, #tpu.memory_space<vmem>>, vector<1x16x32xf32>
    %85 = vector.shape_cast %84 : vector<1x16x32xf32> to vector<16x32xf32>
    %86 = vector.shape_cast %83 : vector<16x32xf32> to vector<1x16x32xf32>
    tpu.vector_store %arg11[%c1_51, %c0_52, %c0_53], %86 {strides = array<i32>} : memref<4x16x32xf32, #tpu.memory_space<vmem>>, vector<1x16x32xf32>,
    %c1_54 = arith.constant 1 : index
    %c0_55 = arith.constant 0 : index
    %c0_56 = arith.constant 0 : index
    %87 = vector.load %arg9[%c1_54, %c0_55, %c0_56] : memref<4x16x1xf32, #tpu.memory_space<vmem>>, vector<1x16x1xf32>
    %88 = vector.shape_cast %87 : vector<1x16x1xf32> to vector<16x1xf32>
    %89 = vector.shape_cast %62 : vector<16x1xf32> to vector<1x16x1xf32>
    tpu.vector_store %arg9[%c1_54, %c0_55, %c0_56], %89 {strides = array<i32>} : memref<4x16x1xf32, #tpu.memory_space<vmem>>, vector<1x16x1xf32>,
    %90 = vector.extract_strided_slice %11 {offsets = [0, 64], sizes = [16, 32], strides = [1, 1]} : vector<16x128xbf16> to vector<16x32xbf16>
    %91 = vector.extract_strided_slice %13 {offsets = [0, 64], sizes = [16, 32], strides = [1, 1]} : vector<16x128xbf16> to vector<16x32xbf16>
    %92 = vector.extract_strided_slice %15 {offsets = [0, 64], sizes = [16, 32], strides = [1, 1]} : vector<16x128xbf16> to vector<16x32xbf16>
    %cst_57 = arith.constant dense<0.000000e+00> : vector<16x16xf32>
    %93 = tpu.matmul %90, %91, %cst_57 {dimension_numbers = #tpu.dot_dimension_numbers<[1], [1], [0], [0], [0, 0, 1, 0], [], []>} : vector<16x32xbf16>, vector<16x32xbf16>, vector<16x16xf32> -> vector<16x16xf32>
    %94 = arith.addf %93, %9 : vector<16x16xf32>
    %c2 = arith.constant 2 : index
    %c0_58 = arith.constant 0 : index
    %c0_59 = arith.constant 0 : index
    %95 = vector.load %arg9[%c2, %c0_58, %c0_59] : memref<4x16x1xf32, #tpu.memory_space<vmem>>, vector<1x16x1xf32>
    %96 = vector.shape_cast %95 : vector<1x16x1xf32> to vector<16x1xf32>
    %cst_60 = arith.constant dense<0xFF800000> : vector<16xf32>
    %97 = vector.multi_reduction <maximumf>, %94, %cst_60 [1] : vector<16x16xf32> to vector<16xf32>
    %98 = vector.shape_cast %97 : vector<16xf32> to vector<16x1xf32>
    %99 = arith.maximumf %96, %98 : vector<16x1xf32>
    %100 = arith.subf %96, %99 : vector<16x1xf32>
    %101 = math.exp %100 : vector<16x1xf32>
    %102 = vector.broadcast %99 : vector<16x1xf32> to vector<16x16xf32>
    %103 = arith.subf %94, %102 : vector<16x16xf32>
    %104 = math.exp %103 : vector<16x16xf32>
    %c2_61 = arith.constant 2 : index
    %c0_62 = arith.constant 0 : index
    %c0_63 = arith.constant 0 : index
    %105 = vector.load %arg10[%c2_61, %c0_62, %c0_63] : memref<4x16x1xf32, #tpu.memory_space<vmem>>, vector<1x16x1xf32>
    %106 = vector.shape_cast %105 : vector<1x16x1xf32> to vector<16x1xf32>
    %107 = arith.mulf %101, %106 : vector<16x1xf32>
    %cst_64 = arith.constant dense<0.000000e+00> : vector<16xf32>
    %108 = vector.multi_reduction <add>, %104, %cst_64 [1] : vector<16x16xf32> to vector<16xf32>
    %109 = vector.shape_cast %108 : vector<16xf32> to vector<16x1xf32>
    %110 = arith.addf %107, %109 : vector<16x1xf32>
    %c2_65 = arith.constant 2 : index
    %c0_66 = arith.constant 0 : index
    %c0_67 = arith.constant 0 : index
    %111 = vector.load %arg10[%c2_65, %c0_66, %c0_67] : memref<4x16x1xf32, #tpu.memory_space<vmem>>, vector<1x16x1xf32>
    %112 = vector.shape_cast %111 : vector<1x16x1xf32> to vector<16x1xf32>
    %113 = vector.shape_cast %110 : vector<16x1xf32> to vector<1x16x1xf32>
    tpu.vector_store %arg10[%c2_65, %c0_66, %c0_67], %113 {strides = array<i32>} : memref<4x16x1xf32, #tpu.memory_space<vmem>>, vector<1x16x1xf32>,
    %c2_68 = arith.constant 2 : index
    %c0_69 = arith.constant 0 : index
    %c0_70 = arith.constant 0 : index
    %114 = vector.load %arg11[%c2_68, %c0_69, %c0_70] : memref<4x16x32xf32, #tpu.memory_space<vmem>>, vector<1x16x32xf32>
    %115 = vector.shape_cast %114 : vector<1x16x32xf32> to vector<16x32xf32>
    %116 = vector.broadcast %101 : vector<16x1xf32> to vector<16x32xf32>
    %117 = arith.mulf %116, %115 : vector<16x32xf32>
    %118 = arith.truncf %104 : vector<16x16xf32> to vector<16x16xbf16>
    %cst_71 = arith.constant dense<0.000000e+00> : vector<16x32xf32>
    %119 = tpu.matmul %118, %92, %cst_71 {dimension_numbers = #tpu.dot_dimension_numbers<[1], [0], [0], [1], [0, 0, 1, 1], [], []>} : vector<16x16xbf16>, vector<16x32xbf16>, vector<16x32xf32> -> vector<16x32xf32>
    %120 = arith.addf %117, %119 : vector<16x32xf32>
    %c2_72 = arith.constant 2 : index
    %c0_73 = arith.constant 0 : index
    %c0_74 = arith.constant 0 : index
    %121 = vector.load %arg11[%c2_72, %c0_73, %c0_74] : memref<4x16x32xf32, #tpu.memory_space<vmem>>, vector<1x16x32xf32>
    %122 = vector.shape_cast %121 : vector<1x16x32xf32> to vector<16x32xf32>
    %123 = vector.shape_cast %120 : vector<16x32xf32> to vector<1x16x32xf32>
    tpu.vector_store %arg11[%c2_72, %c0_73, %c0_74], %123 {strides = array<i32>} : memref<4x16x32xf32, #tpu.memory_space<vmem>>, vector<1x16x32xf32>,
    %c2_75 = arith.constant 2 : index
    %c0_76 = arith.constant 0 : index
    %c0_77 = arith.constant 0 : index
    %124 = vector.load %arg9[%c2_75, %c0_76, %c0_77] : memref<4x16x1xf32, #tpu.memory_space<vmem>>, vector<1x16x1xf32>
    %125 = vector.shape_cast %124 : vector<1x16x1xf32> to vector<16x1xf32>
    %126 = vector.shape_cast %99 : vector<16x1xf32> to vector<1x16x1xf32>
    tpu.vector_store %arg9[%c2_75, %c0_76, %c0_77], %126 {strides = array<i32>} : memref<4x16x1xf32, #tpu.memory_space<vmem>>, vector<1x16x1xf32>,
    %127 = vector.extract_strided_slice %11 {offsets = [0, 96], sizes = [16, 32], strides = [1, 1]} : vector<16x128xbf16> to vector<16x32xbf16>
    %128 = vector.extract_strided_slice %13 {offsets = [0, 96], sizes = [16, 32], strides = [1, 1]} : vector<16x128xbf16> to vector<16x32xbf16>
    %129 = vector.extract_strided_slice %15 {offsets = [0, 96], sizes = [16, 32], strides = [1, 1]} : vector<16x128xbf16> to vector<16x32xbf16>
    %cst_78 = arith.constant dense<0.000000e+00> : vector<16x16xf32>
    %130 = tpu.matmul %127, %128, %cst_78 {dimension_numbers = #tpu.dot_dimension_numbers<[1], [1], [0], [0], [0, 0, 1, 0], [], []>} : vector<16x32xbf16>, vector<16x32xbf16>, vector<16x16xf32> -> vector<16x16xf32>
    %131 = arith.addf %130, %9 : vector<16x16xf32>
    %c3 = arith.constant 3 : index
    %c0_79 = arith.constant 0 : index
    %c0_80 = arith.constant 0 : index
    %132 = vector.load %arg9[%c3, %c0_79, %c0_80] : memref<4x16x1xf32, #tpu.memory_space<vmem>>, vector<1x16x1xf32>
    %133 = vector.shape_cast %132 : vector<1x16x1xf32> to vector<16x1xf32>
    %cst_81 = arith.constant dense<0xFF800000> : vector<16xf32>
    %134 = vector.multi_reduction <maximumf>, %131, %cst_81 [1] : vector<16x16xf32> to vector<16xf32>
    %135 = vector.shape_cast %134 : vector<16xf32> to vector<16x1xf32>
    %136 = arith.maximumf %133, %135 : vector<16x1xf32>
    %137 = arith.subf %133, %136 : vector<16x1xf32>
    %138 = math.exp %137 : vector<16x1xf32>
    %139 = vector.broadcast %136 : vector<16x1xf32> to vector<16x16xf32>
    %140 = arith.subf %131, %139 : vector<16x16xf32>
    %141 = math.exp %140 : vector<16x16xf32>
    %c3_82 = arith.constant 3 : index
    %c0_83 = arith.constant 0 : index
    %c0_84 = arith.constant 0 : index
    %142 = vector.load %arg10[%c3_82, %c0_83, %c0_84] : memref<4x16x1xf32, #tpu.memory_space<vmem>>, vector<1x16x1xf32>
    %143 = vector.shape_cast %142 : vector<1x16x1xf32> to vector<16x1xf32>
    %144 = arith.mulf %138, %143 : vector<16x1xf32>
    %cst_85 = arith.constant dense<0.000000e+00> : vector<16xf32>
    %145 = vector.multi_reduction <add>, %141, %cst_85 [1] : vector<16x16xf32> to vector<16xf32>
    %146 = vector.shape_cast %145 : vector<16xf32> to vector<16x1xf32>
    %147 = arith.addf %144, %146 : vector<16x1xf32>
    %c3_86 = arith.constant 3 : index
    %c0_87 = arith.constant 0 : index
    %c0_88 = arith.constant 0 : index
    %148 = vector.load %arg10[%c3_86, %c0_87, %c0_88] : memref<4x16x1xf32, #tpu.memory_space<vmem>>, vector<1x16x1xf32>
    %149 = vector.shape_cast %148 : vector<1x16x1xf32> to vector<16x1xf32>
    %150 = vector.shape_cast %147 : vector<16x1xf32> to vector<1x16x1xf32>
    tpu.vector_store %arg10[%c3_86, %c0_87, %c0_88], %150 {strides = array<i32>} : memref<4x16x1xf32, #tpu.memory_space<vmem>>, vector<1x16x1xf32>,
    %c3_89 = arith.constant 3 : index
    %c0_90 = arith.constant 0 : index
    %c0_91 = arith.constant 0 : index
    %151 = vector.load %arg11[%c3_89, %c0_90, %c0_91] : memref<4x16x32xf32, #tpu.memory_space<vmem>>, vector<1x16x32xf32>
    %152 = vector.shape_cast %151 : vector<1x16x32xf32> to vector<16x32xf32>
    %153 = vector.broadcast %138 : vector<16x1xf32> to vector<16x32xf32>
    %154 = arith.mulf %153, %152 : vector<16x32xf32>
    %155 = arith.truncf %141 : vector<16x16xf32> to vector<16x16xbf16>
    %cst_92 = arith.constant dense<0.000000e+00> : vector<16x32xf32>
    %156 = tpu.matmul %155, %129, %cst_92 {dimension_numbers = #tpu.dot_dimension_numbers<[1], [0], [0], [1], [0, 0, 1, 1], [], []>} : vector<16x16xbf16>, vector<16x32xbf16>, vector<16x32xf32> -> vector<16x32xf32>
    %157 = arith.addf %154, %156 : vector<16x32xf32>
    %c3_93 = arith.constant 3 : index
    %c0_94 = arith.constant 0 : index
    %c0_95 = arith.constant 0 : index
    %158 = vector.load %arg11[%c3_93, %c0_94, %c0_95] : memref<4x16x32xf32, #tpu.memory_space<vmem>>, vector<1x16x32xf32>
    %159 = vector.shape_cast %158 : vector<1x16x32xf32> to vector<16x32xf32>
    %160 = vector.shape_cast %157 : vector<16x32xf32> to vector<1x16x32xf32>
    tpu.vector_store %arg11[%c3_93, %c0_94, %c0_95], %160 {strides = array<i32>} : memref<4x16x32xf32, #tpu.memory_space<vmem>>, vector<1x16x32xf32>,
    %c3_96 = arith.constant 3 : index
    %c0_97 = arith.constant 0 : index
    %c0_98 = arith.constant 0 : index
    %161 = vector.load %arg9[%c3_96, %c0_97, %c0_98] : memref<4x16x1xf32, #tpu.memory_space<vmem>>, vector<1x16x1xf32>
    %162 = vector.shape_cast %161 : vector<1x16x1xf32> to vector<16x1xf32>
    %163 = vector.shape_cast %136 : vector<16x1xf32> to vector<1x16x1xf32>
    tpu.vector_store %arg9[%c3_96, %c0_97, %c0_98], %163 {strides = array<i32>} : memref<4x16x1xf32, #tpu.memory_space<vmem>>, vector<1x16x1xf32>,
    %c0_i32_99 = arith.constant 0 : i32
    %164 = arith.cmpi eq, %arg2, %c0_i32_99 : i32
    %165 = arith.extui %164 : i1 to i32
    %c0_i32_100 = arith.constant 0 : i32
    %166 = arith.cmpi ne, %165, %c0_i32_100 : i32
    scf.if %166 {
      %c0_101 = arith.constant 0 : index
      %c0_102 = arith.constant 0 : index
      %c0_103 = arith.constant 0 : index
      %167 = vector.load %arg11[%c0_101, %c0_102, %c0_103] : memref<4x16x32xf32, #tpu.memory_space<vmem>>, vector<1x16x32xf32>
      %168 = vector.shape_cast %167 : vector<1x16x32xf32> to vector<16x32xf32>
      %c0_104 = arith.constant 0 : index
      %c0_105 = arith.constant 0 : index
      %c0_106 = arith.constant 0 : index
      %169 = vector.load %arg10[%c0_104, %c0_105, %c0_106] : memref<4x16x1xf32, #tpu.memory_space<vmem>>, vector<1x16x1xf32>
      %170 = vector.shape_cast %169 : vector<1x16x1xf32> to vector<16x1xf32>
      %171 = tpu.reciprocal %170 {approx = true} : vector<16x1xf32> -> vector<16x1xf32>
      %172 = vector.broadcast %171 : vector<16x1xf32> to vector<16x32xf32>
      %173 = arith.mulf %168, %172 : vector<16x32xf32>
      %c1_107 = arith.constant 1 : index
      %c0_108 = arith.constant 0 : index
      %c0_109 = arith.constant 0 : index
      %174 = vector.load %arg11[%c1_107, %c0_108, %c0_109] : memref<4x16x32xf32, #tpu.memory_space<vmem>>, vector<1x16x32xf32>
      %175 = vector.shape_cast %174 : vector<1x16x32xf32> to vector<16x32xf32>
      %c1_110 = arith.constant 1 : index
      %c0_111 = arith.constant 0 : index
      %c0_112 = arith.constant 0 : index
      %176 = vector.load %arg10[%c1_110, %c0_111, %c0_112] : memref<4x16x1xf32, #tpu.memory_space<vmem>>, vector<1x16x1xf32>
      %177 = vector.shape_cast %176 : vector<1x16x1xf32> to vector<16x1xf32>
      %178 = tpu.reciprocal %177 {approx = true} : vector<16x1xf32> -> vector<16x1xf32>
      %179 = vector.broadcast %178 : vector<16x1xf32> to vector<16x32xf32>
      %180 = arith.mulf %175, %179 : vector<16x32xf32>
      %c2_113 = arith.constant 2 : index
      %c0_114 = arith.constant 0 : index
      %c0_115 = arith.constant 0 : index
      %181 = vector.load %arg11[%c2_113, %c0_114, %c0_115] : memref<4x16x32xf32, #tpu.memory_space<vmem>>, vector<1x16x32xf32>
      %182 = vector.shape_cast %181 : vector<1x16x32xf32> to vector<16x32xf32>
      %c2_116 = arith.constant 2 : index
      %c0_117 = arith.constant 0 : index
      %c0_118 = arith.constant 0 : index
      %183 = vector.load %arg10[%c2_116, %c0_117, %c0_118] : memref<4x16x1xf32, #tpu.memory_space<vmem>>, vector<1x16x1xf32>
      %184 = vector.shape_cast %183 : vector<1x16x1xf32> to vector<16x1xf32>
      %185 = tpu.reciprocal %184 {approx = true} : vector<16x1xf32> -> vector<16x1xf32>
      %186 = vector.broadcast %185 : vector<16x1xf32> to vector<16x32xf32>
      %187 = arith.mulf %182, %186 : vector<16x32xf32>
      %c3_119 = arith.constant 3 : index
      %c0_120 = arith.constant 0 : index
      %c0_121 = arith.constant 0 : index
      %188 = vector.load %arg11[%c3_119, %c0_120, %c0_121] : memref<4x16x32xf32, #tpu.memory_space<vmem>>, vector<1x16x32xf32>
      %189 = vector.shape_cast %188 : vector<1x16x32xf32> to vector<16x32xf32>
      %c3_122 = arith.constant 3 : index
      %c0_123 = arith.constant 0 : index
      %c0_124 = arith.constant 0 : index
      %190 = vector.load %arg10[%c3_122, %c0_123, %c0_124] : memref<4x16x1xf32, #tpu.memory_space<vmem>>, vector<1x16x1xf32>
      %191 = vector.shape_cast %190 : vector<1x16x1xf32> to vector<16x1xf32>
      %192 = tpu.reciprocal %191 {approx = true} : vector<16x1xf32> -> vector<16x1xf32>
      %193 = vector.broadcast %192 : vector<16x1xf32> to vector<16x32xf32>
      %194 = arith.mulf %189, %193 : vector<16x32xf32>
      %195 = tpu.concatenate %173, %180, %187, %194 in 1 : vector<16x32xf32>, vector<16x32xf32>, vector<16x32xf32>, vector<16x32xf32> -> vector<16x128xf32>
      %196 = arith.truncf %195 : vector<16x128xf32> to vector<16x128xbf16>
      %c0_125 = arith.constant 0 : index
      %c0_126 = arith.constant 0 : index
      %c0_127 = arith.constant 0 : index
      %197 = vector.load %arg8[%c0_125, %c0_126, %c0_127] : memref<1x16x128xbf16, #tpu.memory_space<vmem>>, vector<1x16x128xbf16>
      %198 = vector.shape_cast %197 : vector<1x16x128xbf16> to vector<16x128xbf16>
      %199 = vector.shape_cast %196 : vector<16x128xbf16> to vector<1x16x128xbf16>
      tpu.vector_store %arg8[%c0_125, %c0_126, %c0_127], %199 {strides = array<i32>} : memref<1x16x128xbf16, #tpu.memory_space<vmem>>, vector<1x16x128xbf16>,
    } else {
    }
    return
  }
  func.func @transform_0(%arg0: i32, %arg1: i32, %arg2: i32) -> (i32, i32, i32) {
    %c0_i32 = arith.constant 0 : i32
    %c0_i32_0 = arith.constant 0 : i32
    return %arg0, %arg1, %c0_i32 : i32, i32, i32
  }
  func.func @transform_1(%arg0: i32, %arg1: i32, %arg2: i32) -> (i32, i32, i32) {
    %c0_i32 = arith.constant 0 : i32
    %c0_i32_0 = arith.constant 0 : i32
    return %arg0, %c0_i32, %arg2 : i32, i32, i32
  }
  func.func @transform_2(%arg0: i32, %arg1: i32, %arg2: i32) -> (i32, i32, i32) {
    %c0_i32 = arith.constant 0 : i32
    %c0_i32_0 = arith.constant 0 : i32
    return %arg0, %arg1, %c0_i32 : i32, i32, i32
  }
  func.func @transform_3(%arg0: i32, %arg1: i32, %arg2: i32) -> (i32, i32, i32) {
    %c1_i32 = arith.constant 1 : i32
    %c0_i32 = arith.constant 0 : i32
    return %arg0, %arg2, %c1_i32 : i32, i32, i32
  }
  func.func @transform_4(%arg0: i32, %arg1: i32, %arg2: i32) -> (i32, i32, i32) {
    %c2_i32 = arith.constant 2 : i32
    %c0_i32 = arith.constant 0 : i32
    return %arg0, %arg2, %c2_i32 : i32, i32, i32
  }
  func.func @transform_5(%arg0: i32, %arg1: i32, %arg2: i32) -> (i32, i32, i32) {
    %c0_i32 = arith.constant 0 : i32
    %c0_i32_0 = arith.constant 0 : i32
    return %arg0, %arg1, %c0_i32 : i32, i32, i32
  }
}

module attributes {stable_mosaic.version = 11 : i64} {
  func.func @_attn_kernel(%arg0: i32, %arg1: i32, %arg2: i32, %arg3: memref<1x16x1xf32, #tpu.memory_space<vmem>>, %arg4: memref<1x1x16xf32, #tpu.memory_space<vmem>>, %arg5: memref<1x16x128xbf16, #tpu.memory_space<vmem>>, %arg6: memref<1x16x128xbf16, #tpu.memory_space<vmem>>, %arg7: memref<1x16x128xbf16, #tpu.memory_space<vmem>>, %arg8: memref<1x16x128xbf16, #tpu.memory_space<vmem>>, %arg9: memref<4x16x1xf32, #tpu.memory_space<vmem>>, %arg10: memref<4x16x1xf32, #tpu.memory_space<vmem>>, %arg11: memref<4x16x32xf32, #tpu.memory_space<vmem>>) attributes {dimension_semantics = [#tpu.dimension_semantics<parallel>, #tpu.dimension_semantics<parallel>, #tpu.dimension_semantics<arbitrary>], iteration_bounds = array<i64: 2, 1, 1>, scalar_prefetch = 0 : i64, scratch_operands = 3 : i64, tpu.core_type = #tpu.core_type<tc>, window_params = [{transform_indices = @transform_0, window_bounds = array<i64: 1, 16, 1>}, {transform_indices = @transform_1, window_bounds = array<i64: 1, 1, 16>}, {transform_indices = @transform_2, window_bounds = array<i64: 1, 16, 128>}, {transform_indices = @transform_3, window_bounds = array<i64: 1, 16, 128>}, {transform_indices = @transform_4, window_bounds = array<i64: 1, 16, 128>}, {transform_indices = @transform_5, window_bounds = array<i64: 1, 16, 128>}]} {
    %c0_i32 = arith.constant 0 : i32
    %0 = arith.cmpi eq, %arg2, %c0_i32 : i32
    %1 = arith.extui %0 : i1 to i32
    %c0_i32_0 = arith.constant 0 : i32
    %2 = arith.cmpi ne, %1, %c0_i32_0 : i32
    scf.if %2 {
      %cst_101 = arith.constant -1.000000e+30 : f32
      %167 = vector.broadcast %cst_101 : f32 to vector<4x16x1xf32>
      %c0_102 = arith.constant 0 : index
      %c0_103 = arith.constant 0 : index
      %c0_104 = arith.constant 0 : index
      %168 = vector.load %arg9[%c0_102, %c0_103, %c0_104] : memref<4x16x1xf32, #tpu.memory_space<vmem>>, vector<4x16x1xf32>
      tpu.vector_store %arg9[%c0_102, %c0_103, %c0_104], %167 {strides = array<i32>} : memref<4x16x1xf32, #tpu.memory_space<vmem>>, vector<4x16x1xf32>,
      %cst_105 = arith.constant 0.000000e+00 : f32
      %169 = vector.broadcast %cst_105 : f32 to vector<4x16x1xf32>
      %c0_106 = arith.constant 0 : index
      %c0_107 = arith.constant 0 : index
      %c0_108 = arith.constant 0 : index
      %170 = vector.load %arg10[%c0_106, %c0_107, %c0_108] : memref<4x16x1xf32, #tpu.memory_space<vmem>>, vector<4x16x1xf32>
      tpu.vector_store %arg10[%c0_106, %c0_107, %c0_108], %169 {strides = array<i32>} : memref<4x16x1xf32, #tpu.memory_space<vmem>>, vector<4x16x1xf32>,
      %cst_109 = arith.constant 0.000000e+00 : f32
      %171 = vector.broadcast %cst_109 : f32 to vector<4x16x32xf32>
      %c0_110 = arith.constant 0 : index
      %c0_111 = arith.constant 0 : index
      %c0_112 = arith.constant 0 : index
      %172 = vector.load %arg11[%c0_110, %c0_111, %c0_112] : memref<4x16x32xf32, #tpu.memory_space<vmem>>, vector<4x16x32xf32>
      tpu.vector_store %arg11[%c0_110, %c0_111, %c0_112], %171 {strides = array<i32>} : memref<4x16x32xf32, #tpu.memory_space<vmem>>, vector<4x16x32xf32>,
    } else {
    }
    %c0 = arith.constant 0 : index
    %c0_1 = arith.constant 0 : index
    %c0_2 = arith.constant 0 : index
    %3 = vector.load %arg3[%c0, %c0_1, %c0_2] : memref<1x16x1xf32, #tpu.memory_space<vmem>>, vector<1x16x1xf32>
    %4 = vector.shape_cast %3 : vector<1x16x1xf32> to vector<16x1xf32>
    %c0_3 = arith.constant 0 : index
    %c0_4 = arith.constant 0 : index
    %c0_5 = arith.constant 0 : index
    %5 = vector.load %arg4[%c0_3, %c0_4, %c0_5] : memref<1x1x16xf32, #tpu.memory_space<vmem>>, vector<1x1x16xf32>
    %6 = vector.shape_cast %5 : vector<1x1x16xf32> to vector<1x16xf32>
    %7 = vector.broadcast %4 : vector<16x1xf32> to vector<16x16xf32>
    %8 = vector.broadcast %6 : vector<1x16xf32> to vector<16x16xf32>
    %9 = arith.addf %7, %8 : vector<16x16xf32>
    %c0_6 = arith.constant 0 : index
    %c0_7 = arith.constant 0 : index
    %c0_8 = arith.constant 0 : index
    %10 = vector.load %arg5[%c0_6, %c0_7, %c0_8] : memref<1x16x128xbf16, #tpu.memory_space<vmem>>, vector<1x16x128xbf16>
    %11 = vector.shape_cast %10 : vector<1x16x128xbf16> to vector<16x128xbf16>
    %c0_9 = arith.constant 0 : index
    %c0_10 = arith.constant 0 : index
    %c0_11 = arith.constant 0 : index
    %12 = vector.load %arg6[%c0_9, %c0_10, %c0_11] : memref<1x16x128xbf16, #tpu.memory_space<vmem>>, vector<1x16x128xbf16>
    %13 = vector.shape_cast %12 : vector<1x16x128xbf16> to vector<16x128xbf16>
    %c0_12 = arith.constant 0 : index
    %c0_13 = arith.constant 0 : index
    %c0_14 = arith.constant 0 : index
    %14 = vector.load %arg7[%c0_12, %c0_13, %c0_14] : memref<1x16x128xbf16, #tpu.memory_space<vmem>>, vector<1x16x128xbf16>
    %15 = vector.shape_cast %14 : vector<1x16x128xbf16> to vector<16x128xbf16>
    %16 = vector.extract_strided_slice %11 {offsets = [0, 0], sizes = [16, 32], strides = [1, 1]} : vector<16x128xbf16> to vector<16x32xbf16>
    %17 = vector.extract_strided_slice %13 {offsets = [0, 0], sizes = [16, 32], strides = [1, 1]} : vector<16x128xbf16> to vector<16x32xbf16>
    %18 = vector.extract_strided_slice %15 {offsets = [0, 0], sizes = [16, 32], strides = [1, 1]} : vector<16x128xbf16> to vector<16x32xbf16>
    %cst = arith.constant dense<0.000000e+00> : vector<16x16xf32>
    %19 = tpu.matmul %16, %17, %cst {dimension_numbers = #tpu.dot_dimension_numbers<[1], [1], [0], [0], [0, 0, 1, 0], [], []>} : vector<16x32xbf16>, vector<16x32xbf16>, vector<16x16xf32> -> vector<16x16xf32>
    %20 = arith.addf %19, %9 : vector<16x16xf32>
    %c0_15 = arith.constant 0 : index
    %c0_16 = arith.constant 0 : index
    %c0_17 = arith.constant 0 : index
    %21 = vector.load %arg9[%c0_15, %c0_16, %c0_17] : memref<4x16x1xf32, #tpu.memory_space<vmem>>, vector<1x16x1xf32>
    %22 = vector.shape_cast %21 : vector<1x16x1xf32> to vector<16x1xf32>
    %cst_18 = arith.constant dense<0xFF800000> : vector<16xf32>
    %23 = vector.multi_reduction <maximumf>, %20, %cst_18 [1] : vector<16x16xf32> to vector<16xf32>
    %24 = vector.shape_cast %23 : vector<16xf32> to vector<16x1xf32>
    %25 = arith.maximumf %22, %24 : vector<16x1xf32>
    %26 = arith.subf %22, %25 : vector<16x1xf32>
    %27 = math.exp %26 : vector<16x1xf32>
    %28 = vector.broadcast %25 : vector<16x1xf32> to vector<16x16xf32>
    %29 = arith.subf %20, %28 : vector<16x16xf32>
    %30 = math.exp %29 : vector<16x16xf32>
    %c0_19 = arith.constant 0 : index
    %c0_20 = arith.constant 0 : index
    %c0_21 = arith.constant 0 : index
    %31 = vector.load %arg10[%c0_19, %c0_20, %c0_21] : memref<4x16x1xf32, #tpu.memory_space<vmem>>, vector<1x16x1xf32>
    %32 = vector.shape_cast %31 : vector<1x16x1xf32> to vector<16x1xf32>
    %33 = arith.mulf %27, %32 : vector<16x1xf32>
    %cst_22 = arith.constant dense<0.000000e+00> : vector<16xf32>
    %34 = vector.multi_reduction <add>, %30, %cst_22 [1] : vector<16x16xf32> to vector<16xf32>
    %35 = vector.shape_cast %34 : vector<16xf32> to vector<16x1xf32>
    %36 = arith.addf %33, %35 : vector<16x1xf32>
    %c0_23 = arith.constant 0 : index
    %c0_24 = arith.constant 0 : index
    %c0_25 = arith.constant 0 : index
    %37 = vector.load %arg10[%c0_23, %c0_24, %c0_25] : memref<4x16x1xf32, #tpu.memory_space<vmem>>, vector<1x16x1xf32>
    %38 = vector.shape_cast %37 : vector<1x16x1xf32> to vector<16x1xf32>
    %39 = vector.shape_cast %36 : vector<16x1xf32> to vector<1x16x1xf32>
    tpu.vector_store %arg10[%c0_23, %c0_24, %c0_25], %39 {strides = array<i32>} : memref<4x16x1xf32, #tpu.memory_space<vmem>>, vector<1x16x1xf32>,
    %c0_26 = arith.constant 0 : index
    %c0_27 = arith.constant 0 : index
    %c0_28 = arith.constant 0 : index
    %40 = vector.load %arg11[%c0_26, %c0_27, %c0_28] : memref<4x16x32xf32, #tpu.memory_space<vmem>>, vector<1x16x32xf32>
    %41 = vector.shape_cast %40 : vector<1x16x32xf32> to vector<16x32xf32>
    %42 = vector.broadcast %27 : vector<16x1xf32> to vector<16x32xf32>
    %43 = arith.mulf %42, %41 : vector<16x32xf32>
    %44 = arith.truncf %30 : vector<16x16xf32> to vector<16x16xbf16>
    %cst_29 = arith.constant dense<0.000000e+00> : vector<16x32xf32>
    %45 = tpu.matmul %44, %18, %cst_29 {dimension_numbers = #tpu.dot_dimension_numbers<[1], [0], [0], [1], [0, 0, 1, 1], [], []>} : vector<16x16xbf16>, vector<16x32xbf16>, vector<16x32xf32> -> vector<16x32xf32>
    %46 = arith.addf %43, %45 : vector<16x32xf32>
    %c0_30 = arith.constant 0 : index
    %c0_31 = arith.constant 0 : index
    %c0_32 = arith.constant 0 : index
    %47 = vector.load %arg11[%c0_30, %c0_31, %c0_32] : memref<4x16x32xf32, #tpu.memory_space<vmem>>, vector<1x16x32xf32>
    %48 = vector.shape_cast %47 : vector<1x16x32xf32> to vector<16x32xf32>
    %49 = vector.shape_cast %46 : vector<16x32xf32> to vector<1x16x32xf32>
    tpu.vector_store %arg11[%c0_30, %c0_31, %c0_32], %49 {strides = array<i32>} : memref<4x16x32xf32, #tpu.memory_space<vmem>>, vector<1x16x32xf32>,
    %c0_33 = arith.constant 0 : index
    %c0_34 = arith.constant 0 : index
    %c0_35 = arith.constant 0 : index
    %50 = vector.load %arg9[%c0_33, %c0_34, %c0_35] : memref<4x16x1xf32, #tpu.memory_space<vmem>>, vector<1x16x1xf32>
    %51 = vector.shape_cast %50 : vector<1x16x1xf32> to vector<16x1xf32>
    %52 = vector.shape_cast %25 : vector<16x1xf32> to vector<1x16x1xf32>
    tpu.vector_store %arg9[%c0_33, %c0_34, %c0_35], %52 {strides = array<i32>} : memref<4x16x1xf32, #tpu.memory_space<vmem>>, vector<1x16x1xf32>,
    %53 = vector.extract_strided_slice %11 {offsets = [0, 32], sizes = [16, 32], strides = [1, 1]} : vector<16x128xbf16> to vector<16x32xbf16>
    %54 = vector.extract_strided_slice %13 {offsets = [0, 32], sizes = [16, 32], strides = [1, 1]} : vector<16x128xbf16> to vector<16x32xbf16>
    %55 = vector.extract_strided_slice %15 {offsets = [0, 32], sizes = [16, 32], strides = [1, 1]} : vector<16x128xbf16> to vector<16x32xbf16>
    %cst_36 = arith.constant dense<0.000000e+00> : vector<16x16xf32>
    %56 = tpu.matmul %53, %54, %cst_36 {dimension_numbers = #tpu.dot_dimension_numbers<[1], [1], [0], [0], [0, 0, 1, 0], [], []>} : vector<16x32xbf16>, vector<16x32xbf16>, vector<16x16xf32> -> vector<16x16xf32>
    %57 = arith.addf %56, %9 : vector<16x16xf32>
    %c1 = arith.constant 1 : index
    %c0_37 = arith.constant 0 : index
    %c0_38 = arith.constant 0 : index
    %58 = vector.load %arg9[%c1, %c0_37, %c0_38] : memref<4x16x1xf32, #tpu.memory_space<vmem>>, vector<1x16x1xf32>
    %59 = vector.shape_cast %58 : vector<1x16x1xf32> to vector<16x1xf32>
    %cst_39 = arith.constant dense<0xFF800000> : vector<16xf32>
    %60 = vector.multi_reduction <maximumf>, %57, %cst_39 [1] : vector<16x16xf32> to vector<16xf32>
    %61 = vector.shape_cast %60 : vector<16xf32> to vector<16x1xf32>
    %62 = arith.maximumf %59, %61 : vector<16x1xf32>
    %63 = arith.subf %59, %62 : vector<16x1xf32>
    %64 = math.exp %63 : vector<16x1xf32>
    %65 = vector.broadcast %62 : vector<16x1xf32> to vector<16x16xf32>
    %66 = arith.subf %57, %65 : vector<16x16xf32>
    %67 = math.exp %66 : vector<16x16xf32>
    %c1_40 = arith.constant 1 : index
    %c0_41 = arith.constant 0 : index
    %c0_42 = arith.constant 0 : index
    %68 = vector.load %arg10[%c1_40, %c0_41, %c0_42] : memref<4x16x1xf32, #tpu.memory_space<vmem>>, vector<1x16x1xf32>
    %69 = vector.shape_cast %68 : vector<1x16x1xf32> to vector<16x1xf32>
    %70 = arith.mulf %64, %69 : vector<16x1xf32>
    %cst_43 = arith.constant dense<0.000000e+00> : vector<16xf32>
    %71 = vector.multi_reduction <add>, %67, %cst_43 [1] : vector<16x16xf32> to vector<16xf32>
    %72 = vector.shape_cast %71 : vector<16xf32> to vector<16x1xf32>
    %73 = arith.addf %70, %72 : vector<16x1xf32>
    %c1_44 = arith.constant 1 : index
    %c0_45 = arith.constant 0 : index
    %c0_46 = arith.constant 0 : index
    %74 = vector.load %arg10[%c1_44, %c0_45, %c0_46] : memref<4x16x1xf32, #tpu.memory_space<vmem>>, vector<1x16x1xf32>
    %75 = vector.shape_cast %74 : vector<1x16x1xf32> to vector<16x1xf32>
    %76 = vector.shape_cast %73 : vector<16x1xf32> to vector<1x16x1xf32>
    tpu.vector_store %arg10[%c1_44, %c0_45, %c0_46], %76 {strides = array<i32>} : memref<4x16x1xf32, #tpu.memory_space<vmem>>, vector<1x16x1xf32>,
    %c1_47 = arith.constant 1 : index
    %c0_48 = arith.constant 0 : index
    %c0_49 = arith.constant 0 : index
    %77 = vector.load %arg11[%c1_47, %c0_48, %c0_49] : memref<4x16x32xf32, #tpu.memory_space<vmem>>, vector<1x16x32xf32>
    %78 = vector.shape_cast %77 : vector<1x16x32xf32> to vector<16x32xf32>
    %79 = vector.broadcast %64 : vector<16x1xf32> to vector<16x32xf32>
    %80 = arith.mulf %79, %78 : vector<16x32xf32>
    %81 = arith.truncf %67 : vector<16x16xf32> to vector<16x16xbf16>
    %cst_50 = arith.constant dense<0.000000e+00> : vector<16x32xf32>
    %82 = tpu.matmul %81, %55, %cst_50 {dimension_numbers = #tpu.dot_dimension_numbers<[1], [0], [0], [1], [0, 0, 1, 1], [], []>} : vector<16x16xbf16>, vector<16x32xbf16>, vector<16x32xf32> -> vector<16x32xf32>
    %83 = arith.addf %80, %82 : vector<16x32xf32>
    %c1_51 = arith.constant 1 : index
    %c0_52 = arith.constant 0 : index
    %c0_53 = arith.constant 0 : index
    %84 = vector.load %arg11[%c1_51, %c0_52, %c0_53] : memref<4x16x32xf32, #tpu.memory_space<vmem>>, vector<1x16x32xf32>
    %85 = vector.shape_cast %84 : vector<1x16x32xf32> to vector<16x32xf32>
    %86 = vector.shape_cast %83 : vector<16x32xf32> to vector<1x16x32xf32>
    tpu.vector_store %arg11[%c1_51, %c0_52, %c0_53], %86 {strides = array<i32>} : memref<4x16x32xf32, #tpu.memory_space<vmem>>, vector<1x16x32xf32>,
    %c1_54 = arith.constant 1 : index
    %c0_55 = arith.constant 0 : index
    %c0_56 = arith.constant 0 : index
    %87 = vector.load %arg9[%c1_54, %c0_55, %c0_56] : memref<4x16x1xf32, #tpu.memory_space<vmem>>, vector<1x16x1xf32>
    %88 = vector.shape_cast %87 : vector<1x16x1xf32> to vector<16x1xf32>
    %89 = vector.shape_cast %62 : vector<16x1xf32> to vector<1x16x1xf32>
    tpu.vector_store %arg9[%c1_54, %c0_55, %c0_56], %89 {strides = array<i32>} : memref<4x16x1xf32, #tpu.memory_space<vmem>>, vector<1x16x1xf32>,
    %90 = vector.extract_strided_slice %11 {offsets = [0, 64], sizes = [16, 32], strides = [1, 1]} : vector<16x128xbf16> to vector<16x32xbf16>
    %91 = vector.extract_strided_slice %13 {offsets = [0, 64], sizes = [16, 32], strides = [1, 1]} : vector<16x128xbf16> to vector<16x32xbf16>
    %92 = vector.extract_strided_slice %15 {offsets = [0, 64], sizes = [16, 32], strides = [1, 1]} : vector<16x128xbf16> to vector<16x32xbf16>
    %cst_57 = arith.constant dense<0.000000e+00> : vector<16x16xf32>
    %93 = tpu.matmul %90, %91, %cst_57 {dimension_numbers = #tpu.dot_dimension_numbers<[1], [1], [0], [0], [0, 0, 1, 0], [], []>} : vector<16x32xbf16>, vector<16x32xbf16>, vector<16x16xf32> -> vector<16x16xf32>
    %94 = arith.addf %93, %9 : vector<16x16xf32>
    %c2 = arith.constant 2 : index
    %c0_58 = arith.constant 0 : index
    %c0_59 = arith.constant 0 : index
    %95 = vector.load %arg9[%c2, %c0_58, %c0_59] : memref<4x16x1xf32, #tpu.memory_space<vmem>>, vector<1x16x1xf32>
    %96 = vector.shape_cast %95 : vector<1x16x1xf32> to vector<16x1xf32>
    %cst_60 = arith.constant dense<0xFF800000> : vector<16xf32>
    %97 = vector.multi_reduction <maximumf>, %94, %cst_60 [1] : vector<16x16xf32> to vector<16xf32>
    %98 = vector.shape_cast %97 : vector<16xf32> to vector<16x1xf32>
    %99 = arith.maximumf %96, %98 : vector<16x1xf32>
    %100 = arith.subf %96, %99 : vector<16x1xf32>
    %101 = math.exp %100 : vector<16x1xf32>
    %102 = vector.broadcast %99 : vector<16x1xf32> to vector<16x16xf32>
    %103 = arith.subf %94, %102 : vector<16x16xf32>
    %104 = math.exp %103 : vector<16x16xf32>
    %c2_61 = arith.constant 2 : index
    %c0_62 = arith.constant 0 : index
    %c0_63 = arith.constant 0 : index
    %105 = vector.load %arg10[%c2_61, %c0_62, %c0_63] : memref<4x16x1xf32, #tpu.memory_space<vmem>>, vector<1x16x1xf32>
    %106 = vector.shape_cast %105 : vector<1x16x1xf32> to vector<16x1xf32>
    %107 = arith.mulf %101, %106 : vector<16x1xf32>
    %cst_64 = arith.constant dense<0.000000e+00> : vector<16xf32>
    %108 = vector.multi_reduction <add>, %104, %cst_64 [1] : vector<16x16xf32> to vector<16xf32>
    %109 = vector.shape_cast %108 : vector<16xf32> to vector<16x1xf32>
    %110 = arith.addf %107, %109 : vector<16x1xf32>
    %c2_65 = arith.constant 2 : index
    %c0_66 = arith.constant 0 : index
    %c0_67 = arith.constant 0 : index
    %111 = vector.load %arg10[%c2_65, %c0_66, %c0_67] : memref<4x16x1xf32, #tpu.memory_space<vmem>>, vector<1x16x1xf32>
    %112 = vector.shape_cast %111 : vector<1x16x1xf32> to vector<16x1xf32>
    %113 = vector.shape_cast %110 : vector<16x1xf32> to vector<1x16x1xf32>
    tpu.vector_store %arg10[%c2_65, %c0_66, %c0_67], %113 {strides = array<i32>} : memref<4x16x1xf32, #tpu.memory_space<vmem>>, vector<1x16x1xf32>,
    %c2_68 = arith.constant 2 : index
    %c0_69 = arith.constant 0 : index
    %c0_70 = arith.constant 0 : index
    %114 = vector.load %arg11[%c2_68, %c0_69, %c0_70] : memref<4x16x32xf32, #tpu.memory_space<vmem>>, vector<1x16x32xf32>
    %115 = vector.shape_cast %114 : vector<1x16x32xf32> to vector<16x32xf32>
    %116 = vector.broadcast %101 : vector<16x1xf32> to vector<16x32xf32>
    %117 = arith.mulf %116, %115 : vector<16x32xf32>
    %118 = arith.truncf %104 : vector<16x16xf32> to vector<16x16xbf16>
    %cst_71 = arith.constant dense<0.000000e+00> : vector<16x32xf32>
    %119 = tpu.matmul %118, %92, %cst_71 {dimension_numbers = #tpu.dot_dimension_numbers<[1], [0], [0], [1], [0, 0, 1, 1], [], []>} : vector<16x16xbf16>, vector<16x32xbf16>, vector<16x32xf32> -> vector<16x32xf32>
    %120 = arith.addf %117, %119 : vector<16x32xf32>
    %c2_72 = arith.constant 2 : index
    %c0_73 = arith.constant 0 : index
    %c0_74 = arith.constant 0 : index
    %121 = vector.load %arg11[%c2_72, %c0_73, %c0_74] : memref<4x16x32xf32, #tpu.memory_space<vmem>>, vector<1x16x32xf32>
    %122 = vector.shape_cast %121 : vector<1x16x32xf32> to vector<16x32xf32>
    %123 = vector.shape_cast %120 : vector<16x32xf32> to vector<1x16x32xf32>
    tpu.vector_store %arg11[%c2_72, %c0_73, %c0_74], %123 {strides = array<i32>} : memref<4x16x32xf32, #tpu.memory_space<vmem>>, vector<1x16x32xf32>,
    %c2_75 = arith.constant 2 : index
    %c0_76 = arith.constant 0 : index
    %c0_77 = arith.constant 0 : index
    %124 = vector.load %arg9[%c2_75, %c0_76, %c0_77] : memref<4x16x1xf32, #tpu.memory_space<vmem>>, vector<1x16x1xf32>
    %125 = vector.shape_cast %124 : vector<1x16x1xf32> to vector<16x1xf32>
    %126 = vector.shape_cast %99 : vector<16x1xf32> to vector<1x16x1xf32>
    tpu.vector_store %arg9[%c2_75, %c0_76, %c0_77], %126 {strides = array<i32>} : memref<4x16x1xf32, #tpu.memory_space<vmem>>, vector<1x16x1xf32>,
    %127 = vector.extract_strided_slice %11 {offsets = [0, 96], sizes = [16, 32], strides = [1, 1]} : vector<16x128xbf16> to vector<16x32xbf16>
    %128 = vector.extract_strided_slice %13 {offsets = [0, 96], sizes = [16, 32], strides = [1, 1]} : vector<16x128xbf16> to vector<16x32xbf16>
    %129 = vector.extract_strided_slice %15 {offsets = [0, 96], sizes = [16, 32], strides = [1, 1]} : vector<16x128xbf16> to vector<16x32xbf16>
    %cst_78 = arith.constant dense<0.000000e+00> : vector<16x16xf32>
    %130 = tpu.matmul %127, %128, %cst_78 {dimension_numbers = #tpu.dot_dimension_numbers<[1], [1], [0], [0], [0, 0, 1, 0], [], []>} : vector<16x32xbf16>, vector<16x32xbf16>, vector<16x16xf32> -> vector<16x16xf32>
    %131 = arith.addf %130, %9 : vector<16x16xf32>
    %c3 = arith.constant 3 : index
    %c0_79 = arith.constant 0 : index
    %c0_80 = arith.constant 0 : index
    %132 = vector.load %arg9[%c3, %c0_79, %c0_80] : memref<4x16x1xf32, #tpu.memory_space<vmem>>, vector<1x16x1xf32>
    %133 = vector.shape_cast %132 : vector<1x16x1xf32> to vector<16x1xf32>
    %cst_81 = arith.constant dense<0xFF800000> : vector<16xf32>
    %134 = vector.multi_reduction <maximumf>, %131, %cst_81 [1] : vector<16x16xf32> to vector<16xf32>
    %135 = vector.shape_cast %134 : vector<16xf32> to vector<16x1xf32>
    %136 = arith.maximumf %133, %135 : vector<16x1xf32>
    %137 = arith.subf %133, %136 : vector<16x1xf32>
    %138 = math.exp %137 : vector<16x1xf32>
    %139 = vector.broadcast %136 : vector<16x1xf32> to vector<16x16xf32>
    %140 = arith.subf %131, %139 : vector<16x16xf32>
    %141 = math.exp %140 : vector<16x16xf32>
    %c3_82 = arith.constant 3 : index
    %c0_83 = arith.constant 0 : index
    %c0_84 = arith.constant 0 : index
    %142 = vector.load %arg10[%c3_82, %c0_83, %c0_84] : memref<4x16x1xf32, #tpu.memory_space<vmem>>, vector<1x16x1xf32>
    %143 = vector.shape_cast %142 : vector<1x16x1xf32> to vector<16x1xf32>
    %144 = arith.mulf %138, %143 : vector<16x1xf32>
    %cst_85 = arith.constant dense<0.000000e+00> : vector<16xf32>
    %145 = vector.multi_reduction <add>, %141, %cst_85 [1] : vector<16x16xf32> to vector<16xf32>
    %146 = vector.shape_cast %145 : vector<16xf32> to vector<16x1xf32>
    %147 = arith.addf %144, %146 : vector<16x1xf32>
    %c3_86 = arith.constant 3 : index
    %c0_87 = arith.constant 0 : index
    %c0_88 = arith.constant 0 : index
    %148 = vector.load %arg10[%c3_86, %c0_87, %c0_88] : memref<4x16x1xf32, #tpu.memory_space<vmem>>, vector<1x16x1xf32>
    %149 = vector.shape_cast %148 : vector<1x16x1xf32> to vector<16x1xf32>
    %150 = vector.shape_cast %147 : vector<16x1xf32> to vector<1x16x1xf32>
    tpu.vector_store %arg10[%c3_86, %c0_87, %c0_88], %150 {strides = array<i32>} : memref<4x16x1xf32, #tpu.memory_space<vmem>>, vector<1x16x1xf32>,
    %c3_89 = arith.constant 3 : index
    %c0_90 = arith.constant 0 : index
    %c0_91 = arith.constant 0 : index
    %151 = vector.load %arg11[%c3_89, %c0_90, %c0_91] : memref<4x16x32xf32, #tpu.memory_space<vmem>>, vector<1x16x32xf32>
    %152 = vector.shape_cast %151 : vector<1x16x32xf32> to vector<16x32xf32>
    %153 = vector.broadcast %138 : vector<16x1xf32> to vector<16x32xf32>
    %154 = arith.mulf %153, %152 : vector<16x32xf32>
    %155 = arith.truncf %141 : vector<16x16xf32> to vector<16x16xbf16>
    %cst_92 = arith.constant dense<0.000000e+00> : vector<16x32xf32>
    %156 = tpu.matmul %155, %129, %cst_92 {dimension_numbers = #tpu.dot_dimension_numbers<[1], [0], [0], [1], [0, 0, 1, 1], [], []>} : vector<16x16xbf16>, vector<16x32xbf16>, vector<16x32xf32> -> vector<16x32xf32>
    %157 = arith.addf %154, %156 : vector<16x32xf32>
    %c3_93 = arith.constant 3 : index
    %c0_94 = arith.constant 0 : index
    %c0_95 = arith.constant 0 : index
    %158 = vector.load %arg11[%c3_93, %c0_94, %c0_95] : memref<4x16x32xf32, #tpu.memory_space<vmem>>, vector<1x16x32xf32>
    %159 = vector.shape_cast %158 : vector<1x16x32xf32> to vector<16x32xf32>
    %160 = vector.shape_cast %157 : vector<16x32xf32> to vector<1x16x32xf32>
    tpu.vector_store %arg11[%c3_93, %c0_94, %c0_95], %160 {strides = array<i32>} : memref<4x16x32xf32, #tpu.memory_space<vmem>>, vector<1x16x32xf32>,
    %c3_96 = arith.constant 3 : index
    %c0_97 = arith.constant 0 : index
    %c0_98 = arith.constant 0 : index
    %161 = vector.load %arg9[%c3_96, %c0_97, %c0_98] : memref<4x16x1xf32, #tpu.memory_space<vmem>>, vector<1x16x1xf32>
    %162 = vector.shape_cast %161 : vector<1x16x1xf32> to vector<16x1xf32>
    %163 = vector.shape_cast %136 : vector<16x1xf32> to vector<1x16x1xf32>
    tpu.vector_store %arg9[%c3_96, %c0_97, %c0_98], %163 {strides = array<i32>} : memref<4x16x1xf32, #tpu.memory_space<vmem>>, vector<1x16x1xf32>,
    %c0_i32_99 = arith.constant 0 : i32
    %164 = arith.cmpi eq, %arg2, %c0_i32_99 : i32
    %165 = arith.extui %164 : i1 to i32
    %c0_i32_100 = arith.constant 0 : i32
    %166 = arith.cmpi ne, %165, %c0_i32_100 : i32
    scf.if %166 {
      %c0_101 = arith.constant 0 : index
      %c0_102 = arith.constant 0 : index
      %c0_103 = arith.constant 0 : index
      %167 = vector.load %arg11[%c0_101, %c0_102, %c0_103] : memref<4x16x32xf32, #tpu.memory_space<vmem>>, vector<1x16x32xf32>
      %168 = vector.shape_cast %167 : vector<1x16x32xf32> to vector<16x32xf32>
      %c0_104 = arith.constant 0 : index
      %c0_105 = arith.constant 0 : index
      %c0_106 = arith.constant 0 : index
      %169 = vector.load %arg10[%c0_104, %c0_105, %c0_106] : memref<4x16x1xf32, #tpu.memory_space<vmem>>, vector<1x16x1xf32>
      %170 = vector.shape_cast %169 : vector<1x16x1xf32> to vector<16x1xf32>
      %171 = tpu.reciprocal %170 {approx = true} : vector<16x1xf32> -> vector<16x1xf32>
      %172 = vector.broadcast %171 : vector<16x1xf32> to vector<16x32xf32>
      %173 = arith.mulf %168, %172 : vector<16x32xf32>
      %c1_107 = arith.constant 1 : index
      %c0_108 = arith.constant 0 : index
      %c0_109 = arith.constant 0 : index
      %174 = vector.load %arg11[%c1_107, %c0_108, %c0_109] : memref<4x16x32xf32, #tpu.memory_space<vmem>>, vector<1x16x32xf32>
      %175 = vector.shape_cast %174 : vector<1x16x32xf32> to vector<16x32xf32>
      %c1_110 = arith.constant 1 : index
      %c0_111 = arith.constant 0 : index
      %c0_112 = arith.constant 0 : index
      %176 = vector.load %arg10[%c1_110, %c0_111, %c0_112] : memref<4x16x1xf32, #tpu.memory_space<vmem>>, vector<1x16x1xf32>
      %177 = vector.shape_cast %176 : vector<1x16x1xf32> to vector<16x1xf32>
      %178 = tpu.reciprocal %177 {approx = true} : vector<16x1xf32> -> vector<16x1xf32>
      %179 = vector.broadcast %178 : vector<16x1xf32> to vector<16x32xf32>
      %180 = arith.mulf %175, %179 : vector<16x32xf32>
      %c2_113 = arith.constant 2 : index
      %c0_114 = arith.constant 0 : index
      %c0_115 = arith.constant 0 : index
      %181 = vector.load %arg11[%c2_113, %c0_114, %c0_115] : memref<4x16x32xf32, #tpu.memory_space<vmem>>, vector<1x16x32xf32>
      %182 = vector.shape_cast %181 : vector<1x16x32xf32> to vector<16x32xf32>
      %c2_116 = arith.constant 2 : index
      %c0_117 = arith.constant 0 : index
      %c0_118 = arith.constant 0 : index
      %183 = vector.load %arg10[%c2_116, %c0_117, %c0_118] : memref<4x16x1xf32, #tpu.memory_space<vmem>>, vector<1x16x1xf32>
      %184 = vector.shape_cast %183 : vector<1x16x1xf32> to vector<16x1xf32>
      %185 = tpu.reciprocal %184 {approx = true} : vector<16x1xf32> -> vector<16x1xf32>
      %186 = vector.broadcast %185 : vector<16x1xf32> to vector<16x32xf32>
      %187 = arith.mulf %182, %186 : vector<16x32xf32>
      %c3_119 = arith.constant 3 : index
      %c0_120 = arith.constant 0 : index
      %c0_121 = arith.constant 0 : index
      %188 = vector.load %arg11[%c3_119, %c0_120, %c0_121] : memref<4x16x32xf32, #tpu.memory_space<vmem>>, vector<1x16x32xf32>
      %189 = vector.shape_cast %188 : vector<1x16x32xf32> to vector<16x32xf32>
      %c3_122 = arith.constant 3 : index
      %c0_123 = arith.constant 0 : index
      %c0_124 = arith.constant 0 : index
      %190 = vector.load %arg10[%c3_122, %c0_123, %c0_124] : memref<4x16x1xf32, #tpu.memory_space<vmem>>, vector<1x16x1xf32>
      %191 = vector.shape_cast %190 : vector<1x16x1xf32> to vector<16x1xf32>
      %192 = tpu.reciprocal %191 {approx = true} : vector<16x1xf32> -> vector<16x1xf32>
      %193 = vector.broadcast %192 : vector<16x1xf32> to vector<16x32xf32>
      %194 = arith.mulf %189, %193 : vector<16x32xf32>
      %195 = tpu.concatenate %173, %180, %187, %194 in 1 : vector<16x32xf32>, vector<16x32xf32>, vector<16x32xf32>, vector<16x32xf32> -> vector<16x128xf32>
      %196 = arith.truncf %195 : vector<16x128xf32> to vector<16x128xbf16>
      %c0_125 = arith.constant 0 : index
      %c0_126 = arith.constant 0 : index
      %c0_127 = arith.constant 0 : index
      %197 = vector.load %arg8[%c0_125, %c0_126, %c0_127] : memref<1x16x128xbf16, #tpu.memory_space<vmem>>, vector<1x16x128xbf16>
      %198 = vector.shape_cast %197 : vector<1x16x128xbf16> to vector<16x128xbf16>
      %199 = vector.shape_cast %196 : vector<16x128xbf16> to vector<1x16x128xbf16>
      tpu.vector_store %arg8[%c0_125, %c0_126, %c0_127], %199 {strides = array<i32>} : memref<1x16x128xbf16, #tpu.memory_space<vmem>>, vector<1x16x128xbf16>,
    } else {
    }
    return
  }
  func.func @transform_0(%arg0: i32, %arg1: i32, %arg2: i32) -> (i32, i32, i32) {
    %c0_i32 = arith.constant 0 : i32
    %c0_i32_0 = arith.constant 0 : i32
    return %arg0, %arg1, %c0_i32 : i32, i32, i32
  }
  func.func @transform_1(%arg0: i32, %arg1: i32, %arg2: i32) -> (i32, i32, i32) {
    %c0_i32 = arith.constant 0 : i32
    %c0_i32_0 = arith.constant 0 : i32
    return %arg0, %c0_i32, %arg2 : i32, i32, i32
  }
  func.func @transform_2(%arg0: i32, %arg1: i32, %arg2: i32) -> (i32, i32, i32) {
    %c0_i32 = arith.constant 0 : i32
    %c0_i32_0 = arith.constant 0 : i32
    return %arg0, %arg1, %c0_i32 : i32, i32, i32
  }
  func.func @transform_3(%arg0: i32, %arg1: i32, %arg2: i32) -> (i32, i32, i32) {
    %c0_i32 = arith.constant 0 : i32
    %c0_i32_0 = arith.constant 0 : i32
    return %arg0, %arg2, %c0_i32 : i32, i32, i32
  }
  func.func @transform_4(%arg0: i32, %arg1: i32, %arg2: i32) -> (i32, i32, i32) {
    %c1_i32 = arith.constant 1 : i32
    %c0_i32 = arith.constant 0 : i32
    return %arg0, %arg2, %c1_i32 : i32, i32, i32
  }
  func.func @transform_5(%arg0: i32, %arg1: i32, %arg2: i32) -> (i32, i32, i32) {
    %c0_i32 = arith.constant 0 : i32
    %c0_i32_0 = arith.constant 0 : i32
    return %arg0, %arg1, %c0_i32 : i32, i32, i32
  }
}

module attributes {stable_mosaic.version = 11 : i64} {
  func.func @_matmul_f32_kernel(%arg0: i32, %arg1: i32, %arg2: i32, %arg3: memref<32x128xbf16, #tpu.memory_space<vmem>>, %arg4: memref<128x128xbf16, #tpu.memory_space<vmem>>, %arg5: memref<1x128xf32, #tpu.memory_space<vmem>>, %arg6: memref<32x128xf32, #tpu.memory_space<vmem>>) attributes {dimension_semantics = [#tpu.dimension_semantics<parallel>, #tpu.dimension_semantics<parallel>, #tpu.dimension_semantics<arbitrary>], iteration_bounds = array<i64: 1, 1, 1>, scalar_prefetch = 0 : i64, scratch_operands = 0 : i64, tpu.core_type = #tpu.core_type<tc>, window_params = [{transform_indices = @transform_0, window_bounds = array<i64: 32, 128>}, {transform_indices = @transform_1, window_bounds = array<i64: 128, 128>}, {transform_indices = @transform_2, window_bounds = array<i64: 1, 128>}, {transform_indices = @transform_3, window_bounds = array<i64: 32, 128>}]} {
    %c0_i32 = arith.constant 0 : i32
    %0 = arith.cmpi eq, %arg2, %c0_i32 : i32
    %1 = arith.extui %0 : i1 to i32
    %c0_i32_0 = arith.constant 0 : i32
    %2 = arith.cmpi ne, %1, %c0_i32_0 : i32
    scf.if %2 {
      %cst_10 = arith.constant 0.000000e+00 : f32
      %12 = vector.broadcast %cst_10 : f32 to vector<32x128xf32>
      %c0_11 = arith.constant 0 : index
      %c0_12 = arith.constant 0 : index
      %13 = vector.load %arg6[%c0_11, %c0_12] : memref<32x128xf32, #tpu.memory_space<vmem>>, vector<32x128xf32>
      tpu.vector_store %arg6[%c0_11, %c0_12], %12 {strides = array<i32>} : memref<32x128xf32, #tpu.memory_space<vmem>>, vector<32x128xf32>,
    } else {
    }
    %c0 = arith.constant 0 : index
    %c0_1 = arith.constant 0 : index
    %3 = vector.load %arg6[%c0, %c0_1] : memref<32x128xf32, #tpu.memory_space<vmem>>, vector<32x128xf32>
    %c0_2 = arith.constant 0 : index
    %c0_3 = arith.constant 0 : index
    %4 = vector.load %arg3[%c0_2, %c0_3] : memref<32x128xbf16, #tpu.memory_space<vmem>>, vector<32x128xbf16>
    %c0_4 = arith.constant 0 : index
    %c0_5 = arith.constant 0 : index
    %5 = vector.load %arg4[%c0_4, %c0_5] : memref<128x128xbf16, #tpu.memory_space<vmem>>, vector<128x128xbf16>
    %cst = arith.constant dense<0.000000e+00> : vector<32x128xf32>
    %6 = tpu.matmul %4, %5, %cst {dimension_numbers = #tpu.dot_dimension_numbers<[1], [0], [0], [1], [0, 0, 1, 1], [], []>} : vector<32x128xbf16>, vector<128x128xbf16>, vector<32x128xf32> -> vector<32x128xf32>
    %7 = arith.addf %3, %6 : vector<32x128xf32>
    %c0_6 = arith.constant 0 : index
    %c0_7 = arith.constant 0 : index
    %8 = vector.load %arg6[%c0_6, %c0_7] : memref<32x128xf32, #tpu.memory_space<vmem>>, vector<32x128xf32>
    tpu.vector_store %arg6[%c0_6, %c0_7], %7 {strides = array<i32>} : memref<32x128xf32, #tpu.memory_space<vmem>>, vector<32x128xf32>,
    %c0_i32_8 = arith.constant 0 : i32
    %9 = arith.cmpi eq, %arg2, %c0_i32_8 : i32
    %10 = arith.extui %9 : i1 to i32
    %c0_i32_9 = arith.constant 0 : i32
    %11 = arith.cmpi ne, %10, %c0_i32_9 : i32
    scf.if %11 {
      %c0_10 = arith.constant 0 : index
      %c0_11 = arith.constant 0 : index
      %12 = vector.load %arg6[%c0_10, %c0_11] : memref<32x128xf32, #tpu.memory_space<vmem>>, vector<32x128xf32>
      %c0_12 = arith.constant 0 : index
      %c0_13 = arith.constant 0 : index
      %13 = vector.load %arg5[%c0_12, %c0_13] : memref<1x128xf32, #tpu.memory_space<vmem>>, vector<1x128xf32>
      %14 = vector.broadcast %13 : vector<1x128xf32> to vector<32x128xf32>
      %15 = arith.addf %12, %14 : vector<32x128xf32>
      %c0_14 = arith.constant 0 : index
      %c0_15 = arith.constant 0 : index
      %16 = vector.load %arg6[%c0_14, %c0_15] : memref<32x128xf32, #tpu.memory_space<vmem>>, vector<32x128xf32>
      tpu.vector_store %arg6[%c0_14, %c0_15], %15 {strides = array<i32>} : memref<32x128xf32, #tpu.memory_space<vmem>>, vector<32x128xf32>,
    } else {
    }
    return
  }
  func.func @transform_0(%arg0: i32, %arg1: i32, %arg2: i32) -> (i32, i32) {
    %c0_i32 = arith.constant 0 : i32
    return %arg0, %arg2 : i32, i32
  }
  func.func @transform_1(%arg0: i32, %arg1: i32, %arg2: i32) -> (i32, i32) {
    %c0_i32 = arith.constant 0 : i32
    return %arg2, %arg1 : i32, i32
  }
  func.func @transform_2(%arg0: i32, %arg1: i32, %arg2: i32) -> (i32, i32) {
    %c0_i32 = arith.constant 0 : i32
    %c0_i32_0 = arith.constant 0 : i32
    return %c0_i32, %arg1 : i32, i32
  }
  func.func @transform_3(%arg0: i32, %arg1: i32, %arg2: i32) -> (i32, i32) {
    %c0_i32 = arith.constant 0 : i32
    return %arg0, %arg1 : i32, i32
  }
}

</mosaic_0001>

<bundles_post_ra>
// kernel: transformer_forward.36
= control target key start
LH: loop header
LB: loop body
LE: loop exit
PB: predicated region body
PF: predicated region fallthrough
CT: control target
= control target key end

     0   :  { %s335_s1 = inlined_call_operand.vmem [shape: bf16[128,128], index: 1, kind: input, shape index: {}]   ;;  %s336_s0 = inlined_call_operand.vmem [shape: bf16[32,128], index: 0, kind: input, shape index: {}]   ;;  %s337_s2 = inlined_call_operand.vmem [shape: f32[1,128], index: 2, kind: input, shape index: {}]   ;;  %s338_s3 = inlined_call_operand.vmem [shape: bf16[32,128], index: 3, kind: output, shape index: {}]  }
   0x1   :  { %v266_v0 = vld [vmem:[%s335_s1 + $0x38] sm:$0xff]   ;;  %v267_v1 = vld [vmem:[%s335_s1 + $0x30] sm:$0xff]   ;;  %v268_v2 = vld [vmem:[%s335_s1 + $0x28] sm:$0xff]  }
   0x2   :  { %246 = vmatprep.subr.bf16.mxu0 %v266_v0  ;;  %v269_v3 = vld [vmem:[%s335_s1 + $0x20] sm:$0xff]   ;;  %v270_v5 = vld [vmem:[%s335_s1 + $0x18] sm:$0xff]   ;;  %v271_v6 = vld [vmem:[%s335_s1 + $0x10] sm:$0xff]  }
   0x3   :  { %247 = vmatpush3.bf16.msra.mxu0 %v266_v0  ;;  %v274_v4 = vld [vmem:[%s336_s0] sm:$0xff]   ;;  %v272_v7 = vld [vmem:[%s335_s1 + $0x8] sm:$0xff]  }
   0x4   :  { %248 = vmatprep.subr.bf16.mxu0 %v267_v1  ;;  %262 = vmatprep.mubr.bf16.mxu0 %v274_v4  ;;  %v273_v8 = vld [vmem:[%s335_s1] sm:$0xff]   ;;  %v275_v9 = vld [vmem:[%s336_s0 + $0x8] sm:$0xff]  }
   0x5   :  { %v216_v11 = vld [vmem:[%s337_s2] ss:$0 sm:$0xff] }
   0x7   :  { %249 = vmatpush3.bf16.msra.mxu0 %v267_v1 }
   0x8   :  { %250 = vmatprep.subr.bf16.mxu0 %v268_v2 }
   0xb   :  { %251 = vmatpush3.bf16.msra.mxu0 %v268_v2 }
   0xc   :  { %252 = vmatprep.subr.bf16.mxu0 %v269_v3 }
   0xf   :  { %253 = vmatpush3.bf16.msra.mxu0 %v269_v3 }
  0x10   :  { %254 = vmatprep.subr.bf16.mxu0 %v270_v5 }
  0x13   :  { %255 = vmatpush3.bf16.msra.mxu0 %v270_v5 }
  0x14   :  { %256 = vmatprep.subr.bf16.mxu0 %v271_v6 }
  0x17   :  { %257 = vmatpush3.bf16.msra.mxu0 %v271_v6 }
  0x18   :  { %258 = vmatprep.subr.bf16.mxu0 %v272_v7 }
  0x1b   :  { %259 = vmatpush3.bf16.msra.mxu0 %v272_v7 }
  0x1c   :  { %260 = vmatprep.subr.bf16.mxu0 %v273_v8 }
  0x1f   :  { %261 = vmatpush3.bf16.msra.mxu0 %v273_v8 }
  0x22   :  { %263 = vmatmul.mubr.bf16.vlgmr.msra.gmra.mxu0 %v275_v9 }
  0xe2   :  { %v264_v10 = vpop.f32.mrf.mxu0 }
  0xe3   :  { %v180_v14 = vadd.f32 %v264_v10, %v216_v11 }
  0xe4   :  { %v141_v12 = vpop.f32.mrf.mxu0 }
  0xe5   :  { %v178_v17 = vadd.f32 %v216_v11, %v141_v12 }
  0xe6   :  { %v265_v13 = vpop.f32.mrf.mxu0 }
  0xe7   :  { %v181_v15 = vadd.f32 %v265_v13, %v216_v11 }
  0xe8   :  { %v144_v16 = vpop.f32.mrf.mxu0 }
  0xe9   :  { %v233_v18 = vpack.c.bf16 %v181_v15, %v180_v14  ;;  %v179_v19 = vadd.f32 %v216_v11, %v144_v16 }
  0xeb   :  { %235 = vst [vmem:[%s338_s3 + $0x8] sm:$0xff] %v233_v18   ;;  %v228_v20 = vpack.c.bf16 %v179_v19, %v178_v17 }
  0xed   :  { %229 = vst [vmem:[%s338_s3] sm:$0xff] %v228_v20  }

// kernel: transformer_forward.33
= control target key start
LH: loop header
LB: loop body
LE: loop exit
PB: predicated region body
PF: predicated region fallthrough
CT: control target
= control target key end

     0   :  { %s879_s12 = smov 0   ;;  %s881_s13 = smov 0   ;;  %s984_s0 = inlined_call_operand.vmem [shape: bf16[32,128], index: 0, kind: input, shape index: {}]   ;;  %s985_s1 = inlined_call_operand.vmem [shape: bf16[128,384], index: 1, kind: input, shape index: {}]   ;;  %s986_s2 = inlined_call_operand.vmem [shape: f32[1,384], index: 2, kind: input, shape index: {}]   ;;  %s987_s3 = inlined_call_operand.vmem [shape: bf16[32,384], index: 3, kind: output, shape index: {}]  }
   0x1   :  { %s883_s14 = smov 0   ;;  %s885_s15 = smov 0  }
   0x2   :  { %s887_s16 = smov 0  }
   0x3 LB: > { %s28_s17 = sadd.s32 1, %s853_s15  ;;  %s695_s18 = sadd.s32 4294967295, %s857_s16   ;;  %s857_s16 = sphi %s887_s16, %s13_s16   ;;  %s853_s15 = sphi %s885_s15, %s992_s15   ;;  %s849_s14 = sphi %s883_s14, %s991_s14   ;;  %s845_s13 = sphi %s881_s13, %s990_s13   ;;  %s841_s12 = sphi %s879_s12, %s989_s12  }
   0x4   : > { %p30_p0 = scmp.ge.s32.totalorder %s28_s17, 3  ;;  %p76_p1 = scmp.ne.s32.totalorder %s845_s13, %s841_s12 }
   0x5   : > { %p77_p2 = scmp.eq.s32.totalorder %s857_s16, 0  ;;  %p134_p4 = scmp.eq.s32.totalorder %s695_s18, 2 }
   0x6   : > { %s994_s17 = smov (%p30_p0, %s28_s17), 0  ;;  %s69_s20 = sadd.s32 1, %s845_s13 }
   0x7   : > { %p78_p3 = por %p77_p2, %p76_p1  ;;  %s65_s19 = ssub.s32 %s853_s15, %s994_s17 }
   0x8   : > { %p67_p5 = scmp.eq.s32.totalorder %s65_s19, 0  ;;  %p914_p6 = por %p134_p4, %p76_p1 }
   0x9   : > { %p699_p7 = scmp.ge.s32.totalorder %s857_s16, 3 }
   0xa   : > { %s919_s22 = scalar_select %p67_p5, %s845_s13, %s69_s20  }
   0xb   : > { %168 = sbr.rel (%p699_p7) target bundleno = 30 (0x1e), region = 20 }
  0x10   : > { %171 = sbr.rel (!%p78_p3) target bundleno = 30 (0x1e), region = 24  ;;  %s173_s23 = sand.u32 (%p78_p3), 1, %s845_s13  }
  0x11   : > { %s701_s24 = sshll.u32 (%p78_p3), %s853_s15, 2  ;;  %s700_s25 = sshll.u32 (%p78_p3), %s173_s23, 6 }
  0x12   : > { %s927_s28 = scalar_lea.vmem (%p78_p3), %s985_s1, %s701_s24  ;;  %s175_s29 = scalar_lea.vmem (%p78_p3), [#allocation3], %s700_s25 }
  0x13   : > { %v197_v0 = vld [vmem:[%s927_s28] sm:$0xf] (%p78_p3)  ;;  %v199_v1 = vld [vmem:[%s927_s28 + $0xc] sm:$0xf] (%p78_p3)  ;;  %v201_v2 = vld [vmem:[%s927_s28 + $0x18] sm:$0xf] (%p78_p3) }
  0x14   : > { %198 = vst [vmem:[%s175_s29] sm:$0xf] (%p78_p3), %v197_v0  ;;  %200 = vst [vmem:[%s175_s29 + $0x4] sm:$0xf] (%p78_p3), %v199_v1  ;;  %v203_v3 = vld [vmem:[%s927_s28 + $0x24] sm:$0xf] (%p78_p3) }
  0x15   : > { %v205_v4 = vld [vmem:[%s927_s28 + $0x30] sm:$0xf]  ;;  %202 = vst [vmem:[%s175_s29 + $0x8] sm:$0xf] %v201_v2  ;;  %204 = vst [vmem:[%s175_s29 + $0xc] sm:$0xf] %v203_v3 }
  0x16   : > { %206 = vst [vmem:[%s175_s29 + $0x10] sm:$0xf] %v205_v4  ;;  %v207_v5 = vld [vmem:[%s927_s28 + $0x3c] sm:$0xf]  ;;  %v209_v6 = vld [vmem:[%s927_s28 + $0x48] sm:$0xf] }
  0x17   : > { %v211_v7 = vld [vmem:[%s927_s28 + $0x54] sm:$0xf]  ;;  %208 = vst [vmem:[%s175_s29 + $0x14] sm:$0xf] %v207_v5  ;;  %210 = vst [vmem:[%s175_s29 + $0x18] sm:$0xf] %v209_v6 }
  0x18   : > { %212 = vst [vmem:[%s175_s29 + $0x1c] sm:$0xf] %v211_v7  ;;  %v213_v8 = vld [vmem:[%s927_s28 + $0x60] sm:$0xf]  ;;  %v215_v9 = vld [vmem:[%s927_s28 + $0x6c] sm:$0xf] }
  0x19   : > { %v217_v10 = vld [vmem:[%s927_s28 + $0x78] sm:$0xf]  ;;  %214 = vst [vmem:[%s175_s29 + $0x20] sm:$0xf] %v213_v8  ;;  %216 = vst [vmem:[%s175_s29 + $0x24] sm:$0xf] %v215_v9 }
  0x1a   : > { %218 = vst [vmem:[%s175_s29 + $0x28] sm:$0xf] %v217_v10  ;;  %v219_v11 = vld [vmem:[%s927_s28 + $0x84] sm:$0xf]  ;;  %v221_v12 = vld [vmem:[%s927_s28 + $0x90] sm:$0xf] }
  0x1b   : > { %v223_v13 = vld [vmem:[%s927_s28 + $0x9c] sm:$0xf]  ;;  %220 = vst [vmem:[%s175_s29 + $0x2c] sm:$0xf] %v219_v11  ;;  %222 = vst [vmem:[%s175_s29 + $0x30] sm:$0xf] %v221_v12 }
  0x1c   : > { %224 = vst [vmem:[%s175_s29 + $0x34] sm:$0xf] %v223_v13  ;;  %v225_v14 = vld [vmem:[%s927_s28 + $0xa8] sm:$0xf]  ;;  %v227_v15 = vld [vmem:[%s927_s28 + $0xb4] sm:$0xf] }
  0x1d   : > { %226 = vst [vmem:[%s175_s29 + $0x38] sm:$0xf] %v225_v14  ;;  %228 = vst [vmem:[%s175_s29 + $0x3c] sm:$0xf] %v227_v15 }
  0x1e PF: > { %p702_p8 = scmp.ge.s32.totalorder %s857_s16, 1  ;;  %p289_p9 = scmp.lt.s32.totalorder %s857_s16, 4 }
  0x20   : > { %p290_p10 = pnand %p702_p8, %p289_p9 }
  0x21   : > { %s296_s30 = sand.u32 (!%p290_p10), 1, %s841_s12   ;;  %p339_p11 = scmp.lt.s32.totalorder (!%p290_p10), %s849_s14, 2 }
  0x22   : > { %293 = sbr.rel (%p290_p10) target bundleno = 284 (0x11c), region = 69  ;;  %s703_s6 = sshll.u32 (!%p290_p10), %s296_s30, 6 }
  0x23   : > { %s298_s7 = scalar_lea.vmem (!%p290_p10), [#allocation3], %s703_s6  ;;  %s704_s20 = sshll.u32 (!%p290_p10), %s296_s30, 4 }
  0x24   : > { %s328_s23 = scalar_lea.vmem (!%p290_p10), [#allocation4], %s704_s20 }
  0x27   : > { %v817_v16 = vld [vmem:[%s984_s0] sm:$0xff]   ;;  %v809_v17 = vld [vmem:[%s298_s7 + $0x38] sm:$0xff]   ;;  %v810_v18 = vld [vmem:[%s298_s7 + $0x30] sm:$0xff]   ;;  %s340_s10 = scalar_select %p339_p11, %s849_s14, 2 }
  0x28   : > { %765 = vmatprep.mubr.bf16.mxu0 %v817_v16  ;;  %749 = vmatprep.subr.bf16.mxu0 %v809_v17  ;;  %v811_v19 = vld [vmem:[%s298_s7 + $0x28] sm:$0xff]   ;;  %v812_v20 = vld [vmem:[%s298_s7 + $0x20] sm:$0xff]   ;;  %v813_v21 = vld [vmem:[%s298_s7 + $0x18] sm:$0xff]   ;;  %s721_s24 = sshll.u32 (%p914_p6), %s849_s14, 2 }
  0x29   : > { %750 = vmatpush3.bf16.msra.mxu0 %v809_v17  ;;  %v814_v22 = vld [vmem:[%s298_s7 + $0x10] sm:$0xff]   ;;  %v815_v23 = vld [vmem:[%s298_s7 + $0x8] sm:$0xff]   ;;  %v816_v24 = vld [vmem:[%s298_s7] sm:$0xff]   ;;  %s341_s19 = scalar_lea.vmem %s986_s2, %s340_s10  ;;  %s542_s26 = scalar_lea.vmem (%p914_p6), %s987_s3, %s721_s24 }
  0x2a   : > { %751 = vmatprep.subr.bf16.mxu0 %v810_v18  ;;  %v818_v25 = vld [vmem:[%s984_s0 + $0x8] sm:$0xff]   ;;  %v715_v27 = vld [vmem:[%s341_s19] ss:$0 sm:$0xff] }
  0x2d   : > { %752 = vmatpush3.bf16.msra.mxu0 %v810_v18 }
  0x2e   : > { %753 = vmatprep.subr.bf16.mxu0 %v811_v19 }
  0x31   : > { %754 = vmatpush3.bf16.msra.mxu0 %v811_v19 }
  0x32   : > { %755 = vmatprep.subr.bf16.mxu0 %v812_v20 }
  0x35   : > { %756 = vmatpush3.bf16.msra.mxu0 %v812_v20 }
  0x36   : > { %757 = vmatprep.subr.bf16.mxu0 %v813_v21 }
  0x39   : > { %758 = vmatpush3.bf16.msra.mxu0 %v813_v21 }
  0x3a   : > { %759 = vmatprep.subr.bf16.mxu0 %v814_v22 }
  0x3d   : > { %760 = vmatpush3.bf16.msra.mxu0 %v814_v22 }
  0x3e   : > { %761 = vmatprep.subr.bf16.mxu0 %v815_v23 }
  0x41   : > { %762 = vmatpush3.bf16.msra.mxu0 %v815_v23 }
  0x42   : > { %763 = vmatprep.subr.bf16.mxu0 %v816_v24 }
  0x45   : > { %764 = vmatpush3.bf16.msra.mxu0 %v816_v24 }
  0x48   : > { %766 = vmatmul.mubr.bf16.vlgmr.msra.gmra.mxu0 %v818_v25 }
 0x108   : > { %v767_v26 = vpop.f32.mrf.mxu0 }
 0x109   : > { %v509_v30 = vadd.f32 %v767_v26, %v715_v27 }
 0x10a   : > { %v470_v28 = vpop.f32.mrf.mxu0 }
 0x10b   : > { %v507_v33 = vadd.f32 %v715_v27, %v470_v28 }
 0x10c   : > { %v768_v29 = vpop.f32.mrf.mxu0 }
 0x10d   : > { %v510_v31 = vadd.f32 %v768_v29, %v715_v27 }
 0x10e   : > { %v473_v32 = vpop.f32.mrf.mxu0 }
 0x10f   : > { %v736_v34 = vpack.c.bf16 %v510_v31, %v509_v30  ;;  %v508_v35 = vadd.f32 %v715_v27, %v473_v32  ;;  %537 = sbr.rel (!%p914_p6) target bundleno = 284 (0x11c), region = 85 }
 0x111   : > { %738 = vst [vmem:[%s328_s23 + $0x8] sm:$0xff] %v736_v34   ;;  %v731_v36 = vpack.c.bf16 %v508_v35, %v507_v33 }
 0x113   : > { %732 = vst [vmem:[%s328_s23] sm:$0xff] %v731_v36  }
 0x118   : > { %v563_v39 = vld [vmem:[%s328_s23 + $0x8] sm:$0xf]  ;;  %v565_v40 = vld [vmem:[%s328_s23 + $0xc] sm:$0xf] }
 0x119   : > { %564 = vst [vmem:[%s542_s26 + $0x18] sm:$0xf] %v563_v39  ;;  %566 = vst [vmem:[%s542_s26 + $0x24] sm:$0xf] %v565_v40 }
 0x11a   : > { %v559_v37 = vld [vmem:[%s328_s23] sm:$0xf]  ;;  %v561_v38 = vld [vmem:[%s328_s23 + $0x4] sm:$0xf] }
 0x11b   : > { %560 = vst [vmem:[%s542_s26] sm:$0xf] %v559_v37  ;;  %562 = vst [vmem:[%s542_s26 + $0xc] sm:$0xf] %v561_v38 }
 0x11c PF: > { %s13_s16 = sadd.s32 1, %s857_s16   ;;  %s989_s12 = smov %s845_s13 }
 0x11d   : > { %p10_p12 = scmp.ge.s32.totalorder %s13_s16, 5   ;;  %s990_s13 = smov %s919_s22 }
 0x11e   : > { %s991_s14 = smov %s853_s15  ;;  %s992_s15 = smov %s994_s17 }
 0x11f   :  { %12 = sbr.rel (!%p10_p12) target bundleno = 3 (0x3), region = 163 }

// kernel: transformer_forward.35
= control target key start
LH: loop header
LB: loop body
LE: loop exit
PB: predicated region body
PF: predicated region fallthrough
CT: control target
= control target key end

     0   :  { %s469_s1 = inlined_call_operand.vmem [shape: bf16[128,128], index: 1, kind: input, shape index: {}]   ;;  %s470_s0 = inlined_call_operand.vmem [shape: bf16[32,128], index: 0, kind: input, shape index: {}]   ;;  %s471_s3 = inlined_call_operand.vmem [shape: bf16[32,128], index: 3, kind: input, shape index: {}]   ;;  %s472_s2 = inlined_call_operand.vmem [shape: f32[1,128], index: 2, kind: input, shape index: {}]   ;;  %s473_s4 = inlined_call_operand.vmem [shape: f32[1,128], index: 4, kind: input, shape index: {}]   ;;  %s474_s5 = inlined_call_operand.vmem [shape: f32[1,128], index: 5, kind: input, shape index: {}]   ;;  %s475_s6 = inlined_call_operand.vmem [shape: bf16[32,128], index: 6, kind: output, shape index: {}]  }
   0x1   :  { %v365_v0 = vld [vmem:[%s469_s1 + $0x38] sm:$0xff]   ;;  %v366_v1 = vld [vmem:[%s469_s1 + $0x30] sm:$0xff]   ;;  %v367_v2 = vld [vmem:[%s469_s1 + $0x28] sm:$0xff]  }
   0x2   :  { %345 = vmatprep.subr.bf16.mxu0 %v365_v0  ;;  %v368_v3 = vld [vmem:[%s469_s1 + $0x20] sm:$0xff]   ;;  %v369_v5 = vld [vmem:[%s469_s1 + $0x18] sm:$0xff]   ;;  %v370_v6 = vld [vmem:[%s469_s1 + $0x10] sm:$0xff]  }
   0x3   :  { %346 = vmatpush3.bf16.msra.mxu0 %v365_v0  ;;  %v373_v4 = vld [vmem:[%s470_s0] sm:$0xff]   ;;  %v371_v7 = vld [vmem:[%s469_s1 + $0x8] sm:$0xff]  }
   0x4   :  { %347 = vmatprep.subr.bf16.mxu0 %v366_v1  ;;  %361 = vmatprep.mubr.bf16.mxu0 %v373_v4  ;;  %v372_v8 = vld [vmem:[%s469_s1] sm:$0xff]   ;;  %v374_v9 = vld [vmem:[%s470_s0 + $0x8] sm:$0xff]  }
   0x5   :  { %v333_v10 = vld [vmem:[%s471_s3 + $0x8] sm:$0xff]   ;;  %v304_v11 = vld [vmem:[%s472_s2] ss:$0 sm:$0xff] }
   0x6   :  { %v316_v12 = vld [vmem:[%s471_s3] sm:$0xff]   ;;  %v321_v13 = vunpack.c.l.bf16 %v333_v10  ;;  %v322_v20 = vunpack.c.h.bf16 %v333_v10 }
   0x7   :  { %348 = vmatpush3.bf16.msra.mxu0 %v366_v1  ;;  %v317_v16 = vunpack.c.l.bf16 %v316_v12  ;;  %v318_v24 = vunpack.c.h.bf16 %v316_v12  ;;  %v305_v59 = vld [vmem:[%s473_s4] ss:$0 sm:$0xff] }
   0x8   :  { %349 = vmatprep.subr.bf16.mxu0 %v367_v2  ;;  %v306_v0 = vld [vmem:[%s474_s5] ss:$0 sm:$0xff] }
   0xb   :  { %350 = vmatpush3.bf16.msra.mxu0 %v367_v2 }
   0xc   :  { %351 = vmatprep.subr.bf16.mxu0 %v368_v3 }
   0xf   :  { %352 = vmatpush3.bf16.msra.mxu0 %v368_v3 }
  0x10   :  { %353 = vmatprep.subr.bf16.mxu0 %v369_v5 }
  0x13   :  { %354 = vmatpush3.bf16.msra.mxu0 %v369_v5 }
  0x14   :  { %355 = vmatprep.subr.bf16.mxu0 %v370_v6 }
  0x17   :  { %356 = vmatpush3.bf16.msra.mxu0 %v370_v6 }
  0x18   :  { %357 = vmatprep.subr.bf16.mxu0 %v371_v7 }
  0x1b   :  { %358 = vmatpush3.bf16.msra.mxu0 %v371_v7 }
  0x1c   :  { %359 = vmatprep.subr.bf16.mxu0 %v372_v8 }
  0x1f   :  { %360 = vmatpush3.bf16.msra.mxu0 %v372_v8 }
  0x22   :  { %362 = vmatmul.mubr.bf16.vlgmr.msra.gmra.mxu0 %v374_v9 }
  0xe2   :  { %v363_v14 = vpop.f32.mrf.mxu0 }
  0xe3   :  { %v189_v15 = vadd.f32 %v363_v14, %v304_v11 }
  0xe4   :  { %v150_v17 = vpop.f32.mrf.mxu0 }
  0xe5   :  { %v187_v18 = vadd.f32 %v304_v11, %v150_v17  ;;  %v201_v19 = vadd.f32 %v321_v13, %v189_v15 }
  0xe6   :  { %v364_v21 = vpop.f32.mrf.mxu0 }
  0xe7   :  { %v190_v22 = vadd.f32 %v364_v21, %v304_v11  ;;  %207 = vadd.xlane.f32.xlu1 %v201_v19  ;;  %v199_v23 = vadd.f32 %v317_v16, %v187_v18 }
  0xe8   :  { %v153_v25 = vpop.f32.mrf.mxu0 }
  0xe9   :  { %v188_v26 = vadd.f32 %v304_v11, %v153_v25  ;;  %203 = vadd.xlane.f32.xlu0 %v199_v23  ;;  %v202_v27 = vadd.f32 %v322_v20, %v190_v22 }
  0xeb   :  { %209 = vadd.xlane.f32.xlu1 %v202_v27  ;;  %v200_v28 = vadd.f32 %v318_v24, %v188_v26 }
  0xed   :  { %205 = vadd.xlane.f32.xlu0 %v200_v28 }
 0x170   :  { %v208_v29 = vpop.xlane.xlu1 %207 }
 0x171   :  { %v214_v31 = vmul.f32 0.0078125, %v208_v29 }
 0x172   :  { %v204_v30 = vpop.xlane.xlu0 %203 }
 0x173   :  { %v212_v32 = vmul.f32 0.0078125, %v204_v30  ;;  %v218_v36 = vsub.f32 %v201_v19, %v214_v31 }
 0x174   :  { %v210_v33 = vpop.xlane.xlu1 %209 }
 0x175   :  { %v216_v34 = vsub.f32 %v199_v23, %v212_v32  ;;  %v215_v37 = vmul.f32 0.0078125, %v210_v33  ;;  %v222_v42 = vmul.f32 %v218_v36, %v218_v36 }
 0x176   :  { %v206_v35 = vpop.xlane.xlu0 %205 }
 0x177   :  { %v213_v38 = vmul.f32 0.0078125, %v206_v35  ;;  %v220_v39 = vmul.f32 %v216_v34, %v216_v34  ;;  %v219_v41 = vsub.f32 %v202_v27, %v215_v37 }
 0x179   :  { %v217_v40 = vsub.f32 %v200_v28, %v213_v38  ;;  %224 = vadd.xlane.f32.xlu0 %v220_v39  ;;  %v223_v44 = vmul.f32 %v219_v41, %v219_v41 }
 0x17b   :  { %v221_v43 = vmul.f32 %v217_v40, %v217_v40 }
 0x17d   :  { %228 = vadd.xlane.f32.xlu0 %v222_v42  ;;  %226 = vadd.xlane.f32.xlu1 %v221_v43 }
 0x181   :  { %230 = vadd.xlane.f32.xlu1 %v223_v44 }
 0x202   :  { %v225_v45 = vpop.xlane.xlu0 %224 }
 0x203   :  { %v232_v46 = vmul.f32 0.0078125, %v225_v45 }
 0x205   :  { %v236_v47 = vadd.f32 1e-12, %v232_v46 }
 0x206   :  { %v227_v48 = vpop.xlane.xlu1 %226  ;;  %v229_v49 = vpop.xlane.xlu0 %228 }
 0x207   :  { %375 = vrsqrt.f32 %v236_v47  ;;  %v233_v50 = vmul.f32 0.0078125, %v227_v48  ;;  %v234_v51 = vmul.f32 0.0078125, %v229_v49 }
 0x209   :  { %v237_v52 = vadd.f32 1e-12, %v233_v50  ;;  %v238_v53 = vadd.f32 1e-12, %v234_v51 }
 0x20a   :  { %v231_v54 = vpop.xlane.xlu1 %230 }
 0x20b   :  { %377 = vrsqrt.f32 %v237_v52  ;;  %v235_v55 = vmul.f32 0.0078125, %v231_v54 }
 0x20c   :  { %379 = vrsqrt.f32 %v238_v53 }
 0x20d   :  { %v239_v56 = vadd.f32 1e-12, %v235_v55 }
 0x20f   :  { %381 = vrsqrt.f32 %v239_v56 }
 0x214   :  { %v376_v57 = vpop.eup %375 }
 0x215   :  { %v244_v58 = vmul.f32 %v376_v57, %v216_v34 }
 0x217   :  { %v255_v62 = vmul.f32 %v305_v59, %v244_v58 }
 0x218   :  { %v378_v60 = vpop.eup %377 }
 0x219   :  { %v380_v61 = vpop.eup %379  ;;  %v245_v63 = vmul.f32 %v378_v60, %v217_v40  ;;  %v266_v4 = vadd.f32 %v306_v0, %v255_v62 }
 0x21a   :  { %v246_v1 = vmul.f32 %v380_v61, %v218_v36 }
 0x21b   :  { %v256_v2 = vmul.f32 %v305_v59, %v245_v63 }
 0x21c   :  { %v382_v3 = vpop.eup %381  ;;  %v257_v6 = vmul.f32 %v305_v59, %v246_v1 }
 0x21d   :  { %v267_v5 = vadd.f32 %v306_v0, %v256_v2  ;;  %v247_v7 = vmul.f32 %v382_v3, %v219_v41 }
 0x21e   :  { %v268_v10 = vadd.f32 %v306_v0, %v257_v6 }
 0x21f   :  { %v326_v8 = vpack.c.bf16 %v267_v5, %v266_v4  ;;  %v258_v9 = vmul.f32 %v305_v59, %v247_v7 }
 0x221   :  { %327 = vst [vmem:[%s475_s6] sm:$0xff] %v326_v8   ;;  %v269_v11 = vadd.f32 %v306_v0, %v258_v9 }
 0x223   :  { %v331_v12 = vpack.c.bf16 %v269_v11, %v268_v10 }
 0x225   :  { %334 = vst [vmem:[%s475_s6 + $0x8] sm:$0xff] %v331_v12  }

// kernel: transformer_forward.34
= control target key start
LH: loop header
LB: loop body
LE: loop exit
PB: predicated region body
PF: predicated region fallthrough
CT: control target
= control target key end

     0   :  { %s1867_s18 = smov 0   ;;  %s1869_s19 = smov 0   ;;  %s2265_s0 = inlined_call_operand.vmem [shape: f32[2,16,1], index: 0, kind: input, shape index: {}]   ;;  %s2266_s1 = inlined_call_operand.vmem [shape: f32[2,1,16], index: 1, kind: input, shape index: {}]   ;;  %s2267_s2 = inlined_call_operand.vmem [shape: bf16[2,16,384], index: 2, kind: input, shape index: {}, may-alias: {2,3,4}]   ;;  %s2268_s3 = inlined_call_operand.vmem [shape: bf16[2,16,384], index: 3, kind: input, shape index: {}, may-alias: {2,3,4}]   ;;  %s2269_s4 = inlined_call_operand.vmem [shape: bf16[2,16,384], index: 4, kind: input, shape index: {}, may-alias: {2,3,4}]   ;;  %s2270_s5 = inlined_call_operand.vmem [shape: bf16[2,16,128], index: 5, kind: output, shape index: {}]  }
   0x1   :  { %s1871_s20 = smov 0   ;;  %s1873_s21 = smov 0  }
   0x2   :  { %s1875_s22 = smov 0  }
   0x3 LB: > { %s34_s23 = sadd.s32 1, %s1823_s21  ;;  %p106_p1 = scmp.ne.s32.totalorder %s1815_s19, %s1811_s18  ;;  %s1827_s22 = sphi %s1875_s22, %s15_s22   ;;  %s1823_s21 = sphi %s1873_s21, %s2275_s21   ;;  %s1819_s20 = sphi %s1871_s20, %s2274_s20   ;;  %s1815_s19 = sphi %s1869_s19, %s2273_s19   ;;  %s1811_s18 = sphi %s1867_s18, %s2272_s18  }
   0x4   : > { %p36_p0 = scmp.ge.s32.totalorder %s34_s23, 2  ;;  %p107_p2 = scmp.eq.s32.totalorder %s1827_s22, 0 }
   0x5   : > { %s99_s26 = sadd.s32 1, %s1815_s19  ;;  %p1564_p5 = scmp.ge.s32.totalorder %s1827_s22, 2 }
   0x6   : > { %s2277_s23 = smov (%p36_p0, %s34_s23), 0  ;;  %p1898_p3 = por %p107_p2, %p106_p1 }
   0x7   : > { %s94_s25 = ssub.s32 %s1823_s21, %s2277_s23  ;;  %216 = sbr.rel (%p1564_p5) target bundleno = 30 (0x1e), region = 16 }
   0x8   : > { %p97_p4 = scmp.eq.s32.totalorder %s94_s25, 0 }
   0xa   : > { %s1906_s27 = scalar_select %p97_p4, %s1815_s19, %s99_s26  }
   0xc   : > { %241 = sbr.rel (!%p1898_p3) target bundleno = 18 (0x12), region = 28  ;;  %s243_s28 = sand.u32 (%p1898_p3), 1, %s1815_s19  }
   0xd   : > { %s1672_s29 = smul.u32 (%p1898_p3), 24, %s1823_s21  ;;  %s1565_s30 = sshll.u32 (%p1898_p3), %s243_s28, 3 }
   0xe   : > { %s245_s9 = scalar_lea.vmem (%p1898_p3), [#allocation5], %s1565_s30 }
   0xf   : > { %s251_s8 = scalar_lea.vmem (%p1898_p3), %s2267_s2, %s1672_s29 }
  0x10   : > { %v268_v0 = vld [vmem:[%s251_s8] sm:$0xf] (%p1898_p3)  ;;  %v270_v1 = vld [vmem:[%s251_s8 + $0xc] sm:$0xf] (%p1898_p3) }
  0x11   : > { %269 = vst [vmem:[%s245_s9] sm:$0xf] %v268_v0  ;;  %271 = vst [vmem:[%s245_s9 + $0x4] sm:$0xf] %v270_v1 }
  0x12 PF: > { %299 = sbr.rel (!%p1898_p3) target bundleno = 24 (0x18), region = 69  ;;  %s301_s10 = sand.u32 (%p1898_p3), 1, %s1815_s19  }
  0x13   : > { %s1568_s11 = smul.u32 (%p1898_p3), 24, %s1823_s21  ;;  %s1567_s12 = sshll.u32 (%p1898_p3), %s301_s10, 3 }
  0x14   : > { %s303_s16 = scalar_lea.vmem (%p1898_p3), [#allocation6], %s1567_s12 }
  0x15   : > { %s1443_s15 = scalar_lea.vmem (%p1898_p3), %s2268_s3, %s1568_s11 }
  0x16   : > { %v1569_v2 = vld [vmem:[%s1443_s15 + $0x4] sm:$0xf] (%p1898_p3)  ;;  %v1570_v3 = vld [vmem:[%s1443_s15 + $0x10] sm:$0xf] (%p1898_p3) }
  0x17   : > { %328 = vst [vmem:[%s303_s16] sm:$0xf] %v1569_v2  ;;  %330 = vst [vmem:[%s303_s16 + $0x4] sm:$0xf] %v1570_v3 }
  0x18 PF: > { %358 = sbr.rel (!%p1898_p3) target bundleno = 30 (0x1e), region = 110  ;;  %s360_s17 = sand.u32 (%p1898_p3), 1, %s1815_s19  }
  0x19   : > { %s1572_s25 = smul.u32 (%p1898_p3), 24, %s1823_s21  ;;  %s1571_s26 = sshll.u32 (%p1898_p3), %s360_s17, 3 }
  0x1a   : > { %s362_s6 = scalar_lea.vmem (%p1898_p3), [#allocation7], %s1571_s26 }
  0x1b   : > { %s1451_s30 = scalar_lea.vmem (%p1898_p3), %s2269_s4, %s1572_s25 }
  0x1c   : > { %v1573_v4 = vld [vmem:[%s1451_s30 + $0x8] sm:$0xf] (%p1898_p3)  ;;  %v1574_v5 = vld [vmem:[%s1451_s30 + $0x14] sm:$0xf] (%p1898_p3) }
  0x1d   : > { %387 = vst [vmem:[%s362_s6] sm:$0xf] %v1573_v4  ;;  %389 = vst [vmem:[%s362_s6 + $0x4] sm:$0xf] %v1574_v5 }
  0x1e PF: > { %p1575_p6 = scmp.ge.s32.totalorder %s1827_s22, 1  ;;  %p416_p7 = scmp.lt.s32.totalorder %s1827_s22, 3 }
  0x20   : > { %p417_p8 = pnand %p1575_p6, %p416_p7 }
  0x21   : > { %s423_s24 = sand.u32 (!%p417_p8), 1, %s1811_s18   ;;  %p492_p9 = scmp.lt.s32.totalorder (!%p417_p8), %s1819_s20, 1 }
  0x22   : > { %420 = sbr.rel (%p417_p8) target bundleno = 1452 (0x5ac), region = 151  ;;  %s1935_s7 = sshll.u32 (!%p417_p8), %s423_s24, 3 }
  0x23   : > { %s432_s18 = scalar_lea.vmem (!%p417_p8), [#allocation6], %s1935_s7  ;;  %s425_s8 = scalar_lea.vmem (!%p417_p8), [#allocation5], %s1935_s7 }
  0x24   : > { %s1834_s16 = smov (!%p417_p8), 96   ;;  %s439_s17 = scalar_lea.vmem (!%p417_p8), [#allocation7], %s1935_s7 }
  0x25   : > { %s1835_s25 = smov (!%p417_p8), 32   ;;  %s1836_s26 = smov (!%p417_p8), 64  }
  0x27   : > { %vm542_vm0 = vcmask 261120   ;;  %v1829_v6 = vmov 0.0   ;;  %vm1830_vm1 = vmmov 0   ;;  %v1831_v7 = vmov 0   ;;  %v1956_v8 = vld [vmem:[%s432_s18] sm:$0xff]   ;;  %s2279_s20 = smov (!%p492_p9, %s1819_s20), 1 }
  0x28   : > { %1624 = vmatprep.subr.bf16.mxu0 %v1829_v6  ;;  %543 = vst.msk [vmem:[#allocation4] sm:$0xff] %vm542_vm0, %v1829_v6  ;;  %544 = vst.msk [vmem:[#allocation4 + $0x8] sm:$0xff] %vm542_vm0, %v1829_v6  ;;  %1626 = vmatprep.mubr.msk.bf16.mxu0 %vm1830_vm1, %v1829_v6  ;;  %v611_v9 = vsel %vm542_vm0, %v1956_v8, 0  ;;  %s1599_s9 = sshll.u32 %s2279_s20, 4  ;;  %v1974_v11 = vld [vmem:[%s425_s8] sm:$0xff]   ;;  %vm525_vm2 = vcmask 7168   ;;  %v572_v14 = vlaneseq  ;;  %s506_s15 = scalar_lea.vmem %s2266_s1, %s2279_s20 }
  0x29   : > { %545 = vst.msk [vmem:[#allocation4 + $0x10] sm:$0xff] %vm542_vm0, %v1829_v6  ;;  %546 = vst.msk [vmem:[#allocation4 + $0x18] sm:$0xff] %vm542_vm0, %v1829_v6  ;;  %1721 = vset.pattern.permute.xlu0 %v1831_v7  ;;  %1722 = vset.pattern.permute.xlu1 %v1831_v7  ;;  %s499_s12 = scalar_lea.vmem %s2265_s0, %s1599_s9  ;;  %v1832_v13 = vmov -1e+30   ;;  %v1583_v17 = vld [vmem:[%s506_s15] ss:$0 sm:$0xff] }
  0x2a   : > { %547 = vst.msk [vmem:[#allocation4 + $0x20] sm:$0xff] %vm542_vm0, %v1829_v6  ;;  %548 = vst.msk [vmem:[#allocation4 + $0x28] sm:$0xff] %vm542_vm0, %v1829_v6  ;;  %1630 = vmatprep.subr.bf16.mxu1 %v1829_v6  ;;  %1632 = vmatprep.mubr.msk.bf16.mxu1 %vm1830_vm1, %v1829_v6  ;;  %v551_v10 = vld [vmem:[%s499_s12] sm:$0xff]  ;;  %v552_v12 = vld [vmem:[%s499_s12 + $0x8] sm:$0xff]  ;;  %v580_v15 = vand.u32 127, %v572_v14  ;;  %v573_v16 = vshrl.u32 %v572_v14, 7 }
  0x2b   : > { %549 = vst.msk [vmem:[#allocation4 + $0x30] sm:$0xff] %vm542_vm0, %v1829_v6  ;;  %550 = vst.msk [vmem:[#allocation4 + $0x38] sm:$0xff] %vm542_vm0, %v1829_v6  ;;  %1625 = vmatpush3.bf16.xpose.msra.mxu0 %v611_v9  ;;  %556 = vperm.xlu0 %1721, %v551_v10   ;;  %v1833_v21 = vmov -1e+09   ;;  %vm656_vm5 = vcmask 130048   ;;  %v2039_v44 = vld [vmem:[%s439_s17] sm:$0xff]  }
  0x2c   : > { %1642 = vmatprep.subr.bf16.mxu0 %v1829_v6  ;;  %526 = vst.msk [vmem:[#allocation2] sm:$0xff] %vm525_vm2, %v1832_v13  ;;  %527 = vst.msk [vmem:[#allocation2 + $0x8] sm:$0xff] %vm525_vm2, %v1832_v13  ;;  %vm584_vm3 = vcmp.ge.s32.totalorder %v573_v16, %v580_v15  ;;  %v574_v20 = vadd.s32 8, %v573_v16  ;;  %1631 = vmatpush3.bf16.msra.mxu1 %v2039_v44  ;;  %vm1378_vm6 = vcmask 523264   ;;  %s1600_s28 = sshll.u32 %s2279_s20, 3  ;;  %vm1381_vm7 = vcmask 785408  }
  0x2d   : > { %528 = vst.msk [vmem:[#allocation2 + $0x10] sm:$0xff] %vm525_vm2, %v1832_v13  ;;  %529 = vst.msk [vmem:[#allocation2 + $0x18] sm:$0xff] %vm525_vm2, %v1832_v13  ;;  %v586_v22 = vsel %vm584_vm3, 0.0, %v1833_v21  ;;  %1636 = vmatprep.subr.bf16.mxu1 %v1829_v6  ;;  %s518_s6 = scalar_lea.vmem %s2270_s5, %s1600_s28 }
  0x2e   : > { %530 = vst.msk [vmem:[#allocation2 + $0x20] sm:$0xff] %vm525_vm2, %v1832_v13  ;;  %531 = vst.msk [vmem:[#allocation2 + $0x28] sm:$0xff] %vm525_vm2, %v1832_v13  ;;  %vm585_vm4 = vcmp.ge.s32.totalorder %v574_v20, %v580_v15 }
  0x2f   : > { %561 = vperm.xlu0 %1721, %v552_v12   ;;  %532 = vst.msk [vmem:[#allocation2 + $0x30] sm:$0xff] %vm525_vm2, %v1832_v13  ;;  %533 = vst.msk [vmem:[#allocation2 + $0x38] sm:$0xff] %vm525_vm2, %v1832_v13  ;;  %v587_v26 = vsel %vm585_vm4, 0.0, %v1833_v21 }
  0x30   : > { %534 = vst.msk [vmem:[#allocation3] sm:$0xff] %vm525_vm2, %v1829_v6  ;;  %535 = vst.msk [vmem:[#allocation3 + $0x8] sm:$0xff] %vm525_vm2, %v1829_v6 }
  0x31   : > { %536 = vst.msk [vmem:[#allocation3 + $0x10] sm:$0xff] %vm525_vm2, %v1829_v6  ;;  %537 = vst.msk [vmem:[#allocation3 + $0x18] sm:$0xff] %vm525_vm2, %v1829_v6 }
  0x32   : > { %1627 = vmatmul.mubr.msk.bf16.vlgmr.msra.gmra.mxu0 %vm542_vm0, %v1974_v11  ;;  %538 = vst.msk [vmem:[#allocation3 + $0x20] sm:$0xff] %vm525_vm2, %v1829_v6  ;;  %539 = vst.msk [vmem:[#allocation3 + $0x28] sm:$0xff] %vm525_vm2, %v1829_v6 }
  0x33   : > { %1644 = vmatprep.mubr.msk.bf16.mxu0 %vm1830_vm1, %v1829_v6  ;;  %540 = vst.msk [vmem:[#allocation3 + $0x30] sm:$0xff] %vm525_vm2, %v1829_v6  ;;  %541 = vst.msk [vmem:[#allocation3 + $0x38] sm:$0xff] %vm525_vm2, %v1829_v6  ;;  %v2016_v36 = vld [vmem:[#allocation2] sm:$0xff]  ;;  %v2021_v39 = vld [vmem:[#allocation2 + $0x8] sm:$0xff] }
  0xa6   : > { %v557_v18 = vpop.permute.xlu0 %556 }
  0xa7   : > { %v570_v19 = vadd.f32 %v1583_v17, %v557_v18 }
  0xa9   : > { %v2008_v24 = vadd.f32 %v586_v22, %v570_v19 }
  0xaa   : > { %v562_v23 = vpop.permute.xlu0 %561 }
  0xab   : > { %v571_v25 = vadd.f32 %v1583_v17, %v562_v23 }
  0xad   : > { %v2011_v30 = vadd.f32 %v587_v26, %v571_v25 }
  0xf2   : > { %v647_v27 = vpop.f32.mrf.mxu0 }
  0xf3   : > { %v648_v28 = vadd.f32 %v647_v27, %v2008_v24 }
  0xf4   : > { %v1628_v29 = vpop.f32.mrf.mxu0 }
  0xf5   : > { %v657_v31 = vsel %vm656_vm5, %v648_v28, -inf  ;;  %v2108_v29 = vld [vmem:[#allocation2 + $0x10] sm:$0xff] }
  0xf6   : > { %658 = vmax.xlane.f32.xlu1 %v657_v31  ;;  %v650_v32 = vpop.f32.mrf.mxu0 }
  0xf7   : > { %v651_v33 = vadd.f32 %v650_v32, %v2011_v30  ;;  %v2113_v32 = vld [vmem:[#allocation2 + $0x18] sm:$0xff] }
  0xf8   : > { %v1629_v34 = vpop.f32.mrf.mxu0 }
  0xf9   : > { %v660_v35 = vsel %vm656_vm5, %v651_v33, -inf }
  0xfa   : > { %661 = vmax.xlane.f32.xlu1 %v660_v35  ;;  %v2123_v35 = vld [vmem:[#allocation2 + $0x20] sm:$0xff] }
 0x17f   : > { %v659_v37 = vpop.xlane.xlu1 %658 }
 0x180   : > { %v2019_v38 = vmax.f32 %v2016_v36, %v659_v37 }
 0x182   : > { %v665_v40 = vsub.f32 %v2016_v36, %v2019_v38  ;;  %771 = vst.msk [vmem:[#allocation2] sm:$0xff] %vm525_vm2, %v2019_v38  ;;  %673 = vperm.xlu0 %1721, %v2019_v38  }
 0x183   : > { %v662_v41 = vpop.xlane.xlu1 %661 }
 0x184   : > { %v2029_v42 = vmax.f32 %v2021_v39, %v662_v41 }
 0x186   : > { %v666_v43 = vsub.f32 %v2021_v39, %v2029_v42  ;;  %772 = vst.msk [vmem:[#allocation2 + $0x8] sm:$0xff] %vm525_vm2, %v2029_v42  ;;  %678 = vperm.xlu1 %1722, %v2029_v42   ;;  %775 = vrot.lane.b32.xlu0 %v1956_v8, %s1834_s16 }
 0x18a   : > { %773 = vrot.lane.b32.xlu0 %v1974_v11, %s1834_s16  ;;  %1111 = vrot.lane.b32.xlu1 %v1956_v8, %s1835_s25 }
 0x18e   : > { %943 = vrot.lane.b32.xlu0 %v1956_v8, %s1836_s26 }
 0x192   : > { %941 = vrot.lane.b32.xlu0 %v1974_v11, %s1836_s26 }
 0x196   : > { %1109 = vrot.lane.b32.xlu0 %v1974_v11, %s1835_s25 }
 0x1fd   : > { %v674_v45 = vpop.permute.xlu0 %673 }
 0x1fe   : > { %v681_v46 = vsub.f32 %v648_v28, %v674_v45 }
 0x200   : > { %v683_v47 = vmul.f32 1.442695, %v681_v46  ;;  %v2133_v46 = vld [vmem:[#allocation2 + $0x28] sm:$0xff] }
 0x201   : > { %v679_v48 = vpop.permute.xlu1 %678  ;;  %v776_v51 = vpop.permute.xlu0 %775 }
 0x202   : > { %v682_v49 = vsub.f32 %v651_v33, %v679_v48  ;;  %1741 = vpow2.f32 %v683_v47  ;;  %v781_v55 = vsel %vm542_vm0, %v776_v51, 0 }
 0x204   : > { %v685_v50 = vmul.f32 1.442695, %v682_v49 }
 0x205   : > { %v774_v54 = vpop.permute.xlu0 %773  ;;  %v1112_v59 = vpop.permute.xlu1 %1111 }
 0x206   : > { %1743 = vpow2.f32 %v685_v50  ;;  %v1117_v61 = vsel %vm542_vm0, %v1112_v59, 0  ;;  %v2143_v50 = vld [vmem:[#allocation2 + $0x30] sm:$0xff] }
 0x209   : > { %v944_v57 = vpop.permute.xlu0 %943 }
 0x20a   : > { %v949_v58 = vsel %vm542_vm0, %v944_v57, 0 }
 0x20d   : > { %v942_v60 = vpop.permute.xlu0 %941 }
 0x20f   : > { %v2053_v52 = vpop.eup %1741 }
 0x211   : > { %v1110_v62 = vpop.permute.xlu0 %1109 }
 0x213   : > { %v2055_v53 = vpop.eup %1743 }
 0x214   : > { %v716_v56 = vpack.c.bf16 %v2055_v53, %v2053_v52 }
 0x216   : > { %1633 = vmatmul.mubr.msk.bf16.vlgmr.msra.gmra.mxu1 %vm656_vm5, %v716_v56  ;;  %v2153_v56 = vld [vmem:[#allocation2 + $0x38] sm:$0xff] }
 0x217   : > { %1637 = vmatpush3.bf16.xpose.msra.mxu1 %v781_v55  ;;  %1638 = vmatprep.mubr.msk.bf16.mxu1 %vm1830_vm1, %v1829_v6 }
 0x218   : > { %1648 = vmatprep.subr.bf16.mxu1 %v1829_v6 }
 0x21e   : > { %1639 = vmatmul.mubr.msk.bf16.vlgmr.msra.gmra.mxu1 %vm542_vm0, %v774_v54 }
 0x21f   : > { %1649 = vmatpush3.bf16.xpose.msra.mxu1 %v949_v58  ;;  %1650 = vmatprep.mubr.msk.bf16.mxu1 %vm1830_vm1, %v1829_v6 }
 0x220   : > { %1660 = vmatprep.subr.bf16.mxu1 %v1829_v6 }
 0x226   : > { %1651 = vmatmul.mubr.msk.bf16.vlgmr.msra.gmra.mxu1 %vm542_vm0, %v942_v60 }
 0x227   : > { %1661 = vmatpush3.bf16.xpose.msra.mxu1 %v1117_v61  ;;  %1662 = vmatprep.mubr.msk.bf16.mxu1 %vm1830_vm1, %v1829_v6  ;;  %v691_v61 = vsel %vm656_vm5, %v2053_v52, 0.0 }
 0x22e   : > { %1663 = vmatmul.mubr.msk.bf16.vlgmr.msra.gmra.mxu1 %vm542_vm0, %v1110_v62  ;;  %v694_v62 = vsel %vm656_vm5, %v2055_v53, 0.0 }
 0x2d6   : > { %v2074_v63 = vpop.f32.mrf.mxu1 }
 0x2d8   : > { %v1634_v0 = vpop.f32.mrf.mxu1 }
 0x2da   : > { %v2076_v1 = vpop.f32.mrf.mxu1 }
 0x2dc   : > { %v1635_v2 = vpop.f32.mrf.mxu1 }
 0x2de   : > { %v817_v3 = vpop.f32.mrf.mxu1 }
 0x2df   : > { %v2079_v4 = vadd.f32 %v817_v3, %v2008_v24 }
 0x2e0   : > { %v1640_v5 = vpop.f32.mrf.mxu1 }
 0x2e1   : > { %v827_v7 = vsel %vm656_vm5, %v2079_v4, -inf }
 0x2e2   : > { %828 = vmax.xlane.f32.xlu1 %v827_v7  ;;  %v820_v8 = vpop.f32.mrf.mxu1 }
 0x2e3   : > { %v2084_v9 = vadd.f32 %v820_v8, %v2011_v30 }
 0x2e4   : > { %v1641_v10 = vpop.f32.mrf.mxu1 }
 0x2e5   : > { %v830_v11 = vsel %vm656_vm5, %v2084_v9, -inf }
 0x2e6   : > { %831 = vmax.xlane.f32.xlu0 %v830_v11  ;;  %v985_v12 = vpop.f32.mrf.mxu1 }
 0x2e7   : > { %v2089_v13 = vadd.f32 %v985_v12, %v2008_v24 }
 0x2e8   : > { %v1652_v14 = vpop.f32.mrf.mxu1 }
 0x2e9   : > { %v995_v15 = vsel %vm656_vm5, %v2089_v13, -inf }
 0x2ea   : > { %996 = vmax.xlane.f32.xlu0 %v995_v15  ;;  %v988_v16 = vpop.f32.mrf.mxu1 }
 0x2eb   : > { %v2094_v17 = vadd.f32 %v988_v16, %v2011_v30 }
 0x2ec   : > { %v1653_v18 = vpop.f32.mrf.mxu1 }
 0x2ed   : > { %v998_v19 = vsel %vm656_vm5, %v2094_v17, -inf }
 0x2ee   : > { %999 = vmax.xlane.f32.xlu1 %v998_v19  ;;  %v1153_v20 = vpop.f32.mrf.mxu1 }
 0x2ef   : > { %v2099_v21 = vadd.f32 %v1153_v20, %v2008_v24 }
 0x2f0   : > { %v1664_v22 = vpop.f32.mrf.mxu1 }
 0x2f1   : > { %v1163_v23 = vsel %vm656_vm5, %v2099_v21, -inf }
 0x2f2   : > { %1164 = vmax.xlane.f32.xlu0 %v1163_v23  ;;  %v1156_v25 = vpop.f32.mrf.mxu1 }
 0x2f3   : > { %v2104_v26 = vadd.f32 %v1156_v25, %v2011_v30 }
 0x2f4   : > { %v1665_v27 = vpop.f32.mrf.mxu1 }
 0x2f5   : > { %v1166_v28 = vsel %vm656_vm5, %v2104_v26, -inf }
 0x2f6   : > { %1167 = vmax.xlane.f32.xlu1 %v1166_v28 }
 0x36b   : > { %v829_v31 = vpop.xlane.xlu1 %828 }
 0x36c   : > { %v2111_v24 = vmax.f32 %v2108_v29, %v829_v31 }
 0x36e   : > { %v835_v33 = vsub.f32 %v2108_v29, %v2111_v24  ;;  %939 = vst.msk [vmem:[#allocation2 + $0x10] sm:$0xff] %vm525_vm2, %v2111_v24  ;;  %843 = vperm.xlu0 %1721, %v2111_v24  }
 0x36f   : > { %v832_v30 = vpop.xlane.xlu0 %831 }
 0x370   : > { %v2121_v34 = vmax.f32 %v2113_v32, %v832_v30  ;;  %v837_v36 = vmul.f32 1.442695, %v835_v33 }
 0x372   : > { %v836_v37 = vsub.f32 %v2113_v32, %v2121_v34  ;;  %940 = vst.msk [vmem:[#allocation2 + $0x18] sm:$0xff] %vm525_vm2, %v2121_v34  ;;  %848 = vperm.xlu1 %1722, %v2121_v34   ;;  %v669_v32 = vmul.f32 1.442695, %v666_v43 }
 0x373   : > { %v997_v41 = vpop.xlane.xlu0 %996 }
 0x374   : > { %v2131_v45 = vmax.f32 %v2123_v35, %v997_v41  ;;  %v839_v30 = vmul.f32 1.442695, %v836_v37 }
 0x376   : > { %v1003_v47 = vsub.f32 %v2123_v35, %v2131_v45  ;;  %1107 = vst.msk [vmem:[#allocation2 + $0x20] sm:$0xff] %vm525_vm2, %v2131_v45  ;;  %1011 = vperm.xlu1 %1722, %v2131_v45   ;;  %v687_v45 = vld [vmem:[#allocation3] sm:$0xff] }
 0x377   : > { %v1000_v48 = vpop.xlane.xlu1 %999 }
 0x378   : > { %v2141_v49 = vmax.f32 %v2133_v46, %v1000_v48 }
 0x37a   : > { %v1004_v51 = vsub.f32 %v2133_v46, %v2141_v49  ;;  %1108 = vst.msk [vmem:[#allocation2 + $0x28] sm:$0xff] %vm525_vm2, %v2141_v49  ;;  %1016 = vperm.xlu0 %1721, %v2141_v49   ;;  %v1005_v46 = vmul.f32 1.442695, %v1003_v47 }
 0x37b   : > { %v1165_v54 = vpop.xlane.xlu0 %1164 }
 0x37c   : > { %v2151_v55 = vmax.f32 %v2143_v50, %v1165_v54  ;;  %v1007_v24 = vmul.f32 1.442695, %v1004_v51 }
 0x37e   : > { %v1171_v57 = vsub.f32 %v2143_v50, %v2151_v55  ;;  %1275 = vst.msk [vmem:[#allocation2 + $0x30] sm:$0xff] %vm525_vm2, %v2151_v55  ;;  %1179 = vperm.xlu1 %1722, %v2151_v55  }
 0x37f   : > { %v1168_v58 = vpop.xlane.xlu1 %1167 }
 0x380   : > { %v2161_v59 = vmax.f32 %v2153_v56, %v1168_v58 }
 0x382   : > { %v1172_v60 = vsub.f32 %v2153_v56, %v2161_v59  ;;  %1276 = vst.msk [vmem:[#allocation2 + $0x38] sm:$0xff] %vm525_vm2, %v2161_v59  ;;  %888 = vrot.lane.b32.xlu1 %v2039_v44, %s1834_s16  ;;  %1184 = vperm.xlu0 %1721, %v2161_v59  }
 0x384   : > { %v1175_v39 = vmul.f32 1.442695, %v1172_v60 }
 0x386   : > { %1224 = vrot.lane.b32.xlu1 %v2039_v44, %s1835_s25  ;;  %1056 = vrot.lane.b32.xlu0 %v2039_v44, %s1836_s26 }
 0x3a5   : > { %692 = vadd.xlane.f32.xlu0 %v691_v61 }
 0x3aa   : > { %695 = vadd.xlane.f32.xlu1 %v694_v62 }
 0x3e9   : > { %v844_v0 = vpop.permute.xlu0 %843 }
 0x3ea   : > { %v851_v2 = vsub.f32 %v2079_v4, %v844_v0 }
 0x3ec   : > { %v853_v3 = vmul.f32 1.442695, %v851_v2 }
 0x3ed   : > { %v849_v5 = vpop.permute.xlu1 %848 }
 0x3ee   : > { %1745 = vpow2.f32 %v853_v3  ;;  %v852_v7 = vsub.f32 %v2084_v9, %v849_v5  ;;  %v858_v3 = vld [vmem:[#allocation3 + $0x10] sm:$0xff] }
 0x3f0   : > { %v855_v8 = vmul.f32 1.442695, %v852_v7 }
 0x3f1   : > { %v1012_v10 = vpop.permute.xlu1 %1011 }
 0x3f2   : > { %1747 = vpow2.f32 %v855_v8  ;;  %v1019_v44 = vsub.f32 %v2089_v13, %v1012_v10  ;;  %v859_v8 = vld [vmem:[#allocation3 + $0x18] sm:$0xff] }
 0x3f4   : > { %v1021_v11 = vmul.f32 1.442695, %v1019_v44 }
 0x3f5   : > { %v1017_v52 = vpop.permute.xlu0 %1016 }
 0x3f6   : > { %1749 = vpow2.f32 %v1021_v11  ;;  %v1020_v12 = vsub.f32 %v2094_v17, %v1017_v52  ;;  %v1026_v52 = vld [vmem:[#allocation3 + $0x20] sm:$0xff] }
 0x3f8   : > { %v1023_v53 = vmul.f32 1.442695, %v1020_v12 }
 0x3f9   : > { %v1180_v14 = vpop.permute.xlu1 %1179 }
 0x3fa   : > { %1751 = vpow2.f32 %v1023_v53  ;;  %v1187_v4 = vsub.f32 %v2099_v21, %v1180_v14  ;;  %v667_v21 = vmul.f32 1.442695, %v665_v40  ;;  %v702_v53 = vld [vmem:[#allocation4] sm:$0xff] }
 0x3fb   : > { %v1746_v15 = vpop.eup %1745 }
 0x3fc   : > { %v1189_v16 = vmul.f32 1.442695, %v1187_v4  ;;  %v862_v18 = vsel %vm656_vm5, %v1746_v15, 0.0 }
 0x3fd   : > { %863 = vadd.xlane.f32.xlu0 %v862_v18  ;;  %v1185_v9 = vpop.permute.xlu0 %1184  ;;  %v889_v19 = vpop.permute.xlu1 %888 }
 0x3fe   : > { %1753 = vpow2.f32 %v1189_v16  ;;  %v1188_v13 = vsub.f32 %v2104_v26, %v1185_v9  ;;  %1643 = vmatpush3.bf16.msra.mxu0 %v889_v19  ;;  %v1027_v16 = vld [vmem:[#allocation3 + $0x28] sm:$0xff] }
 0x3ff   : > { %v1748_v20 = vpop.eup %1747  ;;  %1654 = vmatprep.subr.bf16.mxu0 %v1829_v6 }
 0x400   : > { %v1191_v17 = vmul.f32 1.442695, %v1188_v13  ;;  %v865_v22 = vsel %vm656_vm5, %v1748_v20, 0.0  ;;  %v887_v23 = vpack.c.bf16 %v1748_v20, %v1746_v15 }
 0x401   : > { %866 = vadd.xlane.f32.xlu1 %v865_v22  ;;  %v1057_v25 = vpop.permute.xlu0 %1056  ;;  %v1225_v31 = vpop.permute.xlu1 %1224  ;;  %v1194_v22 = vld [vmem:[#allocation3 + $0x30] sm:$0xff] }
 0x402   : > { %1755 = vpow2.f32 %v1191_v17  ;;  %1645 = vmatmul.mubr.msk.bf16.vlgmr.msra.gmra.mxu0 %vm656_vm5, %v887_v23 }
 0x403   : > { %v1750_v27 = vpop.eup %1749  ;;  %1655 = vmatpush3.bf16.msra.mxu0 %v1057_v25  ;;  %1656 = vmatprep.mubr.msk.bf16.mxu0 %vm1830_vm1, %v1829_v6  ;;  %1757 = vpow2.f32 %v667_v21 }
 0x404   : > { %v1030_v26 = vsel %vm656_vm5, %v1750_v27, 0.0  ;;  %1666 = vmatprep.subr.bf16.mxu0 %v1829_v6  ;;  %1759 = vpow2.f32 %v837_v36 }
 0x405   : > { %1031 = vadd.xlane.f32.xlu1 %v1030_v26  ;;  %1761 = vpow2.f32 %v839_v30  ;;  %v1195_v26 = vld [vmem:[#allocation3 + $0x38] sm:$0xff] }
 0x406   : > { %1763 = vpow2.f32 %v1007_v24 }
 0x407   : > { %v1752_v38 = vpop.eup %1751  ;;  %1765 = vpow2.f32 %v669_v32 }
 0x408   : > { %v1033_v40 = vsel %vm656_vm5, %v1752_v38, 0.0  ;;  %v1055_v28 = vpack.c.bf16 %v1752_v38, %v1750_v27 }
 0x409   : > { %1034 = vadd.xlane.f32.xlu1 %v1033_v40 }
 0x40a   : > { %1657 = vmatmul.mubr.msk.bf16.vlgmr.msra.gmra.mxu0 %vm656_vm5, %v1055_v28 }
 0x40b   : > { %v1754_v41 = vpop.eup %1753  ;;  %1667 = vmatpush3.bf16.msra.mxu0 %v1225_v31  ;;  %1668 = vmatprep.mubr.msk.bf16.mxu0 %vm1830_vm1, %v1829_v6  ;;  %v1173_v6 = vmul.f32 1.442695, %v1171_v57  ;;  %v688_v57 = vld [vmem:[#allocation3 + $0x8] sm:$0xff] }
 0x40c   : > { %v1198_v29 = vsel %vm656_vm5, %v1754_v41, 0.0  ;;  %v703_v31 = vld [vmem:[#allocation4 + $0x8] sm:$0xff] }
 0x40d   : > { %1199 = vadd.xlane.f32.xlu1 %v1198_v29  ;;  %1767 = vpow2.f32 %v1173_v6 }
 0x40e   : > { %1769 = vpow2.f32 %v1005_v46 }
 0x40f   : > { %v1756_v33 = vpop.eup %1755  ;;  %1771 = vpow2.f32 %v1175_v39 }
 0x410   : > { %v1201_v34 = vsel %vm656_vm5, %v1756_v33, 0.0  ;;  %v1223_v37 = vpack.c.bf16 %v1756_v33, %v1754_v41  ;;  %v1758_v48 = vpop.eup %1757 }
 0x411   : > { %1202 = vadd.xlane.f32.xlu1 %v1201_v34  ;;  %v1760_v42 = vpop.eup %1759  ;;  %v689_v47 = vmul.f32 %v1758_v48, %v687_v45 }
 0x412   : > { %1669 = vmatmul.mubr.msk.bf16.vlgmr.msra.gmra.mxu0 %vm656_vm5, %v1223_v37  ;;  %v1762_v43 = vpop.eup %1761  ;;  %v860_v5 = vmul.f32 %v1760_v42, %v858_v3 }
 0x413   : > { %706 = vperm.xlu0 %1721, %v1758_v48   ;;  %v1764_v49 = vpop.eup %1763  ;;  %v861_v44 = vmul.f32 %v1762_v43, %v859_v8 }
 0x414   : > { %v1766_v50 = vpop.eup %1765  ;;  %v1029_v20 = vmul.f32 %v1764_v49, %v1027_v16 }
 0x415   : > { %v690_v58 = vmul.f32 %v1766_v50, %v688_v57 }
 0x417   : > { %877 = vperm.xlu0 %1721, %v1760_v42  }
 0x41a   : > { %v1768_v51 = vpop.eup %1767 }
 0x41b   : > { %882 = vperm.xlu0 %1721, %v1762_v43   ;;  %v1770_v54 = vpop.eup %1769  ;;  %v1196_v25 = vmul.f32 %v1768_v51, %v1194_v22  ;;  %v873_v43 = vld [vmem:[#allocation4 + $0x10] sm:$0xff] }
 0x41c   : > { %v1772_v35 = vpop.eup %1771  ;;  %v1028_v14 = vmul.f32 %v1770_v54, %v1026_v52  ;;  %v1210_v52 = vld [vmem:[#allocation4 + $0x38] sm:$0xff] }
 0x41f   : > { %1050 = vperm.xlu0 %1721, %v1764_v49  }
 0x422   : > { %711 = vperm.xlu1 %1722, %v1766_v50  }
 0x423   : > { %1213 = vperm.xlu0 %1721, %v1768_v51  }
 0x426   : > { %1045 = vperm.xlu1 %1722, %v1770_v54  }
 0x427   : > { %1218 = vperm.xlu0 %1721, %v1772_v35  }
 0x42e   : > { %v693_v55 = vpop.xlane.xlu0 %692 }
 0x42f   : > { %v697_v56 = vadd.f32 %v693_v55, %v689_v47  ;;  %v1041_v55 = vld [vmem:[#allocation4 + $0x20] sm:$0xff] }
 0x431   : > { %700 = vst.msk [vmem:[#allocation3] sm:$0xff] %vm525_vm2, %v697_v56 }
 0x433   : > { %v696_v59 = vpop.xlane.xlu1 %695 }
 0x434   : > { %v698_v60 = vadd.f32 %v696_v59, %v690_v58 }
 0x436   : > { %701 = vst.msk [vmem:[#allocation3 + $0x8] sm:$0xff] %vm525_vm2, %v698_v60 }
 0x438   : > { %v1282_v61 = vld [vmem:[#allocation3] sm:$0xff] }
 0x439   : > { %1773 = vrcp.f32 %v1282_v61  ;;  %v1042_v61 = vld [vmem:[#allocation4 + $0x28] sm:$0xff] }
 0x43d   : > { %v1283_v62 = vld [vmem:[#allocation3 + $0x8] sm:$0xff] }
 0x43e   : > { %1775 = vrcp.f32 %v1283_v62 }
 0x446   : > { %v1774_v0 = vpop.eup %1773 }
 0x447   : > { %1288 = vperm.xlu0 %1721, %v1774_v0  }
 0x44b   : > { %v1776_v2 = vpop.eup %1775 }
 0x44c   : > { %1293 = vperm.xlu1 %1722, %v1776_v2  }
 0x486   : > { %v864_v7 = vpop.xlane.xlu0 %863 }
 0x487   : > { %v868_v10 = vadd.f32 %v864_v7, %v860_v5  ;;  %v1209_v7 = vld [vmem:[#allocation4 + $0x30] sm:$0xff] }
 0x489   : > { %870 = vst.msk [vmem:[#allocation3 + $0x10] sm:$0xff] %vm525_vm2, %v868_v10 }
 0x48a   : > { %v867_v11 = vpop.xlane.xlu1 %866 }
 0x48b   : > { %v869_v12 = vadd.f32 %v867_v11, %v861_v44 }
 0x48d   : > { %871 = vst.msk [vmem:[#allocation3 + $0x18] sm:$0xff] %vm525_vm2, %v869_v12 }
 0x48e   : > { %v707_v4 = vpop.permute.xlu0 %706  ;;  %v1032_v15 = vpop.xlane.xlu1 %1031 }
 0x48f   : > { %v714_v18 = vmul.f32 %v707_v4, %v702_v53  ;;  %v1036_v9 = vadd.f32 %v1032_v15, %v1028_v14 }
 0x490   : > { %v1300_v19 = vld [vmem:[#allocation3 + $0x10] sm:$0xff] }
 0x491   : > { %v767_v13 = vadd.f32 %v2074_v63, %v714_v18  ;;  %1038 = vst.msk [vmem:[#allocation3 + $0x20] sm:$0xff] %vm525_vm2, %v1036_v9  ;;  %1777 = vrcp.f32 %v1300_v19  ;;  %v1197_v63 = vmul.f32 %v1772_v35, %v1195_v26 }
 0x492   : > { %v1035_v17 = vpop.xlane.xlu1 %1034  ;;  %v878_v42 = vpop.permute.xlu0 %877 }
 0x493   : > { %769 = vst.msk [vmem:[#allocation4] sm:$0xff] %vm542_vm0, %v767_v13  ;;  %v1037_v23 = vadd.f32 %v1035_v17, %v1029_v20  ;;  %v885_v50 = vmul.f32 %v878_v42, %v873_v43 }
 0x494   : > { %v1301_v21 = vld [vmem:[#allocation3 + $0x18] sm:$0xff] }
 0x495   : > { %1039 = vst.msk [vmem:[#allocation3 + $0x28] sm:$0xff] %vm525_vm2, %v1037_v23  ;;  %1779 = vrcp.f32 %v1301_v21 }
 0x496   : > { %v1200_v27 = vpop.xlane.xlu1 %1199  ;;  %v883_v49 = vpop.permute.xlu0 %882 }
 0x497   : > { %v1204_v36 = vadd.f32 %v1200_v27, %v1196_v25 }
 0x498   : > { %v1318_v38 = vld [vmem:[#allocation3 + $0x20] sm:$0xff] }
 0x499   : > { %1206 = vst.msk [vmem:[#allocation3 + $0x30] sm:$0xff] %vm525_vm2, %v1204_v36  ;;  %1781 = vrcp.f32 %v1318_v38 }
 0x49a   : > { %v1203_v40 = vpop.xlane.xlu1 %1202  ;;  %v1051_v47 = vpop.permute.xlu0 %1050 }
 0x49b   : > { %v1205_v28 = vadd.f32 %v1203_v40, %v1197_v63  ;;  %v1054_v5 = vmul.f32 %v1051_v47, %v1042_v61 }
 0x49c   : > { %v1319_v30 = vld [vmem:[#allocation3 + $0x28] sm:$0xff] }
 0x49d   : > { %1207 = vst.msk [vmem:[#allocation3 + $0x38] sm:$0xff] %vm525_vm2, %v1205_v28  ;;  %1783 = vrcp.f32 %v1319_v30 }
 0x49e   : > { %v1778_v41 = vpop.eup %1777  ;;  %v712_v29 = vpop.permute.xlu1 %711 }
 0x49f   : > { %v715_v24 = vmul.f32 %v712_v29, %v703_v31  ;;  %1306 = vperm.xlu0 %1721, %v1778_v41   ;;  %v1214_v2 = vpop.permute.xlu0 %1213 }
 0x4a0   : > { %v1336_v33 = vld [vmem:[#allocation3 + $0x30] sm:$0xff]  ;;  %v1221_v11 = vmul.f32 %v1214_v2, %v1209_v7 }
 0x4a1   : > { %v768_v32 = vadd.f32 %v2076_v1, %v715_v24  ;;  %1785 = vrcp.f32 %v1336_v33  ;;  %v874_v1 = vld [vmem:[#allocation4 + $0x18] sm:$0xff] }
 0x4a2   : > { %v1780_v34 = vpop.eup %1779  ;;  %v886_v45 = vmul.f32 %v883_v49, %v874_v1  ;;  %v1046_v56 = vpop.permute.xlu1 %1045 }
 0x4a3   : > { %770 = vst.msk [vmem:[#allocation4 + $0x8] sm:$0xff] %vm542_vm0, %v768_v32  ;;  %1311 = vperm.xlu1 %1722, %v1780_v34   ;;  %v1053_v60 = vmul.f32 %v1046_v56, %v1041_v55  ;;  %v1219_v12 = vpop.permute.xlu0 %1218 }
 0x4a4   : > { %v1337_v37 = vld [vmem:[#allocation3 + $0x38] sm:$0xff]  ;;  %v1222_v15 = vmul.f32 %v1219_v12, %v1210_v52 }
 0x4a5   : > { %1787 = vrcp.f32 %v1337_v37 }
 0x4a6   : > { %v1782_v6 = vpop.eup %1781 }
 0x4a7   : > { %1324 = vperm.xlu0 %1721, %v1782_v6  }
 0x4aa   : > { %v1784_v48 = vpop.eup %1783  ;;  %v1281_v42 = vld [vmem:[#allocation4 + $0x8] sm:$0xff] }
 0x4ab   : > { %1329 = vperm.xlu1 %1722, %v1784_v48  }
 0x4ae   : > { %v1786_v46 = vpop.eup %1785 }
 0x4af   : > { %1342 = vperm.xlu0 %1721, %v1786_v46  }
 0x4b2   : > { %v1788_v39 = vpop.eup %1787 }
 0x4b3   : > { %1347 = vperm.xlu1 %1722, %v1788_v39   ;;  %v1280_v39 = vld [vmem:[#allocation4] sm:$0xff] }
 0x4c2   : > { %v928_v51 = vpop.f32.mrf.mxu0  ;;  %v1289_v19 = vpop.permute.xlu0 %1288 }
 0x4c3   : > { %v935_v54 = vadd.f32 %v928_v51, %v885_v50  ;;  %v1296_v50 = vmul.f32 %v1289_v19, %v1280_v39 }
 0x4c4   : > { %v1646_v35 = vpop.f32.mrf.mxu0 }
 0x4c5   : > { %937 = vst.msk [vmem:[#allocation4 + $0x10] sm:$0xff] %vm542_vm0, %v935_v54 }
 0x4c6   : > { %v931_v57 = vpop.f32.mrf.mxu0 }
 0x4c7   : > { %v936_v58 = vadd.f32 %v931_v57, %v886_v45  ;;  %v1294_v13 = vpop.permute.xlu1 %1293 }
 0x4c8   : > { %v1647_v59 = vpop.f32.mrf.mxu0  ;;  %v1297_v1 = vmul.f32 %v1294_v13, %v1281_v42 }
 0x4c9   : > { %938 = vst.msk [vmem:[#allocation4 + $0x18] sm:$0xff] %vm542_vm0, %v936_v58 }
 0x4ca   : > { %v1096_v62 = vpop.f32.mrf.mxu0 }
 0x4cb   : > { %v1103_v0 = vadd.f32 %v1096_v62, %v1053_v60 }
 0x4cc   : > { %v1658_v3 = vpop.f32.mrf.mxu0  ;;  %v1298_v17 = vld [vmem:[#allocation4 + $0x10] sm:$0xff] }
 0x4cd   : > { %1105 = vst.msk [vmem:[#allocation4 + $0x20] sm:$0xff] %vm542_vm0, %v1103_v0 }
 0x4ce   : > { %v1099_v8 = vpop.f32.mrf.mxu0 }
 0x4cf   : > { %v1104_v10 = vadd.f32 %v1099_v8, %v1054_v5 }
 0x4d0   : > { %v1659_v44 = vpop.f32.mrf.mxu0  ;;  %v1299_v23 = vld [vmem:[#allocation4 + $0x18] sm:$0xff] }
 0x4d1   : > { %1106 = vst.msk [vmem:[#allocation4 + $0x28] sm:$0xff] %vm542_vm0, %v1104_v10 }
 0x4d2   : > { %v1264_v53 = vpop.f32.mrf.mxu0 }
 0x4d3   : > { %v1271_v14 = vadd.f32 %v1264_v53, %v1221_v11 }
 0x4d4   : > { %v1670_v4 = vpop.f32.mrf.mxu0  ;;  %v1316_v36 = vld [vmem:[#allocation4 + $0x20] sm:$0xff] }
 0x4d5   : > { %1273 = vst.msk [vmem:[#allocation4 + $0x30] sm:$0xff] %vm542_vm0, %v1271_v14 }
 0x4d6   : > { %v1267_v16 = vpop.f32.mrf.mxu0 }
 0x4d7   : > { %v1272_v18 = vadd.f32 %v1267_v16, %v1222_v15 }
 0x4d8   : > { %v1671_v9 = vpop.f32.mrf.mxu0  ;;  %v1317_v63 = vld [vmem:[#allocation4 + $0x28] sm:$0xff] }
 0x4d9   : > { %1274 = vst.msk [vmem:[#allocation4 + $0x38] sm:$0xff] %vm542_vm0, %v1272_v18 }
 0x4dc   : > { %v1334_v41 = vld [vmem:[#allocation4 + $0x30] sm:$0xff] }
 0x4e0   : > { %v1335_v24 = vld [vmem:[#allocation4 + $0x38] sm:$0xff] }
 0x51a   : > { %v1307_v20 = vpop.permute.xlu0 %1306 }
 0x51b   : > { %v1314_v21 = vmul.f32 %v1307_v20, %v1298_v17 }
 0x51e   : > { %v1312_v22 = vpop.permute.xlu1 %1311 }
 0x51f   : > { %v1315_v25 = vmul.f32 %v1312_v22, %v1299_v23 }
 0x521   : > { %v1723_v27 = vpack.i.bf16 %v1315_v25, %v1314_v21 }
 0x522   : > { %v1325_v26 = vpop.permute.xlu0 %1324 }
 0x523   : > { %1724 = vrot.lane.b32.xlu0 %v1723_v27, %s1835_s25  ;;  %v1332_v40 = vmul.f32 %v1325_v26, %v1316_v36 }
 0x526   : > { %v1330_v38 = vpop.permute.xlu1 %1329 }
 0x527   : > { %v1333_v28 = vmul.f32 %v1330_v38, %v1317_v63 }
 0x529   : > { %v1728_v31 = vpack.i.bf16 %v1333_v28, %v1332_v40 }
 0x52a   : > { %v1343_v30 = vpop.permute.xlu0 %1342 }
 0x52b   : > { %1729 = vrot.lane.b32.xlu1 %v1728_v31, %s1836_s26  ;;  %v1350_v33 = vmul.f32 %v1343_v30, %v1334_v41 }
 0x52e   : > { %v1348_v29 = vpop.permute.xlu1 %1347 }
 0x52f   : > { %v1351_v32 = vmul.f32 %v1348_v29, %v1335_v24 }
 0x531   : > { %v1733_v34 = vpack.i.bf16 %v1351_v32, %v1350_v33 }
 0x533   : > { %1734 = vrot.lane.b32.xlu0 %v1733_v34, %s1834_s16 }
 0x595   : > { %v1725_v37 = vpop.permute.xlu0 %1724 }
 0x596   : > { %v1727_v48 = vunpack.i.h.bf16 %v1725_v37  ;;  %v1726_v46 = vunpack.i.l.bf16 %v1725_v37 }
 0x598   : > { %v1377_v54 = vsel %vm542_vm0, %v1297_v1, %v1727_v48  ;;  %v1376_v35 = vsel %vm542_vm0, %v1296_v50, %v1726_v46 }
 0x59d   : > { %v1730_v6 = vpop.permute.xlu1 %1729 }
 0x59e   : > { %v1732_v43 = vunpack.i.h.bf16 %v1730_v6  ;;  %v1731_v49 = vunpack.i.l.bf16 %v1730_v6 }
 0x5a0   : > { %v1380_v55 = vsel %vm1378_vm6, %v1377_v54, %v1732_v43  ;;  %v1379_v56 = vsel %vm1378_vm6, %v1376_v35, %v1731_v49 }
 0x5a5   : > { %v1735_v51 = vpop.permute.xlu0 %1734 }
 0x5a6   : > { %v1737_v45 = vunpack.i.h.bf16 %v1735_v51  ;;  %v1736_v47 = vunpack.i.l.bf16 %v1735_v51 }
 0x5a8   : > { %v1383_v57 = vsel %vm1381_vm7, %v1380_v55, %v1737_v45  ;;  %v1382_v58 = vsel %vm1381_vm7, %v1379_v56, %v1736_v47 }
 0x5a9   : > { %v1606_v59 = vpack.c.bf16 %v1383_v57, %v1382_v58 }
 0x5ab   : > { %1607 = vst [vmem:[%s518_s6] sm:$0xff] %v1606_v59  }
 0x5ac PF: > { %s15_s22 = sadd.s32 1, %s1827_s22   ;;  %s2272_s18 = smov %s1815_s19 }
 0x5ad   : > { %p12_p10 = scmp.ge.s32.totalorder %s15_s22, 4   ;;  %s2273_s19 = smov %s1906_s27 }
 0x5ae   : > { %s2274_s20 = smov %s1823_s21  ;;  %s2275_s21 = smov %s2277_s23 }
 0x5af   :  { %14 = sbr.rel (!%p12_p10) target bundleno = 3 (0x3), region = 237 }

// kernel: transformer_forward.37
= control target key start
LH: loop header
LB: loop body
LE: loop exit
PB: predicated region body
PF: predicated region fallthrough
CT: control target
= control target key end

     0   :  { %v348_v1 = vmov 0   ;;  %v229_v19 = vlaneseq  ;;  %s438_s1 = inlined_call_operand.vmem [shape: bf16[128,256], index: 1, kind: input, shape index: {}]   ;;  %s439_s0 = inlined_call_operand.vmem [shape: bf16[32,128], index: 0, kind: input, shape index: {}]   ;;  %s440_s2 = inlined_call_operand.vmem [shape: f32[1,256], index: 2, kind: input, shape index: {}]   ;;  %s441_s3 = inlined_call_operand.vmem [shape: bf16[32,256], index: 3, kind: output, shape index: {}]  }
   0x1   :  { %v322_v0 = vld [vmem:[%s438_s1 + $0x74] ss:$8 sps:$4 sm:$0xff]   ;;  %179 = vmatprep.mubr.bf16.mxu0 %v348_v1  ;;  %189 = vmatprep.mubr.bf16.mxu1 %v348_v1  ;;  %v324_v2 = vld [vmem:[%s438_s1 + $0x70] ss:$8 sps:$4 sm:$0xff]   ;;  %v325_v3 = vld [vmem:[%s438_s1 + $0x64] ss:$8 sps:$4 sm:$0xff]  }
   0x2   :  { %147 = vmatprep.subr.bf16.mxu0 %v322_v0  ;;  %305 = vmatprep.subr.bf16.mxu1 %v322_v0  ;;  %v327_v4 = vld [vmem:[%s438_s1 + $0x60] ss:$8 sps:$4 sm:$0xff]   ;;  %v328_v5 = vld [vmem:[%s438_s1 + $0x54] ss:$8 sps:$4 sm:$0xff]   ;;  %v330_v6 = vld [vmem:[%s438_s1 + $0x50] ss:$8 sps:$4 sm:$0xff]  }
   0x3   :  { %148 = vmatpush1.bf16.msra.mxu0 %v324_v2  ;;  %313 = vmatpush1.bf16.msra.mxu1 %v324_v2  ;;  %v331_v7 = vld [vmem:[%s438_s1 + $0x44] ss:$8 sps:$4 sm:$0xff]   ;;  %v333_v8 = vld [vmem:[%s438_s1 + $0x40] ss:$8 sps:$4 sm:$0xff]   ;;  %v334_v9 = vld [vmem:[%s438_s1 + $0x34] ss:$8 sps:$4 sm:$0xff]  }
   0x4   :  { %149 = vmatprep.subr.bf16.mxu0 %v325_v3  ;;  %306 = vmatprep.subr.bf16.mxu1 %v325_v3  ;;  %v336_v10 = vld [vmem:[%s438_s1 + $0x30] ss:$8 sps:$4 sm:$0xff]   ;;  %v337_v11 = vld [vmem:[%s438_s1 + $0x24] ss:$8 sps:$4 sm:$0xff]   ;;  %v339_v12 = vld [vmem:[%s438_s1 + $0x20] ss:$8 sps:$4 sm:$0xff]  }
   0x5   :  { %v340_v13 = vld [vmem:[%s438_s1 + $0x14] ss:$8 sps:$4 sm:$0xff]   ;;  %v342_v14 = vld [vmem:[%s438_s1 + $0x10] ss:$8 sps:$4 sm:$0xff]   ;;  %v343_v15 = vld [vmem:[%s438_s1 + $0x4] ss:$8 sps:$4 sm:$0xff]  }
   0x6   :  { %v345_v16 = vld [vmem:[%s438_s1] ss:$8 sps:$4 sm:$0xff]   ;;  %v230_v20 = vshrl.u32 %v229_v19, 7 }
   0x7   :  { %150 = vmatpush1.bf16.msra.mxu0 %v327_v4  ;;  %314 = vmatpush1.bf16.msra.mxu1 %v327_v4  ;;  %v346_v17 = vld [vmem:[%s439_s0] sm:$0xff]   ;;  %v347_v18 = vld [vmem:[%s439_s0 + $0x8] sm:$0xff]  }
   0x8   :  { %151 = vmatprep.subr.bf16.mxu0 %v328_v5  ;;  %307 = vmatprep.subr.bf16.mxu1 %v328_v5  ;;  %v231_v21 = vsub.s32 0, %v230_v20  ;;  %v235_v22 = vsub.s32 1, %v230_v20  ;;  %v227_v23 = vld [vmem:[%s440_s2] sm:$0x3] }
   0xa   :  { %v232_v24 = vrot.slane %v227_v23, %v231_v21  ;;  %v236_v25 = vrot.slane %v227_v23, %v235_v22 }
   0xb   :  { %152 = vmatpush1.bf16.msra.mxu0 %v330_v6  ;;  %315 = vmatpush1.bf16.msra.mxu1 %v330_v6 }
   0xc   :  { %153 = vmatprep.subr.bf16.mxu0 %v331_v7  ;;  %308 = vmatprep.subr.bf16.mxu1 %v331_v7 }
   0xf   :  { %154 = vmatpush1.bf16.msra.mxu0 %v333_v8  ;;  %316 = vmatpush1.bf16.msra.mxu1 %v333_v8 }
  0x10   :  { %155 = vmatprep.subr.bf16.mxu0 %v334_v9  ;;  %309 = vmatprep.subr.bf16.mxu1 %v334_v9 }
  0x13   :  { %156 = vmatpush1.bf16.msra.mxu0 %v336_v10  ;;  %317 = vmatpush1.bf16.msra.mxu1 %v336_v10 }
  0x14   :  { %157 = vmatprep.subr.bf16.mxu0 %v337_v11  ;;  %310 = vmatprep.subr.bf16.mxu1 %v337_v11 }
  0x17   :  { %158 = vmatpush1.bf16.msra.mxu0 %v339_v12  ;;  %318 = vmatpush1.bf16.msra.mxu1 %v339_v12 }
  0x18   :  { %159 = vmatprep.subr.bf16.mxu0 %v340_v13  ;;  %311 = vmatprep.subr.bf16.mxu1 %v340_v13 }
  0x1b   :  { %160 = vmatpush1.bf16.msra.mxu0 %v342_v14  ;;  %319 = vmatpush1.bf16.msra.mxu1 %v342_v14 }
  0x1c   :  { %161 = vmatprep.subr.bf16.mxu0 %v343_v15  ;;  %312 = vmatprep.subr.bf16.mxu1 %v343_v15 }
  0x1f   :  { %162 = vmatpush1.bf16.msra.mxu0 %v345_v16  ;;  %320 = vmatpush1.bf16.msra.mxu1 %v345_v16 }
  0x22   :  { %180 = vmatmul.mubr.bf16.vlgmr.msra.gmra.mxu0 %v346_v17  ;;  %190 = vmatmul.mubr.bf16.vlgmr.msra.gmra.mxu1 %v347_v18 }
  0xe2   :  { %v181_v26 = vpop.f32.mrf.mxu0  ;;  %v191_v27 = vpop.f32.mrf.mxu1 }
  0xe3   :  { %v239_v30 = vadd.f32 %v232_v24, %v181_v26  ;;  %v243_v31 = vadd.f32 %v232_v24, %v191_v27 }
  0xe4   :  { %v183_v28 = vpop.f32.mrf.mxu0  ;;  %v193_v29 = vpop.f32.mrf.mxu1 }
  0xe5   :  { %v240_v32 = vadd.f32 %v236_v25, %v183_v28  ;;  %v244_v33 = vadd.f32 %v236_v25, %v193_v29 }
  0xe6   :  { %v185_v34 = vpop.f32.mrf.mxu0  ;;  %v195_v35 = vpop.f32.mrf.mxu1 }
  0xe7   :  { %v301_v36 = vpack.c.bf16 %v240_v32, %v239_v30  ;;  %v303_v37 = vpack.c.bf16 %v244_v33, %v243_v31  ;;  %v241_v40 = vadd.f32 %v232_v24, %v185_v34  ;;  %v245_v41 = vadd.f32 %v232_v24, %v195_v35 }
  0xe8   :  { %v187_v38 = vpop.f32.mrf.mxu0  ;;  %v197_v39 = vpop.f32.mrf.mxu1 }
  0xe9   :  { %271 = vst [vmem:[%s441_s3] sm:$0xff] %v301_v36  ;;  %273 = vst [vmem:[%s441_s3 + $0x10] sm:$0xff] %v303_v37  ;;  %v242_v42 = vadd.f32 %v236_v25, %v187_v38  ;;  %v246_v43 = vadd.f32 %v236_v25, %v197_v39 }
  0xeb   :  { %v302_v44 = vpack.c.bf16 %v242_v42, %v241_v40  ;;  %v304_v45 = vpack.c.bf16 %v246_v43, %v245_v41 }
  0xed   :  { %272 = vst [vmem:[%s441_s3 + $0x8] sm:$0xff] %v302_v44  ;;  %274 = vst [vmem:[%s441_s3 + $0x18] sm:$0xff] %v304_v45 }

// kernel: transformer_forward.28
= control target key start
LH: loop header
LB: loop body
LE: loop exit
PB: predicated region body
PF: predicated region fallthrough
CT: control target
= control target key end

     0   :  { %v681_v1 = vmov 0   ;;  %v60_v35 = vlaneseq  ;;  %s853_s1 = inlined_call_operand.vmem [shape: bf16[128,256], index: 1, kind: input, shape index: {}]   ;;  %s854_s0 = inlined_call_operand.vmem [shape: bf16[32,128], index: 0, kind: input, shape index: {}, may-alias: {0,5}]   ;;  %s855_s3 = inlined_call_operand.vmem [shape: bf16[256,128], index: 3, kind: input, shape index: {}]   ;;  %s856_s2 = inlined_call_operand.vmem [shape: f32[1,256], index: 2, kind: input, shape index: {}]   ;;  %s857_s5 = inlined_call_operand.vmem [shape: bf16[32,128], index: 5, kind: input, shape index: {}, may-alias: {0,5}]   ;;  %s858_s4 = inlined_call_operand.vmem [shape: f32[1,128], index: 4, kind: input, shape index: {}]   ;;  %s859_s6 = inlined_call_operand.vmem [shape: f32[1,128], index: 6, kind: input, shape index: {}]   ;;  %s860_s7 = inlined_call_operand.vmem [shape: f32[1,128], index: 7, kind: input, shape index: {}]   ;;  %s861_s8 = inlined_call_operand.vmem [shape: bf16[32,128], index: 8, kind: output, shape index: {}]  }
   0x1   :  { %v631_v0 = vld [vmem:[%s853_s1 + $0x74] ss:$8 sps:$4 sm:$0xff]   ;;  %194 = vmatprep.mubr.bf16.mxu0 %v681_v1  ;;  %v633_v2 = vld [vmem:[%s853_s1 + $0x70] ss:$8 sps:$4 sm:$0xff]   ;;  %v634_v3 = vld [vmem:[%s853_s1 + $0x64] ss:$8 sps:$4 sm:$0xff]  }
   0x2   :  { %162 = vmatprep.subr.bf16.mxu0 %v631_v0  ;;  %v636_v4 = vld [vmem:[%s853_s1 + $0x60] ss:$8 sps:$4 sm:$0xff]   ;;  %v637_v5 = vld [vmem:[%s853_s1 + $0x54] ss:$8 sps:$4 sm:$0xff]   ;;  %v639_v6 = vld [vmem:[%s853_s1 + $0x50] ss:$8 sps:$4 sm:$0xff]  }
   0x3   :  { %163 = vmatpush1.bf16.msra.mxu0 %v633_v2  ;;  %v640_v7 = vld [vmem:[%s853_s1 + $0x44] ss:$8 sps:$4 sm:$0xff]   ;;  %v642_v8 = vld [vmem:[%s853_s1 + $0x40] ss:$8 sps:$4 sm:$0xff]   ;;  %v643_v9 = vld [vmem:[%s853_s1 + $0x34] ss:$8 sps:$4 sm:$0xff]  }
   0x4   :  { %164 = vmatprep.subr.bf16.mxu0 %v634_v3  ;;  %v645_v10 = vld [vmem:[%s853_s1 + $0x30] ss:$8 sps:$4 sm:$0xff]   ;;  %v646_v12 = vld [vmem:[%s853_s1 + $0x24] ss:$8 sps:$4 sm:$0xff]   ;;  %v648_v17 = vld [vmem:[%s853_s1 + $0x20] ss:$8 sps:$4 sm:$0xff]  }
   0x5   :  { %v657_v11 = vld [vmem:[%s855_s3 + $0x78] sm:$0xff]   ;;  %v659_v14 = vld [vmem:[%s855_s3 + $0x70] sm:$0xff]   ;;  %v661_v16 = vld [vmem:[%s855_s3 + $0x68] sm:$0xff]   ;;  %v61_v36 = vshrl.u32 %v60_v35, 7 }
   0x6   :  { %v658_v13 = vld [vmem:[%s855_s3 + $0x38] sm:$0xff]   ;;  %602 = vmatprep.subr.bf16.mxu1 %v657_v11  ;;  %v660_v15 = vld [vmem:[%s855_s3 + $0x30] sm:$0xff]   ;;  %v662_v19 = vld [vmem:[%s855_s3 + $0x28] sm:$0xff]  }
   0x7   :  { %165 = vmatpush1.bf16.msra.mxu0 %v636_v4  ;;  %603 = vmatpush3.bf16.msra.mxu1 %v658_v13  ;;  %v649_v18 = vld [vmem:[%s853_s1 + $0x14] ss:$8 sps:$4 sm:$0xff]   ;;  %v651_v20 = vld [vmem:[%s853_s1 + $0x10] ss:$8 sps:$4 sm:$0xff]   ;;  %v663_v21 = vld [vmem:[%s855_s3 + $0x60] sm:$0xff]   ;;  %v66_v37 = vsub.s32 1, %v61_v36 }
   0x8   :  { %166 = vmatprep.subr.bf16.mxu0 %v637_v5  ;;  %604 = vmatprep.subr.bf16.mxu1 %v659_v14  ;;  %v652_v22 = vld [vmem:[%s853_s1 + $0x4] ss:$8 sps:$4 sm:$0xff]   ;;  %v665_v24 = vld [vmem:[%s855_s3 + $0x58] sm:$0xff]   ;;  %v654_v25 = vld [vmem:[%s853_s1] ss:$8 sps:$4 sm:$0xff]   ;;  %v62_v38 = vsub.s32 0, %v61_v36 }
   0x9   :  { %v664_v23 = vld [vmem:[%s855_s3 + $0x20] sm:$0xff]   ;;  %v666_v26 = vld [vmem:[%s855_s3 + $0x18] sm:$0xff]   ;;  %v656_v28 = vld [vmem:[%s854_s0 + $0x8] sm:$0xff]  }
   0xa   :  { %v655_v27 = vld [vmem:[%s854_s0] sm:$0xff]   ;;  %v667_v29 = vld [vmem:[%s855_s3 + $0x50] sm:$0xff]   ;;  %v669_v31 = vld [vmem:[%s855_s3 + $0x48] sm:$0xff]  }
   0xb   :  { %167 = vmatpush1.bf16.msra.mxu0 %v639_v6  ;;  %605 = vmatpush3.bf16.msra.mxu1 %v660_v15  ;;  %v668_v30 = vld [vmem:[%s855_s3 + $0x10] sm:$0xff]   ;;  %v670_v32 = vld [vmem:[%s855_s3 + $0x8] sm:$0xff]   ;;  %v671_v33 = vld [vmem:[%s855_s3 + $0x40] sm:$0xff]  }
   0xc   :  { %168 = vmatprep.subr.bf16.mxu0 %v640_v7  ;;  %606 = vmatprep.subr.bf16.mxu1 %v661_v16  ;;  %v672_v34 = vld [vmem:[%s855_s3] sm:$0xff]  }
   0xd   :  { %v58_v39 = vld [vmem:[%s856_s2] sm:$0x3] }
   0xe   :  { %v67_v41 = vrot.slane %v58_v39, %v66_v37  ;;  %v63_v42 = vrot.slane %v58_v39, %v62_v38  ;;  %v583_v7 = vld [vmem:[%s857_s5] sm:$0xff]  }
   0xf   :  { %169 = vmatpush1.bf16.msra.mxu0 %v642_v8  ;;  %607 = vmatpush3.bf16.msra.mxu1 %v662_v19  ;;  %v584_v11 = vunpack.c.l.bf16 %v583_v7  ;;  %v600_v19 = vld [vmem:[%s857_s5 + $0x8] sm:$0xff]  }
  0x10   :  { %170 = vmatprep.subr.bf16.mxu0 %v643_v9  ;;  %608 = vmatprep.subr.bf16.mxu1 %v663_v21  ;;  %v571_v9 = vld [vmem:[%s858_s4] ss:$0 sm:$0xff] }
  0x13   :  { %171 = vmatpush1.bf16.msra.mxu0 %v645_v10  ;;  %609 = vmatpush3.bf16.msra.mxu1 %v664_v23 }
  0x14   :  { %172 = vmatprep.subr.bf16.mxu0 %v646_v12  ;;  %610 = vmatprep.subr.bf16.mxu1 %v665_v24  ;;  %v588_v24 = vunpack.c.l.bf16 %v600_v19 }
  0x17   :  { %173 = vmatpush1.bf16.msra.mxu0 %v648_v17  ;;  %611 = vmatpush3.bf16.msra.mxu1 %v666_v26  ;;  %v585_v17 = vunpack.c.h.bf16 %v583_v7 }
  0x18   :  { %174 = vmatprep.subr.bf16.mxu0 %v649_v18  ;;  %612 = vmatprep.subr.bf16.mxu1 %v667_v29 }
  0x1b   :  { %175 = vmatpush1.bf16.msra.mxu0 %v651_v20  ;;  %613 = vmatpush3.bf16.msra.mxu1 %v668_v30  ;;  %v589_v30 = vunpack.c.h.bf16 %v600_v19 }
  0x1c   :  { %176 = vmatprep.subr.bf16.mxu0 %v652_v22  ;;  %614 = vmatprep.subr.bf16.mxu1 %v669_v31 }
  0x1f   :  { %177 = vmatpush1.bf16.msra.mxu0 %v654_v25  ;;  %615 = vmatpush3.bf16.msra.mxu1 %v670_v32 }
  0x20   :  { %616 = vmatprep.subr.bf16.mxu1 %v671_v33 }
  0x22   :  { %195 = vmatmul.mubr.bf16.vlgmr.msra.gmra.mxu0 %v655_v27 }
  0x23   :  { %204 = vmatprep.mubr.bf16.mxu0 %v681_v1  ;;  %617 = vmatpush3.bf16.msra.mxu1 %v672_v34 }
  0x2a   :  { %205 = vmatmul.mubr.bf16.gmra.mxu0 %v656_v28 }
  0xe2   :  { %v196_v40 = vpop.f32.mrf.mxu0 }
  0xe3   :  { %v197_v47 = vadd.f32 %v196_v40, %v63_v42 }
  0xe4   :  { %v198_v43 = vpop.f32.mrf.mxu0 }
  0xe5   :  { %v199_v45 = vadd.f32 %v198_v43, %v67_v41  ;;  %v215_v54 = vmax.f32 %v197_v47, 0.0 }
  0xe6   :  { %v200_v44 = vpop.f32.mrf.mxu0 }
  0xe7   :  { %v201_v46 = vadd.f32 %v200_v44, %v63_v42  ;;  %v216_v52 = vmax.f32 %v199_v45, 0.0 }
  0xe8   :  { %v202_v48 = vpop.f32.mrf.mxu0 }
  0xe9   :  { %v203_v49 = vadd.f32 %v202_v48, %v67_v41  ;;  %v217_v50 = vmax.f32 %v201_v46, 0.0 }
  0xea   :  { %v206_v51 = vpop.f32.mrf.mxu0 }
  0xeb   :  { %v218_v53 = vmax.f32 %v203_v49, 0.0  ;;  %v223_v57 = vpack.c.bf16 %v217_v50, %v215_v54  ;;  %v207_v61 = vadd.f32 %v206_v51, %v63_v42 }
  0xec   :  { %v208_v55 = vpop.f32.mrf.mxu0 }
  0xed   :  { %v224_v56 = vpack.c.bf16 %v218_v53, %v216_v52  ;;  %v209_v59 = vadd.f32 %v208_v55, %v67_v41  ;;  %v219_v3 = vmax.f32 %v207_v61, 0.0 }
  0xee   :  { %v210_v58 = vpop.f32.mrf.mxu0 }
  0xef   :  { %v211_v60 = vadd.f32 %v210_v58, %v63_v42  ;;  %391 = vmatprep.mubr.bf16.mxu1 %v224_v56  ;;  %v220_v1 = vmax.f32 %v209_v59, 0.0 }
  0xf0   :  { %v212_v62 = vpop.f32.mrf.mxu0  ;;  %392 = vmatmul.mubr.bf16.vlgmr.msra.gmra.mxu1 %v223_v57 }
  0xf1   :  { %v213_v63 = vadd.f32 %v212_v62, %v67_v41  ;;  %v221_v0 = vmax.f32 %v211_v60, 0.0 }
  0xf3   :  { %v222_v2 = vmax.f32 %v213_v63, 0.0  ;;  %v225_v5 = vpack.c.bf16 %v221_v0, %v219_v3  ;;  %v572_v63 = vld [vmem:[%s859_s6] ss:$0 sm:$0xff] }
  0xf4   :  { %v573_v3 = vld [vmem:[%s860_s7] ss:$0 sm:$0xff] }
  0xf5   :  { %v226_v4 = vpack.c.bf16 %v222_v2, %v220_v1 }
  0xf7   :  { %399 = vmatprep.mubr.bf16.mxu1 %v226_v4 }
  0xf8   :  { %400 = vmatmul.mubr.bf16.gmra.mxu1 %v225_v5 }
 0x1b0   :  { %v618_v6 = vpop.f32.mrf.mxu1 }
 0x1b2   :  { %v619_v8 = vpop.f32.mrf.mxu1 }
 0x1b3   :  { %v620_v10 = vadd.f32 %v619_v8, %v618_v6 }
 0x1b4   :  { %v621_v12 = vpop.f32.mrf.mxu1 }
 0x1b5   :  { %v430_v13 = vadd.f32 %v620_v10, %v571_v9 }
 0x1b6   :  { %v622_v14 = vpop.f32.mrf.mxu1 }
 0x1b7   :  { %v623_v15 = vadd.f32 %v622_v14, %v621_v12  ;;  %v442_v16 = vadd.f32 %v584_v11, %v430_v13 }
 0x1b8   :  { %v624_v18 = vpop.f32.mrf.mxu1 }
 0x1b9   :  { %v431_v20 = vadd.f32 %v623_v15, %v571_v9  ;;  %446 = vadd.xlane.f32.xlu0 %v442_v16 }
 0x1ba   :  { %v625_v21 = vpop.f32.mrf.mxu1 }
 0x1bb   :  { %v626_v22 = vadd.f32 %v625_v21, %v624_v18  ;;  %v443_v23 = vadd.f32 %v585_v17, %v431_v20 }
 0x1bc   :  { %v627_v25 = vpop.f32.mrf.mxu1 }
 0x1bd   :  { %v432_v26 = vadd.f32 %v626_v22, %v571_v9  ;;  %448 = vadd.xlane.f32.xlu0 %v443_v23 }
 0x1be   :  { %v628_v27 = vpop.f32.mrf.mxu1 }
 0x1bf   :  { %v629_v28 = vadd.f32 %v628_v27, %v627_v25  ;;  %v444_v29 = vadd.f32 %v588_v24, %v432_v26 }
 0x1c1   :  { %v433_v31 = vadd.f32 %v629_v28, %v571_v9  ;;  %450 = vadd.xlane.f32.xlu1 %v444_v29 }
 0x1c3   :  { %v445_v32 = vadd.f32 %v589_v30, %v433_v31 }
 0x1c5   :  { %452 = vadd.xlane.f32.xlu1 %v445_v32 }
 0x242   :  { %v447_v33 = vpop.xlane.xlu0 %446 }
 0x243   :  { %v455_v34 = vmul.f32 0.0078125, %v447_v33 }
 0x245   :  { %v459_v35 = vsub.f32 %v442_v16, %v455_v34 }
 0x246   :  { %v449_v36 = vpop.xlane.xlu0 %448 }
 0x247   :  { %v456_v37 = vmul.f32 0.0078125, %v449_v36  ;;  %v463_v38 = vmul.f32 %v459_v35, %v459_v35 }
 0x249   :  { %v460_v39 = vsub.f32 %v443_v23, %v456_v37  ;;  %467 = vadd.xlane.f32.xlu0 %v463_v38 }
 0x24a   :  { %v451_v40 = vpop.xlane.xlu1 %450 }
 0x24b   :  { %v457_v41 = vmul.f32 0.0078125, %v451_v40  ;;  %v464_v42 = vmul.f32 %v460_v39, %v460_v39 }
 0x24d   :  { %v461_v43 = vsub.f32 %v444_v29, %v457_v41  ;;  %469 = vadd.xlane.f32.xlu1 %v464_v42 }
 0x24e   :  { %v453_v44 = vpop.xlane.xlu1 %452 }
 0x24f   :  { %v458_v45 = vmul.f32 0.0078125, %v453_v44  ;;  %v465_v46 = vmul.f32 %v461_v43, %v461_v43 }
 0x251   :  { %v462_v47 = vsub.f32 %v445_v32, %v458_v45  ;;  %471 = vadd.xlane.f32.xlu0 %v465_v46 }
 0x253   :  { %v466_v48 = vmul.f32 %v462_v47, %v462_v47 }
 0x255   :  { %473 = vadd.xlane.f32.xlu1 %v466_v48 }
 0x2d2   :  { %v468_v49 = vpop.xlane.xlu0 %467 }
 0x2d3   :  { %v475_v50 = vmul.f32 0.0078125, %v468_v49 }
 0x2d5   :  { %v479_v51 = vadd.f32 1e-12, %v475_v50 }
 0x2d6   :  { %v470_v52 = vpop.xlane.xlu1 %469 }
 0x2d7   :  { %673 = vrsqrt.f32 %v479_v51  ;;  %v476_v53 = vmul.f32 0.0078125, %v470_v52 }
 0x2d9   :  { %v480_v54 = vadd.f32 1e-12, %v476_v53 }
 0x2da   :  { %v472_v55 = vpop.xlane.xlu0 %471 }
 0x2db   :  { %675 = vrsqrt.f32 %v480_v54  ;;  %v477_v56 = vmul.f32 0.0078125, %v472_v55 }
 0x2dd   :  { %v481_v57 = vadd.f32 1e-12, %v477_v56 }
 0x2de   :  { %v474_v58 = vpop.xlane.xlu1 %473 }
 0x2df   :  { %677 = vrsqrt.f32 %v481_v57  ;;  %v478_v59 = vmul.f32 0.0078125, %v474_v58 }
 0x2e1   :  { %v482_v60 = vadd.f32 1e-12, %v478_v59 }
 0x2e3   :  { %679 = vrsqrt.f32 %v482_v60 }
 0x2e4   :  { %v674_v61 = vpop.eup %673 }
 0x2e5   :  { %v487_v62 = vmul.f32 %v674_v61, %v459_v35 }
 0x2e7   :  { %v498_v1 = vmul.f32 %v572_v63, %v487_v62 }
 0x2e8   :  { %v676_v0 = vpop.eup %675 }
 0x2e9   :  { %v488_v2 = vmul.f32 %v676_v0, %v460_v39  ;;  %v509_v6 = vadd.f32 %v573_v3, %v498_v1 }
 0x2eb   :  { %v499_v4 = vmul.f32 %v572_v63, %v488_v2 }
 0x2ec   :  { %v678_v5 = vpop.eup %677 }
 0x2ed   :  { %v510_v7 = vadd.f32 %v573_v3, %v499_v4  ;;  %v489_v8 = vmul.f32 %v678_v5, %v461_v43 }
 0x2ef   :  { %v593_v9 = vpack.c.bf16 %v510_v7, %v509_v6  ;;  %v500_v11 = vmul.f32 %v572_v63, %v489_v8 }
 0x2f0   :  { %v680_v10 = vpop.eup %679 }
 0x2f1   :  { %594 = vst [vmem:[%s861_s8] sm:$0xff] %v593_v9   ;;  %v490_v12 = vmul.f32 %v680_v10, %v462_v47  ;;  %v511_v14 = vadd.f32 %v573_v3, %v500_v11 }
 0x2f3   :  { %v501_v13 = vmul.f32 %v572_v63, %v490_v12 }
 0x2f5   :  { %v512_v15 = vadd.f32 %v573_v3, %v501_v13 }
 0x2f7   :  { %v598_v16 = vpack.c.bf16 %v512_v15, %v511_v14 }
 0x2f9   :  { %601 = vst [vmem:[%s861_s8 + $0x8] sm:$0xff] %v598_v16  }

// kernel: transformer_forward.26
= control target key start
LH: loop header
LB: loop body
LE: loop exit
PB: predicated region body
PF: predicated region fallthrough
CT: control target
= control target key end

     0   :  { %s1847_s18 = smov 0   ;;  %s1849_s19 = smov 0   ;;  %s2245_s0 = inlined_call_operand.vmem [shape: f32[2,16,1], index: 0, kind: input, shape index: {}]   ;;  %s2246_s1 = inlined_call_operand.vmem [shape: f32[2,1,16], index: 1, kind: input, shape index: {}]   ;;  %s2247_s2 = inlined_call_operand.vmem [shape: bf16[2,16,384], index: 2, kind: input, shape index: {}, may-alias: {2,3,4}]   ;;  %s2248_s3 = inlined_call_operand.vmem [shape: bf16[2,16,384], index: 3, kind: input, shape index: {}, may-alias: {2,3,4}]   ;;  %s2249_s4 = inlined_call_operand.vmem [shape: bf16[2,16,384], index: 4, kind: input, shape index: {}, may-alias: {2,3,4}]   ;;  %s2250_s5 = inlined_call_operand.vmem [shape: bf16[2,16,128], index: 5, kind: output, shape index: {}]  }
   0x1   :  { %s1851_s20 = smov 0   ;;  %s1853_s21 = smov 0  }
   0x2   :  { %s1855_s22 = smov 0  }
   0x3 LB: > { %s34_s23 = sadd.s32 1, %s1804_s21  ;;  %p106_p1 = scmp.ne.s32.totalorder %s1796_s19, %s1792_s18  ;;  %s1808_s22 = sphi %s1855_s22, %s15_s22   ;;  %s1804_s21 = sphi %s1853_s21, %s2255_s21   ;;  %s1800_s20 = sphi %s1851_s20, %s2254_s20   ;;  %s1796_s19 = sphi %s1849_s19, %s2253_s19   ;;  %s1792_s18 = sphi %s1847_s18, %s2252_s18  }
   0x4   : > { %p36_p0 = scmp.ge.s32.totalorder %s34_s23, 2  ;;  %p107_p2 = scmp.eq.s32.totalorder %s1808_s22, 0 }
   0x5   : > { %s99_s26 = sadd.s32 1, %s1796_s19  ;;  %p1546_p5 = scmp.ge.s32.totalorder %s1808_s22, 2 }
   0x6   : > { %s2257_s23 = smov (%p36_p0, %s34_s23), 0  ;;  %p1878_p3 = por %p107_p2, %p106_p1 }
   0x7   : > { %s94_s25 = ssub.s32 %s1804_s21, %s2257_s23  ;;  %216 = sbr.rel (%p1546_p5) target bundleno = 30 (0x1e), region = 16 }
   0x8   : > { %p97_p4 = scmp.eq.s32.totalorder %s94_s25, 0 }
   0xa   : > { %s1886_s27 = scalar_select %p97_p4, %s1796_s19, %s99_s26  }
   0xc   : > { %241 = sbr.rel (!%p1878_p3) target bundleno = 18 (0x12), region = 28  ;;  %s243_s28 = sand.u32 (%p1878_p3), 1, %s1796_s19  }
   0xd   : > { %s1654_s29 = smul.u32 (%p1878_p3), 24, %s1804_s21  ;;  %s1547_s30 = sshll.u32 (%p1878_p3), %s243_s28, 3 }
   0xe   : > { %s245_s9 = scalar_lea.vmem (%p1878_p3), [#allocation5], %s1547_s30 }
   0xf   : > { %s251_s8 = scalar_lea.vmem (%p1878_p3), %s2247_s2, %s1654_s29 }
  0x10   : > { %v268_v0 = vld [vmem:[%s251_s8] sm:$0xf] (%p1878_p3)  ;;  %v270_v1 = vld [vmem:[%s251_s8 + $0xc] sm:$0xf] (%p1878_p3) }
  0x11   : > { %269 = vst [vmem:[%s245_s9] sm:$0xf] %v268_v0  ;;  %271 = vst [vmem:[%s245_s9 + $0x4] sm:$0xf] %v270_v1 }
  0x12 PF: > { %299 = sbr.rel (!%p1878_p3) target bundleno = 24 (0x18), region = 69  ;;  %s301_s10 = sand.u32 (%p1878_p3), 1, %s1796_s19  }
  0x13   : > { %s1550_s11 = smul.u32 (%p1878_p3), 24, %s1804_s21  ;;  %s1549_s12 = sshll.u32 (%p1878_p3), %s301_s10, 3 }
  0x14   : > { %s303_s16 = scalar_lea.vmem (%p1878_p3), [#allocation6], %s1549_s12 }
  0x15   : > { %s1425_s15 = scalar_lea.vmem (%p1878_p3), %s2248_s3, %s1550_s11 }
  0x16   : > { %v1551_v2 = vld [vmem:[%s1425_s15 + $0x4] sm:$0xf] (%p1878_p3)  ;;  %v1552_v3 = vld [vmem:[%s1425_s15 + $0x10] sm:$0xf] (%p1878_p3) }
  0x17   : > { %328 = vst [vmem:[%s303_s16] sm:$0xf] %v1551_v2  ;;  %330 = vst [vmem:[%s303_s16 + $0x4] sm:$0xf] %v1552_v3 }
  0x18 PF: > { %358 = sbr.rel (!%p1878_p3) target bundleno = 30 (0x1e), region = 110  ;;  %s360_s17 = sand.u32 (%p1878_p3), 1, %s1796_s19  }
  0x19   : > { %s1554_s25 = smul.u32 (%p1878_p3), 24, %s1804_s21  ;;  %s1553_s26 = sshll.u32 (%p1878_p3), %s360_s17, 3 }
  0x1a   : > { %s362_s6 = scalar_lea.vmem (%p1878_p3), [#allocation7], %s1553_s26 }
  0x1b   : > { %s1433_s30 = scalar_lea.vmem (%p1878_p3), %s2249_s4, %s1554_s25 }
  0x1c   : > { %v1555_v4 = vld [vmem:[%s1433_s30 + $0x8] sm:$0xf] (%p1878_p3)  ;;  %v1556_v5 = vld [vmem:[%s1433_s30 + $0x14] sm:$0xf] (%p1878_p3) }
  0x1d   : > { %387 = vst [vmem:[%s362_s6] sm:$0xf] %v1555_v4  ;;  %389 = vst [vmem:[%s362_s6 + $0x4] sm:$0xf] %v1556_v5 }
  0x1e PF: > { %p1557_p6 = scmp.ge.s32.totalorder %s1808_s22, 1  ;;  %p416_p7 = scmp.lt.s32.totalorder %s1808_s22, 3 }
  0x20   : > { %p417_p8 = pnand %p1557_p6, %p416_p7 }
  0x21   : > { %s423_s24 = sand.u32 (!%p417_p8), 1, %s1792_s18   ;;  %p492_p9 = scmp.lt.s32.totalorder (!%p417_p8), %s1800_s20, 1 }
  0x22   : > { %420 = sbr.rel (%p417_p8) target bundleno = 1452 (0x5ac), region = 151  ;;  %s1915_s7 = sshll.u32 (!%p417_p8), %s423_s24, 3 }
  0x23   : > { %s432_s18 = scalar_lea.vmem (!%p417_p8), [#allocation6], %s1915_s7  ;;  %s425_s8 = scalar_lea.vmem (!%p417_p8), [#allocation5], %s1915_s7 }
  0x24   : > { %s1814_s16 = smov (!%p417_p8), 96   ;;  %s439_s17 = scalar_lea.vmem (!%p417_p8), [#allocation7], %s1915_s7 }
  0x25   : > { %s1815_s25 = smov (!%p417_p8), 32   ;;  %s1816_s26 = smov (!%p417_p8), 64  }
  0x27   : > { %vm542_vm0 = vcmask 261120   ;;  %v1810_v6 = vmov 0.0   ;;  %vm1811_vm1 = vmmov 0   ;;  %v1812_v7 = vmov 0   ;;  %v1936_v8 = vld [vmem:[%s432_s18] sm:$0xff]   ;;  %s2259_s20 = smov (!%p492_p9, %s1800_s20), 1 }
  0x28   : > { %1606 = vmatprep.subr.bf16.mxu0 %v1810_v6  ;;  %543 = vst.msk [vmem:[#allocation4] sm:$0xff] %vm542_vm0, %v1810_v6  ;;  %544 = vst.msk [vmem:[#allocation4 + $0x8] sm:$0xff] %vm542_vm0, %v1810_v6  ;;  %1608 = vmatprep.mubr.msk.bf16.mxu0 %vm1811_vm1, %v1810_v6  ;;  %v593_v9 = vsel %vm542_vm0, %v1936_v8, 0  ;;  %s1581_s9 = sshll.u32 %s2259_s20, 4  ;;  %v1954_v11 = vld [vmem:[%s425_s8] sm:$0xff]   ;;  %vm525_vm2 = vcmask 7168   ;;  %s506_s15 = scalar_lea.vmem %s2246_s1, %s2259_s20 }
  0x29   : > { %545 = vst.msk [vmem:[#allocation4 + $0x10] sm:$0xff] %vm542_vm0, %v1810_v6  ;;  %546 = vst.msk [vmem:[#allocation4 + $0x18] sm:$0xff] %vm542_vm0, %v1810_v6  ;;  %1702 = vset.pattern.permute.xlu0 %v1812_v7  ;;  %1703 = vset.pattern.permute.xlu1 %v1812_v7  ;;  %s499_s12 = scalar_lea.vmem %s2245_s0, %s1581_s9  ;;  %v1813_v13 = vmov -1e+30   ;;  %v1565_v14 = vld [vmem:[%s506_s15] ss:$0 sm:$0xff] }
  0x2a   : > { %547 = vst.msk [vmem:[#allocation4 + $0x20] sm:$0xff] %vm542_vm0, %v1810_v6  ;;  %548 = vst.msk [vmem:[#allocation4 + $0x28] sm:$0xff] %vm542_vm0, %v1810_v6  ;;  %1612 = vmatprep.subr.bf16.mxu1 %v1810_v6  ;;  %1614 = vmatprep.mubr.msk.bf16.mxu1 %vm1811_vm1, %v1810_v6  ;;  %v551_v10 = vld [vmem:[%s499_s12] sm:$0xff]  ;;  %v552_v12 = vld [vmem:[%s499_s12 + $0x8] sm:$0xff]  ;;  %vm638_vm3 = vcmask 130048   ;;  %vm1360_vm4 = vcmask 523264  }
  0x2b   : > { %549 = vst.msk [vmem:[#allocation4 + $0x30] sm:$0xff] %vm542_vm0, %v1810_v6  ;;  %550 = vst.msk [vmem:[#allocation4 + $0x38] sm:$0xff] %vm542_vm0, %v1810_v6  ;;  %1607 = vmatpush3.bf16.xpose.msra.mxu0 %v593_v9  ;;  %556 = vperm.xlu0 %1702, %v551_v10   ;;  %v2019_v35 = vld [vmem:[%s439_s17] sm:$0xff]   ;;  %s1582_s28 = sshll.u32 %s2259_s20, 3  ;;  %vm1363_vm5 = vcmask 785408  }
  0x2c   : > { %1624 = vmatprep.subr.bf16.mxu0 %v1810_v6  ;;  %526 = vst.msk [vmem:[#allocation2] sm:$0xff] %vm525_vm2, %v1813_v13  ;;  %527 = vst.msk [vmem:[#allocation2 + $0x8] sm:$0xff] %vm525_vm2, %v1813_v13  ;;  %1613 = vmatpush3.bf16.msra.mxu1 %v2019_v35  ;;  %s518_s6 = scalar_lea.vmem %s2250_s5, %s1582_s28 }
  0x2d   : > { %528 = vst.msk [vmem:[#allocation2 + $0x10] sm:$0xff] %vm525_vm2, %v1813_v13  ;;  %529 = vst.msk [vmem:[#allocation2 + $0x18] sm:$0xff] %vm525_vm2, %v1813_v13  ;;  %1618 = vmatprep.subr.bf16.mxu1 %v1810_v6 }
  0x2e   : > { %530 = vst.msk [vmem:[#allocation2 + $0x20] sm:$0xff] %vm525_vm2, %v1813_v13  ;;  %531 = vst.msk [vmem:[#allocation2 + $0x28] sm:$0xff] %vm525_vm2, %v1813_v13 }
  0x2f   : > { %561 = vperm.xlu0 %1702, %v552_v12   ;;  %532 = vst.msk [vmem:[#allocation2 + $0x30] sm:$0xff] %vm525_vm2, %v1813_v13  ;;  %533 = vst.msk [vmem:[#allocation2 + $0x38] sm:$0xff] %vm525_vm2, %v1813_v13 }
  0x30   : > { %534 = vst.msk [vmem:[#allocation3] sm:$0xff] %vm525_vm2, %v1810_v6  ;;  %535 = vst.msk [vmem:[#allocation3 + $0x8] sm:$0xff] %vm525_vm2, %v1810_v6 }
  0x31   : > { %536 = vst.msk [vmem:[#allocation3 + $0x10] sm:$0xff] %vm525_vm2, %v1810_v6  ;;  %537 = vst.msk [vmem:[#allocation3 + $0x18] sm:$0xff] %vm525_vm2, %v1810_v6 }
  0x32   : > { %1609 = vmatmul.mubr.msk.bf16.vlgmr.msra.gmra.mxu0 %vm542_vm0, %v1954_v11  ;;  %538 = vst.msk [vmem:[#allocation3 + $0x20] sm:$0xff] %vm525_vm2, %v1810_v6  ;;  %539 = vst.msk [vmem:[#allocation3 + $0x28] sm:$0xff] %vm525_vm2, %v1810_v6 }
  0x33   : > { %1626 = vmatprep.mubr.msk.bf16.mxu0 %vm1811_vm1, %v1810_v6  ;;  %540 = vst.msk [vmem:[#allocation3 + $0x30] sm:$0xff] %vm525_vm2, %v1810_v6  ;;  %541 = vst.msk [vmem:[#allocation3 + $0x38] sm:$0xff] %vm525_vm2, %v1810_v6  ;;  %v1996_v27 = vld [vmem:[#allocation2] sm:$0xff]  ;;  %v2001_v30 = vld [vmem:[#allocation2 + $0x8] sm:$0xff] }
  0xa6   : > { %v557_v15 = vpop.permute.xlu0 %556 }
  0xa7   : > { %v1988_v16 = vadd.f32 %v1565_v14, %v557_v15 }
  0xaa   : > { %v562_v17 = vpop.permute.xlu0 %561 }
  0xab   : > { %v1991_v21 = vadd.f32 %v1565_v14, %v562_v17 }
  0xf2   : > { %v629_v18 = vpop.f32.mrf.mxu0 }
  0xf3   : > { %v630_v19 = vadd.f32 %v629_v18, %v1988_v16 }
  0xf4   : > { %v1610_v20 = vpop.f32.mrf.mxu0 }
  0xf5   : > { %v639_v22 = vsel %vm638_vm3, %v630_v19, -inf  ;;  %v2088_v20 = vld [vmem:[#allocation2 + $0x10] sm:$0xff] }
  0xf6   : > { %640 = vmax.xlane.f32.xlu1 %v639_v22  ;;  %v632_v23 = vpop.f32.mrf.mxu0 }
  0xf7   : > { %v633_v24 = vadd.f32 %v632_v23, %v1991_v21  ;;  %v2093_v23 = vld [vmem:[#allocation2 + $0x18] sm:$0xff] }
  0xf8   : > { %v1611_v25 = vpop.f32.mrf.mxu0 }
  0xf9   : > { %v642_v26 = vsel %vm638_vm3, %v633_v24, -inf }
  0xfa   : > { %643 = vmax.xlane.f32.xlu1 %v642_v26  ;;  %v2103_v26 = vld [vmem:[#allocation2 + $0x20] sm:$0xff] }
 0x17f   : > { %v641_v28 = vpop.xlane.xlu1 %640 }
 0x180   : > { %v1999_v29 = vmax.f32 %v1996_v27, %v641_v28 }
 0x182   : > { %v647_v31 = vsub.f32 %v1996_v27, %v1999_v29  ;;  %753 = vst.msk [vmem:[#allocation2] sm:$0xff] %vm525_vm2, %v1999_v29  ;;  %655 = vperm.xlu0 %1702, %v1999_v29  }
 0x183   : > { %v644_v32 = vpop.xlane.xlu1 %643 }
 0x184   : > { %v2009_v33 = vmax.f32 %v2001_v30, %v644_v32 }
 0x186   : > { %v648_v34 = vsub.f32 %v2001_v30, %v2009_v33  ;;  %754 = vst.msk [vmem:[#allocation2 + $0x8] sm:$0xff] %vm525_vm2, %v2009_v33  ;;  %660 = vperm.xlu1 %1703, %v2009_v33   ;;  %757 = vrot.lane.b32.xlu0 %v1936_v8, %s1814_s16 }
 0x18a   : > { %755 = vrot.lane.b32.xlu0 %v1954_v11, %s1814_s16  ;;  %1093 = vrot.lane.b32.xlu1 %v1936_v8, %s1815_s25 }
 0x18e   : > { %925 = vrot.lane.b32.xlu0 %v1936_v8, %s1816_s26 }
 0x192   : > { %923 = vrot.lane.b32.xlu0 %v1954_v11, %s1816_s26 }
 0x196   : > { %1091 = vrot.lane.b32.xlu0 %v1954_v11, %s1815_s25 }
 0x1fd   : > { %v656_v36 = vpop.permute.xlu0 %655 }
 0x1fe   : > { %v663_v37 = vsub.f32 %v630_v19, %v656_v36 }
 0x200   : > { %v665_v38 = vmul.f32 1.442695, %v663_v37  ;;  %v2113_v37 = vld [vmem:[#allocation2 + $0x28] sm:$0xff] }
 0x201   : > { %v661_v39 = vpop.permute.xlu1 %660  ;;  %v758_v42 = vpop.permute.xlu0 %757 }
 0x202   : > { %v664_v40 = vsub.f32 %v633_v24, %v661_v39  ;;  %1722 = vpow2.f32 %v665_v38  ;;  %v763_v46 = vsel %vm542_vm0, %v758_v42, 0 }
 0x204   : > { %v667_v41 = vmul.f32 1.442695, %v664_v40 }
 0x205   : > { %v756_v45 = vpop.permute.xlu0 %755  ;;  %v1094_v50 = vpop.permute.xlu1 %1093 }
 0x206   : > { %1724 = vpow2.f32 %v667_v41  ;;  %v1099_v52 = vsel %vm542_vm0, %v1094_v50, 0  ;;  %v2123_v41 = vld [vmem:[#allocation2 + $0x30] sm:$0xff] }
 0x209   : > { %v926_v48 = vpop.permute.xlu0 %925 }
 0x20a   : > { %v931_v49 = vsel %vm542_vm0, %v926_v48, 0 }
 0x20d   : > { %v924_v51 = vpop.permute.xlu0 %923 }
 0x20f   : > { %v2033_v43 = vpop.eup %1722 }
 0x211   : > { %v1092_v53 = vpop.permute.xlu0 %1091 }
 0x213   : > { %v2035_v44 = vpop.eup %1724 }
 0x214   : > { %v698_v47 = vpack.c.bf16 %v2035_v44, %v2033_v43 }
 0x216   : > { %1615 = vmatmul.mubr.msk.bf16.vlgmr.msra.gmra.mxu1 %vm638_vm3, %v698_v47  ;;  %v2133_v47 = vld [vmem:[#allocation2 + $0x38] sm:$0xff] }
 0x217   : > { %1619 = vmatpush3.bf16.xpose.msra.mxu1 %v763_v46  ;;  %1620 = vmatprep.mubr.msk.bf16.mxu1 %vm1811_vm1, %v1810_v6 }
 0x218   : > { %1630 = vmatprep.subr.bf16.mxu1 %v1810_v6 }
 0x21e   : > { %1621 = vmatmul.mubr.msk.bf16.vlgmr.msra.gmra.mxu1 %vm542_vm0, %v756_v45 }
 0x21f   : > { %1631 = vmatpush3.bf16.xpose.msra.mxu1 %v931_v49  ;;  %1632 = vmatprep.mubr.msk.bf16.mxu1 %vm1811_vm1, %v1810_v6 }
 0x220   : > { %1642 = vmatprep.subr.bf16.mxu1 %v1810_v6 }
 0x226   : > { %1633 = vmatmul.mubr.msk.bf16.vlgmr.msra.gmra.mxu1 %vm542_vm0, %v924_v51 }
 0x227   : > { %1643 = vmatpush3.bf16.xpose.msra.mxu1 %v1099_v52  ;;  %1644 = vmatprep.mubr.msk.bf16.mxu1 %vm1811_vm1, %v1810_v6  ;;  %v673_v52 = vsel %vm638_vm3, %v2033_v43, 0.0 }
 0x22e   : > { %1645 = vmatmul.mubr.msk.bf16.vlgmr.msra.gmra.mxu1 %vm542_vm0, %v1092_v53  ;;  %v676_v53 = vsel %vm638_vm3, %v2035_v44, 0.0 }
 0x2d6   : > { %v2054_v54 = vpop.f32.mrf.mxu1 }
 0x2d8   : > { %v1616_v55 = vpop.f32.mrf.mxu1 }
 0x2da   : > { %v2056_v56 = vpop.f32.mrf.mxu1 }
 0x2dc   : > { %v1617_v57 = vpop.f32.mrf.mxu1 }
 0x2de   : > { %v799_v58 = vpop.f32.mrf.mxu1 }
 0x2df   : > { %v2059_v59 = vadd.f32 %v799_v58, %v1988_v16 }
 0x2e0   : > { %v1622_v60 = vpop.f32.mrf.mxu1 }
 0x2e1   : > { %v809_v61 = vsel %vm638_vm3, %v2059_v59, -inf }
 0x2e2   : > { %810 = vmax.xlane.f32.xlu1 %v809_v61  ;;  %v802_v62 = vpop.f32.mrf.mxu1 }
 0x2e3   : > { %v2064_v63 = vadd.f32 %v802_v62, %v1991_v21 }
 0x2e4   : > { %v1623_v0 = vpop.f32.mrf.mxu1 }
 0x2e5   : > { %v812_v1 = vsel %vm638_vm3, %v2064_v63, -inf }
 0x2e6   : > { %813 = vmax.xlane.f32.xlu0 %v812_v1  ;;  %v967_v2 = vpop.f32.mrf.mxu1 }
 0x2e7   : > { %v2069_v3 = vadd.f32 %v967_v2, %v1988_v16 }
 0x2e8   : > { %v1634_v4 = vpop.f32.mrf.mxu1 }
 0x2e9   : > { %v977_v5 = vsel %vm638_vm3, %v2069_v3, -inf }
 0x2ea   : > { %978 = vmax.xlane.f32.xlu0 %v977_v5  ;;  %v970_v7 = vpop.f32.mrf.mxu1 }
 0x2eb   : > { %v2074_v8 = vadd.f32 %v970_v7, %v1991_v21 }
 0x2ec   : > { %v1635_v9 = vpop.f32.mrf.mxu1 }
 0x2ed   : > { %v980_v10 = vsel %vm638_vm3, %v2074_v8, -inf }
 0x2ee   : > { %981 = vmax.xlane.f32.xlu1 %v980_v10  ;;  %v1135_v11 = vpop.f32.mrf.mxu1 }
 0x2ef   : > { %v2079_v12 = vadd.f32 %v1135_v11, %v1988_v16 }
 0x2f0   : > { %v1646_v13 = vpop.f32.mrf.mxu1 }
 0x2f1   : > { %v1145_v14 = vsel %vm638_vm3, %v2079_v12, -inf }
 0x2f2   : > { %1146 = vmax.xlane.f32.xlu0 %v1145_v14  ;;  %v1138_v15 = vpop.f32.mrf.mxu1 }
 0x2f3   : > { %v2084_v17 = vadd.f32 %v1138_v15, %v1991_v21 }
 0x2f4   : > { %v1647_v18 = vpop.f32.mrf.mxu1 }
 0x2f5   : > { %v1148_v19 = vsel %vm638_vm3, %v2084_v17, -inf }
 0x2f6   : > { %1149 = vmax.xlane.f32.xlu1 %v1148_v19 }
 0x36b   : > { %v811_v22 = vpop.xlane.xlu1 %810 }
 0x36c   : > { %v2091_v16 = vmax.f32 %v2088_v20, %v811_v22 }
 0x36e   : > { %v817_v24 = vsub.f32 %v2088_v20, %v2091_v16  ;;  %921 = vst.msk [vmem:[#allocation2 + $0x10] sm:$0xff] %vm525_vm2, %v2091_v16  ;;  %825 = vperm.xlu0 %1702, %v2091_v16  }
 0x36f   : > { %v814_v21 = vpop.xlane.xlu0 %813 }
 0x370   : > { %v2101_v25 = vmax.f32 %v2093_v23, %v814_v21  ;;  %v819_v27 = vmul.f32 1.442695, %v817_v24 }
 0x372   : > { %v818_v28 = vsub.f32 %v2093_v23, %v2101_v25  ;;  %922 = vst.msk [vmem:[#allocation2 + $0x18] sm:$0xff] %vm525_vm2, %v2101_v25  ;;  %830 = vperm.xlu1 %1703, %v2101_v25   ;;  %v651_v23 = vmul.f32 1.442695, %v648_v34 }
 0x373   : > { %v979_v32 = vpop.xlane.xlu0 %978 }
 0x374   : > { %v2111_v36 = vmax.f32 %v2103_v26, %v979_v32  ;;  %v821_v21 = vmul.f32 1.442695, %v818_v28 }
 0x376   : > { %v985_v38 = vsub.f32 %v2103_v26, %v2111_v36  ;;  %1089 = vst.msk [vmem:[#allocation2 + $0x20] sm:$0xff] %vm525_vm2, %v2111_v36  ;;  %993 = vperm.xlu1 %1703, %v2111_v36   ;;  %v669_v36 = vld [vmem:[#allocation3] sm:$0xff] }
 0x377   : > { %v982_v39 = vpop.xlane.xlu1 %981 }
 0x378   : > { %v2121_v40 = vmax.f32 %v2113_v37, %v982_v39 }
 0x37a   : > { %v986_v42 = vsub.f32 %v2113_v37, %v2121_v40  ;;  %1090 = vst.msk [vmem:[#allocation2 + $0x28] sm:$0xff] %vm525_vm2, %v2121_v40  ;;  %998 = vperm.xlu0 %1702, %v2121_v40   ;;  %v987_v37 = vmul.f32 1.442695, %v985_v38 }
 0x37b   : > { %v1147_v45 = vpop.xlane.xlu0 %1146 }
 0x37c   : > { %v2131_v46 = vmax.f32 %v2123_v41, %v1147_v45  ;;  %v989_v16 = vmul.f32 1.442695, %v986_v42 }
 0x37e   : > { %v1153_v48 = vsub.f32 %v2123_v41, %v2131_v46  ;;  %1257 = vst.msk [vmem:[#allocation2 + $0x30] sm:$0xff] %vm525_vm2, %v2131_v46  ;;  %1161 = vperm.xlu1 %1703, %v2131_v46  }
 0x37f   : > { %v1150_v49 = vpop.xlane.xlu1 %1149 }
 0x380   : > { %v2141_v50 = vmax.f32 %v2133_v47, %v1150_v49 }
 0x382   : > { %v1154_v51 = vsub.f32 %v2133_v47, %v2141_v50  ;;  %1258 = vst.msk [vmem:[#allocation2 + $0x38] sm:$0xff] %vm525_vm2, %v2141_v50  ;;  %870 = vrot.lane.b32.xlu1 %v2019_v35, %s1814_s16  ;;  %1166 = vperm.xlu0 %1702, %v2141_v50  }
 0x384   : > { %v1157_v30 = vmul.f32 1.442695, %v1154_v51 }
 0x386   : > { %1206 = vrot.lane.b32.xlu1 %v2019_v35, %s1815_s25  ;;  %1038 = vrot.lane.b32.xlu0 %v2019_v35, %s1816_s26 }
 0x3a5   : > { %674 = vadd.xlane.f32.xlu0 %v673_v52 }
 0x3aa   : > { %677 = vadd.xlane.f32.xlu1 %v676_v53 }
 0x3e9   : > { %v826_v55 = vpop.permute.xlu0 %825 }
 0x3ea   : > { %v833_v57 = vsub.f32 %v2059_v59, %v826_v55 }
 0x3ec   : > { %v835_v58 = vmul.f32 1.442695, %v833_v57 }
 0x3ed   : > { %v831_v60 = vpop.permute.xlu1 %830 }
 0x3ee   : > { %1726 = vpow2.f32 %v835_v58  ;;  %v834_v61 = vsub.f32 %v2064_v63, %v831_v60  ;;  %v840_v58 = vld [vmem:[#allocation3 + $0x10] sm:$0xff] }
 0x3f0   : > { %v837_v62 = vmul.f32 1.442695, %v834_v61 }
 0x3f1   : > { %v994_v0 = vpop.permute.xlu1 %993 }
 0x3f2   : > { %1728 = vpow2.f32 %v837_v62  ;;  %v1001_v35 = vsub.f32 %v2069_v3, %v994_v0  ;;  %v841_v62 = vld [vmem:[#allocation3 + $0x18] sm:$0xff] }
 0x3f4   : > { %v1003_v1 = vmul.f32 1.442695, %v1001_v35 }
 0x3f5   : > { %v999_v43 = vpop.permute.xlu0 %998 }
 0x3f6   : > { %1730 = vpow2.f32 %v1003_v1  ;;  %v1002_v2 = vsub.f32 %v2074_v8, %v999_v43  ;;  %v1008_v43 = vld [vmem:[#allocation3 + $0x20] sm:$0xff] }
 0x3f8   : > { %v1005_v44 = vmul.f32 1.442695, %v1002_v2 }
 0x3f9   : > { %v1162_v4 = vpop.permute.xlu1 %1161 }
 0x3fa   : > { %1732 = vpow2.f32 %v1005_v44  ;;  %v1169_v59 = vsub.f32 %v2079_v12, %v1162_v4  ;;  %v649_v12 = vmul.f32 1.442695, %v647_v31  ;;  %v684_v44 = vld [vmem:[#allocation4] sm:$0xff] }
 0x3fb   : > { %v1727_v5 = vpop.eup %1726 }
 0x3fc   : > { %v1171_v7 = vmul.f32 1.442695, %v1169_v59  ;;  %v844_v9 = vsel %vm638_vm3, %v1727_v5, 0.0 }
 0x3fd   : > { %845 = vadd.xlane.f32.xlu0 %v844_v9  ;;  %v1167_v63 = vpop.permute.xlu0 %1166  ;;  %v871_v10 = vpop.permute.xlu1 %870 }
 0x3fe   : > { %1734 = vpow2.f32 %v1171_v7  ;;  %v1170_v3 = vsub.f32 %v2084_v17, %v1167_v63  ;;  %1625 = vmatpush3.bf16.msra.mxu0 %v871_v10  ;;  %v1009_v7 = vld [vmem:[#allocation3 + $0x28] sm:$0xff] }
 0x3ff   : > { %v1729_v11 = vpop.eup %1728  ;;  %1636 = vmatprep.subr.bf16.mxu0 %v1810_v6 }
 0x400   : > { %v1173_v8 = vmul.f32 1.442695, %v1170_v3  ;;  %v847_v13 = vsel %vm638_vm3, %v1729_v11, 0.0  ;;  %v869_v14 = vpack.c.bf16 %v1729_v11, %v1727_v5 }
 0x401   : > { %848 = vadd.xlane.f32.xlu1 %v847_v13  ;;  %v1039_v15 = vpop.permute.xlu0 %1038  ;;  %v1207_v22 = vpop.permute.xlu1 %1206  ;;  %v1176_v13 = vld [vmem:[#allocation3 + $0x30] sm:$0xff] }
 0x402   : > { %1736 = vpow2.f32 %v1173_v8  ;;  %1627 = vmatmul.mubr.msk.bf16.vlgmr.msra.gmra.mxu0 %vm638_vm3, %v869_v14 }
 0x403   : > { %v1731_v18 = vpop.eup %1730  ;;  %1637 = vmatpush3.bf16.msra.mxu0 %v1039_v15  ;;  %1638 = vmatprep.mubr.msk.bf16.mxu0 %vm1811_vm1, %v1810_v6  ;;  %1738 = vpow2.f32 %v649_v12 }
 0x404   : > { %v1012_v17 = vsel %vm638_vm3, %v1731_v18, 0.0  ;;  %1648 = vmatprep.subr.bf16.mxu0 %v1810_v6  ;;  %1740 = vpow2.f32 %v819_v27 }
 0x405   : > { %1013 = vadd.xlane.f32.xlu1 %v1012_v17  ;;  %1742 = vpow2.f32 %v821_v21  ;;  %v1177_v17 = vld [vmem:[#allocation3 + $0x38] sm:$0xff] }
 0x406   : > { %1744 = vpow2.f32 %v989_v16 }
 0x407   : > { %v1733_v29 = vpop.eup %1732  ;;  %1746 = vpow2.f32 %v651_v23 }
 0x408   : > { %v1015_v31 = vsel %vm638_vm3, %v1733_v29, 0.0  ;;  %v1037_v19 = vpack.c.bf16 %v1733_v29, %v1731_v18 }
 0x409   : > { %1016 = vadd.xlane.f32.xlu1 %v1015_v31 }
 0x40a   : > { %1639 = vmatmul.mubr.msk.bf16.vlgmr.msra.gmra.mxu0 %vm638_vm3, %v1037_v19 }
 0x40b   : > { %v1735_v32 = vpop.eup %1734  ;;  %1649 = vmatpush3.bf16.msra.mxu0 %v1207_v22  ;;  %1650 = vmatprep.mubr.msk.bf16.mxu0 %vm1811_vm1, %v1810_v6  ;;  %v1155_v6 = vmul.f32 1.442695, %v1153_v48  ;;  %v670_v48 = vld [vmem:[#allocation3 + $0x8] sm:$0xff] }
 0x40c   : > { %v1180_v20 = vsel %vm638_vm3, %v1735_v32, 0.0  ;;  %v685_v22 = vld [vmem:[#allocation4 + $0x8] sm:$0xff] }
 0x40d   : > { %1181 = vadd.xlane.f32.xlu1 %v1180_v20  ;;  %1748 = vpow2.f32 %v1155_v6 }
 0x40e   : > { %1750 = vpow2.f32 %v987_v37 }
 0x40f   : > { %v1737_v24 = vpop.eup %1736  ;;  %1752 = vpow2.f32 %v1157_v30 }
 0x410   : > { %v1183_v25 = vsel %vm638_vm3, %v1737_v24, 0.0  ;;  %v1205_v28 = vpack.c.bf16 %v1737_v24, %v1735_v32  ;;  %v1739_v39 = vpop.eup %1738 }
 0x411   : > { %1184 = vadd.xlane.f32.xlu1 %v1183_v25  ;;  %v1741_v33 = vpop.eup %1740  ;;  %v671_v38 = vmul.f32 %v1739_v39, %v669_v36 }
 0x412   : > { %1651 = vmatmul.mubr.msk.bf16.vlgmr.msra.gmra.mxu0 %vm638_vm3, %v1205_v28  ;;  %v1743_v34 = vpop.eup %1742  ;;  %v842_v60 = vmul.f32 %v1741_v33, %v840_v58 }
 0x413   : > { %688 = vperm.xlu0 %1702, %v1739_v39   ;;  %v1745_v40 = vpop.eup %1744  ;;  %v843_v35 = vmul.f32 %v1743_v34, %v841_v62 }
 0x414   : > { %v1747_v41 = vpop.eup %1746  ;;  %v1011_v11 = vmul.f32 %v1745_v40, %v1009_v7 }
 0x415   : > { %v672_v49 = vmul.f32 %v1747_v41, %v670_v48 }
 0x417   : > { %859 = vperm.xlu0 %1702, %v1741_v33  }
 0x41a   : > { %v1749_v42 = vpop.eup %1748 }
 0x41b   : > { %864 = vperm.xlu0 %1702, %v1743_v34   ;;  %v1751_v45 = vpop.eup %1750  ;;  %v1178_v15 = vmul.f32 %v1749_v42, %v1176_v13  ;;  %v855_v34 = vld [vmem:[#allocation4 + $0x10] sm:$0xff] }
 0x41c   : > { %v1753_v26 = vpop.eup %1752  ;;  %v1010_v4 = vmul.f32 %v1751_v45, %v1008_v43  ;;  %v1192_v43 = vld [vmem:[#allocation4 + $0x38] sm:$0xff] }
 0x41f   : > { %1032 = vperm.xlu0 %1702, %v1745_v40  }
 0x422   : > { %693 = vperm.xlu1 %1703, %v1747_v41  }
 0x423   : > { %1195 = vperm.xlu0 %1702, %v1749_v42  }
 0x426   : > { %1027 = vperm.xlu1 %1703, %v1751_v45  }
 0x427   : > { %1200 = vperm.xlu0 %1702, %v1753_v26  }
 0x42e   : > { %v675_v46 = vpop.xlane.xlu0 %674 }
 0x42f   : > { %v679_v47 = vadd.f32 %v675_v46, %v671_v38  ;;  %v1023_v46 = vld [vmem:[#allocation4 + $0x20] sm:$0xff] }
 0x431   : > { %682 = vst.msk [vmem:[#allocation3] sm:$0xff] %vm525_vm2, %v679_v47 }
 0x433   : > { %v678_v50 = vpop.xlane.xlu1 %677 }
 0x434   : > { %v680_v51 = vadd.f32 %v678_v50, %v672_v49 }
 0x436   : > { %683 = vst.msk [vmem:[#allocation3 + $0x8] sm:$0xff] %vm525_vm2, %v680_v51 }
 0x438   : > { %v1264_v52 = vld [vmem:[#allocation3] sm:$0xff] }
 0x439   : > { %1754 = vrcp.f32 %v1264_v52  ;;  %v1024_v52 = vld [vmem:[#allocation4 + $0x28] sm:$0xff] }
 0x43d   : > { %v1265_v53 = vld [vmem:[#allocation3 + $0x8] sm:$0xff] }
 0x43e   : > { %1756 = vrcp.f32 %v1265_v53 }
 0x446   : > { %v1755_v55 = vpop.eup %1754 }
 0x447   : > { %1270 = vperm.xlu0 %1702, %v1755_v55  }
 0x44b   : > { %v1757_v57 = vpop.eup %1756 }
 0x44c   : > { %1275 = vperm.xlu1 %1703, %v1757_v57  }
 0x486   : > { %v846_v61 = vpop.xlane.xlu0 %845 }
 0x487   : > { %v850_v0 = vadd.f32 %v846_v61, %v842_v60  ;;  %v1191_v61 = vld [vmem:[#allocation4 + $0x30] sm:$0xff] }
 0x489   : > { %852 = vst.msk [vmem:[#allocation3 + $0x10] sm:$0xff] %vm525_vm2, %v850_v0 }
 0x48a   : > { %v849_v1 = vpop.xlane.xlu1 %848 }
 0x48b   : > { %v851_v2 = vadd.f32 %v849_v1, %v843_v35 }
 0x48d   : > { %853 = vst.msk [vmem:[#allocation3 + $0x18] sm:$0xff] %vm525_vm2, %v851_v2 }
 0x48e   : > { %v689_v59 = vpop.permute.xlu0 %688  ;;  %v1014_v5 = vpop.xlane.xlu1 %1013 }
 0x48f   : > { %v696_v9 = vmul.f32 %v689_v59, %v684_v44  ;;  %v1018_v63 = vadd.f32 %v1014_v5, %v1010_v4 }
 0x490   : > { %v1282_v10 = vld [vmem:[#allocation3 + $0x10] sm:$0xff] }
 0x491   : > { %v749_v3 = vadd.f32 %v2054_v54, %v696_v9  ;;  %1020 = vst.msk [vmem:[#allocation3 + $0x20] sm:$0xff] %vm525_vm2, %v1018_v63  ;;  %1758 = vrcp.f32 %v1282_v10  ;;  %v1179_v54 = vmul.f32 %v1753_v26, %v1177_v17 }
 0x492   : > { %v1017_v8 = vpop.xlane.xlu1 %1016  ;;  %v860_v33 = vpop.permute.xlu0 %859 }
 0x493   : > { %751 = vst.msk [vmem:[#allocation4] sm:$0xff] %vm542_vm0, %v749_v3  ;;  %v1019_v14 = vadd.f32 %v1017_v8, %v1011_v11  ;;  %v867_v41 = vmul.f32 %v860_v33, %v855_v34 }
 0x494   : > { %v1283_v12 = vld [vmem:[#allocation3 + $0x18] sm:$0xff] }
 0x495   : > { %1021 = vst.msk [vmem:[#allocation3 + $0x28] sm:$0xff] %vm525_vm2, %v1019_v14  ;;  %1760 = vrcp.f32 %v1283_v12 }
 0x496   : > { %v1182_v18 = vpop.xlane.xlu1 %1181  ;;  %v865_v40 = vpop.permute.xlu0 %864 }
 0x497   : > { %v1186_v27 = vadd.f32 %v1182_v18, %v1178_v15 }
 0x498   : > { %v1300_v29 = vld [vmem:[#allocation3 + $0x20] sm:$0xff] }
 0x499   : > { %1188 = vst.msk [vmem:[#allocation3 + $0x30] sm:$0xff] %vm525_vm2, %v1186_v27  ;;  %1762 = vrcp.f32 %v1300_v29 }
 0x49a   : > { %v1185_v31 = vpop.xlane.xlu1 %1184  ;;  %v1033_v38 = vpop.permute.xlu0 %1032 }
 0x49b   : > { %v1187_v19 = vadd.f32 %v1185_v31, %v1179_v54  ;;  %v1036_v60 = vmul.f32 %v1033_v38, %v1024_v52 }
 0x49c   : > { %v1301_v21 = vld [vmem:[#allocation3 + $0x28] sm:$0xff] }
 0x49d   : > { %1189 = vst.msk [vmem:[#allocation3 + $0x38] sm:$0xff] %vm525_vm2, %v1187_v19  ;;  %1764 = vrcp.f32 %v1301_v21 }
 0x49e   : > { %v1759_v32 = vpop.eup %1758  ;;  %v694_v20 = vpop.permute.xlu1 %693 }
 0x49f   : > { %v697_v16 = vmul.f32 %v694_v20, %v685_v22  ;;  %1288 = vperm.xlu0 %1702, %v1759_v32   ;;  %v1196_v57 = vpop.permute.xlu0 %1195 }
 0x4a0   : > { %v1318_v24 = vld [vmem:[#allocation3 + $0x30] sm:$0xff]  ;;  %v1203_v1 = vmul.f32 %v1196_v57, %v1191_v61 }
 0x4a1   : > { %v750_v23 = vadd.f32 %v2056_v56, %v697_v16  ;;  %1766 = vrcp.f32 %v1318_v24  ;;  %v856_v56 = vld [vmem:[#allocation4 + $0x18] sm:$0xff] }
 0x4a2   : > { %v1761_v25 = vpop.eup %1760  ;;  %v868_v36 = vmul.f32 %v865_v40, %v856_v56  ;;  %v1028_v47 = vpop.permute.xlu1 %1027 }
 0x4a3   : > { %752 = vst.msk [vmem:[#allocation4 + $0x8] sm:$0xff] %vm542_vm0, %v750_v23  ;;  %1293 = vperm.xlu1 %1703, %v1761_v25   ;;  %v1035_v51 = vmul.f32 %v1028_v47, %v1023_v46  ;;  %v1201_v2 = vpop.permute.xlu0 %1200 }
 0x4a4   : > { %v1319_v28 = vld [vmem:[#allocation3 + $0x38] sm:$0xff]  ;;  %v1204_v5 = vmul.f32 %v1201_v2, %v1192_v43 }
 0x4a5   : > { %1768 = vrcp.f32 %v1319_v28 }
 0x4a6   : > { %v1763_v6 = vpop.eup %1762 }
 0x4a7   : > { %1306 = vperm.xlu0 %1702, %v1763_v6  }
 0x4aa   : > { %v1765_v39 = vpop.eup %1764  ;;  %v1263_v33 = vld [vmem:[#allocation4 + $0x8] sm:$0xff] }
 0x4ab   : > { %1311 = vperm.xlu1 %1703, %v1765_v39  }
 0x4ae   : > { %v1767_v37 = vpop.eup %1766 }
 0x4af   : > { %1324 = vperm.xlu0 %1702, %v1767_v37  }
 0x4b2   : > { %v1769_v30 = vpop.eup %1768 }
 0x4b3   : > { %1329 = vperm.xlu1 %1703, %v1769_v30   ;;  %v1262_v30 = vld [vmem:[#allocation4] sm:$0xff] }
 0x4c2   : > { %v910_v42 = vpop.f32.mrf.mxu0  ;;  %v1271_v10 = vpop.permute.xlu0 %1270 }
 0x4c3   : > { %v917_v45 = vadd.f32 %v910_v42, %v867_v41  ;;  %v1278_v41 = vmul.f32 %v1271_v10, %v1262_v30 }
 0x4c4   : > { %v1628_v26 = vpop.f32.mrf.mxu0 }
 0x4c5   : > { %919 = vst.msk [vmem:[#allocation4 + $0x10] sm:$0xff] %vm542_vm0, %v917_v45 }
 0x4c6   : > { %v913_v48 = vpop.f32.mrf.mxu0 }
 0x4c7   : > { %v918_v49 = vadd.f32 %v913_v48, %v868_v36  ;;  %v1276_v3 = vpop.permute.xlu1 %1275 }
 0x4c8   : > { %v1629_v50 = vpop.f32.mrf.mxu0  ;;  %v1279_v56 = vmul.f32 %v1276_v3, %v1263_v33 }
 0x4c9   : > { %920 = vst.msk [vmem:[#allocation4 + $0x18] sm:$0xff] %vm542_vm0, %v918_v49 }
 0x4ca   : > { %v1078_v53 = vpop.f32.mrf.mxu0 }
 0x4cb   : > { %v1085_v55 = vadd.f32 %v1078_v53, %v1035_v51 }
 0x4cc   : > { %v1640_v58 = vpop.f32.mrf.mxu0  ;;  %v1280_v8 = vld [vmem:[#allocation4 + $0x10] sm:$0xff] }
 0x4cd   : > { %1087 = vst.msk [vmem:[#allocation4 + $0x20] sm:$0xff] %vm542_vm0, %v1085_v55 }
 0x4ce   : > { %v1081_v62 = vpop.f32.mrf.mxu0 }
 0x4cf   : > { %v1086_v0 = vadd.f32 %v1081_v62, %v1036_v60 }
 0x4d0   : > { %v1641_v35 = vpop.f32.mrf.mxu0  ;;  %v1281_v14 = vld [vmem:[#allocation4 + $0x18] sm:$0xff] }
 0x4d1   : > { %1088 = vst.msk [vmem:[#allocation4 + $0x28] sm:$0xff] %vm542_vm0, %v1086_v0 }
 0x4d2   : > { %v1246_v44 = vpop.f32.mrf.mxu0 }
 0x4d3   : > { %v1253_v4 = vadd.f32 %v1246_v44, %v1203_v1 }
 0x4d4   : > { %v1652_v59 = vpop.f32.mrf.mxu0  ;;  %v1298_v27 = vld [vmem:[#allocation4 + $0x20] sm:$0xff] }
 0x4d5   : > { %1255 = vst.msk [vmem:[#allocation4 + $0x30] sm:$0xff] %vm542_vm0, %v1253_v4 }
 0x4d6   : > { %v1249_v7 = vpop.f32.mrf.mxu0 }
 0x4d7   : > { %v1254_v9 = vadd.f32 %v1249_v7, %v1204_v5 }
 0x4d8   : > { %v1653_v63 = vpop.f32.mrf.mxu0  ;;  %v1299_v54 = vld [vmem:[#allocation4 + $0x28] sm:$0xff] }
 0x4d9   : > { %1256 = vst.msk [vmem:[#allocation4 + $0x38] sm:$0xff] %vm542_vm0, %v1254_v9 }
 0x4dc   : > { %v1316_v32 = vld [vmem:[#allocation4 + $0x30] sm:$0xff] }
 0x4e0   : > { %v1317_v16 = vld [vmem:[#allocation4 + $0x38] sm:$0xff] }
 0x51a   : > { %v1289_v11 = vpop.permute.xlu0 %1288 }
 0x51b   : > { %v1296_v12 = vmul.f32 %v1289_v11, %v1280_v8 }
 0x51e   : > { %v1294_v13 = vpop.permute.xlu1 %1293 }
 0x51f   : > { %v1297_v15 = vmul.f32 %v1294_v13, %v1281_v14 }
 0x521   : > { %v1704_v18 = vpack.i.bf16 %v1297_v15, %v1296_v12 }
 0x522   : > { %v1307_v17 = vpop.permute.xlu0 %1306 }
 0x523   : > { %1705 = vrot.lane.b32.xlu0 %v1704_v18, %s1815_s25  ;;  %v1314_v31 = vmul.f32 %v1307_v17, %v1298_v27 }
 0x526   : > { %v1312_v29 = vpop.permute.xlu1 %1311 }
 0x527   : > { %v1315_v19 = vmul.f32 %v1312_v29, %v1299_v54 }
 0x529   : > { %v1709_v22 = vpack.i.bf16 %v1315_v19, %v1314_v31 }
 0x52a   : > { %v1325_v21 = vpop.permute.xlu0 %1324 }
 0x52b   : > { %1710 = vrot.lane.b32.xlu1 %v1709_v22, %s1816_s26  ;;  %v1332_v24 = vmul.f32 %v1325_v21, %v1316_v32 }
 0x52e   : > { %v1330_v20 = vpop.permute.xlu1 %1329 }
 0x52f   : > { %v1333_v23 = vmul.f32 %v1330_v20, %v1317_v16 }
 0x531   : > { %v1714_v25 = vpack.i.bf16 %v1333_v23, %v1332_v24 }
 0x533   : > { %1715 = vrot.lane.b32.xlu0 %v1714_v25, %s1814_s16 }
 0x595   : > { %v1706_v28 = vpop.permute.xlu0 %1705 }
 0x596   : > { %v1708_v39 = vunpack.i.h.bf16 %v1706_v28  ;;  %v1707_v37 = vunpack.i.l.bf16 %v1706_v28 }
 0x598   : > { %v1359_v45 = vsel %vm542_vm0, %v1279_v56, %v1708_v39  ;;  %v1358_v26 = vsel %vm542_vm0, %v1278_v41, %v1707_v37 }
 0x59d   : > { %v1711_v6 = vpop.permute.xlu1 %1710 }
 0x59e   : > { %v1713_v34 = vunpack.i.h.bf16 %v1711_v6  ;;  %v1712_v40 = vunpack.i.l.bf16 %v1711_v6 }
 0x5a0   : > { %v1362_v46 = vsel %vm1360_vm4, %v1359_v45, %v1713_v34  ;;  %v1361_v47 = vsel %vm1360_vm4, %v1358_v26, %v1712_v40 }
 0x5a5   : > { %v1716_v42 = vpop.permute.xlu0 %1715 }
 0x5a6   : > { %v1718_v36 = vunpack.i.h.bf16 %v1716_v42  ;;  %v1717_v38 = vunpack.i.l.bf16 %v1716_v42 }
 0x5a8   : > { %v1365_v48 = vsel %vm1363_vm5, %v1362_v46, %v1718_v36  ;;  %v1364_v49 = vsel %vm1363_vm5, %v1361_v47, %v1717_v38 }
 0x5a9   : > { %v1588_v50 = vpack.c.bf16 %v1365_v48, %v1364_v49 }
 0x5ab   : > { %1589 = vst [vmem:[%s518_s6] sm:$0xff] %v1588_v50  }
 0x5ac PF: > { %s15_s22 = sadd.s32 1, %s1808_s22   ;;  %s2252_s18 = smov %s1796_s19 }
 0x5ad   : > { %p12_p10 = scmp.ge.s32.totalorder %s15_s22, 4   ;;  %s2253_s19 = smov %s1886_s27 }
 0x5ae   : > { %s2254_s20 = smov %s1804_s21  ;;  %s2255_s21 = smov %s2257_s23 }
 0x5af   :  { %14 = sbr.rel (!%p12_p10) target bundleno = 3 (0x3), region = 237 }

// kernel: transformer_forward.49
= control target key start
LH: loop header
LB: loop body
LE: loop exit
PB: predicated region body
PF: predicated region fallthrough
CT: control target
= control target key end

     0   :  { %s339_s0 = inlined_call_operand.vmem [shape: bf16[32,128], index: 0, kind: input, shape index: {}]   ;;  %s340_s1 = inlined_call_operand.vmem [shape: bf16[128,128], index: 1, kind: input, shape index: {}]   ;;  %s341_s2 = inlined_call_operand.vmem [shape: f32[1,128], index: 2, kind: input, shape index: {}]   ;;  %s342_s3 = inlined_call_operand.hbm [shape: f32[32,128], index: 3, kind: output, shape index: {}]  }
   0x1   :  { %v248_v0 = vld [vmem:[%s340_s1 + $0x38] sm:$0xff]   ;;  %v249_v1 = vld [vmem:[%s340_s1 + $0x30] sm:$0xff]   ;;  %v250_v2 = vld [vmem:[%s340_s1 + $0x28] sm:$0xff]  }
   0x2   :  { %224 = vmatprep.subr.bf16.mxu0 %v248_v0  ;;  %v251_v3 = vld [vmem:[%s340_s1 + $0x20] sm:$0xff]  }
   0x3   :  { %225 = vmatpush3.bf16.msra.mxu0 %v248_v0  ;;  %v256_v4 = vld [vmem:[%s339_s0] sm:$0xff]  }
   0x4   :  { %226 = vmatprep.subr.bf16.mxu0 %v249_v1  ;;  %240 = vmatprep.mubr.bf16.mxu0 %v256_v4 }
   0x7   :  { %227 = vmatpush3.bf16.msra.mxu0 %v249_v1 }
   0x8   :  { %228 = vmatprep.subr.bf16.mxu0 %v250_v2 }
   0x9   :  { %8 = vsyncpa [#allocation3], 0  ;;  %v252_v5 = vld [vmem:[%s340_s1 + $0x18] sm:$0xff]   ;;  %v253_v6 = vld [vmem:[%s340_s1 + $0x10] sm:$0xff]   ;;  %s280_s7 = smov [#allocation2]  }
   0xa   :  { %v254_v7 = vld [vmem:[%s340_s1 + $0x8] sm:$0xff]   ;;  %v255_v8 = vld [vmem:[%s340_s1] sm:$0xff]   ;;  %s192_s1 = sshll.u32 %s280_s7, 4  ;;  %s193_s1 = int_to_ptr.vmem [resolvable:$true] %s192_s1 }
   0xb   :  { %229 = vmatpush3.bf16.msra.mxu0 %v250_v2  ;;  %v257_v9 = vld [vmem:[%s339_s0 + $0x8] sm:$0xff]   ;;  %v213_v11 = vld [vmem:[%s341_s2] ss:$0 sm:$0xff]  ;;  %s258_s0 = scalar_lea.vmem %s193_s1, 512  ;;  %p263_p1 = scmp.lt.s32.totalorder %s193_s1, %s193_s1 }
   0xc   :  { %230 = vmatprep.subr.bf16.mxu0 %v251_v3  ;;  %p259_p0 = scmp.ne.s32.totalorder %s193_s1, %s258_s0  ;;  %p264_p2 = scmp.lt.s32.totalorder %s258_s0, %s258_s0 }
   0xe   :  { %p265_p3 = por %p264_p2, %p263_p1 }
   0xf   :  { %231 = vmatpush3.bf16.msra.mxu0 %v251_v3 }
  0x10   :  { %232 = vmatprep.subr.bf16.mxu0 %v252_v5  ;;  %p266_p4 = pnand %p265_p3, %p259_p0 }
  0x13   :  { %233 = vmatpush3.bf16.msra.mxu0 %v252_v5 }
  0x14   :  { %234 = vmatprep.subr.bf16.mxu0 %v253_v6 }
  0x17   :  { %235 = vmatpush3.bf16.msra.mxu0 %v253_v6 }
  0x18   :  { %236 = vmatprep.subr.bf16.mxu0 %v254_v7 }
  0x1b   :  { %237 = vmatpush3.bf16.msra.mxu0 %v254_v7 }
  0x1c   :  { %238 = vmatprep.subr.bf16.mxu0 %v255_v8 }
  0x1f   :  { %239 = vmatpush3.bf16.msra.mxu0 %v255_v8 }
  0x22   :  { %241 = vmatmul.mubr.bf16.vlgmr.msra.gmra.mxu0 %v257_v9 }
  0xe2   :  { %v242_v10 = vpop.f32.mrf.mxu0 }
  0xe3   :  { %v181_v13 = vadd.f32 %v242_v10, %v213_v11 }
  0xe4   :  { %v142_v12 = vpop.f32.mrf.mxu0 }
  0xe5   :  { %185 = vst [vmem:[#allocation2 + $0x10] sm:$0xff] %v181_v13  ;;  %v179_v15 = vadd.f32 %v213_v11, %v142_v12 }
  0xe6   :  { %v243_v14 = vpop.f32.mrf.mxu0 }
  0xe7   :  { %183 = vst [vmem:[#allocation2] sm:$0xff] %v179_v15  ;;  %v182_v17 = vadd.f32 %v243_v14, %v213_v11 }
  0xe8   :  { %v145_v16 = vpop.f32.mrf.mxu0 }
  0xe9   :  { %186 = vst [vmem:[#allocation2 + $0x18] sm:$0xff] %v182_v17  ;;  %v180_v18 = vadd.f32 %v213_v11, %v145_v16 }
  0xeb   :  { %184 = vst [vmem:[#allocation2 + $0x8] sm:$0xff] %v180_v18 }
  0xec   :  { %269 = shalt.err (!%p266_p4)
}
  0xed   :  { %s281_s2 = smov 128   ;;  %s282_s8 = smov 8  }
  0xee   :  { %198 = dma.vmem_to_hbm [thread:$0]  %s193_s1, 512, %s342_s3, [#allocation3], %s281_s2, %s281_s2, %s282_s8  }
  0xef   :  { %278 = dma.done.wait [#allocation3], 512  }
  0xf0   :  { %279 = vsyncadd [#allocation3], 4294966784 }
  0xf1   :  { %202 = vsyncpa [#allocation3], 1 }

// kernel: transformer_forward.38
= control target key start
LH: loop header
LB: loop body
LE: loop exit
PB: predicated region body
PF: predicated region fallthrough
CT: control target
= control target key end

     0   :  { %s1805_s18 = smov 0   ;;  %s1807_s19 = smov 0   ;;  %s2202_s0 = inlined_call_operand.vmem [shape: f32[2,16,1], index: 0, kind: input, shape index: {}]   ;;  %s2203_s1 = inlined_call_operand.vmem [shape: f32[2,1,16], index: 1, kind: input, shape index: {}]   ;;  %s2204_s2 = inlined_call_operand.vmem [shape: bf16[2,16,128], index: 2, kind: input, shape index: {}]   ;;  %s2205_s3 = inlined_call_operand.vmem [shape: bf16[2,16,256], index: 3, kind: input, shape index: {}, may-alias: {3,4}]   ;;  %s2206_s4 = inlined_call_operand.vmem [shape: bf16[2,16,256], index: 4, kind: input, shape index: {}, may-alias: {3,4}]   ;;  %s2207_s5 = inlined_call_operand.vmem [shape: bf16[2,16,128], index: 5, kind: output, shape index: {}]  }
   0x1   :  { %s1809_s20 = smov 0   ;;  %s1811_s21 = smov 0  }
   0x2   :  { %s1813_s22 = smov 0  }
   0x3 LB: > { %s34_s23 = sadd.s32 1, %s1762_s21  ;;  %p134_p1 = scmp.ne.s32.totalorder %s1754_s19, %s1750_s18  ;;  %s1766_s22 = sphi %s1813_s22, %s15_s22   ;;  %s1762_s21 = sphi %s1811_s21, %s2212_s21   ;;  %s1758_s20 = sphi %s1809_s20, %s2211_s20   ;;  %s1754_s19 = sphi %s1807_s19, %s2210_s19   ;;  %s1750_s18 = sphi %s1805_s18, %s2209_s18  }
   0x4   : > { %p36_p0 = scmp.ge.s32.totalorder %s34_s23, 2  ;;  %p135_p2 = scmp.eq.s32.totalorder %s1766_s22, 0 }
   0x5   : > { %s127_s26 = sadd.s32 1, %s1754_s19  ;;  %p1503_p5 = scmp.ge.s32.totalorder %s1766_s22, 2 }
   0x6   : > { %s2214_s23 = smov (%p36_p0, %s34_s23), 0  ;;  %p1836_p3 = por %p135_p2, %p134_p1 }
   0x7   : > { %s122_s25 = ssub.s32 %s1762_s21, %s2214_s23  ;;  %216 = sbr.rel (%p1503_p5) target bundleno = 22 (0x16), region = 16 }
   0x8   : > { %p125_p4 = scmp.eq.s32.totalorder %s122_s25, 0 }
   0xa   : > { %s1844_s27 = scalar_select %p125_p4, %s1754_s19, %s127_s26  }
   0xc   : > { %254 = sbr.rel (!%p1836_p3) target bundleno = 17 (0x11), region = 32  ;;  %s256_s28 = sand.u32 (%p1836_p3), 1, %s1754_s19  }
   0xd   : > { %s1537_s29 = sshll.u32 (%p1836_p3), %s1762_s21, 4  ;;  %s1504_s30 = sshll.u32 (%p1836_p3), %s256_s28, 3 }
   0xe   : > { %s264_s8 = scalar_lea.vmem (%p1836_p3), %s2205_s3, %s1537_s29  ;;  %s258_s9 = scalar_lea.vmem (%p1836_p3), [#allocation5], %s1504_s30 }
   0xf   : > { %v281_v0 = vld [vmem:[%s264_s8] sm:$0xf] (%p1836_p3)  ;;  %v283_v1 = vld [vmem:[%s264_s8 + $0x8] sm:$0xf] (%p1836_p3) }
  0x10   : > { %282 = vst [vmem:[%s258_s9] sm:$0xf] (%p1836_p3), %v281_v0  ;;  %284 = vst [vmem:[%s258_s9 + $0x4] sm:$0xf] (%p1836_p3), %v283_v1 }
  0x11 PF: > { %312 = sbr.rel (!%p1836_p3) target bundleno = 22 (0x16), region = 73  ;;  %s314_s10 = sand.u32 (%p1836_p3), 1, %s1754_s19  }
  0x12   : > { %s1538_s11 = sshll.u32 (%p1836_p3), %s1762_s21, 4  ;;  %s1507_s12 = sshll.u32 (%p1836_p3), %s314_s10, 3 }
  0x13   : > { %s1390_s15 = scalar_lea.vmem (%p1836_p3), %s2206_s4, %s1538_s11  ;;  %s316_s16 = scalar_lea.vmem (%p1836_p3), [#allocation6], %s1507_s12 }
  0x14   : > { %v1510_v2 = vld [vmem:[%s1390_s15 + $0x4] sm:$0xf] (%p1836_p3)  ;;  %v1511_v3 = vld [vmem:[%s1390_s15 + $0xc] sm:$0xf] (%p1836_p3) }
  0x15   : > { %341 = vst [vmem:[%s316_s16] sm:$0xf] (%p1836_p3), %v1510_v2  ;;  %343 = vst [vmem:[%s316_s16 + $0x4] sm:$0xf] (%p1836_p3), %v1511_v3 }
  0x16 PF: > { %p1512_p6 = scmp.ge.s32.totalorder %s1766_s22, 1  ;;  %p370_p7 = scmp.lt.s32.totalorder %s1766_s22, 3 }
  0x18   : > { %p371_p8 = pnand %p1512_p6, %p370_p7 }
  0x19   : > { %s377_s17 = sand.u32 (!%p371_p8), 1, %s1750_s18   ;;  %p444_p9 = scmp.lt.s32.totalorder (!%p371_p8), %s1758_s20, 1 }
  0x1a   : > { %374 = sbr.rel (%p371_p8) target bundleno = 1444 (0x5a4), region = 114  ;;  %s1866_s24 = sshll.u32 (!%p371_p8), %s377_s17, 3 }
  0x1b   : > { %s379_s18 = scalar_lea.vmem (!%p371_p8), [#allocation5], %s1866_s24  ;;  %s1772_s12 = smov (!%p371_p8), 96  }
  0x1c   : > { %s386_s13 = scalar_lea.vmem (!%p371_p8), [#allocation6], %s1866_s24  ;;  %s1773_s14 = smov (!%p371_p8), 32  }
  0x1d   : > { %s1774_s15 = smov (!%p371_p8), 64  }
  0x1f   : > { %vm503_vm0 = vcmask 261120   ;;  %v1768_v4 = vmov 0.0   ;;  %vm1769_vm1 = vmmov 0   ;;  %v1770_v5 = vmov 0   ;;  %v1887_v6 = vld [vmem:[%s379_s18] sm:$0xff]   ;;  %s2216_s20 = smov (!%p444_p9, %s1758_s20), 1 }
  0x20   : > { %1565 = vmatprep.subr.bf16.mxu0 %v1768_v4  ;;  %504 = vst.msk [vmem:[#allocation4] sm:$0xff] %vm503_vm0, %v1768_v4  ;;  %505 = vst.msk [vmem:[#allocation4 + $0x8] sm:$0xff] %vm503_vm0, %v1768_v4  ;;  %1567 = vmatprep.mubr.msk.bf16.mxu0 %vm1769_vm1, %v1768_v4  ;;  %v554_v7 = vsel %vm503_vm0, %v1887_v6, 0  ;;  %s1540_s25 = sshll.u32 %s2216_s20, 3  ;;  %s1539_s26 = sshll.u32 %s2216_s20, 4  ;;  %vm486_vm2 = vcmask 7168  }
  0x21   : > { %506 = vst.msk [vmem:[#allocation4 + $0x10] sm:$0xff] %vm503_vm0, %v1768_v4  ;;  %507 = vst.msk [vmem:[#allocation4 + $0x18] sm:$0xff] %vm503_vm0, %v1768_v4  ;;  %1660 = vset.pattern.permute.xlu0 %v1770_v5  ;;  %1661 = vset.pattern.permute.xlu1 %v1770_v5  ;;  %s467_s30 = scalar_lea.vmem %s2204_s2, %s1540_s25  ;;  %s451_s8 = scalar_lea.vmem %s2202_s0, %s1539_s26  ;;  %v1771_v11 = vmov -1e+30   ;;  %vm599_vm3 = vcmask 130048   ;;  %v1975_v33 = vld [vmem:[%s386_s13] sm:$0xff]  }
  0x22   : > { %508 = vst.msk [vmem:[#allocation4 + $0x20] sm:$0xff] %vm503_vm0, %v1768_v4  ;;  %509 = vst.msk [vmem:[#allocation4 + $0x28] sm:$0xff] %vm503_vm0, %v1768_v4  ;;  %1571 = vmatprep.subr.bf16.mxu1 %v1768_v4  ;;  %1573 = vmatprep.mubr.msk.bf16.mxu1 %vm1769_vm1, %v1768_v4  ;;  %v512_v8 = vld [vmem:[%s451_s8] sm:$0xff]  ;;  %v513_v10 = vld [vmem:[%s451_s8 + $0x8] sm:$0xff]  ;;  %s458_s11 = scalar_lea.vmem %s2203_s1, %s2216_s20  ;;  %vm1321_vm4 = vcmask 523264   ;;  %vm1324_vm5 = vcmask 785408   ;;  %s479_s24 = scalar_lea.vmem %s2207_s5, %s1540_s25 }
  0x23   : > { %510 = vst.msk [vmem:[#allocation4 + $0x30] sm:$0xff] %vm503_vm0, %v1768_v4  ;;  %511 = vst.msk [vmem:[#allocation4 + $0x38] sm:$0xff] %vm503_vm0, %v1768_v4  ;;  %1566 = vmatpush3.bf16.xpose.msra.mxu0 %v554_v7  ;;  %v1910_v9 = vld [vmem:[%s467_s30] sm:$0xff]   ;;  %517 = vperm.xlu0 %1660, %v512_v8  }
  0x24   : > { %1583 = vmatprep.subr.bf16.mxu0 %v1768_v4  ;;  %487 = vst.msk [vmem:[#allocation2] sm:$0xff] %vm486_vm2, %v1771_v11  ;;  %488 = vst.msk [vmem:[#allocation2 + $0x8] sm:$0xff] %vm486_vm2, %v1771_v11  ;;  %v1521_v12 = vld [vmem:[%s458_s11] ss:$0 sm:$0xff]  ;;  %1572 = vmatpush3.bf16.msra.mxu1 %v1975_v33 }
  0x25   : > { %489 = vst.msk [vmem:[#allocation2 + $0x10] sm:$0xff] %vm486_vm2, %v1771_v11  ;;  %490 = vst.msk [vmem:[#allocation2 + $0x18] sm:$0xff] %vm486_vm2, %v1771_v11  ;;  %1577 = vmatprep.subr.bf16.mxu1 %v1768_v4 }
  0x26   : > { %491 = vst.msk [vmem:[#allocation2 + $0x20] sm:$0xff] %vm486_vm2, %v1771_v11  ;;  %492 = vst.msk [vmem:[#allocation2 + $0x28] sm:$0xff] %vm486_vm2, %v1771_v11 }
  0x27   : > { %522 = vperm.xlu0 %1660, %v513_v10   ;;  %493 = vst.msk [vmem:[#allocation2 + $0x30] sm:$0xff] %vm486_vm2, %v1771_v11  ;;  %494 = vst.msk [vmem:[#allocation2 + $0x38] sm:$0xff] %vm486_vm2, %v1771_v11 }
  0x28   : > { %495 = vst.msk [vmem:[#allocation3] sm:$0xff] %vm486_vm2, %v1768_v4  ;;  %496 = vst.msk [vmem:[#allocation3 + $0x8] sm:$0xff] %vm486_vm2, %v1768_v4 }
  0x29   : > { %497 = vst.msk [vmem:[#allocation3 + $0x10] sm:$0xff] %vm486_vm2, %v1768_v4  ;;  %498 = vst.msk [vmem:[#allocation3 + $0x18] sm:$0xff] %vm486_vm2, %v1768_v4 }
  0x2a   : > { %1568 = vmatmul.mubr.msk.bf16.vlgmr.msra.gmra.mxu0 %vm503_vm0, %v1910_v9  ;;  %499 = vst.msk [vmem:[#allocation3 + $0x20] sm:$0xff] %vm486_vm2, %v1768_v4  ;;  %500 = vst.msk [vmem:[#allocation3 + $0x28] sm:$0xff] %vm486_vm2, %v1768_v4 }
  0x2b   : > { %1585 = vmatprep.mubr.msk.bf16.mxu0 %vm1769_vm1, %v1768_v4  ;;  %501 = vst.msk [vmem:[#allocation3 + $0x30] sm:$0xff] %vm486_vm2, %v1768_v4  ;;  %502 = vst.msk [vmem:[#allocation3 + $0x38] sm:$0xff] %vm486_vm2, %v1768_v4  ;;  %v1952_v25 = vld [vmem:[#allocation2] sm:$0xff]  ;;  %v1957_v28 = vld [vmem:[#allocation2 + $0x8] sm:$0xff] }
  0x9e   : > { %v518_v13 = vpop.permute.xlu0 %517 }
  0x9f   : > { %v1944_v14 = vadd.f32 %v1521_v12, %v518_v13 }
  0xa2   : > { %v523_v15 = vpop.permute.xlu0 %522 }
  0xa3   : > { %v1947_v19 = vadd.f32 %v1521_v12, %v523_v15 }
  0xea   : > { %v590_v16 = vpop.f32.mrf.mxu0 }
  0xeb   : > { %v591_v17 = vadd.f32 %v590_v16, %v1944_v14 }
  0xec   : > { %v1569_v18 = vpop.f32.mrf.mxu0 }
  0xed   : > { %v600_v20 = vsel %vm599_vm3, %v591_v17, -inf  ;;  %v2044_v18 = vld [vmem:[#allocation2 + $0x10] sm:$0xff] }
  0xee   : > { %601 = vmax.xlane.f32.xlu1 %v600_v20  ;;  %v593_v21 = vpop.f32.mrf.mxu0 }
  0xef   : > { %v594_v22 = vadd.f32 %v593_v21, %v1947_v19  ;;  %v2049_v21 = vld [vmem:[#allocation2 + $0x18] sm:$0xff] }
  0xf0   : > { %v1570_v23 = vpop.f32.mrf.mxu0 }
  0xf1   : > { %v603_v24 = vsel %vm599_vm3, %v594_v22, -inf }
  0xf2   : > { %604 = vmax.xlane.f32.xlu1 %v603_v24  ;;  %v2059_v24 = vld [vmem:[#allocation2 + $0x20] sm:$0xff] }
 0x177   : > { %v602_v26 = vpop.xlane.xlu1 %601 }
 0x178   : > { %v1955_v27 = vmax.f32 %v1952_v25, %v602_v26 }
 0x17a   : > { %v608_v29 = vsub.f32 %v1952_v25, %v1955_v27  ;;  %714 = vst.msk [vmem:[#allocation2] sm:$0xff] %vm486_vm2, %v1955_v27  ;;  %616 = vperm.xlu0 %1660, %v1955_v27  }
 0x17b   : > { %v605_v30 = vpop.xlane.xlu1 %604 }
 0x17c   : > { %v1965_v31 = vmax.f32 %v1957_v28, %v605_v30 }
 0x17e   : > { %v609_v32 = vsub.f32 %v1957_v28, %v1965_v31  ;;  %715 = vst.msk [vmem:[#allocation2 + $0x8] sm:$0xff] %vm486_vm2, %v1965_v31  ;;  %621 = vperm.xlu1 %1661, %v1965_v31   ;;  %718 = vrot.lane.b32.xlu0 %v1887_v6, %s1772_s12 }
 0x182   : > { %716 = vrot.lane.b32.xlu0 %v1910_v9, %s1772_s12  ;;  %1054 = vrot.lane.b32.xlu1 %v1887_v6, %s1773_s14 }
 0x186   : > { %886 = vrot.lane.b32.xlu0 %v1887_v6, %s1774_s15 }
 0x18a   : > { %884 = vrot.lane.b32.xlu0 %v1910_v9, %s1774_s15 }
 0x18e   : > { %1052 = vrot.lane.b32.xlu0 %v1910_v9, %s1773_s14 }
 0x1f5   : > { %v617_v34 = vpop.permute.xlu0 %616 }
 0x1f6   : > { %v624_v35 = vsub.f32 %v591_v17, %v617_v34 }
 0x1f8   : > { %v626_v36 = vmul.f32 1.442695, %v624_v35  ;;  %v2069_v35 = vld [vmem:[#allocation2 + $0x28] sm:$0xff] }
 0x1f9   : > { %v622_v37 = vpop.permute.xlu1 %621  ;;  %v719_v40 = vpop.permute.xlu0 %718 }
 0x1fa   : > { %v625_v38 = vsub.f32 %v594_v22, %v622_v37  ;;  %1680 = vpow2.f32 %v626_v36  ;;  %v724_v44 = vsel %vm503_vm0, %v719_v40, 0 }
 0x1fc   : > { %v628_v39 = vmul.f32 1.442695, %v625_v38 }
 0x1fd   : > { %v717_v43 = vpop.permute.xlu0 %716  ;;  %v1055_v48 = vpop.permute.xlu1 %1054 }
 0x1fe   : > { %1682 = vpow2.f32 %v628_v39  ;;  %v1060_v50 = vsel %vm503_vm0, %v1055_v48, 0  ;;  %v2079_v39 = vld [vmem:[#allocation2 + $0x30] sm:$0xff] }
 0x201   : > { %v887_v46 = vpop.permute.xlu0 %886 }
 0x202   : > { %v892_v47 = vsel %vm503_vm0, %v887_v46, 0 }
 0x205   : > { %v885_v49 = vpop.permute.xlu0 %884 }
 0x207   : > { %v1989_v41 = vpop.eup %1680 }
 0x209   : > { %v1053_v51 = vpop.permute.xlu0 %1052 }
 0x20b   : > { %v1991_v42 = vpop.eup %1682 }
 0x20c   : > { %v659_v45 = vpack.c.bf16 %v1991_v42, %v1989_v41 }
 0x20e   : > { %1574 = vmatmul.mubr.msk.bf16.vlgmr.msra.gmra.mxu1 %vm599_vm3, %v659_v45  ;;  %v2089_v45 = vld [vmem:[#allocation2 + $0x38] sm:$0xff] }
 0x20f   : > { %1578 = vmatpush3.bf16.xpose.msra.mxu1 %v724_v44  ;;  %1579 = vmatprep.mubr.msk.bf16.mxu1 %vm1769_vm1, %v1768_v4 }
 0x210   : > { %1589 = vmatprep.subr.bf16.mxu1 %v1768_v4 }
 0x216   : > { %1580 = vmatmul.mubr.msk.bf16.vlgmr.msra.gmra.mxu1 %vm503_vm0, %v717_v43 }
 0x217   : > { %1590 = vmatpush3.bf16.xpose.msra.mxu1 %v892_v47  ;;  %1591 = vmatprep.mubr.msk.bf16.mxu1 %vm1769_vm1, %v1768_v4 }
 0x218   : > { %1601 = vmatprep.subr.bf16.mxu1 %v1768_v4 }
 0x21e   : > { %1592 = vmatmul.mubr.msk.bf16.vlgmr.msra.gmra.mxu1 %vm503_vm0, %v885_v49 }
 0x21f   : > { %1602 = vmatpush3.bf16.xpose.msra.mxu1 %v1060_v50  ;;  %1603 = vmatprep.mubr.msk.bf16.mxu1 %vm1769_vm1, %v1768_v4  ;;  %v634_v50 = vsel %vm599_vm3, %v1989_v41, 0.0 }
 0x226   : > { %1604 = vmatmul.mubr.msk.bf16.vlgmr.msra.gmra.mxu1 %vm503_vm0, %v1053_v51  ;;  %v637_v51 = vsel %vm599_vm3, %v1991_v42, 0.0 }
 0x2ce   : > { %v2010_v52 = vpop.f32.mrf.mxu1 }
 0x2d0   : > { %v1575_v53 = vpop.f32.mrf.mxu1 }
 0x2d2   : > { %v2012_v54 = vpop.f32.mrf.mxu1 }
 0x2d4   : > { %v1576_v55 = vpop.f32.mrf.mxu1 }
 0x2d6   : > { %v760_v56 = vpop.f32.mrf.mxu1 }
 0x2d7   : > { %v2015_v57 = vadd.f32 %v760_v56, %v1944_v14 }
 0x2d8   : > { %v1581_v58 = vpop.f32.mrf.mxu1 }
 0x2d9   : > { %v770_v59 = vsel %vm599_vm3, %v2015_v57, -inf }
 0x2da   : > { %771 = vmax.xlane.f32.xlu1 %v770_v59  ;;  %v763_v60 = vpop.f32.mrf.mxu1 }
 0x2db   : > { %v2020_v61 = vadd.f32 %v763_v60, %v1947_v19 }
 0x2dc   : > { %v1582_v62 = vpop.f32.mrf.mxu1 }
 0x2dd   : > { %v773_v63 = vsel %vm599_vm3, %v2020_v61, -inf }
 0x2de   : > { %774 = vmax.xlane.f32.xlu0 %v773_v63  ;;  %v928_v0 = vpop.f32.mrf.mxu1 }
 0x2df   : > { %v2025_v1 = vadd.f32 %v928_v0, %v1944_v14 }
 0x2e0   : > { %v1593_v2 = vpop.f32.mrf.mxu1 }
 0x2e1   : > { %v938_v3 = vsel %vm599_vm3, %v2025_v1, -inf }
 0x2e2   : > { %939 = vmax.xlane.f32.xlu0 %v938_v3  ;;  %v931_v5 = vpop.f32.mrf.mxu1 }
 0x2e3   : > { %v2030_v6 = vadd.f32 %v931_v5, %v1947_v19 }
 0x2e4   : > { %v1594_v7 = vpop.f32.mrf.mxu1 }
 0x2e5   : > { %v941_v8 = vsel %vm599_vm3, %v2030_v6, -inf }
 0x2e6   : > { %942 = vmax.xlane.f32.xlu1 %v941_v8  ;;  %v1096_v9 = vpop.f32.mrf.mxu1 }
 0x2e7   : > { %v2035_v10 = vadd.f32 %v1096_v9, %v1944_v14 }
 0x2e8   : > { %v1605_v11 = vpop.f32.mrf.mxu1 }
 0x2e9   : > { %v1106_v12 = vsel %vm599_vm3, %v2035_v10, -inf }
 0x2ea   : > { %1107 = vmax.xlane.f32.xlu0 %v1106_v12  ;;  %v1099_v13 = vpop.f32.mrf.mxu1 }
 0x2eb   : > { %v2040_v15 = vadd.f32 %v1099_v13, %v1947_v19 }
 0x2ec   : > { %v1606_v16 = vpop.f32.mrf.mxu1 }
 0x2ed   : > { %v1109_v17 = vsel %vm599_vm3, %v2040_v15, -inf }
 0x2ee   : > { %1110 = vmax.xlane.f32.xlu1 %v1109_v17 }
 0x363   : > { %v772_v20 = vpop.xlane.xlu1 %771 }
 0x364   : > { %v2047_v14 = vmax.f32 %v2044_v18, %v772_v20 }
 0x366   : > { %v778_v22 = vsub.f32 %v2044_v18, %v2047_v14  ;;  %882 = vst.msk [vmem:[#allocation2 + $0x10] sm:$0xff] %vm486_vm2, %v2047_v14  ;;  %786 = vperm.xlu0 %1660, %v2047_v14  }
 0x367   : > { %v775_v19 = vpop.xlane.xlu0 %774 }
 0x368   : > { %v2057_v23 = vmax.f32 %v2049_v21, %v775_v19  ;;  %v780_v25 = vmul.f32 1.442695, %v778_v22 }
 0x36a   : > { %v779_v26 = vsub.f32 %v2049_v21, %v2057_v23  ;;  %883 = vst.msk [vmem:[#allocation2 + $0x18] sm:$0xff] %vm486_vm2, %v2057_v23  ;;  %791 = vperm.xlu1 %1661, %v2057_v23   ;;  %v612_v21 = vmul.f32 1.442695, %v609_v32 }
 0x36b   : > { %v940_v30 = vpop.xlane.xlu0 %939 }
 0x36c   : > { %v2067_v34 = vmax.f32 %v2059_v24, %v940_v30  ;;  %v782_v19 = vmul.f32 1.442695, %v779_v26 }
 0x36e   : > { %v946_v36 = vsub.f32 %v2059_v24, %v2067_v34  ;;  %1050 = vst.msk [vmem:[#allocation2 + $0x20] sm:$0xff] %vm486_vm2, %v2067_v34  ;;  %954 = vperm.xlu1 %1661, %v2067_v34   ;;  %v630_v34 = vld [vmem:[#allocation3] sm:$0xff] }
 0x36f   : > { %v943_v37 = vpop.xlane.xlu1 %942 }
 0x370   : > { %v2077_v38 = vmax.f32 %v2069_v35, %v943_v37 }
 0x372   : > { %v947_v40 = vsub.f32 %v2069_v35, %v2077_v38  ;;  %1051 = vst.msk [vmem:[#allocation2 + $0x28] sm:$0xff] %vm486_vm2, %v2077_v38  ;;  %959 = vperm.xlu0 %1660, %v2077_v38   ;;  %v948_v35 = vmul.f32 1.442695, %v946_v36 }
 0x373   : > { %v1108_v43 = vpop.xlane.xlu0 %1107 }
 0x374   : > { %v2087_v44 = vmax.f32 %v2079_v39, %v1108_v43  ;;  %v950_v14 = vmul.f32 1.442695, %v947_v40 }
 0x376   : > { %v1114_v46 = vsub.f32 %v2079_v39, %v2087_v44  ;;  %1218 = vst.msk [vmem:[#allocation2 + $0x30] sm:$0xff] %vm486_vm2, %v2087_v44  ;;  %1122 = vperm.xlu1 %1661, %v2087_v44  }
 0x377   : > { %v1111_v47 = vpop.xlane.xlu1 %1110 }
 0x378   : > { %v2097_v48 = vmax.f32 %v2089_v45, %v1111_v47 }
 0x37a   : > { %v1115_v49 = vsub.f32 %v2089_v45, %v2097_v48  ;;  %1219 = vst.msk [vmem:[#allocation2 + $0x38] sm:$0xff] %vm486_vm2, %v2097_v48  ;;  %831 = vrot.lane.b32.xlu1 %v1975_v33, %s1772_s12  ;;  %1127 = vperm.xlu0 %1660, %v2097_v48  }
 0x37c   : > { %v1118_v28 = vmul.f32 1.442695, %v1115_v49 }
 0x37e   : > { %1167 = vrot.lane.b32.xlu1 %v1975_v33, %s1773_s14  ;;  %999 = vrot.lane.b32.xlu0 %v1975_v33, %s1774_s15 }
 0x39d   : > { %635 = vadd.xlane.f32.xlu0 %v634_v50 }
 0x3a2   : > { %638 = vadd.xlane.f32.xlu1 %v637_v51 }
 0x3e1   : > { %v787_v53 = vpop.permute.xlu0 %786 }
 0x3e2   : > { %v794_v55 = vsub.f32 %v2015_v57, %v787_v53 }
 0x3e4   : > { %v796_v56 = vmul.f32 1.442695, %v794_v55 }
 0x3e5   : > { %v792_v58 = vpop.permute.xlu1 %791 }
 0x3e6   : > { %1684 = vpow2.f32 %v796_v56  ;;  %v795_v59 = vsub.f32 %v2020_v61, %v792_v58  ;;  %v801_v56 = vld [vmem:[#allocation3 + $0x10] sm:$0xff] }
 0x3e8   : > { %v798_v60 = vmul.f32 1.442695, %v795_v59 }
 0x3e9   : > { %v955_v62 = vpop.permute.xlu1 %954 }
 0x3ea   : > { %1686 = vpow2.f32 %v798_v60  ;;  %v962_v33 = vsub.f32 %v2025_v1, %v955_v62  ;;  %v802_v60 = vld [vmem:[#allocation3 + $0x18] sm:$0xff] }
 0x3ec   : > { %v964_v63 = vmul.f32 1.442695, %v962_v33 }
 0x3ed   : > { %v960_v41 = vpop.permute.xlu0 %959 }
 0x3ee   : > { %1688 = vpow2.f32 %v964_v63  ;;  %v963_v0 = vsub.f32 %v2030_v6, %v960_v41  ;;  %v969_v41 = vld [vmem:[#allocation3 + $0x20] sm:$0xff] }
 0x3f0   : > { %v966_v42 = vmul.f32 1.442695, %v963_v0 }
 0x3f1   : > { %v1123_v2 = vpop.permute.xlu1 %1122 }
 0x3f2   : > { %1690 = vpow2.f32 %v966_v42  ;;  %v1130_v57 = vsub.f32 %v2035_v10, %v1123_v2  ;;  %v610_v10 = vmul.f32 1.442695, %v608_v29  ;;  %v645_v42 = vld [vmem:[#allocation4] sm:$0xff] }
 0x3f3   : > { %v1685_v3 = vpop.eup %1684 }
 0x3f4   : > { %v1132_v5 = vmul.f32 1.442695, %v1130_v57  ;;  %v805_v7 = vsel %vm599_vm3, %v1685_v3, 0.0 }
 0x3f5   : > { %806 = vadd.xlane.f32.xlu0 %v805_v7  ;;  %v1128_v61 = vpop.permute.xlu0 %1127  ;;  %v832_v8 = vpop.permute.xlu1 %831 }
 0x3f6   : > { %1692 = vpow2.f32 %v1132_v5  ;;  %v1131_v1 = vsub.f32 %v2040_v15, %v1128_v61  ;;  %1584 = vmatpush3.bf16.msra.mxu0 %v832_v8  ;;  %v970_v5 = vld [vmem:[#allocation3 + $0x28] sm:$0xff] }
 0x3f7   : > { %v1687_v9 = vpop.eup %1686  ;;  %1595 = vmatprep.subr.bf16.mxu0 %v1768_v4 }
 0x3f8   : > { %v1134_v6 = vmul.f32 1.442695, %v1131_v1  ;;  %v808_v11 = vsel %vm599_vm3, %v1687_v9, 0.0  ;;  %v830_v12 = vpack.c.bf16 %v1687_v9, %v1685_v3 }
 0x3f9   : > { %809 = vadd.xlane.f32.xlu1 %v808_v11  ;;  %v1000_v13 = vpop.permute.xlu0 %999  ;;  %v1168_v20 = vpop.permute.xlu1 %1167  ;;  %v1137_v11 = vld [vmem:[#allocation3 + $0x30] sm:$0xff] }
 0x3fa   : > { %1694 = vpow2.f32 %v1134_v6  ;;  %1586 = vmatmul.mubr.msk.bf16.vlgmr.msra.gmra.mxu0 %vm599_vm3, %v830_v12 }
 0x3fb   : > { %v1689_v16 = vpop.eup %1688  ;;  %1596 = vmatpush3.bf16.msra.mxu0 %v1000_v13  ;;  %1597 = vmatprep.mubr.msk.bf16.mxu0 %vm1769_vm1, %v1768_v4  ;;  %1696 = vpow2.f32 %v610_v10 }
 0x3fc   : > { %v973_v15 = vsel %vm599_vm3, %v1689_v16, 0.0  ;;  %1607 = vmatprep.subr.bf16.mxu0 %v1768_v4  ;;  %1698 = vpow2.f32 %v780_v25 }
 0x3fd   : > { %974 = vadd.xlane.f32.xlu1 %v973_v15  ;;  %1700 = vpow2.f32 %v782_v19  ;;  %v1138_v15 = vld [vmem:[#allocation3 + $0x38] sm:$0xff] }
 0x3fe   : > { %1702 = vpow2.f32 %v950_v14 }
 0x3ff   : > { %v1691_v27 = vpop.eup %1690  ;;  %1704 = vpow2.f32 %v612_v21 }
 0x400   : > { %v976_v29 = vsel %vm599_vm3, %v1691_v27, 0.0  ;;  %v998_v17 = vpack.c.bf16 %v1691_v27, %v1689_v16 }
 0x401   : > { %977 = vadd.xlane.f32.xlu1 %v976_v29 }
 0x402   : > { %1598 = vmatmul.mubr.msk.bf16.vlgmr.msra.gmra.mxu0 %vm599_vm3, %v998_v17 }
 0x403   : > { %v1693_v30 = vpop.eup %1692  ;;  %1608 = vmatpush3.bf16.msra.mxu0 %v1168_v20  ;;  %1609 = vmatprep.mubr.msk.bf16.mxu0 %vm1769_vm1, %v1768_v4  ;;  %v1116_v4 = vmul.f32 1.442695, %v1114_v46  ;;  %v631_v46 = vld [vmem:[#allocation3 + $0x8] sm:$0xff] }
 0x404   : > { %v1141_v18 = vsel %vm599_vm3, %v1693_v30, 0.0  ;;  %v646_v20 = vld [vmem:[#allocation4 + $0x8] sm:$0xff] }
 0x405   : > { %1142 = vadd.xlane.f32.xlu1 %v1141_v18  ;;  %1706 = vpow2.f32 %v1116_v4 }
 0x406   : > { %1708 = vpow2.f32 %v948_v35 }
 0x407   : > { %v1695_v22 = vpop.eup %1694  ;;  %1710 = vpow2.f32 %v1118_v28 }
 0x408   : > { %v1144_v23 = vsel %vm599_vm3, %v1695_v22, 0.0  ;;  %v1166_v26 = vpack.c.bf16 %v1695_v22, %v1693_v30  ;;  %v1697_v37 = vpop.eup %1696 }
 0x409   : > { %1145 = vadd.xlane.f32.xlu1 %v1144_v23  ;;  %v1699_v31 = vpop.eup %1698  ;;  %v632_v36 = vmul.f32 %v1697_v37, %v630_v34 }
 0x40a   : > { %1610 = vmatmul.mubr.msk.bf16.vlgmr.msra.gmra.mxu0 %vm599_vm3, %v1166_v26  ;;  %v1701_v32 = vpop.eup %1700  ;;  %v803_v58 = vmul.f32 %v1699_v31, %v801_v56 }
 0x40b   : > { %649 = vperm.xlu0 %1660, %v1697_v37   ;;  %v1703_v38 = vpop.eup %1702  ;;  %v804_v33 = vmul.f32 %v1701_v32, %v802_v60 }
 0x40c   : > { %v1705_v39 = vpop.eup %1704  ;;  %v972_v9 = vmul.f32 %v1703_v38, %v970_v5 }
 0x40d   : > { %v633_v47 = vmul.f32 %v1705_v39, %v631_v46 }
 0x40f   : > { %820 = vperm.xlu0 %1660, %v1699_v31  }
 0x412   : > { %v1707_v40 = vpop.eup %1706 }
 0x413   : > { %825 = vperm.xlu0 %1660, %v1701_v32   ;;  %v1709_v43 = vpop.eup %1708  ;;  %v1139_v13 = vmul.f32 %v1707_v40, %v1137_v11  ;;  %v816_v32 = vld [vmem:[#allocation4 + $0x10] sm:$0xff] }
 0x414   : > { %v1711_v24 = vpop.eup %1710  ;;  %v971_v2 = vmul.f32 %v1709_v43, %v969_v41  ;;  %v1153_v41 = vld [vmem:[#allocation4 + $0x38] sm:$0xff] }
 0x417   : > { %993 = vperm.xlu0 %1660, %v1703_v38  }
 0x41a   : > { %654 = vperm.xlu1 %1661, %v1705_v39  }
 0x41b   : > { %1156 = vperm.xlu0 %1660, %v1707_v40  }
 0x41e   : > { %988 = vperm.xlu1 %1661, %v1709_v43  }
 0x41f   : > { %1161 = vperm.xlu0 %1660, %v1711_v24  }
 0x426   : > { %v636_v44 = vpop.xlane.xlu0 %635 }
 0x427   : > { %v640_v45 = vadd.f32 %v636_v44, %v632_v36  ;;  %v984_v44 = vld [vmem:[#allocation4 + $0x20] sm:$0xff] }
 0x429   : > { %643 = vst.msk [vmem:[#allocation3] sm:$0xff] %vm486_vm2, %v640_v45 }
 0x42b   : > { %v639_v48 = vpop.xlane.xlu1 %638 }
 0x42c   : > { %v641_v49 = vadd.f32 %v639_v48, %v633_v47 }
 0x42e   : > { %644 = vst.msk [vmem:[#allocation3 + $0x8] sm:$0xff] %vm486_vm2, %v641_v49 }
 0x430   : > { %v1225_v50 = vld [vmem:[#allocation3] sm:$0xff] }
 0x431   : > { %1712 = vrcp.f32 %v1225_v50  ;;  %v985_v50 = vld [vmem:[#allocation4 + $0x28] sm:$0xff] }
 0x435   : > { %v1226_v51 = vld [vmem:[#allocation3 + $0x8] sm:$0xff] }
 0x436   : > { %1714 = vrcp.f32 %v1226_v51 }
 0x43e   : > { %v1713_v53 = vpop.eup %1712 }
 0x43f   : > { %1231 = vperm.xlu0 %1660, %v1713_v53  }
 0x443   : > { %v1715_v55 = vpop.eup %1714 }
 0x444   : > { %1236 = vperm.xlu1 %1661, %v1715_v55  }
 0x47e   : > { %v807_v59 = vpop.xlane.xlu0 %806 }
 0x47f   : > { %v811_v62 = vadd.f32 %v807_v59, %v803_v58  ;;  %v1152_v59 = vld [vmem:[#allocation4 + $0x30] sm:$0xff] }
 0x481   : > { %813 = vst.msk [vmem:[#allocation3 + $0x10] sm:$0xff] %vm486_vm2, %v811_v62 }
 0x482   : > { %v810_v63 = vpop.xlane.xlu1 %809 }
 0x483   : > { %v812_v0 = vadd.f32 %v810_v63, %v804_v33 }
 0x485   : > { %814 = vst.msk [vmem:[#allocation3 + $0x18] sm:$0xff] %vm486_vm2, %v812_v0 }
 0x486   : > { %v650_v57 = vpop.permute.xlu0 %649  ;;  %v975_v3 = vpop.xlane.xlu1 %974 }
 0x487   : > { %v657_v7 = vmul.f32 %v650_v57, %v645_v42  ;;  %v979_v61 = vadd.f32 %v975_v3, %v971_v2 }
 0x488   : > { %v1243_v8 = vld [vmem:[#allocation3 + $0x10] sm:$0xff] }
 0x489   : > { %v710_v1 = vadd.f32 %v2010_v52, %v657_v7  ;;  %981 = vst.msk [vmem:[#allocation3 + $0x20] sm:$0xff] %vm486_vm2, %v979_v61  ;;  %1716 = vrcp.f32 %v1243_v8  ;;  %v1140_v52 = vmul.f32 %v1711_v24, %v1138_v15 }
 0x48a   : > { %v978_v6 = vpop.xlane.xlu1 %977  ;;  %v821_v31 = vpop.permute.xlu0 %820 }
 0x48b   : > { %712 = vst.msk [vmem:[#allocation4] sm:$0xff] %vm503_vm0, %v710_v1  ;;  %v980_v12 = vadd.f32 %v978_v6, %v972_v9  ;;  %v828_v39 = vmul.f32 %v821_v31, %v816_v32 }
 0x48c   : > { %v1244_v10 = vld [vmem:[#allocation3 + $0x18] sm:$0xff] }
 0x48d   : > { %982 = vst.msk [vmem:[#allocation3 + $0x28] sm:$0xff] %vm486_vm2, %v980_v12  ;;  %1718 = vrcp.f32 %v1244_v10 }
 0x48e   : > { %v1143_v16 = vpop.xlane.xlu1 %1142  ;;  %v826_v38 = vpop.permute.xlu0 %825 }
 0x48f   : > { %v1147_v25 = vadd.f32 %v1143_v16, %v1139_v13 }
 0x490   : > { %v1261_v27 = vld [vmem:[#allocation3 + $0x20] sm:$0xff] }
 0x491   : > { %1149 = vst.msk [vmem:[#allocation3 + $0x30] sm:$0xff] %vm486_vm2, %v1147_v25  ;;  %1720 = vrcp.f32 %v1261_v27 }
 0x492   : > { %v1146_v29 = vpop.xlane.xlu1 %1145  ;;  %v994_v36 = vpop.permute.xlu0 %993 }
 0x493   : > { %v1148_v17 = vadd.f32 %v1146_v29, %v1140_v52  ;;  %v997_v58 = vmul.f32 %v994_v36, %v985_v50 }
 0x494   : > { %v1262_v19 = vld [vmem:[#allocation3 + $0x28] sm:$0xff] }
 0x495   : > { %1150 = vst.msk [vmem:[#allocation3 + $0x38] sm:$0xff] %vm486_vm2, %v1148_v17  ;;  %1722 = vrcp.f32 %v1262_v19 }
 0x496   : > { %v1717_v30 = vpop.eup %1716  ;;  %v655_v18 = vpop.permute.xlu1 %654 }
 0x497   : > { %v658_v14 = vmul.f32 %v655_v18, %v646_v20  ;;  %1249 = vperm.xlu0 %1660, %v1717_v30   ;;  %v1157_v55 = vpop.permute.xlu0 %1156 }
 0x498   : > { %v1279_v22 = vld [vmem:[#allocation3 + $0x30] sm:$0xff]  ;;  %v1164_v63 = vmul.f32 %v1157_v55, %v1152_v59 }
 0x499   : > { %v711_v21 = vadd.f32 %v2012_v54, %v658_v14  ;;  %1724 = vrcp.f32 %v1279_v22  ;;  %v817_v54 = vld [vmem:[#allocation4 + $0x18] sm:$0xff] }
 0x49a   : > { %v1719_v23 = vpop.eup %1718  ;;  %v829_v34 = vmul.f32 %v826_v38, %v817_v54  ;;  %v989_v45 = vpop.permute.xlu1 %988 }
 0x49b   : > { %713 = vst.msk [vmem:[#allocation4 + $0x8] sm:$0xff] %vm503_vm0, %v711_v21  ;;  %1254 = vperm.xlu1 %1661, %v1719_v23   ;;  %v996_v49 = vmul.f32 %v989_v45, %v984_v44  ;;  %v1162_v0 = vpop.permute.xlu0 %1161 }
 0x49c   : > { %v1280_v26 = vld [vmem:[#allocation3 + $0x38] sm:$0xff]  ;;  %v1165_v3 = vmul.f32 %v1162_v0, %v1153_v41 }
 0x49d   : > { %1726 = vrcp.f32 %v1280_v26 }
 0x49e   : > { %v1721_v4 = vpop.eup %1720 }
 0x49f   : > { %1267 = vperm.xlu0 %1660, %v1721_v4  }
 0x4a2   : > { %v1723_v37 = vpop.eup %1722  ;;  %v1224_v31 = vld [vmem:[#allocation4 + $0x8] sm:$0xff] }
 0x4a3   : > { %1272 = vperm.xlu1 %1661, %v1723_v37  }
 0x4a6   : > { %v1725_v35 = vpop.eup %1724 }
 0x4a7   : > { %1285 = vperm.xlu0 %1660, %v1725_v35  }
 0x4aa   : > { %v1727_v28 = vpop.eup %1726 }
 0x4ab   : > { %1290 = vperm.xlu1 %1661, %v1727_v28   ;;  %v1223_v28 = vld [vmem:[#allocation4] sm:$0xff] }
 0x4ba   : > { %v871_v40 = vpop.f32.mrf.mxu0  ;;  %v1232_v8 = vpop.permute.xlu0 %1231 }
 0x4bb   : > { %v878_v43 = vadd.f32 %v871_v40, %v828_v39  ;;  %v1239_v39 = vmul.f32 %v1232_v8, %v1223_v28 }
 0x4bc   : > { %v1587_v24 = vpop.f32.mrf.mxu0 }
 0x4bd   : > { %880 = vst.msk [vmem:[#allocation4 + $0x10] sm:$0xff] %vm503_vm0, %v878_v43 }
 0x4be   : > { %v874_v46 = vpop.f32.mrf.mxu0 }
 0x4bf   : > { %v879_v47 = vadd.f32 %v874_v46, %v829_v34  ;;  %v1237_v1 = vpop.permute.xlu1 %1236 }
 0x4c0   : > { %v1588_v48 = vpop.f32.mrf.mxu0  ;;  %v1240_v54 = vmul.f32 %v1237_v1, %v1224_v31 }
 0x4c1   : > { %881 = vst.msk [vmem:[#allocation4 + $0x18] sm:$0xff] %vm503_vm0, %v879_v47 }
 0x4c2   : > { %v1039_v51 = vpop.f32.mrf.mxu0 }
 0x4c3   : > { %v1046_v53 = vadd.f32 %v1039_v51, %v996_v49 }
 0x4c4   : > { %v1599_v56 = vpop.f32.mrf.mxu0  ;;  %v1241_v6 = vld [vmem:[#allocation4 + $0x10] sm:$0xff] }
 0x4c5   : > { %1048 = vst.msk [vmem:[#allocation4 + $0x20] sm:$0xff] %vm503_vm0, %v1046_v53 }
 0x4c6   : > { %v1042_v60 = vpop.f32.mrf.mxu0 }
 0x4c7   : > { %v1047_v62 = vadd.f32 %v1042_v60, %v997_v58 }
 0x4c8   : > { %v1600_v33 = vpop.f32.mrf.mxu0  ;;  %v1242_v12 = vld [vmem:[#allocation4 + $0x18] sm:$0xff] }
 0x4c9   : > { %1049 = vst.msk [vmem:[#allocation4 + $0x28] sm:$0xff] %vm503_vm0, %v1047_v62 }
 0x4ca   : > { %v1207_v42 = vpop.f32.mrf.mxu0 }
 0x4cb   : > { %v1214_v2 = vadd.f32 %v1207_v42, %v1164_v63 }
 0x4cc   : > { %v1611_v57 = vpop.f32.mrf.mxu0  ;;  %v1259_v25 = vld [vmem:[#allocation4 + $0x20] sm:$0xff] }
 0x4cd   : > { %1216 = vst.msk [vmem:[#allocation4 + $0x30] sm:$0xff] %vm503_vm0, %v1214_v2 }
 0x4ce   : > { %v1210_v5 = vpop.f32.mrf.mxu0 }
 0x4cf   : > { %v1215_v7 = vadd.f32 %v1210_v5, %v1165_v3 }
 0x4d0   : > { %v1612_v61 = vpop.f32.mrf.mxu0  ;;  %v1260_v52 = vld [vmem:[#allocation4 + $0x28] sm:$0xff] }
 0x4d1   : > { %1217 = vst.msk [vmem:[#allocation4 + $0x38] sm:$0xff] %vm503_vm0, %v1215_v7 }
 0x4d4   : > { %v1277_v30 = vld [vmem:[#allocation4 + $0x30] sm:$0xff] }
 0x4d8   : > { %v1278_v14 = vld [vmem:[#allocation4 + $0x38] sm:$0xff] }
 0x512   : > { %v1250_v9 = vpop.permute.xlu0 %1249 }
 0x513   : > { %v1257_v10 = vmul.f32 %v1250_v9, %v1241_v6 }
 0x516   : > { %v1255_v11 = vpop.permute.xlu1 %1254 }
 0x517   : > { %v1258_v13 = vmul.f32 %v1255_v11, %v1242_v12 }
 0x519   : > { %v1662_v16 = vpack.i.bf16 %v1258_v13, %v1257_v10 }
 0x51a   : > { %v1268_v15 = vpop.permute.xlu0 %1267 }
 0x51b   : > { %1663 = vrot.lane.b32.xlu0 %v1662_v16, %s1773_s14  ;;  %v1275_v29 = vmul.f32 %v1268_v15, %v1259_v25 }
 0x51e   : > { %v1273_v27 = vpop.permute.xlu1 %1272 }
 0x51f   : > { %v1276_v17 = vmul.f32 %v1273_v27, %v1260_v52 }
 0x521   : > { %v1667_v20 = vpack.i.bf16 %v1276_v17, %v1275_v29 }
 0x522   : > { %v1286_v19 = vpop.permute.xlu0 %1285 }
 0x523   : > { %1668 = vrot.lane.b32.xlu1 %v1667_v20, %s1774_s15  ;;  %v1293_v22 = vmul.f32 %v1286_v19, %v1277_v30 }
 0x526   : > { %v1291_v18 = vpop.permute.xlu1 %1290 }
 0x527   : > { %v1294_v21 = vmul.f32 %v1291_v18, %v1278_v14 }
 0x529   : > { %v1672_v23 = vpack.i.bf16 %v1294_v21, %v1293_v22 }
 0x52b   : > { %1673 = vrot.lane.b32.xlu0 %v1672_v23, %s1772_s12 }
 0x58d   : > { %v1664_v26 = vpop.permute.xlu0 %1663 }
 0x58e   : > { %v1666_v37 = vunpack.i.h.bf16 %v1664_v26  ;;  %v1665_v35 = vunpack.i.l.bf16 %v1664_v26 }
 0x590   : > { %v1320_v43 = vsel %vm503_vm0, %v1240_v54, %v1666_v37  ;;  %v1319_v24 = vsel %vm503_vm0, %v1239_v39, %v1665_v35 }
 0x595   : > { %v1669_v4 = vpop.permute.xlu1 %1668 }
 0x596   : > { %v1671_v32 = vunpack.i.h.bf16 %v1669_v4  ;;  %v1670_v38 = vunpack.i.l.bf16 %v1669_v4 }
 0x598   : > { %v1323_v44 = vsel %vm1321_vm4, %v1320_v43, %v1671_v32  ;;  %v1322_v45 = vsel %vm1321_vm4, %v1319_v24, %v1670_v38 }
 0x59d   : > { %v1674_v40 = vpop.permute.xlu0 %1673 }
 0x59e   : > { %v1676_v34 = vunpack.i.h.bf16 %v1674_v40  ;;  %v1675_v36 = vunpack.i.l.bf16 %v1674_v40 }
 0x5a0   : > { %v1326_v46 = vsel %vm1324_vm5, %v1323_v44, %v1676_v34  ;;  %v1325_v47 = vsel %vm1324_vm5, %v1322_v45, %v1675_v36 }
 0x5a1   : > { %v1547_v48 = vpack.c.bf16 %v1326_v46, %v1325_v47 }
 0x5a3   : > { %1548 = vst [vmem:[%s479_s24] sm:$0xff] %v1547_v48  }
 0x5a4 PF: > { %s15_s22 = sadd.s32 1, %s1766_s22   ;;  %s2209_s18 = smov %s1754_s19 }
 0x5a5   : > { %p12_p10 = scmp.ge.s32.totalorder %s15_s22, 4   ;;  %s2210_s19 = smov %s1844_s27 }
 0x5a6   : > { %s2211_s20 = smov %s1762_s21  ;;  %s2212_s21 = smov %s2214_s23 }
 0x5a7   :  { %14 = sbr.rel (!%p12_p10) target bundleno = 3 (0x3), region = 191 }

</bundles_post_ra>
